<compile_context>
chip_gen: v7x
topology: tpu7x:2x2x1
jax: 0.10.0
libtpu: 0.0.40
codegen_flags: <defaults>
</compile_context>

<pallas_src>
import math

import numpy as np
import jax
import jax.numpy as jnp
from jax.experimental import pallas as pl
from jax.experimental.pallas import tpu as pltpu

_BN_EPS = 1e-5
_PAD_OFF = 8   # sublane-aligned column offset of the image inside the halo scratch


# ----------------------------------------------------------------------------
# Pallas kernel: fused 3x3 conv (pad=1) + folded-BN bias + ReLU, split outputs
# ----------------------------------------------------------------------------
def _make_conv_kernel(out_channels):
    n_out = len(out_channels)

    def kernel(*refs):
        x_ref, w_ref, b_ref = refs[:3]
        out_refs = refs[3:3 + n_out]
        xpad_ref, patch_ref = refs[3 + n_out:]

        H, W, Cin = x_ref.shape
        HW = H * W

        # ---- in-kernel "same" padding: zero the halo scratch, place the image
        # at a sublane-aligned column offset so the interior store is aligned;
        # halo columns _PAD_OFF-1 / _PAD_OFF+W and rows 0 / H+1 stay zero. ----
        xpad_ref[...] = jnp.zeros_like(xpad_ref)
        xpad_ref[1:H + 1, _PAD_OFF:_PAD_OFF + W, :] = (
            x_ref[...].astype(xpad_ref.dtype))

        # ---- im2col: build the (H*W, 9*Cin) patch ONCE in VMEM so the conv is
        # one MXU matmul with K = 9*Cin instead of nine tiny K = Cin matmuls. ----
        for t in range(9):
            dh, dw = divmod(t, 3)
            c0 = _PAD_OFF - 1 + dw
            tap = xpad_ref[dh:dh + H, c0:c0 + W, :]
            patch_ref[:, t * Cin:(t + 1) * Cin] = (
                tap.reshape(HW, Cin).astype(patch_ref.dtype))

        # ---- single bf16 MXU matmul, f32 accumulation ----
        acc = jnp.dot(patch_ref[...], w_ref[...],
                      preferred_element_type=jnp.float32)
        acc = jnp.maximum(acc + b_ref[...], 0.0)   # folded BN bias + ReLU (f32)

        # ---- split fused Cout back into the per-branch outputs ----
        off = 0
        for o_ref, c in zip(out_refs, out_channels):
            o_ref[...] = acc[:, off:off + c].reshape(H, W, c).astype(o_ref.dtype)
            off += c

    return kernel


def conv3x3_bn_relu_fused(x_nhwc, w_flat, bias, out_channels, out_dtypes):
    """Fused Conv2d(3x3, s=1, p=1, no bias) + BN + ReLU for one or more convs
    that share the same input (their Cout stacked in w_flat / bias).

    x_nhwc: (N, H, W, Cin) bf16; w_flat: (9*Cin, sum(Cout)) bf16 (BN folded,
    rows ordered (kh, kw, cin)); bias: (1, sum(Cout)) f32.
    Returns a tuple of (N, H, W, c) arrays, one per entry of out_channels.
    """
    N, H, W, Cin = x_nhwc.shape
    K9, Cout = w_flat.shape
    assert K9 == 9 * Cin and Cout == sum(out_channels)

    out_shape = tuple(jax.ShapeDtypeStruct((N, H, W, c), dt)
                      for c, dt in zip(out_channels, out_dtypes))
    out_specs = tuple(pl.BlockSpec((None, H, W, c), lambda n: (n, 0, 0, 0))
                      for c in out_channels)

    bytes_accessed = int(
        x_nhwc.size * x_nhwc.dtype.itemsize
        + w_flat.size * w_flat.dtype.itemsize
        + bias.size * bias.dtype.itemsize
        + sum(int(np.prod(s.shape)) * s.dtype.itemsize for s in out_shape))
    cost = pl.CostEstimate(flops=2 * N * H * W * K9 * Cout,
                           transcendentals=0,
                           bytes_accessed=bytes_accessed)

    # TODO(synk): for large H*W add an H-row grid axis with haloed blocks so
    # blocks stay inside v7x's 64 MiB VMEM and both v7x TensorCores get work.
    outs = pl.pallas_call(
        _make_conv_kernel(tuple(out_channels)),
        out_shape=out_shape,
        grid=(N,),
        in_specs=[
            pl.BlockSpec((None, H, W, Cin), lambda n: (n, 0, 0, 0)),
            pl.BlockSpec((K9, Cout), lambda n: (0, 0)),
            pl.BlockSpec((1, Cout), lambda n: (0, 0)),
        ],
        out_specs=out_specs,
        scratch_shapes=[
            # zero-halo image scratch (f32: aligned 8-row sublane tiles).
            pltpu.VMEM((H + 2, W + _PAD_OFF + 1, Cin), jnp.float32),
            # im2col patch, bf16 feeds the MXU directly.
            pltpu.VMEM((H * W, 9 * Cin), jnp.bfloat16),
        ],
        compiler_params=pltpu.CompilerParams(
            dimension_semantics=("parallel",),
            vmem_limit_bytes=32 * 1024 * 1024),
        cost_estimate=cost,
    )(x_nhwc, w_flat, bias)

    if not isinstance(outs, (list, tuple)):
        outs = (outs,)
    return tuple(outs)


# ----------------------------------------------------------------------------
# Deterministic parameter construction (mirrors CBAModule.__init__) + fusion
# ----------------------------------------------------------------------------
def _make_cba_params(key, in_ch, out_ch):
    """Xavier-uniform 3x3 conv weight + default eval-mode BatchNorm stats."""
    fan_in = in_ch * 3 * 3
    fan_out = out_ch * 3 * 3
    bound = math.sqrt(6.0 / (fan_in + fan_out))
    # PyTorch layout (Cout, Cin, kH, kW) -> HWIO.
    w_oihw = jax.random.uniform(key, (out_ch, in_ch, 3, 3), jnp.float32,
                                -bound, bound)
    w_hwio = jnp.transpose(w_oihw, (2, 3, 1, 0))
    gamma = jnp.ones((out_ch,), jnp.float32)
    beta = jnp.zeros((out_ch,), jnp.float32)
    running_mean = jnp.zeros((out_ch,), jnp.float32)
    running_var = jnp.ones((out_ch,), jnp.float32)
    scale = gamma / jnp.sqrt(running_var + _BN_EPS)
    bias = beta - running_mean * scale
    return {"w": w_hwio, "scale": scale, "bias": bias}


def _fuse_convs(*convs):
    """Fold BN into conv weights and stack convs (same input) along Cout."""
    w = jnp.concatenate(
        [c["w"] * c["scale"][None, None, None, :] for c in convs], axis=-1)
    kh, kw, cin, cout = w.shape
    w_flat = w.reshape(kh * kw * cin, cout).astype(jnp.bfloat16)
    b = jnp.concatenate([c["bias"] for c in convs], axis=0)
    return w_flat, b.reshape(1, cout).astype(jnp.float32)


def make_detect_module_params(key, in_channels):
    assert in_channels % 4 == 0
    half, quarter = in_channels // 2, in_channels // 4
    ks = jax.random.split(key, 5)
    upconv = _make_cba_params(ks[0], in_channels, half)     # DetectModule.upconv
    ctx_in = _make_cba_params(ks[1], in_channels, quarter)  # context.inconv
    ctx_up = _make_cba_params(ks[2], quarter, quarter)      # context.upconv
    ctx_dn = _make_cba_params(ks[3], quarter, quarter)      # context.downconv
    ctx_dn2 = _make_cba_params(ks[4], quarter, quarter)     # context.downconv2

    s1_w, s1_b = _fuse_convs(upconv, ctx_in)   # x       -> [up | cx]
    s2_w, s2_b = _fuse_convs(ctx_up, ctx_dn)   # cx      -> [cx_up | cx_down]
    s3_w, s3_b = _fuse_convs(ctx_dn2)          # cx_down -> cx_down2
    return {"s1_w": s1_w, "s1_b": s1_b,
            "s2_w": s2_w, "s2_b": s2_b,
            "s3_w": s3_w, "s3_b": s3_b}


# ----------------------------------------------------------------------------
# DetectModule forward (NCHW in / NCHW out, like the PyTorch module)
# ----------------------------------------------------------------------------
@jax.jit
def detect_module_forward(x_nchw, params):
    N, C, H, W = x_nchw.shape
    half, quarter = C // 2, C // 4
    f32, bf16 = jnp.float32, jnp.bfloat16

    # NCHW -> NHWC (channels on lanes); bf16 at the kernel boundary halves HBM
    # traffic and feeds the MXU's bf16 path; accumulation stays f32 in-kernel.
    x = jnp.transpose(x_nchw, (0, 2, 3, 1)).astype(bf16)

    # stage 1: DetectModule.upconv + context.inconv (both read x)
    up, cx = conv3x3_bn_relu_fused(
        x, params["s1_w"], params["s1_b"], (half, quarter), (f32, bf16))
    # stage 2: context.upconv + context.downconv (both read cx)
    cx_up, cx_dn = conv3x3_bn_relu_fused(
        cx, params["s2_w"], params["s2_b"], (quarter, quarter), (f32, bf16))
    # stage 3: context.downconv2
    (cx_dn2,) = conv3x3_bn_relu_fused(
        cx_dn, params["s3_w"], params["s3_b"], (quarter,), (f32,))

    # torch.cat(dim=1) on NCHW == channel concat in NHWC: [up, ctx_up, ctx_down]
    out = jnp.concatenate([up, cx_up, cx_dn2], axis=-1)   # (N, H, W, C) f32
    return jnp.transpose(out, (0, 3, 1, 2))


if __name__ == "__main__":
    key = jax.random.PRNGKey(0)
    k_x, k_p = jax.random.split(key)

    N, C, H, W = 2, 16, 16, 16   # C must be divisible by 4
    x = jax.random.normal(k_x, (N, C, H, W), jnp.float32)
    params = make_detect_module_params(k_p, C)

    out = detect_module_forward(x, params)
    out = jax.block_until_ready(out)

    assert out.shape == (N, C, H, W), out.shape
    assert jnp.all(jnp.isfinite(out))
    print("KERNEL_OK")
</pallas_src>

<mosaic_0001>
module attributes {stable_mosaic.version = 11 : i64} {
  func.func @kernel(%arg0: i32, %arg1: memref<1x16x16x4xbf16, #tpu.memory_space<vmem>>, %arg2: memref<36x8xbf16, #tpu.memory_space<vmem>>, %arg3: memref<1x8xf32, #tpu.memory_space<vmem>>, %arg4: memref<1x16x16x4xf32, #tpu.memory_space<vmem>>, %arg5: memref<1x16x16x4xbf16, #tpu.memory_space<vmem>>, %arg6: memref<18x25x4xf32, #tpu.memory_space<vmem>>, %arg7: memref<256x36xbf16, #tpu.memory_space<vmem>>) attributes {dimension_semantics = [#tpu.dimension_semantics<parallel>], iteration_bounds = array<i64: 2>, scalar_prefetch = 0 : i64, scratch_operands = 2 : i64, tpu.core_type = #tpu.core_type<tc>, window_params = [{transform_indices = @transform_0, window_bounds = array<i64: 1, 16, 16, 4>}, {pipeline_mode = #tpu.pipeline_mode<synchronous>, transform_indices = @transform_1, window_bounds = array<i64: 36, 8>}, {pipeline_mode = #tpu.pipeline_mode<synchronous>, transform_indices = @transform_2, window_bounds = array<i64: 1, 8>}, {transform_indices = @transform_3, window_bounds = array<i64: 1, 16, 16, 4>}, {transform_indices = @transform_4, window_bounds = array<i64: 1, 16, 16, 4>}]} {
    %cst = arith.constant 0.000000e+00 : f32
    %0 = vector.broadcast %cst : f32 to vector<18x25x4xf32>
    %c0 = arith.constant 0 : index
    %c0_0 = arith.constant 0 : index
    %c0_1 = arith.constant 0 : index
    %1 = vector.load %arg6[%c0, %c0_0, %c0_1] : memref<18x25x4xf32, #tpu.memory_space<vmem>>, vector<18x25x4xf32>
    tpu.vector_store %arg6[%c0, %c0_0, %c0_1], %0 {strides = array<i32>} : memref<18x25x4xf32, #tpu.memory_space<vmem>>, vector<18x25x4xf32>,
    %c0_2 = arith.constant 0 : index
    %c0_3 = arith.constant 0 : index
    %c0_4 = arith.constant 0 : index
    %c0_5 = arith.constant 0 : index
    %2 = vector.load %arg1[%c0_2, %c0_3, %c0_4, %c0_5] : memref<1x16x16x4xbf16, #tpu.memory_space<vmem>>, vector<1x16x16x4xbf16>
    %3 = vector.shape_cast %2 : vector<1x16x16x4xbf16> to vector<16x16x4xbf16>
    %4 = arith.extf %3 : vector<16x16x4xbf16> to vector<16x16x4xf32>
    %c1 = arith.constant 1 : index
    %c8 = arith.constant 8 : index
    %c0_6 = arith.constant 0 : index
    %5 = vector.load %arg6[%c1, %c8, %c0_6] : memref<18x25x4xf32, #tpu.memory_space<vmem>>, vector<16x16x4xf32>
    tpu.vector_store %arg6[%c1, %c8, %c0_6], %4 {strides = array<i32>} : memref<18x25x4xf32, #tpu.memory_space<vmem>>, vector<16x16x4xf32>,
    %c0_7 = arith.constant 0 : index
    %c7 = arith.constant 7 : index
    %c0_8 = arith.constant 0 : index
    %6 = vector.load %arg6[%c0_7, %c7, %c0_8] : memref<18x25x4xf32, #tpu.memory_space<vmem>>, vector<16x16x4xf32>
    %7 = vector.shape_cast %6 : vector<16x16x4xf32> to vector<256x4xf32>
    %8 = arith.truncf %7 : vector<256x4xf32> to vector<256x4xbf16>
    %c0_9 = arith.constant 0 : index
    %c0_10 = arith.constant 0 : index
    %9 = vector.load %arg7[%c0_9, %c0_10] : memref<256x36xbf16, #tpu.memory_space<vmem>>, vector<256x4xbf16>
    tpu.vector_store %arg7[%c0_9, %c0_10], %8 {strides = array<i32>} : memref<256x36xbf16, #tpu.memory_space<vmem>>, vector<256x4xbf16>,
    %c0_11 = arith.constant 0 : index
    %c8_12 = arith.constant 8 : index
    %c0_13 = arith.constant 0 : index
    %10 = vector.load %arg6[%c0_11, %c8_12, %c0_13] : memref<18x25x4xf32, #tpu.memory_space<vmem>>, vector<16x16x4xf32>
    %11 = vector.shape_cast %10 : vector<16x16x4xf32> to vector<256x4xf32>
    %12 = arith.truncf %11 : vector<256x4xf32> to vector<256x4xbf16>
    %c0_14 = arith.constant 0 : index
    %c4 = arith.constant 4 : index
    %13 = vector.load %arg7[%c0_14, %c4] : memref<256x36xbf16, #tpu.memory_space<vmem>>, vector<256x4xbf16>
    tpu.vector_store %arg7[%c0_14, %c4], %12 {strides = array<i32>} : memref<256x36xbf16, #tpu.memory_space<vmem>>, vector<256x4xbf16>,
    %c0_15 = arith.constant 0 : index
    %c9 = arith.constant 9 : index
    %c0_16 = arith.constant 0 : index
    %14 = vector.load %arg6[%c0_15, %c9, %c0_16] : memref<18x25x4xf32, #tpu.memory_space<vmem>>, vector<16x16x4xf32>
    %15 = vector.shape_cast %14 : vector<16x16x4xf32> to vector<256x4xf32>
    %16 = arith.truncf %15 : vector<256x4xf32> to vector<256x4xbf16>
    %c0_17 = arith.constant 0 : index
    %c8_18 = arith.constant 8 : index
    %17 = vector.load %arg7[%c0_17, %c8_18] : memref<256x36xbf16, #tpu.memory_space<vmem>>, vector<256x4xbf16>
    tpu.vector_store %arg7[%c0_17, %c8_18], %16 {strides = array<i32>} : memref<256x36xbf16, #tpu.memory_space<vmem>>, vector<256x4xbf16>,
    %c1_19 = arith.constant 1 : index
    %c7_20 = arith.constant 7 : index
    %c0_21 = arith.constant 0 : index
    %18 = vector.load %arg6[%c1_19, %c7_20, %c0_21] : memref<18x25x4xf32, #tpu.memory_space<vmem>>, vector<16x16x4xf32>
    %19 = vector.shape_cast %18 : vector<16x16x4xf32> to vector<256x4xf32>
    %20 = arith.truncf %19 : vector<256x4xf32> to vector<256x4xbf16>
    %c0_22 = arith.constant 0 : index
    %c12 = arith.constant 12 : index
    %21 = vector.load %arg7[%c0_22, %c12] : memref<256x36xbf16, #tpu.memory_space<vmem>>, vector<256x4xbf16>
    tpu.vector_store %arg7[%c0_22, %c12], %20 {strides = array<i32>} : memref<256x36xbf16, #tpu.memory_space<vmem>>, vector<256x4xbf16>,
    %c1_23 = arith.constant 1 : index
    %c8_24 = arith.constant 8 : index
    %c0_25 = arith.constant 0 : index
    %22 = vector.load %arg6[%c1_23, %c8_24, %c0_25] : memref<18x25x4xf32, #tpu.memory_space<vmem>>, vector<16x16x4xf32>
    %23 = vector.shape_cast %22 : vector<16x16x4xf32> to vector<256x4xf32>
    %24 = arith.truncf %23 : vector<256x4xf32> to vector<256x4xbf16>
    %c0_26 = arith.constant 0 : index
    %c16 = arith.constant 16 : index
    %25 = vector.load %arg7[%c0_26, %c16] : memref<256x36xbf16, #tpu.memory_space<vmem>>, vector<256x4xbf16>
    tpu.vector_store %arg7[%c0_26, %c16], %24 {strides = array<i32>} : memref<256x36xbf16, #tpu.memory_space<vmem>>, vector<256x4xbf16>,
    %c1_27 = arith.constant 1 : index
    %c9_28 = arith.constant 9 : index
    %c0_29 = arith.constant 0 : index
    %26 = vector.load %arg6[%c1_27, %c9_28, %c0_29] : memref<18x25x4xf32, #tpu.memory_space<vmem>>, vector<16x16x4xf32>
    %27 = vector.shape_cast %26 : vector<16x16x4xf32> to vector<256x4xf32>
    %28 = arith.truncf %27 : vector<256x4xf32> to vector<256x4xbf16>
    %c0_30 = arith.constant 0 : index
    %c20 = arith.constant 20 : index
    %29 = vector.load %arg7[%c0_30, %c20] : memref<256x36xbf16, #tpu.memory_space<vmem>>, vector<256x4xbf16>
    tpu.vector_store %arg7[%c0_30, %c20], %28 {strides = array<i32>} : memref<256x36xbf16, #tpu.memory_space<vmem>>, vector<256x4xbf16>,
    %c2 = arith.constant 2 : index
    %c7_31 = arith.constant 7 : index
    %c0_32 = arith.constant 0 : index
    %30 = vector.load %arg6[%c2, %c7_31, %c0_32] : memref<18x25x4xf32, #tpu.memory_space<vmem>>, vector<16x16x4xf32>
    %31 = vector.shape_cast %30 : vector<16x16x4xf32> to vector<256x4xf32>
    %32 = arith.truncf %31 : vector<256x4xf32> to vector<256x4xbf16>
    %c0_33 = arith.constant 0 : index
    %c24 = arith.constant 24 : index
    %33 = vector.load %arg7[%c0_33, %c24] : memref<256x36xbf16, #tpu.memory_space<vmem>>, vector<256x4xbf16>
    tpu.vector_store %arg7[%c0_33, %c24], %32 {strides = array<i32>} : memref<256x36xbf16, #tpu.memory_space<vmem>>, vector<256x4xbf16>,
    %c2_34 = arith.constant 2 : index
    %c8_35 = arith.constant 8 : index
    %c0_36 = arith.constant 0 : index
    %34 = vector.load %arg6[%c2_34, %c8_35, %c0_36] : memref<18x25x4xf32, #tpu.memory_space<vmem>>, vector<16x16x4xf32>
    %35 = vector.shape_cast %34 : vector<16x16x4xf32> to vector<256x4xf32>
    %36 = arith.truncf %35 : vector<256x4xf32> to vector<256x4xbf16>
    %c0_37 = arith.constant 0 : index
    %c28 = arith.constant 28 : index
    %37 = vector.load %arg7[%c0_37, %c28] : memref<256x36xbf16, #tpu.memory_space<vmem>>, vector<256x4xbf16>
    tpu.vector_store %arg7[%c0_37, %c28], %36 {strides = array<i32>} : memref<256x36xbf16, #tpu.memory_space<vmem>>, vector<256x4xbf16>,
    %c2_38 = arith.constant 2 : index
    %c9_39 = arith.constant 9 : index
    %c0_40 = arith.constant 0 : index
    %38 = vector.load %arg6[%c2_38, %c9_39, %c0_40] : memref<18x25x4xf32, #tpu.memory_space<vmem>>, vector<16x16x4xf32>
    %39 = vector.shape_cast %38 : vector<16x16x4xf32> to vector<256x4xf32>
    %40 = arith.truncf %39 : vector<256x4xf32> to vector<256x4xbf16>
    %c0_41 = arith.constant 0 : index
    %c32 = arith.constant 32 : index
    %41 = vector.load %arg7[%c0_41, %c32] : memref<256x36xbf16, #tpu.memory_space<vmem>>, vector<256x4xbf16>
    tpu.vector_store %arg7[%c0_41, %c32], %40 {strides = array<i32>} : memref<256x36xbf16, #tpu.memory_space<vmem>>, vector<256x4xbf16>,
    %c0_42 = arith.constant 0 : index
    %c0_43 = arith.constant 0 : index
    %42 = vector.load %arg7[%c0_42, %c0_43] : memref<256x36xbf16, #tpu.memory_space<vmem>>, vector<256x36xbf16>
    %c0_44 = arith.constant 0 : index
    %c0_45 = arith.constant 0 : index
    %43 = vector.load %arg2[%c0_44, %c0_45] : memref<36x8xbf16, #tpu.memory_space<vmem>>, vector<36x8xbf16>
    %cst_46 = arith.constant dense<0.000000e+00> : vector<256x8xf32>
    %44 = tpu.matmul %42, %43, %cst_46 {dimension_numbers = #tpu.dot_dimension_numbers<[1], [0], [0], [1], [0, 0, 1, 1], [], []>} : vector<256x36xbf16>, vector<36x8xbf16>, vector<256x8xf32> -> vector<256x8xf32>
    %c0_47 = arith.constant 0 : index
    %c0_48 = arith.constant 0 : index
    %45 = vector.load %arg3[%c0_47, %c0_48] : memref<1x8xf32, #tpu.memory_space<vmem>>, vector<1x8xf32>
    %46 = vector.broadcast %45 : vector<1x8xf32> to vector<256x8xf32>
    %47 = arith.addf %44, %46 : vector<256x8xf32>
    %cst_49 = arith.constant 0.000000e+00 : f32
    %48 = vector.broadcast %cst_49 : f32 to vector<256x8xf32>
    %49 = arith.maximumf %47, %48 : vector<256x8xf32>
    %50 = vector.extract_strided_slice %49 {offsets = [0, 0], sizes = [256, 4], strides = [1, 1]} : vector<256x8xf32> to vector<256x4xf32>
    %51 = vector.shape_cast %50 : vector<256x4xf32> to vector<16x16x4xf32>
    %c0_50 = arith.constant 0 : index
    %c0_51 = arith.constant 0 : index
    %c0_52 = arith.constant 0 : index
    %c0_53 = arith.constant 0 : index
    %52 = vector.load %arg4[%c0_50, %c0_51, %c0_52, %c0_53] : memref<1x16x16x4xf32, #tpu.memory_space<vmem>>, vector<1x16x16x4xf32>
    %53 = vector.shape_cast %52 : vector<1x16x16x4xf32> to vector<16x16x4xf32>
    %54 = vector.shape_cast %51 : vector<16x16x4xf32> to vector<1x16x16x4xf32>
    tpu.vector_store %arg4[%c0_50, %c0_51, %c0_52, %c0_53], %54 {strides = array<i32>} : memref<1x16x16x4xf32, #tpu.memory_space<vmem>>, vector<1x16x16x4xf32>,
    %55 = vector.extract_strided_slice %49 {offsets = [0, 4], sizes = [256, 4], strides = [1, 1]} : vector<256x8xf32> to vector<256x4xf32>
    %56 = vector.shape_cast %55 : vector<256x4xf32> to vector<16x16x4xf32>
    %57 = arith.truncf %56 : vector<16x16x4xf32> to vector<16x16x4xbf16>
    %c0_54 = arith.constant 0 : index
    %c0_55 = arith.constant 0 : index
    %c0_56 = arith.constant 0 : index
    %c0_57 = arith.constant 0 : index
    %58 = vector.load %arg5[%c0_54, %c0_55, %c0_56, %c0_57] : memref<1x16x16x4xbf16, #tpu.memory_space<vmem>>, vector<1x16x16x4xbf16>
    %59 = vector.shape_cast %58 : vector<1x16x16x4xbf16> to vector<16x16x4xbf16>
    %60 = vector.shape_cast %57 : vector<16x16x4xbf16> to vector<1x16x16x4xbf16>
    tpu.vector_store %arg5[%c0_54, %c0_55, %c0_56, %c0_57], %60 {strides = array<i32>} : memref<1x16x16x4xbf16, #tpu.memory_space<vmem>>, vector<1x16x16x4xbf16>,
    return
  }
  func.func @transform_0(%arg0: i32) -> (i32, i32, i32, i32) {
    %c0_i32 = arith.constant 0 : i32
    %c0_i32_0 = arith.constant 0 : i32
    %c0_i32_1 = arith.constant 0 : i32
    %c0_i32_2 = arith.constant 0 : i32
    return %arg0, %c0_i32, %c0_i32_0, %c0_i32_1 : i32, i32, i32, i32
  }
  func.func @transform_1(%arg0: i32) -> (i32, i32) {
    %c0_i32 = arith.constant 0 : i32
    %c0_i32_0 = arith.constant 0 : i32
    %c0_i32_1 = arith.constant 0 : i32
    return %c0_i32, %c0_i32_0 : i32, i32
  }
  func.func @transform_2(%arg0: i32) -> (i32, i32) {
    %c0_i32 = arith.constant 0 : i32
    %c0_i32_0 = arith.constant 0 : i32
    %c0_i32_1 = arith.constant 0 : i32
    return %c0_i32, %c0_i32_0 : i32, i32
  }
  func.func @transform_3(%arg0: i32) -> (i32, i32, i32, i32) {
    %c0_i32 = arith.constant 0 : i32
    %c0_i32_0 = arith.constant 0 : i32
    %c0_i32_1 = arith.constant 0 : i32
    %c0_i32_2 = arith.constant 0 : i32
    return %arg0, %c0_i32, %c0_i32_0, %c0_i32_1 : i32, i32, i32, i32
  }
  func.func @transform_4(%arg0: i32) -> (i32, i32, i32, i32) {
    %c0_i32 = arith.constant 0 : i32
    %c0_i32_0 = arith.constant 0 : i32
    %c0_i32_1 = arith.constant 0 : i32
    %c0_i32_2 = arith.constant 0 : i32
    return %arg0, %c0_i32, %c0_i32_0, %c0_i32_1 : i32, i32, i32, i32
  }
}

module attributes {stable_mosaic.version = 11 : i64} {
  func.func @kernel(%arg0: i32, %arg1: memref<1x16x16x4xbf16, #tpu.memory_space<vmem>>, %arg2: memref<36x4xbf16, #tpu.memory_space<vmem>>, %arg3: memref<1x4xf32, #tpu.memory_space<vmem>>, %arg4: memref<1x16x16x4xf32, #tpu.memory_space<vmem>>, %arg5: memref<18x25x4xf32, #tpu.memory_space<vmem>>, %arg6: memref<256x36xbf16, #tpu.memory_space<vmem>>) attributes {dimension_semantics = [#tpu.dimension_semantics<parallel>], iteration_bounds = array<i64: 2>, scalar_prefetch = 0 : i64, scratch_operands = 2 : i64, tpu.core_type = #tpu.core_type<tc>, window_params = [{transform_indices = @transform_0, window_bounds = array<i64: 1, 16, 16, 4>}, {pipeline_mode = #tpu.pipeline_mode<synchronous>, transform_indices = @transform_1, window_bounds = array<i64: 36, 4>}, {pipeline_mode = #tpu.pipeline_mode<synchronous>, transform_indices = @transform_2, window_bounds = array<i64: 1, 4>}, {transform_indices = @transform_3, window_bounds = array<i64: 1, 16, 16, 4>}]} {
    %cst = arith.constant 0.000000e+00 : f32
    %0 = vector.broadcast %cst : f32 to vector<18x25x4xf32>
    %c0 = arith.constant 0 : index
    %c0_0 = arith.constant 0 : index
    %c0_1 = arith.constant 0 : index
    %1 = vector.load %arg5[%c0, %c0_0, %c0_1] : memref<18x25x4xf32, #tpu.memory_space<vmem>>, vector<18x25x4xf32>
    tpu.vector_store %arg5[%c0, %c0_0, %c0_1], %0 {strides = array<i32>} : memref<18x25x4xf32, #tpu.memory_space<vmem>>, vector<18x25x4xf32>,
    %c0_2 = arith.constant 0 : index
    %c0_3 = arith.constant 0 : index
    %c0_4 = arith.constant 0 : index
    %c0_5 = arith.constant 0 : index
    %2 = vector.load %arg1[%c0_2, %c0_3, %c0_4, %c0_5] : memref<1x16x16x4xbf16, #tpu.memory_space<vmem>>, vector<1x16x16x4xbf16>
    %3 = vector.shape_cast %2 : vector<1x16x16x4xbf16> to vector<16x16x4xbf16>
    %4 = arith.extf %3 : vector<16x16x4xbf16> to vector<16x16x4xf32>
    %c1 = arith.constant 1 : index
    %c8 = arith.constant 8 : index
    %c0_6 = arith.constant 0 : index
    %5 = vector.load %arg5[%c1, %c8, %c0_6] : memref<18x25x4xf32, #tpu.memory_space<vmem>>, vector<16x16x4xf32>
    tpu.vector_store %arg5[%c1, %c8, %c0_6], %4 {strides = array<i32>} : memref<18x25x4xf32, #tpu.memory_space<vmem>>, vector<16x16x4xf32>,
    %c0_7 = arith.constant 0 : index
    %c7 = arith.constant 7 : index
    %c0_8 = arith.constant 0 : index
    %6 = vector.load %arg5[%c0_7, %c7, %c0_8] : memref<18x25x4xf32, #tpu.memory_space<vmem>>, vector<16x16x4xf32>
    %7 = vector.shape_cast %6 : vector<16x16x4xf32> to vector<256x4xf32>
    %8 = arith.truncf %7 : vector<256x4xf32> to vector<256x4xbf16>
    %c0_9 = arith.constant 0 : index
    %c0_10 = arith.constant 0 : index
    %9 = vector.load %arg6[%c0_9, %c0_10] : memref<256x36xbf16, #tpu.memory_space<vmem>>, vector<256x4xbf16>
    tpu.vector_store %arg6[%c0_9, %c0_10], %8 {strides = array<i32>} : memref<256x36xbf16, #tpu.memory_space<vmem>>, vector<256x4xbf16>,
    %c0_11 = arith.constant 0 : index
    %c8_12 = arith.constant 8 : index
    %c0_13 = arith.constant 0 : index
    %10 = vector.load %arg5[%c0_11, %c8_12, %c0_13] : memref<18x25x4xf32, #tpu.memory_space<vmem>>, vector<16x16x4xf32>
    %11 = vector.shape_cast %10 : vector<16x16x4xf32> to vector<256x4xf32>
    %12 = arith.truncf %11 : vector<256x4xf32> to vector<256x4xbf16>
    %c0_14 = arith.constant 0 : index
    %c4 = arith.constant 4 : index
    %13 = vector.load %arg6[%c0_14, %c4] : memref<256x36xbf16, #tpu.memory_space<vmem>>, vector<256x4xbf16>
    tpu.vector_store %arg6[%c0_14, %c4], %12 {strides = array<i32>} : memref<256x36xbf16, #tpu.memory_space<vmem>>, vector<256x4xbf16>,
    %c0_15 = arith.constant 0 : index
    %c9 = arith.constant 9 : index
    %c0_16 = arith.constant 0 : index
    %14 = vector.load %arg5[%c0_15, %c9, %c0_16] : memref<18x25x4xf32, #tpu.memory_space<vmem>>, vector<16x16x4xf32>
    %15 = vector.shape_cast %14 : vector<16x16x4xf32> to vector<256x4xf32>
    %16 = arith.truncf %15 : vector<256x4xf32> to vector<256x4xbf16>
    %c0_17 = arith.constant 0 : index
    %c8_18 = arith.constant 8 : index
    %17 = vector.load %arg6[%c0_17, %c8_18] : memref<256x36xbf16, #tpu.memory_space<vmem>>, vector<256x4xbf16>
    tpu.vector_store %arg6[%c0_17, %c8_18], %16 {strides = array<i32>} : memref<256x36xbf16, #tpu.memory_space<vmem>>, vector<256x4xbf16>,
    %c1_19 = arith.constant 1 : index
    %c7_20 = arith.constant 7 : index
    %c0_21 = arith.constant 0 : index
    %18 = vector.load %arg5[%c1_19, %c7_20, %c0_21] : memref<18x25x4xf32, #tpu.memory_space<vmem>>, vector<16x16x4xf32>
    %19 = vector.shape_cast %18 : vector<16x16x4xf32> to vector<256x4xf32>
    %20 = arith.truncf %19 : vector<256x4xf32> to vector<256x4xbf16>
    %c0_22 = arith.constant 0 : index
    %c12 = arith.constant 12 : index
    %21 = vector.load %arg6[%c0_22, %c12] : memref<256x36xbf16, #tpu.memory_space<vmem>>, vector<256x4xbf16>
    tpu.vector_store %arg6[%c0_22, %c12], %20 {strides = array<i32>} : memref<256x36xbf16, #tpu.memory_space<vmem>>, vector<256x4xbf16>,
    %c1_23 = arith.constant 1 : index
    %c8_24 = arith.constant 8 : index
    %c0_25 = arith.constant 0 : index
    %22 = vector.load %arg5[%c1_23, %c8_24, %c0_25] : memref<18x25x4xf32, #tpu.memory_space<vmem>>, vector<16x16x4xf32>
    %23 = vector.shape_cast %22 : vector<16x16x4xf32> to vector<256x4xf32>
    %24 = arith.truncf %23 : vector<256x4xf32> to vector<256x4xbf16>
    %c0_26 = arith.constant 0 : index
    %c16 = arith.constant 16 : index
    %25 = vector.load %arg6[%c0_26, %c16] : memref<256x36xbf16, #tpu.memory_space<vmem>>, vector<256x4xbf16>
    tpu.vector_store %arg6[%c0_26, %c16], %24 {strides = array<i32>} : memref<256x36xbf16, #tpu.memory_space<vmem>>, vector<256x4xbf16>,
    %c1_27 = arith.constant 1 : index
    %c9_28 = arith.constant 9 : index
    %c0_29 = arith.constant 0 : index
    %26 = vector.load %arg5[%c1_27, %c9_28, %c0_29] : memref<18x25x4xf32, #tpu.memory_space<vmem>>, vector<16x16x4xf32>
    %27 = vector.shape_cast %26 : vector<16x16x4xf32> to vector<256x4xf32>
    %28 = arith.truncf %27 : vector<256x4xf32> to vector<256x4xbf16>
    %c0_30 = arith.constant 0 : index
    %c20 = arith.constant 20 : index
    %29 = vector.load %arg6[%c0_30, %c20] : memref<256x36xbf16, #tpu.memory_space<vmem>>, vector<256x4xbf16>
    tpu.vector_store %arg6[%c0_30, %c20], %28 {strides = array<i32>} : memref<256x36xbf16, #tpu.memory_space<vmem>>, vector<256x4xbf16>,
    %c2 = arith.constant 2 : index
    %c7_31 = arith.constant 7 : index
    %c0_32 = arith.constant 0 : index
    %30 = vector.load %arg5[%c2, %c7_31, %c0_32] : memref<18x25x4xf32, #tpu.memory_space<vmem>>, vector<16x16x4xf32>
    %31 = vector.shape_cast %30 : vector<16x16x4xf32> to vector<256x4xf32>
    %32 = arith.truncf %31 : vector<256x4xf32> to vector<256x4xbf16>
    %c0_33 = arith.constant 0 : index
    %c24 = arith.constant 24 : index
    %33 = vector.load %arg6[%c0_33, %c24] : memref<256x36xbf16, #tpu.memory_space<vmem>>, vector<256x4xbf16>
    tpu.vector_store %arg6[%c0_33, %c24], %32 {strides = array<i32>} : memref<256x36xbf16, #tpu.memory_space<vmem>>, vector<256x4xbf16>,
    %c2_34 = arith.constant 2 : index
    %c8_35 = arith.constant 8 : index
    %c0_36 = arith.constant 0 : index
    %34 = vector.load %arg5[%c2_34, %c8_35, %c0_36] : memref<18x25x4xf32, #tpu.memory_space<vmem>>, vector<16x16x4xf32>
    %35 = vector.shape_cast %34 : vector<16x16x4xf32> to vector<256x4xf32>
    %36 = arith.truncf %35 : vector<256x4xf32> to vector<256x4xbf16>
    %c0_37 = arith.constant 0 : index
    %c28 = arith.constant 28 : index
    %37 = vector.load %arg6[%c0_37, %c28] : memref<256x36xbf16, #tpu.memory_space<vmem>>, vector<256x4xbf16>
    tpu.vector_store %arg6[%c0_37, %c28], %36 {strides = array<i32>} : memref<256x36xbf16, #tpu.memory_space<vmem>>, vector<256x4xbf16>,
    %c2_38 = arith.constant 2 : index
    %c9_39 = arith.constant 9 : index
    %c0_40 = arith.constant 0 : index
    %38 = vector.load %arg5[%c2_38, %c9_39, %c0_40] : memref<18x25x4xf32, #tpu.memory_space<vmem>>, vector<16x16x4xf32>
    %39 = vector.shape_cast %38 : vector<16x16x4xf32> to vector<256x4xf32>
    %40 = arith.truncf %39 : vector<256x4xf32> to vector<256x4xbf16>
    %c0_41 = arith.constant 0 : index
    %c32 = arith.constant 32 : index
    %41 = vector.load %arg6[%c0_41, %c32] : memref<256x36xbf16, #tpu.memory_space<vmem>>, vector<256x4xbf16>
    tpu.vector_store %arg6[%c0_41, %c32], %40 {strides = array<i32>} : memref<256x36xbf16, #tpu.memory_space<vmem>>, vector<256x4xbf16>,
    %c0_42 = arith.constant 0 : index
    %c0_43 = arith.constant 0 : index
    %42 = vector.load %arg6[%c0_42, %c0_43] : memref<256x36xbf16, #tpu.memory_space<vmem>>, vector<256x36xbf16>
    %c0_44 = arith.constant 0 : index
    %c0_45 = arith.constant 0 : index
    %43 = vector.load %arg2[%c0_44, %c0_45] : memref<36x4xbf16, #tpu.memory_space<vmem>>, vector<36x4xbf16>
    %cst_46 = arith.constant dense<0.000000e+00> : vector<256x4xf32>
    %44 = tpu.matmul %42, %43, %cst_46 {dimension_numbers = #tpu.dot_dimension_numbers<[1], [0], [0], [1], [0, 0, 1, 1], [], []>} : vector<256x36xbf16>, vector<36x4xbf16>, vector<256x4xf32> -> vector<256x4xf32>
    %c0_47 = arith.constant 0 : index
    %c0_48 = arith.constant 0 : index
    %45 = vector.load %arg3[%c0_47, %c0_48] : memref<1x4xf32, #tpu.memory_space<vmem>>, vector<1x4xf32>
    %46 = vector.broadcast %45 : vector<1x4xf32> to vector<256x4xf32>
    %47 = arith.addf %44, %46 : vector<256x4xf32>
    %cst_49 = arith.constant 0.000000e+00 : f32
    %48 = vector.broadcast %cst_49 : f32 to vector<256x4xf32>
    %49 = arith.maximumf %47, %48 : vector<256x4xf32>
    %50 = vector.shape_cast %49 : vector<256x4xf32> to vector<16x16x4xf32>
    %c0_50 = arith.constant 0 : index
    %c0_51 = arith.constant 0 : index
    %c0_52 = arith.constant 0 : index
    %c0_53 = arith.constant 0 : index
    %51 = vector.load %arg4[%c0_50, %c0_51, %c0_52, %c0_53] : memref<1x16x16x4xf32, #tpu.memory_space<vmem>>, vector<1x16x16x4xf32>
    %52 = vector.shape_cast %51 : vector<1x16x16x4xf32> to vector<16x16x4xf32>
    %53 = vector.shape_cast %50 : vector<16x16x4xf32> to vector<1x16x16x4xf32>
    tpu.vector_store %arg4[%c0_50, %c0_51, %c0_52, %c0_53], %53 {strides = array<i32>} : memref<1x16x16x4xf32, #tpu.memory_space<vmem>>, vector<1x16x16x4xf32>,
    return
  }
  func.func @transform_0(%arg0: i32) -> (i32, i32, i32, i32) {
    %c0_i32 = arith.constant 0 : i32
    %c0_i32_0 = arith.constant 0 : i32
    %c0_i32_1 = arith.constant 0 : i32
    %c0_i32_2 = arith.constant 0 : i32
    return %arg0, %c0_i32, %c0_i32_0, %c0_i32_1 : i32, i32, i32, i32
  }
  func.func @transform_1(%arg0: i32) -> (i32, i32) {
    %c0_i32 = arith.constant 0 : i32
    %c0_i32_0 = arith.constant 0 : i32
    %c0_i32_1 = arith.constant 0 : i32
    return %c0_i32, %c0_i32_0 : i32, i32
  }
  func.func @transform_2(%arg0: i32) -> (i32, i32) {
    %c0_i32 = arith.constant 0 : i32
    %c0_i32_0 = arith.constant 0 : i32
    %c0_i32_1 = arith.constant 0 : i32
    return %c0_i32, %c0_i32_0 : i32, i32
  }
  func.func @transform_3(%arg0: i32) -> (i32, i32, i32, i32) {
    %c0_i32 = arith.constant 0 : i32
    %c0_i32_0 = arith.constant 0 : i32
    %c0_i32_1 = arith.constant 0 : i32
    %c0_i32_2 = arith.constant 0 : i32
    return %arg0, %c0_i32, %c0_i32_0, %c0_i32_1 : i32, i32, i32, i32
  }
}

module attributes {stable_mosaic.version = 11 : i64} {
  func.func @kernel(%arg0: i32, %arg1: memref<1x16x16x16xbf16, #tpu.memory_space<vmem>>, %arg2: memref<144x12xbf16, #tpu.memory_space<vmem>>, %arg3: memref<1x12xf32, #tpu.memory_space<vmem>>, %arg4: memref<1x16x16x8xf32, #tpu.memory_space<vmem>>, %arg5: memref<1x16x16x4xbf16, #tpu.memory_space<vmem>>, %arg6: memref<18x25x16xf32, #tpu.memory_space<vmem>>, %arg7: memref<256x144xbf16, #tpu.memory_space<vmem>>) attributes {dimension_semantics = [#tpu.dimension_semantics<parallel>], iteration_bounds = array<i64: 2>, scalar_prefetch = 0 : i64, scratch_operands = 2 : i64, tpu.core_type = #tpu.core_type<tc>, window_params = [{transform_indices = @transform_0, window_bounds = array<i64: 1, 16, 16, 16>}, {pipeline_mode = #tpu.pipeline_mode<synchronous>, transform_indices = @transform_1, window_bounds = array<i64: 144, 12>}, {pipeline_mode = #tpu.pipeline_mode<synchronous>, transform_indices = @transform_2, window_bounds = array<i64: 1, 12>}, {transform_indices = @transform_3, window_bounds = array<i64: 1, 16, 16, 8>}, {transform_indices = @transform_4, window_bounds = array<i64: 1, 16, 16, 4>}]} {
    %cst = arith.constant 0.000000e+00 : f32
    %0 = vector.broadcast %cst : f32 to vector<18x25x16xf32>
    %c0 = arith.constant 0 : index
    %c0_0 = arith.constant 0 : index
    %c0_1 = arith.constant 0 : index
    %1 = vector.load %arg6[%c0, %c0_0, %c0_1] : memref<18x25x16xf32, #tpu.memory_space<vmem>>, vector<18x25x16xf32>
    tpu.vector_store %arg6[%c0, %c0_0, %c0_1], %0 {strides = array<i32>} : memref<18x25x16xf32, #tpu.memory_space<vmem>>, vector<18x25x16xf32>,
    %c0_2 = arith.constant 0 : index
    %c0_3 = arith.constant 0 : index
    %c0_4 = arith.constant 0 : index
    %c0_5 = arith.constant 0 : index
    %2 = vector.load %arg1[%c0_2, %c0_3, %c0_4, %c0_5] : memref<1x16x16x16xbf16, #tpu.memory_space<vmem>>, vector<1x16x16x16xbf16>
    %3 = vector.shape_cast %2 : vector<1x16x16x16xbf16> to vector<16x16x16xbf16>
    %4 = arith.extf %3 : vector<16x16x16xbf16> to vector<16x16x16xf32>
    %c1 = arith.constant 1 : index
    %c8 = arith.constant 8 : index
    %c0_6 = arith.constant 0 : index
    %5 = vector.load %arg6[%c1, %c8, %c0_6] : memref<18x25x16xf32, #tpu.memory_space<vmem>>, vector<16x16x16xf32>
    tpu.vector_store %arg6[%c1, %c8, %c0_6], %4 {strides = array<i32>} : memref<18x25x16xf32, #tpu.memory_space<vmem>>, vector<16x16x16xf32>,
    %c0_7 = arith.constant 0 : index
    %c7 = arith.constant 7 : index
    %c0_8 = arith.constant 0 : index
    %6 = vector.load %arg6[%c0_7, %c7, %c0_8] : memref<18x25x16xf32, #tpu.memory_space<vmem>>, vector<16x16x16xf32>
    %7 = vector.shape_cast %6 : vector<16x16x16xf32> to vector<256x16xf32>
    %8 = arith.truncf %7 : vector<256x16xf32> to vector<256x16xbf16>
    %c0_9 = arith.constant 0 : index
    %c0_10 = arith.constant 0 : index
    %9 = vector.load %arg7[%c0_9, %c0_10] : memref<256x144xbf16, #tpu.memory_space<vmem>>, vector<256x16xbf16>
    tpu.vector_store %arg7[%c0_9, %c0_10], %8 {strides = array<i32>} : memref<256x144xbf16, #tpu.memory_space<vmem>>, vector<256x16xbf16>,
    %c0_11 = arith.constant 0 : index
    %c8_12 = arith.constant 8 : index
    %c0_13 = arith.constant 0 : index
    %10 = vector.load %arg6[%c0_11, %c8_12, %c0_13] : memref<18x25x16xf32, #tpu.memory_space<vmem>>, vector<16x16x16xf32>
    %11 = vector.shape_cast %10 : vector<16x16x16xf32> to vector<256x16xf32>
    %12 = arith.truncf %11 : vector<256x16xf32> to vector<256x16xbf16>
    %c0_14 = arith.constant 0 : index
    %c16 = arith.constant 16 : index
    %13 = vector.load %arg7[%c0_14, %c16] : memref<256x144xbf16, #tpu.memory_space<vmem>>, vector<256x16xbf16>
    tpu.vector_store %arg7[%c0_14, %c16], %12 {strides = array<i32>} : memref<256x144xbf16, #tpu.memory_space<vmem>>, vector<256x16xbf16>,
    %c0_15 = arith.constant 0 : index
    %c9 = arith.constant 9 : index
    %c0_16 = arith.constant 0 : index
    %14 = vector.load %arg6[%c0_15, %c9, %c0_16] : memref<18x25x16xf32, #tpu.memory_space<vmem>>, vector<16x16x16xf32>
    %15 = vector.shape_cast %14 : vector<16x16x16xf32> to vector<256x16xf32>
    %16 = arith.truncf %15 : vector<256x16xf32> to vector<256x16xbf16>
    %c0_17 = arith.constant 0 : index
    %c32 = arith.constant 32 : index
    %17 = vector.load %arg7[%c0_17, %c32] : memref<256x144xbf16, #tpu.memory_space<vmem>>, vector<256x16xbf16>
    tpu.vector_store %arg7[%c0_17, %c32], %16 {strides = array<i32>} : memref<256x144xbf16, #tpu.memory_space<vmem>>, vector<256x16xbf16>,
    %c1_18 = arith.constant 1 : index
    %c7_19 = arith.constant 7 : index
    %c0_20 = arith.constant 0 : index
    %18 = vector.load %arg6[%c1_18, %c7_19, %c0_20] : memref<18x25x16xf32, #tpu.memory_space<vmem>>, vector<16x16x16xf32>
    %19 = vector.shape_cast %18 : vector<16x16x16xf32> to vector<256x16xf32>
    %20 = arith.truncf %19 : vector<256x16xf32> to vector<256x16xbf16>
    %c0_21 = arith.constant 0 : index
    %c48 = arith.constant 48 : index
    %21 = vector.load %arg7[%c0_21, %c48] : memref<256x144xbf16, #tpu.memory_space<vmem>>, vector<256x16xbf16>
    tpu.vector_store %arg7[%c0_21, %c48], %20 {strides = array<i32>} : memref<256x144xbf16, #tpu.memory_space<vmem>>, vector<256x16xbf16>,
    %c1_22 = arith.constant 1 : index
    %c8_23 = arith.constant 8 : index
    %c0_24 = arith.constant 0 : index
    %22 = vector.load %arg6[%c1_22, %c8_23, %c0_24] : memref<18x25x16xf32, #tpu.memory_space<vmem>>, vector<16x16x16xf32>
    %23 = vector.shape_cast %22 : vector<16x16x16xf32> to vector<256x16xf32>
    %24 = arith.truncf %23 : vector<256x16xf32> to vector<256x16xbf16>
    %c0_25 = arith.constant 0 : index
    %c64 = arith.constant 64 : index
    %25 = vector.load %arg7[%c0_25, %c64] : memref<256x144xbf16, #tpu.memory_space<vmem>>, vector<256x16xbf16>
    tpu.vector_store %arg7[%c0_25, %c64], %24 {strides = array<i32>} : memref<256x144xbf16, #tpu.memory_space<vmem>>, vector<256x16xbf16>,
    %c1_26 = arith.constant 1 : index
    %c9_27 = arith.constant 9 : index
    %c0_28 = arith.constant 0 : index
    %26 = vector.load %arg6[%c1_26, %c9_27, %c0_28] : memref<18x25x16xf32, #tpu.memory_space<vmem>>, vector<16x16x16xf32>
    %27 = vector.shape_cast %26 : vector<16x16x16xf32> to vector<256x16xf32>
    %28 = arith.truncf %27 : vector<256x16xf32> to vector<256x16xbf16>
    %c0_29 = arith.constant 0 : index
    %c80 = arith.constant 80 : index
    %29 = vector.load %arg7[%c0_29, %c80] : memref<256x144xbf16, #tpu.memory_space<vmem>>, vector<256x16xbf16>
    tpu.vector_store %arg7[%c0_29, %c80], %28 {strides = array<i32>} : memref<256x144xbf16, #tpu.memory_space<vmem>>, vector<256x16xbf16>,
    %c2 = arith.constant 2 : index
    %c7_30 = arith.constant 7 : index
    %c0_31 = arith.constant 0 : index
    %30 = vector.load %arg6[%c2, %c7_30, %c0_31] : memref<18x25x16xf32, #tpu.memory_space<vmem>>, vector<16x16x16xf32>
    %31 = vector.shape_cast %30 : vector<16x16x16xf32> to vector<256x16xf32>
    %32 = arith.truncf %31 : vector<256x16xf32> to vector<256x16xbf16>
    %c0_32 = arith.constant 0 : index
    %c96 = arith.constant 96 : index
    %33 = vector.load %arg7[%c0_32, %c96] : memref<256x144xbf16, #tpu.memory_space<vmem>>, vector<256x16xbf16>
    tpu.vector_store %arg7[%c0_32, %c96], %32 {strides = array<i32>} : memref<256x144xbf16, #tpu.memory_space<vmem>>, vector<256x16xbf16>,
    %c2_33 = arith.constant 2 : index
    %c8_34 = arith.constant 8 : index
    %c0_35 = arith.constant 0 : index
    %34 = vector.load %arg6[%c2_33, %c8_34, %c0_35] : memref<18x25x16xf32, #tpu.memory_space<vmem>>, vector<16x16x16xf32>
    %35 = vector.shape_cast %34 : vector<16x16x16xf32> to vector<256x16xf32>
    %36 = arith.truncf %35 : vector<256x16xf32> to vector<256x16xbf16>
    %c0_36 = arith.constant 0 : index
    %c112 = arith.constant 112 : index
    %37 = vector.load %arg7[%c0_36, %c112] : memref<256x144xbf16, #tpu.memory_space<vmem>>, vector<256x16xbf16>
    tpu.vector_store %arg7[%c0_36, %c112], %36 {strides = array<i32>} : memref<256x144xbf16, #tpu.memory_space<vmem>>, vector<256x16xbf16>,
    %c2_37 = arith.constant 2 : index
    %c9_38 = arith.constant 9 : index
    %c0_39 = arith.constant 0 : index
    %38 = vector.load %arg6[%c2_37, %c9_38, %c0_39] : memref<18x25x16xf32, #tpu.memory_space<vmem>>, vector<16x16x16xf32>
    %39 = vector.shape_cast %38 : vector<16x16x16xf32> to vector<256x16xf32>
    %40 = arith.truncf %39 : vector<256x16xf32> to vector<256x16xbf16>
    %c0_40 = arith.constant 0 : index
    %c128 = arith.constant 128 : index
    %41 = vector.load %arg7[%c0_40, %c128] : memref<256x144xbf16, #tpu.memory_space<vmem>>, vector<256x16xbf16>
    tpu.vector_store %arg7[%c0_40, %c128], %40 {strides = array<i32>} : memref<256x144xbf16, #tpu.memory_space<vmem>>, vector<256x16xbf16>,
    %c0_41 = arith.constant 0 : index
    %c0_42 = arith.constant 0 : index
    %42 = vector.load %arg7[%c0_41, %c0_42] : memref<256x144xbf16, #tpu.memory_space<vmem>>, vector<256x144xbf16>
    %c0_43 = arith.constant 0 : index
    %c0_44 = arith.constant 0 : index
    %43 = vector.load %arg2[%c0_43, %c0_44] : memref<144x12xbf16, #tpu.memory_space<vmem>>, vector<144x12xbf16>
    %cst_45 = arith.constant dense<0.000000e+00> : vector<256x12xf32>
    %44 = tpu.matmul %42, %43, %cst_45 {dimension_numbers = #tpu.dot_dimension_numbers<[1], [0], [0], [1], [0, 0, 1, 1], [], []>} : vector<256x144xbf16>, vector<144x12xbf16>, vector<256x12xf32> -> vector<256x12xf32>
    %c0_46 = arith.constant 0 : index
    %c0_47 = arith.constant 0 : index
    %45 = vector.load %arg3[%c0_46, %c0_47] : memref<1x12xf32, #tpu.memory_space<vmem>>, vector<1x12xf32>
    %46 = vector.broadcast %45 : vector<1x12xf32> to vector<256x12xf32>
    %47 = arith.addf %44, %46 : vector<256x12xf32>
    %cst_48 = arith.constant 0.000000e+00 : f32
    %48 = vector.broadcast %cst_48 : f32 to vector<256x12xf32>
    %49 = arith.maximumf %47, %48 : vector<256x12xf32>
    %50 = vector.extract_strided_slice %49 {offsets = [0, 0], sizes = [256, 8], strides = [1, 1]} : vector<256x12xf32> to vector<256x8xf32>
    %51 = vector.shape_cast %50 : vector<256x8xf32> to vector<16x16x8xf32>
    %c0_49 = arith.constant 0 : index
    %c0_50 = arith.constant 0 : index
    %c0_51 = arith.constant 0 : index
    %c0_52 = arith.constant 0 : index
    %52 = vector.load %arg4[%c0_49, %c0_50, %c0_51, %c0_52] : memref<1x16x16x8xf32, #tpu.memory_space<vmem>>, vector<1x16x16x8xf32>
    %53 = vector.shape_cast %52 : vector<1x16x16x8xf32> to vector<16x16x8xf32>
    %54 = vector.shape_cast %51 : vector<16x16x8xf32> to vector<1x16x16x8xf32>
    tpu.vector_store %arg4[%c0_49, %c0_50, %c0_51, %c0_52], %54 {strides = array<i32>} : memref<1x16x16x8xf32, #tpu.memory_space<vmem>>, vector<1x16x16x8xf32>,
    %55 = vector.extract_strided_slice %49 {offsets = [0, 8], sizes = [256, 4], strides = [1, 1]} : vector<256x12xf32> to vector<256x4xf32>
    %56 = vector.shape_cast %55 : vector<256x4xf32> to vector<16x16x4xf32>
    %57 = arith.truncf %56 : vector<16x16x4xf32> to vector<16x16x4xbf16>
    %c0_53 = arith.constant 0 : index
    %c0_54 = arith.constant 0 : index
    %c0_55 = arith.constant 0 : index
    %c0_56 = arith.constant 0 : index
    %58 = vector.load %arg5[%c0_53, %c0_54, %c0_55, %c0_56] : memref<1x16x16x4xbf16, #tpu.memory_space<vmem>>, vector<1x16x16x4xbf16>
    %59 = vector.shape_cast %58 : vector<1x16x16x4xbf16> to vector<16x16x4xbf16>
    %60 = vector.shape_cast %57 : vector<16x16x4xbf16> to vector<1x16x16x4xbf16>
    tpu.vector_store %arg5[%c0_53, %c0_54, %c0_55, %c0_56], %60 {strides = array<i32>} : memref<1x16x16x4xbf16, #tpu.memory_space<vmem>>, vector<1x16x16x4xbf16>,
    return
  }
  func.func @transform_0(%arg0: i32) -> (i32, i32, i32, i32) {
    %c0_i32 = arith.constant 0 : i32
    %c0_i32_0 = arith.constant 0 : i32
    %c0_i32_1 = arith.constant 0 : i32
    %c0_i32_2 = arith.constant 0 : i32
    return %arg0, %c0_i32, %c0_i32_0, %c0_i32_1 : i32, i32, i32, i32
  }
  func.func @transform_1(%arg0: i32) -> (i32, i32) {
    %c0_i32 = arith.constant 0 : i32
    %c0_i32_0 = arith.constant 0 : i32
    %c0_i32_1 = arith.constant 0 : i32
    return %c0_i32, %c0_i32_0 : i32, i32
  }
  func.func @transform_2(%arg0: i32) -> (i32, i32) {
    %c0_i32 = arith.constant 0 : i32
    %c0_i32_0 = arith.constant 0 : i32
    %c0_i32_1 = arith.constant 0 : i32
    return %c0_i32, %c0_i32_0 : i32, i32
  }
  func.func @transform_3(%arg0: i32) -> (i32, i32, i32, i32) {
    %c0_i32 = arith.constant 0 : i32
    %c0_i32_0 = arith.constant 0 : i32
    %c0_i32_1 = arith.constant 0 : i32
    %c0_i32_2 = arith.constant 0 : i32
    return %arg0, %c0_i32, %c0_i32_0, %c0_i32_1 : i32, i32, i32, i32
  }
  func.func @transform_4(%arg0: i32) -> (i32, i32, i32, i32) {
    %c0_i32 = arith.constant 0 : i32
    %c0_i32_0 = arith.constant 0 : i32
    %c0_i32_1 = arith.constant 0 : i32
    %c0_i32_2 = arith.constant 0 : i32
    return %arg0, %c0_i32, %c0_i32_0, %c0_i32_1 : i32, i32, i32, i32
  }
}

</mosaic_0001>

<bundles_post_ra>
// kernel: detect_module_forward.5
= control target key start
LH: loop header
LB: loop body
LE: loop exit
PB: predicated region body
PF: predicated region fallthrough
CT: control target
= control target key end

     0   :  { %s2050_s12 = smov 0   ;;  %s2841_s0 = inlined_call_operand.vmem [shape: bf16[2,16,16,4], index: 0, kind: input, shape index: {}]   ;;  %s2842_s1 = inlined_call_operand.vmem [shape: bf16[36,4], index: 1, kind: input, shape index: {}]   ;;  %s2843_s2 = inlined_call_operand.vmem [shape: f32[1,4], index: 2, kind: input, shape index: {}]   ;;  %s2844_s3 = inlined_call_operand.vmem [shape: f32[2,16,16,4], index: 3, kind: output, shape index: {}]  }
   0x1 LB: > { %s1816_s13 = sadd.s32 4294967295, %s2019_s12   ;;  %p1820_p0 = scmp.ge.s32.totalorder %s2019_s12, 1  ;;  %s2019_s12 = sphi %s2050_s12, %s13_s12  }
   0x2   : > { %p137_p1 = scmp.lt.s32.totalorder %s2019_s12, 3 }
   0x4   : > { %p138_p2 = pnand %p1820_p0, %p137_p1 }
   0x5   : > { %vm172_vm0 = vcmask (!%p138_p2), 31744   ;;  %p2060_p3 = scmp.lt.s32.totalorder (!%p138_p2), %s1816_s13, 1  ;;  %vm176_vm1 = vcmask (!%p138_p2), 24576   ;;  %v2021_v0 = vmov (!%p138_p2), 0.0   ;;  %s2022_s19 = smov (!%p138_p2), 4   ;;  %vm1532_vm2 = vcmask (!%p138_p2), 1041408  }
   0x6   : > { %141 = sbr.rel (%p138_p2) target bundleno = 647 (0x287), region = 32  ;;  %174 = vst.msk [vmem:[#allocation2 + $0x8] sm:$0xff] (!%p138_p2), %vm172_vm0, %v2021_v0  ;;  %175 = vst.msk [vmem:[#allocation2 + $0x10] sm:$0xff] (!%p138_p2), %vm172_vm0, %v2021_v0  ;;  %s2023_s20 = smov (!%p138_p2), 8   ;;  %vm519_vm3 = vcmask (!%p138_p2), 64544   ;;  %vm648_vm4 = vcmask (!%p138_p2), 97344  }
   0x7   : > { %173 = vst.msk [vmem:[#allocation2] sm:$0xff] (!%p138_p2), %vm172_vm0, %v2021_v0  ;;  %178 = vst.msk [vmem:[#allocation2 + $0x20] sm:$0xff] (!%p138_p2), %vm172_vm0, %v2021_v0  ;;  %s2024_s21 = smov (!%p138_p2), 12   ;;  %s2025_s22 = smov (!%p138_p2), 16   ;;  %vm777_vm5 = vcmask (!%p138_p2), 130144   ;;  %vm906_vm6 = vcmask (!%p138_p2), 162944  }
   0x8   : > { %179 = vst.msk [vmem:[#allocation2 + $0x28] sm:$0xff] (!%p138_p2), %vm172_vm0, %v2021_v0  ;;  %180 = vst.msk [vmem:[#allocation2 + $0x30] sm:$0xff] (!%p138_p2), %vm172_vm0, %v2021_v0  ;;  %s2026_s23 = smov (!%p138_p2), 20   ;;  %s2027_s24 = smov (!%p138_p2), 24   ;;  %vm1035_vm7 = vcmask (!%p138_p2), 195744   ;;  %vm1165_vm8 = vcmask (!%p138_p2), 228544  }
   0x9   : > { %182 = vst.msk [vmem:[#allocation2 + $0x40] sm:$0xff] (!%p138_p2), %vm172_vm0, %v2021_v0  ;;  %183 = vst.msk [vmem:[#allocation2 + $0x48] sm:$0xff] (!%p138_p2), %vm172_vm0, %v2021_v0  ;;  %s2028_s25 = smov (!%p138_p2), 28   ;;  %s2029_s30 = smov (!%p138_p2), 32   ;;  %vm1294_vm9 = vcmask (!%p138_p2), 261344   ;;  %vm1423_vm10 = vcmask (!%p138_p2), 294144  }
   0xa   : > { %184 = vst.msk [vmem:[#allocation2 + $0x50] sm:$0xff] (!%p138_p2), %vm172_vm0, %v2021_v0  ;;  %186 = vst.msk [vmem:[#allocation2 + $0x60] sm:$0xff] (!%p138_p2), %vm172_vm0, %v2021_v0  ;;  %vm1483_vm11 = vcmask (!%p138_p2), 293888  }
   0xb   : > { %187 = vst.msk [vmem:[#allocation2 + $0x68] sm:$0xff] (!%p138_p2), %vm172_vm0, %v2021_v0  ;;  %188 = vst.msk [vmem:[#allocation2 + $0x70] sm:$0xff] (!%p138_p2), %vm172_vm0, %v2021_v0 }
   0xc   : > { %190 = vst.msk [vmem:[#allocation2 + $0x80] sm:$0xff] (!%p138_p2), %vm172_vm0, %v2021_v0  ;;  %191 = vst.msk [vmem:[#allocation2 + $0x88] sm:$0xff] (!%p138_p2), %vm172_vm0, %v2021_v0 }
   0xd   : > { %192 = vst.msk [vmem:[#allocation2 + $0x90] sm:$0xff] %vm172_vm0, %v2021_v0  ;;  %194 = vst.msk [vmem:[#allocation2 + $0xa0] sm:$0xff] %vm172_vm0, %v2021_v0  ;;  %s2847_s13 = smov (!%p2060_p3, %s1816_s13), 1  ;;  %v407_v11 = vld [vmem:[#allocation2 + $0x8] sm:$0xff]  ;;  %v408_v12 = vld [vmem:[#allocation2 + $0x10] sm:$0xff] }
   0xe   : > { %195 = vst.msk [vmem:[#allocation2 + $0xa8] sm:$0xff] %vm172_vm0, %v2021_v0  ;;  %196 = vst.msk [vmem:[#allocation2 + $0xb0] sm:$0xff] %vm172_vm0, %v2021_v0  ;;  %s1847_s15 = sshll.u32 %s2847_s13, 7  ;;  %v536_v13 = vld [vmem:[#allocation2 + $0x9] sm:$0xff]  ;;  %v439_v18 = vpack.c.bf16 %v408_v12, %v407_v11  ;;  %s1848_s8 = sshll.u32 %s2847_s13, 8 }
   0xf   : > { %198 = vst.msk [vmem:[#allocation2 + $0xc0] sm:$0xff] %vm172_vm0, %v2021_v0  ;;  %199 = vst.msk [vmem:[#allocation2 + $0xc8] sm:$0xff] %vm172_vm0, %v2021_v0  ;;  %s2218_s18 = scalar_lea.vmem %s2841_s0, %s1847_s15  ;;  %v343_v36 = vld [vmem:[#allocation2 + $0x7] sm:$0xff]  ;;  %v344_v37 = vld [vmem:[#allocation2 + $0xf] sm:$0xff]  ;;  %s2741_s11 = scalar_lea.vmem %s2844_s3, %s1848_s8 }
  0x10   : > { %200 = vst.msk [vmem:[#allocation2 + $0xd0] sm:$0xff] %vm172_vm0, %v2021_v0  ;;  %202 = vst.msk [vmem:[#allocation2 + $0xe0] sm:$0xff] %vm172_vm0, %v2021_v0  ;;  %v1850_v1 = vld [vmem:[%s2218_s18] sm:$0xff]   ;;  %v1919_v3 = vld [vmem:[%s2218_s18 + $0x38] sm:$0xff]   ;;  %471 = vrot.lane.b32.xlu0 %v439_v18, %s2022_s19  ;;  %v375_v42 = vpack.c.bf16 %v344_v37, %v343_v36 }
  0x11   : > { %203 = vst.msk [vmem:[#allocation2 + $0xe8] sm:$0xff] %vm172_vm0, %v2021_v0  ;;  %204 = vst.msk [vmem:[#allocation2 + $0xf0] sm:$0xff] %vm172_vm0, %v2021_v0  ;;  %v1920_v2 = vld [vmem:[%s2218_s18 + $0x40] sm:$0xff]   ;;  %v1851_v4 = vunpack.c.l.bf16 %v1850_v1  ;;  %v1852_v5 = vunpack.c.h.bf16 %v1850_v1  ;;  %v1913_v8 = vld [vmem:[%s2218_s18 + $0x8] sm:$0xff]   ;;  %v1879_v14 = vunpack.c.l.bf16 %v1919_v3  ;;  %v1880_v15 = vunpack.c.h.bf16 %v1919_v3 }
  0x12   : > { %206 = vst.msk [vmem:[#allocation2 + $0x100] sm:$0xff] %vm172_vm0, %v2021_v0  ;;  %207 = vst.msk [vmem:[#allocation2 + $0x108] sm:$0xff] %vm172_vm0, %v2021_v0  ;;  %v1883_v6 = vunpack.c.l.bf16 %v1920_v2  ;;  %v1884_v7 = vunpack.c.h.bf16 %v1920_v2  ;;  %v1921_v9 = vld [vmem:[%s2218_s18 + $0x48] sm:$0xff]   ;;  %v1914_v10 = vld [vmem:[%s2218_s18 + $0x10] sm:$0xff]   ;;  %v1855_v16 = vunpack.c.l.bf16 %v1913_v8  ;;  %v1856_v17 = vunpack.c.h.bf16 %v1913_v8 }
  0x13   : > { %208 = vst.msk [vmem:[#allocation2 + $0x110] sm:$0xff] %vm172_vm0, %v2021_v0  ;;  %210 = vst.msk [vmem:[#allocation2 + $0x120] sm:$0xff] %vm172_vm0, %v2021_v0  ;;  %v1887_v20 = vunpack.c.l.bf16 %v1921_v9  ;;  %v1888_v21 = vunpack.c.h.bf16 %v1921_v9  ;;  %v1859_v22 = vunpack.c.l.bf16 %v1914_v10  ;;  %v1922_v23 = vld [vmem:[%s2218_s18 + $0x50] sm:$0xff]   ;;  %v1915_v24 = vld [vmem:[%s2218_s18 + $0x18] sm:$0xff]   ;;  %v1860_v26 = vunpack.c.h.bf16 %v1914_v10 }
  0x14   : > { %211 = vst.msk [vmem:[#allocation2 + $0x128] sm:$0xff] %vm172_vm0, %v2021_v0  ;;  %212 = vst.msk [vmem:[#allocation2 + $0x130] sm:$0xff] %vm172_vm0, %v2021_v0  ;;  %v1891_v27 = vunpack.c.l.bf16 %v1922_v23  ;;  %v1892_v28 = vunpack.c.h.bf16 %v1922_v23  ;;  %v1923_v29 = vld [vmem:[%s2218_s18 + $0x58] sm:$0xff]   ;;  %v1916_v30 = vld [vmem:[%s2218_s18 + $0x20] sm:$0xff]   ;;  %v1863_v32 = vunpack.c.l.bf16 %v1915_v24  ;;  %v1864_v33 = vunpack.c.h.bf16 %v1915_v24 }
  0x15   : > { %214 = vst.msk [vmem:[#allocation2 + $0x140] sm:$0xff] %vm172_vm0, %v2021_v0  ;;  %215 = vst.msk [vmem:[#allocation2 + $0x148] sm:$0xff] %vm172_vm0, %v2021_v0  ;;  %v1924_v31 = vld [vmem:[%s2218_s18 + $0x60] sm:$0xff]   ;;  %v1895_v34 = vunpack.c.l.bf16 %v1923_v29  ;;  %v1896_v35 = vunpack.c.h.bf16 %v1923_v29  ;;  %v1867_v38 = vunpack.c.l.bf16 %v1916_v30  ;;  %v1868_v39 = vunpack.c.h.bf16 %v1916_v30 }
  0x16   : > { %216 = vst.msk [vmem:[#allocation2 + $0x150] sm:$0xff] %vm172_vm0, %v2021_v0  ;;  %218 = vst.msk [vmem:[#allocation2 + $0x160] sm:$0xff] %vm172_vm0, %v2021_v0  ;;  %v1899_v40 = vunpack.c.l.bf16 %v1924_v31  ;;  %v1900_v41 = vunpack.c.h.bf16 %v1924_v31 }
  0x17   : > { %219 = vst.msk [vmem:[#allocation2 + $0x168] sm:$0xff] %vm172_vm0, %v2021_v0  ;;  %220 = vst.msk [vmem:[#allocation2 + $0x170] sm:$0xff] %vm172_vm0, %v2021_v0 }
  0x18   : > { %222 = vst.msk [vmem:[#allocation2 + $0x180] sm:$0xff] %vm172_vm0, %v2021_v0  ;;  %223 = vst.msk [vmem:[#allocation2 + $0x188] sm:$0xff] %vm172_vm0, %v2021_v0 }
  0x19   : > { %224 = vst.msk [vmem:[#allocation2 + $0x190] sm:$0xff] %vm172_vm0, %v2021_v0  ;;  %226 = vst.msk [vmem:[#allocation2 + $0x1a0] sm:$0xff] %vm172_vm0, %v2021_v0 }
  0x1a   : > { %227 = vst.msk [vmem:[#allocation2 + $0x1a8] sm:$0xff] %vm172_vm0, %v2021_v0  ;;  %228 = vst.msk [vmem:[#allocation2 + $0x1b0] sm:$0xff] %vm172_vm0, %v2021_v0 }
  0x1b   : > { %230 = vst.msk [vmem:[#allocation2 + $0x1c0] sm:$0xff] %vm172_vm0, %v2021_v0  ;;  %231 = vst.msk [vmem:[#allocation2 + $0x1c8] sm:$0xff] %vm172_vm0, %v2021_v0 }
  0x1c   : > { %232 = vst.msk [vmem:[#allocation2 + $0x1d0] sm:$0xff] %vm172_vm0, %v2021_v0  ;;  %234 = vst.msk [vmem:[#allocation2 + $0x1e0] sm:$0xff] %vm172_vm0, %v2021_v0 }
  0x1d   : > { %235 = vst.msk [vmem:[#allocation2 + $0x1e8] sm:$0xff] %vm172_vm0, %v2021_v0  ;;  %236 = vst.msk [vmem:[#allocation2 + $0x1f0] sm:$0xff] %vm172_vm0, %v2021_v0 }
  0x1e   : > { %238 = vst.msk [vmem:[#allocation2 + $0x200] sm:$0xff] %vm172_vm0, %v2021_v0  ;;  %239 = vst.msk [vmem:[#allocation2 + $0x208] sm:$0xff] %vm172_vm0, %v2021_v0 }
  0x1f   : > { %240 = vst.msk [vmem:[#allocation2 + $0x210] sm:$0xff] %vm172_vm0, %v2021_v0  ;;  %242 = vst.msk [vmem:[#allocation2 + $0x220] sm:$0xff] %vm172_vm0, %v2021_v0 }
  0x20   : > { %243 = vst.msk [vmem:[#allocation2 + $0x228] sm:$0xff] %vm172_vm0, %v2021_v0  ;;  %244 = vst.msk [vmem:[#allocation2 + $0x230] sm:$0xff] %vm172_vm0, %v2021_v0 }
  0x21   : > { %177 = vst.msk [vmem:[#allocation2 + $0x18] sm:$0x1] %vm176_vm1, %v2021_v0  ;;  %181 = vst.msk [vmem:[#allocation2 + $0x38] sm:$0x1] %vm176_vm1, %v2021_v0 }
  0x22   : > { %185 = vst.msk [vmem:[#allocation2 + $0x58] sm:$0x1] %vm176_vm1, %v2021_v0  ;;  %189 = vst.msk [vmem:[#allocation2 + $0x78] sm:$0x1] %vm176_vm1, %v2021_v0 }
  0x23   : > { %193 = vst.msk [vmem:[#allocation2 + $0x98] sm:$0x1] %vm176_vm1, %v2021_v0  ;;  %197 = vst.msk [vmem:[#allocation2 + $0xb8] sm:$0x1] %vm176_vm1, %v2021_v0 }
  0x24   : > { %201 = vst.msk [vmem:[#allocation2 + $0xd8] sm:$0x1] %vm176_vm1, %v2021_v0  ;;  %205 = vst.msk [vmem:[#allocation2 + $0xf8] sm:$0x1] %vm176_vm1, %v2021_v0 }
  0x25   : > { %209 = vst.msk [vmem:[#allocation2 + $0x118] sm:$0x1] %vm176_vm1, %v2021_v0  ;;  %213 = vst.msk [vmem:[#allocation2 + $0x138] sm:$0x1] %vm176_vm1, %v2021_v0 }
  0x26   : > { %217 = vst.msk [vmem:[#allocation2 + $0x158] sm:$0x1] %vm176_vm1, %v2021_v0  ;;  %221 = vst.msk [vmem:[#allocation2 + $0x178] sm:$0x1] %vm176_vm1, %v2021_v0 }
  0x27   : > { %225 = vst.msk [vmem:[#allocation2 + $0x198] sm:$0x1] %vm176_vm1, %v2021_v0  ;;  %229 = vst.msk [vmem:[#allocation2 + $0x1b8] sm:$0x1] %vm176_vm1, %v2021_v0 }
  0x28   : > { %233 = vst.msk [vmem:[#allocation2 + $0x1d8] sm:$0x1] %vm176_vm1, %v2021_v0  ;;  %237 = vst.msk [vmem:[#allocation2 + $0x1f8] sm:$0x1] %vm176_vm1, %v2021_v0  ;;  %v537_v19 = vld [vmem:[#allocation2 + $0x11] sm:$0xff] }
  0x29   : > { %241 = vst.msk [vmem:[#allocation2 + $0x218] sm:$0x1] %vm176_vm1, %v2021_v0  ;;  %245 = vst.msk [vmem:[#allocation2 + $0x238] sm:$0x1] %vm176_vm1, %v2021_v0  ;;  %v568_v25 = vpack.c.bf16 %v537_v19, %v536_v13 }
  0x2a   : > { %311 = vst.msk [vmem:[#allocation2 + $0x28] sm:$0xff] %vm172_vm0, %v1851_v4  ;;  %312 = vst.msk [vmem:[#allocation2 + $0x30] sm:$0xff] %vm172_vm0, %v1852_v5 }
  0x2b   : > { %327 = vst.msk [vmem:[#allocation2 + $0x128] sm:$0xff] %vm172_vm0, %v1883_v6  ;;  %328 = vst.msk [vmem:[#allocation2 + $0x130] sm:$0xff] %vm172_vm0, %v1884_v7  ;;  %600 = vrot.lane.b32.xlu0 %v568_v25, %s2023_s20 }
  0x2c   : > { %325 = vst.msk [vmem:[#allocation2 + $0x108] sm:$0xff] %vm172_vm0, %v1879_v14  ;;  %326 = vst.msk [vmem:[#allocation2 + $0x110] sm:$0xff] %vm172_vm0, %v1880_v15 }
  0x2d   : > { %313 = vst.msk [vmem:[#allocation2 + $0x48] sm:$0xff] %vm172_vm0, %v1855_v16  ;;  %314 = vst.msk [vmem:[#allocation2 + $0x50] sm:$0xff] %vm172_vm0, %v1856_v17 }
  0x2e   : > { %329 = vst.msk [vmem:[#allocation2 + $0x148] sm:$0xff] %vm172_vm0, %v1887_v20  ;;  %330 = vst.msk [vmem:[#allocation2 + $0x150] sm:$0xff] %vm172_vm0, %v1888_v21  ;;  %v1917_v21 = vld [vmem:[%s2218_s18 + $0x28] sm:$0xff]  }
  0x2f   : > { %315 = vst.msk [vmem:[#allocation2 + $0x68] sm:$0xff] %vm172_vm0, %v1859_v22  ;;  %316 = vst.msk [vmem:[#allocation2 + $0x70] sm:$0xff] %vm172_vm0, %v1860_v26  ;;  %v1925_v22 = vld [vmem:[%s2218_s18 + $0x68] sm:$0xff]   ;;  %v1871_v23 = vunpack.c.l.bf16 %v1917_v21  ;;  %v1872_v24 = vunpack.c.h.bf16 %v1917_v21 }
  0x30   : > { %331 = vst.msk [vmem:[#allocation2 + $0x168] sm:$0xff] %vm172_vm0, %v1891_v27  ;;  %332 = vst.msk [vmem:[#allocation2 + $0x170] sm:$0xff] %vm172_vm0, %v1892_v28  ;;  %v1903_v25 = vunpack.c.l.bf16 %v1925_v22  ;;  %v1904_v26 = vunpack.c.h.bf16 %v1925_v22 }
  0x31   : > { %317 = vst.msk [vmem:[#allocation2 + $0x88] sm:$0xff] %vm172_vm0, %v1863_v32  ;;  %318 = vst.msk [vmem:[#allocation2 + $0x90] sm:$0xff] %vm172_vm0, %v1864_v33  ;;  %v409_v43 = vld [vmem:[#allocation2 + $0x28] sm:$0xff]  ;;  %v410_v44 = vld [vmem:[#allocation2 + $0x30] sm:$0xff] }
  0x32   : > { %333 = vst.msk [vmem:[#allocation2 + $0x188] sm:$0xff] %vm172_vm0, %v1895_v34  ;;  %334 = vst.msk [vmem:[#allocation2 + $0x190] sm:$0xff] %vm172_vm0, %v1896_v35  ;;  %v425_v45 = vld [vmem:[#allocation2 + $0x128] sm:$0xff]  ;;  %v440_v46 = vpack.c.bf16 %v410_v44, %v409_v43  ;;  %v426_v47 = vld [vmem:[#allocation2 + $0x130] sm:$0xff] }
  0x33   : > { %319 = vst.msk [vmem:[#allocation2 + $0xa8] sm:$0xff] %vm172_vm0, %v1867_v38  ;;  %320 = vst.msk [vmem:[#allocation2 + $0xb0] sm:$0xff] %vm172_vm0, %v1868_v39  ;;  %v423_v48 = vld [vmem:[#allocation2 + $0x108] sm:$0xff]  ;;  %v424_v49 = vld [vmem:[#allocation2 + $0x110] sm:$0xff]  ;;  %v2257_v52 = vpack.c.bf16 %v426_v47, %v425_v45 }
  0x34   : > { %335 = vst.msk [vmem:[#allocation2 + $0x1a8] sm:$0xff] %vm172_vm0, %v1899_v40  ;;  %336 = vst.msk [vmem:[#allocation2 + $0x1b0] sm:$0xff] %vm172_vm0, %v1900_v41  ;;  %v447_v50 = vpack.c.bf16 %v424_v49, %v423_v48  ;;  %v538_v51 = vld [vmem:[#allocation2 + $0x29] sm:$0xff]  ;;  %473 = vrot.lane.b32.xlu1 %v440_v46, %s2022_s19  ;;  %v553_v54 = vld [vmem:[#allocation2 + $0x111] sm:$0xff] }
  0x35   : > { %391 = vst.msk [vmem:[#allocation3] sm:$0xff] %vm172_vm0, %v375_v42  ;;  %v552_v53 = vld [vmem:[#allocation2 + $0x109] sm:$0xff]  ;;  %v539_v55 = vld [vmem:[#allocation2 + $0x31] sm:$0xff]  ;;  %321 = vst.msk [vmem:[#allocation2 + $0xc8] sm:$0xff] %vm172_vm0, %v1871_v23 }
  0x36   : > { %487 = vrot.lane.b32.xlu0 %v447_v50, %s2022_s19  ;;  %v2260_v56 = vpack.c.bf16 %v539_v55, %v538_v51  ;;  %v665_v57 = vld [vmem:[#allocation2 + $0x27] sm:$0xff]  ;;  %v666_v58 = vld [vmem:[#allocation2 + $0x2f] sm:$0xff]  ;;  %v576_v4 = vpack.c.bf16 %v553_v54, %v552_v53  ;;  %322 = vst.msk [vmem:[#allocation2 + $0xd0] sm:$0xff] %vm172_vm0, %v1872_v24  ;;  %337 = vst.msk [vmem:[#allocation2 + $0x1c8] sm:$0xff] %vm172_vm0, %v1903_v25 }
  0x37   : > { %v681_v59 = vld [vmem:[#allocation2 + $0x127] sm:$0xff]  ;;  %v697_v60 = vpack.c.bf16 %v666_v58, %v665_v57  ;;  %v682_v61 = vld [vmem:[#allocation2 + $0x12f] sm:$0xff]  ;;  %338 = vst.msk [vmem:[#allocation2 + $0x1d0] sm:$0xff] %vm172_vm0, %v1904_v26 }
  0x38   : > { %v667_v62 = vld [vmem:[#allocation2 + $0x47] sm:$0xff]  ;;  %v668_v63 = vld [vmem:[#allocation2 + $0x4f] sm:$0xff]  ;;  %v705_v0 = vpack.c.bf16 %v682_v61, %v681_v59  ;;  %489 = vrot.lane.b32.xlu1 %v2257_v52, %s2022_s19 }
  0x39   : > { %v2262_v1 = vpack.c.bf16 %v668_v63, %v667_v62  ;;  %v683_v2 = vld [vmem:[#allocation2 + $0x147] sm:$0xff]  ;;  %v684_v3 = vld [vmem:[#allocation2 + $0x14f] sm:$0xff]  ;;  %392 = vst.msk [vmem:[#allocation3 + $0x8] sm:$0xff] %vm172_vm0, %v697_v60 }
  0x3a   : > { %v2266_v5 = vpack.c.bf16 %v684_v3, %v683_v2  ;;  %602 = vrot.lane.b32.xlu0 %v2260_v56, %s2023_s20  ;;  %v554_v6 = vld [vmem:[#allocation2 + $0x129] sm:$0xff]  ;;  %v555_v7 = vld [vmem:[#allocation2 + $0x131] sm:$0xff]  ;;  %400 = vst.msk [vmem:[#allocation3 + $0x48] sm:$0xff] %vm172_vm0, %v705_v0  ;;  %v2010_v54 = vld [vmem:[%s2842_s1] sm:$0xff]  }
  0x3b   : > { %393 = vst.msk [vmem:[#allocation3 + $0x10] sm:$0xff] %vm172_vm0, %v2262_v1  ;;  %v1055_v8 = vld [vmem:[#allocation2 + $0x67] sm:$0xff]  ;;  %v1056_v9 = vld [vmem:[#allocation2 + $0x6f] sm:$0xff]  ;;  %v577_v13 = vpack.c.bf16 %v555_v7, %v554_v6  ;;  %1947 = vmatprep.subr.bf16.mxu0 %v2010_v54  ;;  %1985 = vmatprep.subr.bf16.mxu1 %v2010_v54 }
  0x3c   : > { %401 = vst.msk [vmem:[#allocation3 + $0x50] sm:$0xff] %vm172_vm0, %v2266_v5  ;;  %v2276_v10 = vpack.c.bf16 %v1056_v9, %v1055_v8  ;;  %v1071_v11 = vld [vmem:[#allocation2 + $0x167] sm:$0xff]  ;;  %v1072_v12 = vld [vmem:[#allocation2 + $0x16f] sm:$0xff]  ;;  %616 = vrot.lane.b32.xlu1 %v576_v4, %s2023_s20  ;;  %1948 = vmatpush3.bf16.msra.mxu0 %v2010_v54  ;;  %v1927_v8 = vld [vmem:[%s2218_s18 + $0x78] sm:$0xff]  }
  0x3d   : > { %v2279_v14 = vpack.c.bf16 %v1072_v12, %v1071_v11  ;;  %v796_v15 = vld [vmem:[#allocation2 + $0x48] sm:$0xff]  ;;  %v797_v16 = vld [vmem:[#allocation2 + $0x50] sm:$0xff]  ;;  %1988 = vmatpush3.bf16.msra.mxu1 %v2010_v54  ;;  %v1911_v9 = vunpack.c.l.bf16 %v1927_v8  ;;  %v1912_v11 = vunpack.c.h.bf16 %v1927_v8 }
  0x3e   : > { %729 = vrot.lane.b32.xlu0 %v697_v60, %s2024_s21  ;;  %394 = vst.msk [vmem:[#allocation3 + $0x18] sm:$0xff] %vm172_vm0, %v2276_v10  ;;  %v2291_v17 = vpack.c.bf16 %v797_v16, %v796_v15  ;;  %v359_v18 = vld [vmem:[#allocation2 + $0x107] sm:$0xff]  ;;  %v360_v19 = vld [vmem:[#allocation2 + $0x10f] sm:$0xff] }
  0x3f   : > { %402 = vst.msk [vmem:[#allocation3 + $0x58] sm:$0xff] %vm172_vm0, %v2279_v14  ;;  %v2293_v20 = vpack.c.bf16 %v360_v19, %v359_v18  ;;  %v812_v27 = vld [vmem:[#allocation2 + $0x148] sm:$0xff]  ;;  %v813_v28 = vld [vmem:[#allocation2 + $0x150] sm:$0xff]  ;;  %341 = vst.msk [vmem:[#allocation2 + $0x208] sm:$0xff] %vm172_vm0, %v1911_v9 }
  0x40   : > { %618 = vrot.lane.b32.xlu1 %v577_v13, %s2023_s20  ;;  %v925_v29 = vld [vmem:[#allocation2 + $0x49] sm:$0xff]  ;;  %v926_v30 = vld [vmem:[#allocation2 + $0x51] sm:$0xff]  ;;  %v2309_v31 = vpack.c.bf16 %v813_v28, %v812_v27  ;;  %342 = vst.msk [vmem:[#allocation2 + $0x210] sm:$0xff] %vm172_vm0, %v1912_v11 }
  0x41   : > { %399 = vst.msk [vmem:[#allocation3 + $0x40] sm:$0xff] %vm172_vm0, %v2293_v20  ;;  %v2313_v32 = vpack.c.bf16 %v926_v30, %v925_v29  ;;  %v941_v33 = vld [vmem:[#allocation2 + $0x149] sm:$0xff]  ;;  %v942_v34 = vld [vmem:[#allocation2 + $0x151] sm:$0xff] }
  0x42   : > { %731 = vrot.lane.b32.xlu0 %v2262_v1, %s2024_s21  ;;  %v1918_v35 = vld [vmem:[%s2218_s18 + $0x30] sm:$0xff]   ;;  %v675_v36 = vld [vmem:[#allocation2 + $0xc7] sm:$0xff]  ;;  %v2327_v44 = vpack.c.bf16 %v942_v34, %v941_v33 }
  0x43   : > { %v676_v37 = vld [vmem:[#allocation2 + $0xcf] sm:$0xff]  ;;  %v691_v38 = vld [vmem:[#allocation2 + $0x1c7] sm:$0xff]  ;;  %v1875_v39 = vunpack.c.l.bf16 %v1918_v35  ;;  %v1876_v40 = vunpack.c.h.bf16 %v1918_v35 }
  0x44   : > { %745 = vrot.lane.b32.xlu1 %v705_v0, %s2024_s21  ;;  %v2320_v41 = vpack.c.bf16 %v676_v37, %v675_v36  ;;  %v692_v42 = vld [vmem:[#allocation2 + $0x1cf] sm:$0xff]  ;;  %v671_v6 = vld [vmem:[#allocation2 + $0x87] sm:$0xff] }
  0x45   : > { %v2322_v43 = vpack.c.bf16 %v692_v42, %v691_v38  ;;  %323 = vst.msk [vmem:[#allocation2 + $0xe8] sm:$0xff] %vm172_vm0, %v1875_v39  ;;  %324 = vst.msk [vmem:[#allocation2 + $0xf0] sm:$0xff] %vm172_vm0, %v1876_v40  ;;  %v1926_v45 = vld [vmem:[%s2218_s18 + $0x70] sm:$0xff]   ;;  %v1184_v48 = vld [vmem:[#allocation2 + $0x68] sm:$0xff] }
  0x46   : > { %858 = vrot.lane.b32.xlu0 %v440_v46, %s2025_s22  ;;  %397 = vst.msk [vmem:[#allocation3 + $0x30] sm:$0xff] %vm172_vm0, %v2320_v41  ;;  %v1907_v46 = vunpack.c.l.bf16 %v1926_v45  ;;  %v1908_v47 = vunpack.c.h.bf16 %v1926_v45  ;;  %v1185_v49 = vld [vmem:[#allocation2 + $0x70] sm:$0xff]  ;;  %v1200_v58 = vld [vmem:[#allocation2 + $0x168] sm:$0xff] }
  0x47   : > { %405 = vst.msk [vmem:[#allocation3 + $0x70] sm:$0xff] %vm172_vm0, %v2322_v43  ;;  %v2348_v53 = vpack.c.bf16 %v1185_v49, %v1184_v48  ;;  %v1201_v59 = vld [vmem:[#allocation2 + $0x170] sm:$0xff]  ;;  %v2011_v60 = vld [vmem:[%s2842_s1 + $0x8] sm:$0xff]  }
  0x48   : > { %747 = vrot.lane.b32.xlu1 %v2266_v5, %s2024_s21  ;;  %339 = vst.msk [vmem:[#allocation2 + $0x1e8] sm:$0xff] %vm172_vm0, %v1907_v46  ;;  %340 = vst.msk [vmem:[#allocation2 + $0x1f0] sm:$0xff] %vm172_vm0, %v1908_v47  ;;  %v1223_v61 = vpack.c.bf16 %v1201_v59, %v1200_v58  ;;  %1949 = vmatprep.subr.bf16.mxu0 %v2011_v60  ;;  %v1313_v62 = vld [vmem:[#allocation2 + $0x69] sm:$0xff]  ;;  %v1314_v63 = vld [vmem:[#allocation2 + $0x71] sm:$0xff] }
  0x49   : > { %1950 = vmatpush3.bf16.msra.mxu0 %v2011_v60  ;;  %1986 = vmatprep.subr.bf16.mxu1 %v2011_v60  ;;  %v2012_v0 = vld [vmem:[%s2842_s1 + $0x10] ss:$0 sps:$4 sm:$0x33]   ;;  %v1344_v2 = vpack.c.bf16 %v1314_v63, %v1313_v62  ;;  %v1330_v4 = vld [vmem:[#allocation2 + $0x171] sm:$0xff]  ;;  %v800_v16 = vld [vmem:[#allocation2 + $0x88] sm:$0xff] }
  0x4a   : > { %860 = vrot.lane.b32.xlu0 %v2291_v17, %s2025_s22  ;;  %1989 = vmatpush3.bf16.msra.mxu1 %v2011_v60  ;;  %v1329_v3 = vld [vmem:[#allocation2 + $0x169] sm:$0xff]  ;;  %v930_v23 = vld [vmem:[#allocation2 + $0x91] sm:$0xff] }
  0x4b   : > { %1991 = vmatprep.subr.msk.bf16.mxu0 %vm1532_vm2, %v2012_v0  ;;  %1992 = vmatprep.subr.msk.bf16.mxu1 %vm1532_vm2, %v2012_v0  ;;  %v672_v7 = vld [vmem:[#allocation2 + $0x8f] sm:$0xff]  ;;  %v1059_v27 = vld [vmem:[#allocation2 + $0xa7] sm:$0xff] }
  0x4c   : > { %874 = vrot.lane.b32.xlu1 %v2257_v52, %s2025_s22  ;;  %v1063_v50 = vld [vmem:[#allocation2 + $0xe7] sm:$0xff]  ;;  %v1064_v51 = vld [vmem:[#allocation2 + $0xef] sm:$0xff]  ;;  %v700_v12 = vpack.c.bf16 %v672_v7, %v671_v6 }
  0x4d   : > { %v2342_v52 = vpack.c.bf16 %v1064_v51, %v1063_v50  ;;  %v688_v15 = vld [vmem:[#allocation2 + $0x18f] sm:$0xff]  ;;  %v351_v38 = vld [vmem:[#allocation2 + $0x87] sm:$0xff] }
  0x4e   : > { %987 = vrot.lane.b32.xlu0 %v2260_v56, %s2026_s23  ;;  %v816_v19 = vld [vmem:[#allocation2 + $0x188] sm:$0xff]  ;;  %v817_v21 = vld [vmem:[#allocation2 + $0x190] sm:$0xff] }
  0x4f   : > { %398 = vst.msk [vmem:[#allocation3 + $0x38] sm:$0xff] %vm172_vm0, %v2342_v52  ;;  %v1079_v55 = vld [vmem:[#allocation2 + $0x1e7] sm:$0xff]  ;;  %v1080_v56 = vld [vmem:[#allocation2 + $0x1ef] sm:$0xff]  ;;  %v2407_v24 = vpack.c.bf16 %v817_v21, %v816_v19 }
  0x50   : > { %876 = vrot.lane.b32.xlu1 %v2309_v31, %s2025_s22  ;;  %v2355_v57 = vpack.c.bf16 %v1080_v56, %v1079_v55  ;;  %v929_v22 = vld [vmem:[#allocation2 + $0x89] sm:$0xff]  ;;  %v946_v26 = vld [vmem:[#allocation2 + $0x191] sm:$0xff] }
  0x51   : > { %v945_v25 = vld [vmem:[#allocation2 + $0x189] sm:$0xff] }
  0x52   : > { %989 = vrot.lane.b32.xlu0 %v2313_v32, %s2026_s23  ;;  %406 = vst.msk [vmem:[#allocation3 + $0x78] sm:$0xff] %vm172_vm0, %v2355_v57  ;;  %v1060_v28 = vld [vmem:[#allocation2 + $0xaf] sm:$0xff]  ;;  %v2417_v29 = vpack.c.bf16 %v946_v26, %v945_v25  ;;  %v367_v40 = vld [vmem:[#allocation2 + $0x187] sm:$0xff] }
  0x53   : > { %v2420_v30 = vpack.c.bf16 %v1060_v28, %v1059_v27  ;;  %v1188_v33 = vld [vmem:[#allocation2 + $0xa8] sm:$0xff]  ;;  %v1189_v34 = vld [vmem:[#allocation2 + $0xb0] sm:$0xff] }
  0x54   : > { %1003 = vrot.lane.b32.xlu1 %v577_v13, %s2026_s23  ;;  %v687_v13 = vld [vmem:[#allocation2 + $0x187] sm:$0xff]  ;;  %v2431_v36 = vpack.c.bf16 %v1189_v34, %v1188_v33  ;;  %v352_v39 = vld [vmem:[#allocation2 + $0x8f] sm:$0xff] }
  0x55   : > { %v708_v18 = vpack.c.bf16 %v688_v15, %v687_v13  ;;  %v379_v42 = vpack.c.bf16 %v352_v39, %v351_v38  ;;  %v1204_v45 = vld [vmem:[#allocation2 + $0x1a8] sm:$0xff]  ;;  %v1205_v46 = vld [vmem:[#allocation2 + $0x1b0] sm:$0xff] }
  0x56   : > { %1117 = vrot.lane.b32.xlu0 %v2262_v1, %s2027_s24  ;;  %v1534_v1 = vsel %vm1532_vm2, %v2012_v0, 0  ;;  %v2443_v49 = vpack.c.bf16 %v1205_v46, %v1204_v45  ;;  %v1317_v51 = vld [vmem:[#allocation2 + $0xa9] sm:$0xff]  ;;  %v934_v26 = vld [vmem:[#allocation2 + $0xd1] sm:$0xff] }
  0x57   : > { %1952 = vmatpush3.bf16.msra.mxu0 %v1534_v1  ;;  %1990 = vmatpush3.bf16.msra.mxu1 %v1534_v1  ;;  %395 = vst.msk [vmem:[#allocation3 + $0x20] sm:$0xff] %vm172_vm0, %v379_v42  ;;  %v353_v55 = vld [vmem:[#allocation2 + $0xa7] sm:$0xff]  ;;  %v354_v56 = vld [vmem:[#allocation2 + $0xaf] sm:$0xff] }
  0x58   : > { %1005 = vrot.lane.b32.xlu1 %v2327_v44, %s2026_s23  ;;  %v369_v58 = vld [vmem:[#allocation2 + $0x1a7] sm:$0xff]  ;;  %v380_v59 = vpack.c.bf16 %v354_v56, %v353_v55  ;;  %v370_v60 = vld [vmem:[#allocation2 + $0x1af] sm:$0xff] }
  0x59   : > { %v388_v62 = vpack.c.bf16 %v370_v60, %v369_v58  ;;  %v1333_v1 = vld [vmem:[#allocation2 + $0x1a9] sm:$0xff]  ;;  %v950_v33 = vld [vmem:[#allocation2 + $0x1d1] sm:$0xff] }
  0x5a   : > { %1119 = vrot.lane.b32.xlu0 %v2276_v10, %s2027_s24  ;;  %396 = vst.msk [vmem:[#allocation3 + $0x28] sm:$0xff] %vm172_vm0, %v380_v59  ;;  %v933_v25 = vld [vmem:[#allocation2 + $0xc9] sm:$0xff]  ;;  %v1322_v56 = vld [vmem:[#allocation2 + $0xf1] sm:$0xff] }
  0x5b   : > { %404 = vst.msk [vmem:[#allocation3 + $0x68] sm:$0xff] %vm172_vm0, %v388_v62  ;;  %v1193_v42 = vld [vmem:[#allocation2 + $0xf0] sm:$0xff] }
  0x5c   : > { %1133 = vrot.lane.b32.xlu1 %v2266_v5, %s2027_s24  ;;  %v1352_v5 = vpack.c.bf16 %v1330_v4, %v1329_v3  ;;  %v1321_v55 = vld [vmem:[#allocation2 + $0xe9] sm:$0xff] }
  0x5d   : > { %v2570_v60 = vpack.c.bf16 %v1322_v56, %v1321_v55  ;;  %v1325_v56 = vld [vmem:[#allocation2 + $0x129] sm:$0xff] }
  0x5e   : > { %1246 = vrot.lane.b32.xlu0 %v2291_v17, %s2028_s25 }
  0x60   : > { %1135 = vrot.lane.b32.xlu1 %v2279_v14, %s2027_s24 }
  0x62   : > { %1248 = vrot.lane.b32.xlu0 %v2348_v53, %s2028_s25 }
  0x64   : > { %1262 = vrot.lane.b32.xlu1 %v2309_v31, %s2028_s25 }
  0x66   : > { %1375 = vrot.lane.b32.xlu0 %v2313_v32, %s2029_s30 }
  0x68   : > { %1264 = vrot.lane.b32.xlu1 %v1223_v61, %s2028_s25 }
  0x6a   : > { %475 = vrot.lane.b32.xlu0 %v2291_v17, %s2022_s19  ;;  %v801_v17 = vld [vmem:[#allocation2 + $0x90] sm:$0xff] }
  0x6c   : > { %1391 = vrot.lane.b32.xlu1 %v2327_v44, %s2029_s30 }
  0x6e   : > { %1377 = vrot.lane.b32.xlu0 %v1344_v2, %s2029_s30 }
  0x70   : > { %491 = vrot.lane.b32.xlu1 %v2309_v31, %s2022_s19  ;;  %v1075_v31 = vld [vmem:[#allocation2 + $0x1a7] sm:$0xff] }
  0x72   : > { %477 = vrot.lane.b32.xlu0 %v2348_v53, %s2022_s19 }
  0x74   : > { %1393 = vrot.lane.b32.xlu1 %v1352_v5, %s2029_s30 }
  0x76   : > { %604 = vrot.lane.b32.xlu0 %v2313_v32, %s2023_s20  ;;  %v1076_v32 = vld [vmem:[#allocation2 + $0x1af] sm:$0xff] }
  0x77   : > { %v2427_v35 = vpack.c.bf16 %v1076_v32, %v1075_v31  ;;  %v949_v32 = vld [vmem:[#allocation2 + $0x1c9] sm:$0xff] }
  0x78   : > { %493 = vrot.lane.b32.xlu1 %v1223_v61, %s2022_s19 }
  0x7a   : > { %606 = vrot.lane.b32.xlu0 %v1344_v2, %s2023_s20 }
  0x7c   : > { %620 = vrot.lane.b32.xlu1 %v2327_v44, %s2023_s20  ;;  %v368_v44 = vld [vmem:[#allocation2 + $0x18f] sm:$0xff] }
  0x7d   : > { %v387_v47 = vpack.c.bf16 %v368_v44, %v367_v40  ;;  %v1192_v40 = vld [vmem:[#allocation2 + $0xe8] sm:$0xff] }
  0x7e   : > { %733 = vrot.lane.b32.xlu0 %v2276_v10, %s2024_s21  ;;  %v2401_v10 = vpack.c.bf16 %v801_v17, %v800_v16  ;;  %v804_v17 = vld [vmem:[#allocation2 + $0xc8] sm:$0xff] }
  0x7f   : > { %403 = vst.msk [vmem:[#allocation3 + $0x60] sm:$0xff] %vm172_vm0, %v387_v47 }
  0x80   : > { %622 = vrot.lane.b32.xlu1 %v1352_v5, %s2023_s20 }
  0x82   : > { %735 = vrot.lane.b32.xlu0 %v700_v12, %s2024_s21  ;;  %v472_v37 = vpop.permute.xlu0 %471 }
  0x83   : > { %520 = vst.msk [vmem:[#allocation3] sm:$0xff] %vm519_vm3, %v472_v37 }
  0x84   : > { %749 = vrot.lane.b32.xlu1 %v2279_v14, %s2024_s21  ;;  %v2410_v14 = vpack.c.bf16 %v930_v23, %v929_v22  ;;  %v820_v23 = vld [vmem:[#allocation2 + $0x1c8] sm:$0xff] }
  0x86   : > { %862 = vrot.lane.b32.xlu0 %v2348_v53, %s2025_s22  ;;  %v1318_v53 = vld [vmem:[#allocation2 + $0xb1] sm:$0xff] }
  0x88   : > { %751 = vrot.lane.b32.xlu1 %v708_v18, %s2024_s21 }
  0x8a   : > { %864 = vrot.lane.b32.xlu0 %v2401_v10, %s2025_s22 }
  0x8c   : > { %878 = vrot.lane.b32.xlu1 %v1223_v61, %s2025_s22  ;;  %v2453_v61 = vpack.c.bf16 %v1318_v53, %v1317_v51 }
  0x8e   : > { %991 = vrot.lane.b32.xlu0 %v1344_v2, %s2026_s23  ;;  %v1334_v2 = vld [vmem:[#allocation2 + $0x1b1] sm:$0xff] }
  0x90   : > { %880 = vrot.lane.b32.xlu1 %v2407_v24, %s2025_s22 }
  0x92   : > { %993 = vrot.lane.b32.xlu0 %v2410_v14, %s2026_s23 }
  0x94   : > { %1007 = vrot.lane.b32.xlu1 %v1352_v5, %s2026_s23  ;;  %v2467_v5 = vpack.c.bf16 %v1334_v2, %v1333_v1 }
  0x96   : > { %1121 = vrot.lane.b32.xlu0 %v700_v12, %s2027_s24 }
  0x98   : > { %1009 = vrot.lane.b32.xlu1 %v2417_v29, %s2026_s23 }
  0x9a   : > { %1123 = vrot.lane.b32.xlu0 %v2420_v30, %s2027_s24 }
  0x9c   : > { %1137 = vrot.lane.b32.xlu1 %v708_v18, %s2027_s24  ;;  %v805_v18 = vld [vmem:[#allocation2 + $0xd0] sm:$0xff] }
  0x9d   : > { %v601_v48 = vpop.permute.xlu0 %600  ;;  %v2501_v19 = vpack.c.bf16 %v805_v18, %v804_v17  ;;  %v808_v18 = vld [vmem:[#allocation2 + $0x108] sm:$0xff] }
  0x9e   : > { %1250 = vrot.lane.b32.xlu0 %v2401_v10, %s2028_s25  ;;  %649 = vst.msk [vmem:[#allocation3] sm:$0xff] %vm648_vm4, %v601_v48  ;;  %v1209_v48 = vld [vmem:[#allocation2 + $0x1f0] sm:$0xff] }
  0xa0   : > { %1139 = vrot.lane.b32.xlu1 %v2427_v35, %s2027_s24 }
  0xa2   : > { %1252 = vrot.lane.b32.xlu0 %v2431_v36, %s2028_s25 }
  0xa4   : > { %1266 = vrot.lane.b32.xlu1 %v2407_v24, %s2028_s25 }
  0xa6   : > { %1379 = vrot.lane.b32.xlu0 %v2410_v14, %s2029_s30  ;;  %v474_v50 = vpop.permute.xlu1 %473 }
  0xa7   : > { %521 = vst.msk [vmem:[#allocation3 + $0x8] sm:$0xff] %vm519_vm3, %v474_v50 }
  0xa8   : > { %v488_v54 = vpop.permute.xlu0 %487  ;;  %1268 = vrot.lane.b32.xlu1 %v2443_v49, %s2028_s25 }
  0xa9   : > { %528 = vst.msk [vmem:[#allocation3 + $0x40] sm:$0xff] %vm519_vm3, %v488_v54 }
  0xaa   : > { %479 = vrot.lane.b32.xlu0 %v2401_v10, %s2022_s19  ;;  %v490_v63 = vpop.permute.xlu1 %489 }
  0xab   : > { %529 = vst.msk [vmem:[#allocation3 + $0x48] sm:$0xff] %vm519_vm3, %v490_v63  ;;  %v1337_v63 = vld [vmem:[#allocation2 + $0x1e9] sm:$0xff] }
  0xac   : > { %v603_v0 = vpop.permute.xlu0 %602  ;;  %1395 = vrot.lane.b32.xlu1 %v2417_v29, %s2029_s30 }
  0xad   : > { %650 = vst.msk [vmem:[#allocation3 + $0x8] sm:$0xff] %vm648_vm4, %v603_v0  ;;  %v1338_v0 = vld [vmem:[#allocation2 + $0x1f1] sm:$0xff] }
  0xae   : > { %1381 = vrot.lane.b32.xlu0 %v2453_v61, %s2029_s30  ;;  %v617_v3 = vpop.permute.xlu1 %616 }
  0xaf   : > { %657 = vst.msk [vmem:[#allocation3 + $0x40] sm:$0xff] %vm648_vm4, %v617_v3 }
  0xb0   : > { %v730_v4 = vpop.permute.xlu0 %729  ;;  %495 = vrot.lane.b32.xlu1 %v2407_v24, %s2022_s19  ;;  %v821_v24 = vld [vmem:[#allocation2 + $0x1d0] sm:$0xff] }
  0xb1   : > { %778 = vst.msk [vmem:[#allocation3] sm:$0xff] %vm777_vm5, %v730_v4  ;;  %v2513_v28 = vpack.c.bf16 %v821_v24, %v820_v23  ;;  %v2583_v4 = vpack.c.bf16 %v1338_v0, %v1337_v63  ;;  %v824_v24 = vld [vmem:[#allocation2 + $0x208] sm:$0xff] }
  0xb2   : > { %481 = vrot.lane.b32.xlu0 %v2431_v36, %s2022_s19  ;;  %v619_v6 = vpop.permute.xlu1 %618 }
  0xb3   : > { %658 = vst.msk [vmem:[#allocation3 + $0x48] sm:$0xff] %vm648_vm4, %v619_v6 }
  0xb4   : > { %v732_v7 = vpop.permute.xlu0 %731  ;;  %1397 = vrot.lane.b32.xlu1 %v2467_v5, %s2029_s30 }
  0xb5   : > { %779 = vst.msk [vmem:[#allocation3 + $0x8] sm:$0xff] %vm777_vm5, %v732_v7 }
  0xb6   : > { %608 = vrot.lane.b32.xlu0 %v2410_v14, %s2023_s20  ;;  %v746_v8 = vpop.permute.xlu1 %745 }
  0xb7   : > { %786 = vst.msk [vmem:[#allocation3 + $0x40] sm:$0xff] %vm777_vm5, %v746_v8 }
  0xb8   : > { %v859_v9 = vpop.permute.xlu0 %858  ;;  %497 = vrot.lane.b32.xlu1 %v2443_v49, %s2022_s19 }
  0xb9   : > { %907 = vst.msk [vmem:[#allocation3] sm:$0xff] %vm906_vm6, %v859_v9 }
  0xba   : > { %610 = vrot.lane.b32.xlu0 %v2453_v61, %s2023_s20  ;;  %v748_v11 = vpop.permute.xlu1 %747 }
  0xbb   : > { %787 = vst.msk [vmem:[#allocation3 + $0x48] sm:$0xff] %vm777_vm5, %v748_v11 }
  0xbc   : > { %v861_v12 = vpop.permute.xlu0 %860  ;;  %624 = vrot.lane.b32.xlu1 %v2417_v29, %s2023_s20  ;;  %v2517_v29 = vpack.c.bf16 %v934_v26, %v933_v25  ;;  %v937_v25 = vld [vmem:[#allocation2 + $0x109] sm:$0xff]  ;;  %v938_v26 = vld [vmem:[#allocation2 + $0x111] sm:$0xff] }
  0xbd   : > { %908 = vst.msk [vmem:[#allocation3 + $0x8] sm:$0xff] %vm906_vm6, %v861_v12 }
  0xbe   : > { %737 = vrot.lane.b32.xlu0 %v2420_v30, %s2024_s21  ;;  %v875_v13 = vpop.permute.xlu1 %874 }
  0xbf   : > { %915 = vst.msk [vmem:[#allocation3 + $0x40] sm:$0xff] %vm906_vm6, %v875_v13 }
  0xc0   : > { %v988_v15 = vpop.permute.xlu0 %987  ;;  %626 = vrot.lane.b32.xlu1 %v2467_v5, %s2023_s20 }
  0xc1   : > { %1036 = vst.msk [vmem:[#allocation3] sm:$0xff] %vm1035_vm7, %v988_v15  ;;  %v695_v15 = vld [vmem:[#allocation2 + $0x207] sm:$0xff] }
  0xc2   : > { %739 = vrot.lane.b32.xlu0 %v2320_v41, %s2024_s21  ;;  %v877_v16 = vpop.permute.xlu1 %876 }
  0xc3   : > { %916 = vst.msk [vmem:[#allocation3 + $0x48] sm:$0xff] %vm906_vm6, %v877_v16  ;;  %v696_v16 = vld [vmem:[#allocation2 + $0x20f] sm:$0xff] }
  0xc4   : > { %v990_v10 = vpop.permute.xlu0 %989  ;;  %753 = vrot.lane.b32.xlu1 %v2427_v35, %s2024_s21 }
  0xc5   : > { %1037 = vst.msk [vmem:[#allocation3 + $0x8] sm:$0xff] %vm1035_vm7, %v990_v10  ;;  %v809_v10 = vld [vmem:[#allocation2 + $0x110] sm:$0xff] }
  0xc6   : > { %866 = vrot.lane.b32.xlu0 %v2431_v36, %s2025_s22  ;;  %v1004_v21 = vpop.permute.xlu1 %1003  ;;  %v2529_v36 = vpack.c.bf16 %v950_v33, %v949_v32  ;;  %v953_v32 = vld [vmem:[#allocation2 + $0x209] sm:$0xff]  ;;  %v954_v33 = vld [vmem:[#allocation2 + $0x211] sm:$0xff] }
  0xc7   : > { %1044 = vst.msk [vmem:[#allocation3 + $0x40] sm:$0xff] %vm1035_vm7, %v1004_v21  ;;  %v833_v21 = vpack.c.bf16 %v809_v10, %v808_v18 }
  0xc8   : > { %v1118_v22 = vpop.permute.xlu0 %1117  ;;  %755 = vrot.lane.b32.xlu1 %v2322_v43, %s2024_s21 }
  0xc9   : > { %1166 = vst.msk [vmem:[#allocation3] sm:$0xff] %vm1165_vm8, %v1118_v22 }
  0xca   : > { %868 = vrot.lane.b32.xlu0 %v2501_v19, %s2025_s22  ;;  %v1006_v14 = vpop.permute.xlu1 %1005 }
  0xcb   : > { %1045 = vst.msk [vmem:[#allocation3 + $0x48] sm:$0xff] %vm1035_vm7, %v1006_v14  ;;  %v825_v14 = vld [vmem:[#allocation2 + $0x210] sm:$0xff] }
  0xcc   : > { %v1120_v27 = vpop.permute.xlu0 %1119  ;;  %882 = vrot.lane.b32.xlu1 %v2443_v49, %s2025_s22 }
  0xcd   : > { %1167 = vst.msk [vmem:[#allocation3 + $0x8] sm:$0xff] %vm1165_vm8, %v1120_v27 }
  0xce   : > { %995 = vrot.lane.b32.xlu0 %v2453_v61, %s2026_s23  ;;  %v1134_v30 = vpop.permute.xlu1 %1133 }
  0xcf   : > { %1174 = vst.msk [vmem:[#allocation3 + $0x40] sm:$0xff] %vm1165_vm8, %v1134_v30 }
  0xd0   : > { %v1247_v31 = vpop.permute.xlu0 %1246  ;;  %884 = vrot.lane.b32.xlu1 %v2513_v28, %s2025_s22 }
  0xd1   : > { %1295 = vst.msk [vmem:[#allocation3] sm:$0xff] %vm1294_vm9, %v1247_v31 }
  0xd2   : > { %997 = vrot.lane.b32.xlu0 %v2517_v29, %s2026_s23  ;;  %v1136_v34 = vpop.permute.xlu1 %1135 }
  0xd3   : > { %1175 = vst.msk [vmem:[#allocation3 + $0x48] sm:$0xff] %vm1165_vm8, %v1136_v34 }
  0xd4   : > { %v1249_v35 = vpop.permute.xlu0 %1248  ;;  %1011 = vrot.lane.b32.xlu1 %v2467_v5, %s2026_s23 }
  0xd5   : > { %1296 = vst.msk [vmem:[#allocation3 + $0x8] sm:$0xff] %vm1294_vm9, %v1249_v35  ;;  %v1067_v35 = vld [vmem:[#allocation2 + $0x127] sm:$0xff] }
  0xd6   : > { %1125 = vrot.lane.b32.xlu0 %v2320_v41, %s2027_s24  ;;  %v1263_v37 = vpop.permute.xlu1 %1262  ;;  %v2545_v41 = vpack.c.bf16 %v1193_v42, %v1192_v40 }
  0xd7   : > { %1303 = vst.msk [vmem:[#allocation3 + $0x40] sm:$0xff] %vm1294_vm9, %v1263_v37 }
  0xd8   : > { %v1376_v38 = vpop.permute.xlu0 %1375  ;;  %1013 = vrot.lane.b32.xlu1 %v2529_v36, %s2026_s23 }
  0xd9   : > { %1424 = vst.msk [vmem:[#allocation3] sm:$0xff] %vm1423_vm10, %v1376_v38  ;;  %v970_v38 = vpack.c.bf16 %v954_v33, %v953_v32 }
  0xda   : > { %1127 = vrot.lane.b32.xlu0 %v2342_v52, %s2027_s24  ;;  %v1265_v39 = vpop.permute.xlu1 %1264 }
  0xdb   : > { %1304 = vst.msk [vmem:[#allocation3 + $0x48] sm:$0xff] %vm1294_vm9, %v1265_v39 }
  0xdc   : > { %v476_v44 = vpop.permute.xlu0 %475  ;;  %1141 = vrot.lane.b32.xlu1 %v2322_v43, %s2027_s24  ;;  %v1208_v43 = vld [vmem:[#allocation2 + $0x1e8] sm:$0xff] }
  0xdd   : > { %522 = vst.msk [vmem:[#allocation3 + $0x10] sm:$0xff] %vm519_vm3, %v476_v44  ;;  %v2558_v51 = vpack.c.bf16 %v1209_v48, %v1208_v43  ;;  %v1083_v44 = vld [vmem:[#allocation2 + $0x227] sm:$0xff] }
  0xde   : > { %1254 = vrot.lane.b32.xlu0 %v2501_v19, %s2028_s25  ;;  %v1392_v45 = vpop.permute.xlu1 %1391 }
  0xdf   : > { %1432 = vst.msk [vmem:[#allocation3 + $0x40] sm:$0xff] %vm1423_vm10, %v1392_v45 }
  0xe0   : > { %v1378_v46 = vpop.permute.xlu0 %1377  ;;  %v1440_v47 = vld [vmem:[#allocation3] sm:$0xff]  ;;  %1143 = vrot.lane.b32.xlu1 %v2355_v57, %s2027_s24 }
  0xe1   : > { %1425 = vst.msk [vmem:[#allocation3 + $0x8] sm:$0xff] %vm1423_vm10, %v1378_v46  ;;  %1953 = vmatprep.mubr.msk.bf16.mxu0 %vm1483_vm11, %v1440_v47  ;;  %v1196_v46 = vld [vmem:[#allocation2 + $0x128] sm:$0xff]  ;;  %v1197_v47 = vld [vmem:[#allocation2 + $0x130] sm:$0xff] }
  0xe2   : > { %1256 = vrot.lane.b32.xlu0 %v2545_v41, %s2028_s25  ;;  %v492_v49 = vpop.permute.xlu1 %491  ;;  %v1221_v48 = vpack.c.bf16 %v1197_v47, %v1196_v46 }
  0xe3   : > { %530 = vst.msk [vmem:[#allocation3 + $0x50] sm:$0xff] %vm519_vm3, %v492_v49 }
  0xe4   : > { %v478_v50 = vpop.permute.xlu0 %477  ;;  %1270 = vrot.lane.b32.xlu1 %v2513_v28, %s2028_s25 }
  0xe5   : > { %523 = vst.msk [vmem:[#allocation3 + $0x18] sm:$0xff] %vm519_vm3, %v478_v50 }
  0xe6   : > { %1383 = vrot.lane.b32.xlu0 %v2517_v29, %s2029_s30  ;;  %v1394_v53 = vpop.permute.xlu1 %1393  ;;  %v1448_v54 = vld [vmem:[#allocation3 + $0x40] sm:$0xff] }
  0xe7   : > { %1433 = vst.msk [vmem:[#allocation3 + $0x48] sm:$0xff] %vm1423_vm10, %v1394_v53  ;;  %1969 = vmatprep.mubr.msk.bf16.mxu1 %vm1483_vm11, %v1448_v54  ;;  %v1212_v53 = vld [vmem:[#allocation2 + $0x228] sm:$0xff]  ;;  %v1213_v54 = vld [vmem:[#allocation2 + $0x230] sm:$0xff] }
  0xe8   : > { %v605_v58 = vpop.permute.xlu0 %604  ;;  %v1441_v59 = vld [vmem:[#allocation3 + $0x8] sm:$0xff]  ;;  %1272 = vrot.lane.b32.xlu1 %v2558_v51, %s2028_s25 }
  0xe9   : > { %651 = vst.msk [vmem:[#allocation3 + $0x10] sm:$0xff] %vm648_vm4, %v605_v58  ;;  %1954 = vmatmul.mubr.msk.bf16.vlgmr.msra.gmra.mrb[0].mxu0 %vm1483_vm11, %v1441_v59  ;;  %v1326_v58 = vld [vmem:[#allocation2 + $0x131] sm:$0xff] }
  0xea   : > { %483 = vrot.lane.b32.xlu0 %v2501_v19, %s2022_s19  ;;  %v494_v61 = vpop.permute.xlu1 %493  ;;  %v712_v19 = vpack.c.bf16 %v696_v16, %v695_v15 }
  0xeb   : > { %531 = vst.msk [vmem:[#allocation3 + $0x58] sm:$0xff] %vm519_vm3, %v494_v61  ;;  %v1350_v61 = vpack.c.bf16 %v1326_v58, %v1325_v56 }
  0xec   : > { %v607_v62 = vpop.permute.xlu0 %606  ;;  %1399 = vrot.lane.b32.xlu1 %v2529_v36, %s2029_s30 }
  0xed   : > { %652 = vst.msk [vmem:[#allocation3 + $0x18] sm:$0xff] %vm648_vm4, %v607_v62 }
  0xee   : > { %1385 = vrot.lane.b32.xlu0 %v2570_v60, %s2029_s30  ;;  %v621_v1 = vpop.permute.xlu1 %620  ;;  %v1449_v2 = vld [vmem:[#allocation3 + $0x48] sm:$0xff] }
  0xef   : > { %659 = vst.msk [vmem:[#allocation3 + $0x50] sm:$0xff] %vm648_vm4, %v621_v1  ;;  %1970 = vmatmul.mubr.msk.bf16.vlgmr.msra.gmra.mrb[0].mxu1 %vm1483_vm11, %v1449_v2  ;;  %v1341_v2 = vld [vmem:[#allocation2 + $0x229] sm:$0xff] }
  0xf0   : > { %v734_v3 = vpop.permute.xlu0 %733  ;;  %499 = vrot.lane.b32.xlu1 %v2513_v28, %s2022_s19  ;;  %v841_v28 = vpack.c.bf16 %v825_v14, %v824_v24 }
  0xf1   : > { %780 = vst.msk [vmem:[#allocation3 + $0x10] sm:$0xff] %vm777_vm5, %v734_v3  ;;  %v1342_v3 = vld [vmem:[#allocation2 + $0x231] sm:$0xff] }
  0xf2   : > { %485 = vrot.lane.b32.xlu0 %v2545_v41, %s2022_s19  ;;  %v623_v5 = vpop.permute.xlu1 %622 }
  0xf3   : > { %660 = vst.msk [vmem:[#allocation3 + $0x58] sm:$0xff] %vm648_vm4, %v623_v5 }
  0xf4   : > { %v736_v6 = vpop.permute.xlu0 %735  ;;  %1401 = vrot.lane.b32.xlu1 %v2583_v4, %s2029_s30 }
  0xf5   : > { %781 = vst.msk [vmem:[#allocation3 + $0x18] sm:$0xff] %vm777_vm5, %v736_v6  ;;  %v1358_v6 = vpack.c.bf16 %v1342_v3, %v1341_v2 }
  0xf6   : > { %612 = vrot.lane.b32.xlu0 %v2517_v29, %s2023_s20  ;;  %v750_v7 = vpop.permute.xlu1 %749  ;;  %v962_v29 = vpack.c.bf16 %v938_v26, %v937_v25 }
  0xf7   : > { %788 = vst.msk [vmem:[#allocation3 + $0x50] sm:$0xff] %vm777_vm5, %v750_v7 }
  0xf8   : > { %v863_v8 = vpop.permute.xlu0 %862  ;;  %501 = vrot.lane.b32.xlu1 %v2558_v51, %s2022_s19 }
  0xf9   : > { %909 = vst.msk [vmem:[#allocation3 + $0x10] sm:$0xff] %vm906_vm6, %v863_v8 }
  0xfa   : > { %614 = vrot.lane.b32.xlu0 %v2570_v60, %s2023_s20  ;;  %v752_v9 = vpop.permute.xlu1 %751 }
  0xfb   : > { %789 = vst.msk [vmem:[#allocation3 + $0x58] sm:$0xff] %vm777_vm5, %v752_v9 }
  0xfc   : > { %v865_v11 = vpop.permute.xlu0 %864  ;;  %628 = vrot.lane.b32.xlu1 %v2529_v36, %s2023_s20  ;;  %v1068_v36 = vld [vmem:[#allocation2 + $0x12f] sm:$0xff] }
  0xfd   : > { %910 = vst.msk [vmem:[#allocation3 + $0x18] sm:$0xff] %vm906_vm6, %v865_v11  ;;  %v1092_v39 = vpack.c.bf16 %v1068_v36, %v1067_v35 }
  0xfe   : > { %741 = vrot.lane.b32.xlu0 %v2342_v52, %s2024_s21  ;;  %v879_v12 = vpop.permute.xlu1 %878 }
  0xff   : > { %917 = vst.msk [vmem:[#allocation3 + $0x50] sm:$0xff] %vm906_vm6, %v879_v12 }
 0x100   : > { %v992_v13 = vpop.permute.xlu0 %991  ;;  %630 = vrot.lane.b32.xlu1 %v2583_v4, %s2023_s20 }
 0x101   : > { %1038 = vst.msk [vmem:[#allocation3 + $0x10] sm:$0xff] %vm1035_vm7, %v992_v13 }
 0x102   : > { %743 = vrot.lane.b32.xlu0 %v2293_v20, %s2024_s21  ;;  %v881_v17 = vpop.permute.xlu1 %880 }
 0x103   : > { %918 = vst.msk [vmem:[#allocation3 + $0x58] sm:$0xff] %vm906_vm6, %v881_v17 }
 0x104   : > { %v994_v52 = vpop.permute.xlu0 %993  ;;  %757 = vrot.lane.b32.xlu1 %v2355_v57, %s2024_s21 }
 0x105   : > { %1039 = vst.msk [vmem:[#allocation3 + $0x18] sm:$0xff] %vm1035_vm7, %v994_v52 }
 0x106   : > { %870 = vrot.lane.b32.xlu0 %v2545_v41, %s2025_s22  ;;  %v1008_v22 = vpop.permute.xlu1 %1007  ;;  %v1084_v41 = vld [vmem:[#allocation2 + $0x22f] sm:$0xff] }
 0x107   : > { %1046 = vst.msk [vmem:[#allocation3 + $0x50] sm:$0xff] %vm1035_vm7, %v1008_v22 }
 0x108   : > { %v1122_v23 = vpop.permute.xlu0 %1121  ;;  %759 = vrot.lane.b32.xlu1 %v712_v19, %s2024_s21 }
 0x109   : > { %1168 = vst.msk [vmem:[#allocation3 + $0x10] sm:$0xff] %vm1165_vm8, %v1122_v23 }
 0x10a   : > { %872 = vrot.lane.b32.xlu0 %v833_v21, %s2025_s22  ;;  %v1010_v57 = vpop.permute.xlu1 %1009 }
 0x10b   : > { %1047 = vst.msk [vmem:[#allocation3 + $0x58] sm:$0xff] %vm1035_vm7, %v1010_v57 }
 0x10c   : > { %v1124_v27 = vpop.permute.xlu0 %1123  ;;  %886 = vrot.lane.b32.xlu1 %v2558_v51, %s2025_s22 }
 0x10d   : > { %1169 = vst.msk [vmem:[#allocation3 + $0x18] sm:$0xff] %vm1165_vm8, %v1124_v27 }
 0x10e   : > { %999 = vrot.lane.b32.xlu0 %v2570_v60, %s2026_s23  ;;  %v1138_v30 = vpop.permute.xlu1 %1137  ;;  %v1229_v60 = vpack.c.bf16 %v1213_v54, %v1212_v53 }
 0x10f   : > { %1176 = vst.msk [vmem:[#allocation3 + $0x50] sm:$0xff] %vm1165_vm8, %v1138_v30 }
 0x110   : > { %v1251_v31 = vpop.permute.xlu0 %1250  ;;  %888 = vrot.lane.b32.xlu1 %v841_v28, %s2025_s22 }
 0x111   : > { %1297 = vst.msk [vmem:[#allocation3 + $0x10] sm:$0xff] %vm1294_vm9, %v1251_v31 }
 0x112   : > { %1001 = vrot.lane.b32.xlu0 %v962_v29, %s2026_s23  ;;  %v1140_v34 = vpop.permute.xlu1 %1139 }
 0x113   : > { %1177 = vst.msk [vmem:[#allocation3 + $0x58] sm:$0xff] %vm1165_vm8, %v1140_v34 }
 0x114   : > { %v1253_v37 = vpop.permute.xlu0 %1252  ;;  %1015 = vrot.lane.b32.xlu1 %v2583_v4, %s2026_s23 }
 0x115   : > { %1298 = vst.msk [vmem:[#allocation3 + $0x18] sm:$0xff] %vm1294_vm9, %v1253_v37 }
 0x116   : > { %1129 = vrot.lane.b32.xlu0 %v2293_v20, %s2027_s24  ;;  %v1267_v40 = vpop.permute.xlu1 %1266  ;;  %v1100_v20 = vpack.c.bf16 %v1084_v41, %v1083_v44 }
 0x117   : > { %1305 = vst.msk [vmem:[#allocation3 + $0x50] sm:$0xff] %vm1294_vm9, %v1267_v40 }
 0x118   : > { %v1380_v42 = vpop.permute.xlu0 %1379  ;;  %1017 = vrot.lane.b32.xlu1 %v970_v38, %s2026_s23 }
 0x119   : > { %1426 = vst.msk [vmem:[#allocation3 + $0x10] sm:$0xff] %vm1423_vm10, %v1380_v42 }
 0x11a   : > { %1131 = vrot.lane.b32.xlu0 %v1092_v39, %s2027_s24  ;;  %v1269_v45 = vpop.permute.xlu1 %1268 }
 0x11b   : > { %1306 = vst.msk [vmem:[#allocation3 + $0x58] sm:$0xff] %vm1294_vm9, %v1269_v45 }
 0x11c   : > { %v480_v43 = vpop.permute.xlu0 %479  ;;  %1145 = vrot.lane.b32.xlu1 %v712_v19, %s2027_s24 }
 0x11d   : > { %524 = vst.msk [vmem:[#allocation3 + $0x20] sm:$0xff] %vm519_vm3, %v480_v43 }
 0x11e   : > { %1258 = vrot.lane.b32.xlu0 %v833_v21, %s2028_s25  ;;  %v1396_v49 = vpop.permute.xlu1 %1395 }
 0x11f   : > { %1434 = vst.msk [vmem:[#allocation3 + $0x50] sm:$0xff] %vm1423_vm10, %v1396_v49 }
 0x120   : > { %v1382_v50 = vpop.permute.xlu0 %1381  ;;  %v1442_v51 = vld [vmem:[#allocation3 + $0x10] sm:$0xff]  ;;  %1147 = vrot.lane.b32.xlu1 %v1100_v20, %s2027_s24 }
 0x121   : > { %1427 = vst.msk [vmem:[#allocation3 + $0x18] sm:$0xff] %vm1423_vm10, %v1382_v50  ;;  %1957 = vmatprep.mubr.msk.bf16.mxu0 %vm1483_vm11, %v1442_v51 }
 0x122   : > { %1260 = vrot.lane.b32.xlu0 %v1221_v48, %s2028_s25  ;;  %v496_v55 = vpop.permute.xlu1 %495 }
 0x123   : > { %532 = vst.msk [vmem:[#allocation3 + $0x60] sm:$0xff] %vm519_vm3, %v496_v55 }
 0x124   : > { %v482_v59 = vpop.permute.xlu0 %481  ;;  %1274 = vrot.lane.b32.xlu1 %v841_v28, %s2028_s25 }
 0x125   : > { %525 = vst.msk [vmem:[#allocation3 + $0x28] sm:$0xff] %vm519_vm3, %v482_v59 }
 0x126   : > { %1387 = vrot.lane.b32.xlu0 %v962_v29, %s2029_s30  ;;  %v1398_v62 = vpop.permute.xlu1 %1397  ;;  %v1450_v63 = vld [vmem:[#allocation3 + $0x50] sm:$0xff] }
 0x127   : > { %1435 = vst.msk [vmem:[#allocation3 + $0x58] sm:$0xff] %vm1423_vm10, %v1398_v62  ;;  %1973 = vmatprep.mubr.msk.bf16.mxu1 %vm1483_vm11, %v1450_v63 }
 0x128   : > { %v609_v0 = vpop.permute.xlu0 %608  ;;  %v1443_v1 = vld [vmem:[#allocation3 + $0x18] sm:$0xff]  ;;  %1276 = vrot.lane.b32.xlu1 %v1229_v60, %s2028_s25 }
 0x129   : > { %653 = vst.msk [vmem:[#allocation3 + $0x20] sm:$0xff] %vm648_vm4, %v609_v0  ;;  %1958 = vmatmul.mubr.msk.bf16.gmra.mrb[4].mxu0 %vm1483_vm11, %v1443_v1 }
 0x12a   : > { %1389 = vrot.lane.b32.xlu0 %v1350_v61, %s2029_s30  ;;  %v498_v4 = vpop.permute.xlu1 %497 }
 0x12b   : > { %533 = vst.msk [vmem:[#allocation3 + $0x68] sm:$0xff] %vm519_vm3, %v498_v4 }
 0x12c   : > { %v611_v5 = vpop.permute.xlu0 %610  ;;  %1403 = vrot.lane.b32.xlu1 %v970_v38, %s2029_s30 }
 0x12d   : > { %654 = vst.msk [vmem:[#allocation3 + $0x28] sm:$0xff] %vm648_vm4, %v611_v5 }
 0x12e   : > { %v625_v7 = vpop.permute.xlu1 %624  ;;  %v1451_v8 = vld [vmem:[#allocation3 + $0x58] sm:$0xff] }
 0x12f   : > { %661 = vst.msk [vmem:[#allocation3 + $0x60] sm:$0xff] %vm648_vm4, %v625_v7  ;;  %1974 = vmatmul.mubr.msk.bf16.gmra.mrb[4].mxu1 %vm1483_vm11, %v1451_v8 }
 0x130   : > { %v738_v9 = vpop.permute.xlu0 %737  ;;  %1405 = vrot.lane.b32.xlu1 %v1358_v6, %s2029_s30 }
 0x131   : > { %782 = vst.msk [vmem:[#allocation3 + $0x20] sm:$0xff] %vm777_vm5, %v738_v9 }
 0x132   : > { %v627_v11 = vpop.permute.xlu1 %626 }
 0x133   : > { %662 = vst.msk [vmem:[#allocation3 + $0x68] sm:$0xff] %vm648_vm4, %v627_v11  ;;  %v2734_v11 = vld [vmem:[%s2843_s2] ss:$0 sm:$0xff] }
 0x134   : > { %v740_v12 = vpop.permute.xlu0 %739 }
 0x135   : > { %783 = vst.msk [vmem:[#allocation3 + $0x28] sm:$0xff] %vm777_vm5, %v740_v12 }
 0x136   : > { %v754_v13 = vpop.permute.xlu1 %753 }
 0x137   : > { %790 = vst.msk [vmem:[#allocation3 + $0x60] sm:$0xff] %vm777_vm5, %v754_v13 }
 0x138   : > { %v867_v15 = vpop.permute.xlu0 %866 }
 0x139   : > { %911 = vst.msk [vmem:[#allocation3 + $0x20] sm:$0xff] %vm906_vm6, %v867_v15 }
 0x13a   : > { %v756_v16 = vpop.permute.xlu1 %755 }
 0x13b   : > { %791 = vst.msk [vmem:[#allocation3 + $0x68] sm:$0xff] %vm777_vm5, %v756_v16 }
 0x13c   : > { %v869_v17 = vpop.permute.xlu0 %868 }
 0x13d   : > { %912 = vst.msk [vmem:[#allocation3 + $0x28] sm:$0xff] %vm906_vm6, %v869_v17 }
 0x13e   : > { %v883_v18 = vpop.permute.xlu1 %882 }
 0x13f   : > { %919 = vst.msk [vmem:[#allocation3 + $0x60] sm:$0xff] %vm906_vm6, %v883_v18 }
 0x140   : > { %v996_v10 = vpop.permute.xlu0 %995 }
 0x141   : > { %1040 = vst.msk [vmem:[#allocation3 + $0x20] sm:$0xff] %vm1035_vm7, %v996_v10 }
 0x142   : > { %v885_v52 = vpop.permute.xlu1 %884 }
 0x143   : > { %920 = vst.msk [vmem:[#allocation3 + $0x68] sm:$0xff] %vm906_vm6, %v885_v52 }
 0x144   : > { %v998_v19 = vpop.permute.xlu0 %997 }
 0x145   : > { %1041 = vst.msk [vmem:[#allocation3 + $0x28] sm:$0xff] %vm1035_vm7, %v998_v19 }
 0x146   : > { %v1012_v21 = vpop.permute.xlu1 %1011 }
 0x147   : > { %1048 = vst.msk [vmem:[#allocation3 + $0x60] sm:$0xff] %vm1035_vm7, %v1012_v21 }
 0x148   : > { %v1126_v22 = vpop.permute.xlu0 %1125 }
 0x149   : > { %1170 = vst.msk [vmem:[#allocation3 + $0x20] sm:$0xff] %vm1165_vm8, %v1126_v22 }
 0x14a   : > { %v1014_v23 = vpop.permute.xlu1 %1013 }
 0x14b   : > { %1049 = vst.msk [vmem:[#allocation3 + $0x68] sm:$0xff] %vm1035_vm7, %v1014_v23 }
 0x14c   : > { %v1128_v24 = vpop.permute.xlu0 %1127 }
 0x14d   : > { %1171 = vst.msk [vmem:[#allocation3 + $0x28] sm:$0xff] %vm1165_vm8, %v1128_v24 }
 0x14e   : > { %v1142_v14 = vpop.permute.xlu1 %1141 }
 0x14f   : > { %1178 = vst.msk [vmem:[#allocation3 + $0x60] sm:$0xff] %vm1165_vm8, %v1142_v14 }
 0x150   : > { %v1255_v57 = vpop.permute.xlu0 %1254 }
 0x151   : > { %1299 = vst.msk [vmem:[#allocation3 + $0x20] sm:$0xff] %vm1294_vm9, %v1255_v57 }
 0x152   : > { %v1144_v25 = vpop.permute.xlu1 %1143 }
 0x153   : > { %1179 = vst.msk [vmem:[#allocation3 + $0x68] sm:$0xff] %vm1165_vm8, %v1144_v25 }
 0x154   : > { %v1257_v26 = vpop.permute.xlu0 %1256 }
 0x155   : > { %1300 = vst.msk [vmem:[#allocation3 + $0x28] sm:$0xff] %vm1294_vm9, %v1257_v26 }
 0x156   : > { %v1271_v27 = vpop.permute.xlu1 %1270 }
 0x157   : > { %1307 = vst.msk [vmem:[#allocation3 + $0x60] sm:$0xff] %vm1294_vm9, %v1271_v27 }
 0x158   : > { %v1384_v28 = vpop.permute.xlu0 %1383 }
 0x159   : > { %1428 = vst.msk [vmem:[#allocation3 + $0x20] sm:$0xff] %vm1423_vm10, %v1384_v28 }
 0x15a   : > { %v1273_v29 = vpop.permute.xlu1 %1272 }
 0x15b   : > { %1308 = vst.msk [vmem:[#allocation3 + $0x68] sm:$0xff] %vm1294_vm9, %v1273_v29 }
 0x15c   : > { %v484_v30 = vpop.permute.xlu0 %483 }
 0x15d   : > { %526 = vst.msk [vmem:[#allocation3 + $0x30] sm:$0xff] %vm519_vm3, %v484_v30 }
 0x15e   : > { %v1400_v31 = vpop.permute.xlu1 %1399 }
 0x15f   : > { %1436 = vst.msk [vmem:[#allocation3 + $0x60] sm:$0xff] %vm1423_vm10, %v1400_v31 }
 0x160   : > { %v1386_v32 = vpop.permute.xlu0 %1385  ;;  %v1444_v33 = vld [vmem:[#allocation3 + $0x20] sm:$0xff] }
 0x161   : > { %1429 = vst.msk [vmem:[#allocation3 + $0x28] sm:$0xff] %vm1423_vm10, %v1386_v32  ;;  %1961 = vmatprep.mubr.msk.bf16.mxu0 %vm1483_vm11, %v1444_v33 }
 0x162   : > { %v500_v34 = vpop.permute.xlu1 %499 }
 0x163   : > { %534 = vst.msk [vmem:[#allocation3 + $0x70] sm:$0xff] %vm519_vm3, %v500_v34 }
 0x164   : > { %v486_v35 = vpop.permute.xlu0 %485 }
 0x165   : > { %527 = vst.msk [vmem:[#allocation3 + $0x38] sm:$0xff] %vm519_vm3, %v486_v35 }
 0x166   : > { %v1402_v36 = vpop.permute.xlu1 %1401  ;;  %v1452_v37 = vld [vmem:[#allocation3 + $0x60] sm:$0xff] }
 0x167   : > { %1437 = vst.msk [vmem:[#allocation3 + $0x68] sm:$0xff] %vm1423_vm10, %v1402_v36  ;;  %1977 = vmatprep.mubr.msk.bf16.mxu1 %vm1483_vm11, %v1452_v37 }
 0x168   : > { %v613_v38 = vpop.permute.xlu0 %612  ;;  %v1445_v39 = vld [vmem:[#allocation3 + $0x28] sm:$0xff] }
 0x169   : > { %655 = vst.msk [vmem:[#allocation3 + $0x30] sm:$0xff] %vm648_vm4, %v613_v38  ;;  %1962 = vmatmul.mubr.msk.bf16.gmra.mrb[8].mxu0 %vm1483_vm11, %v1445_v39 }
 0x16a   : > { %v502_v40 = vpop.permute.xlu1 %501 }
 0x16b   : > { %535 = vst.msk [vmem:[#allocation3 + $0x78] sm:$0xff] %vm519_vm3, %v502_v40 }
 0x16c   : > { %v615_v42 = vpop.permute.xlu0 %614 }
 0x16d   : > { %656 = vst.msk [vmem:[#allocation3 + $0x38] sm:$0xff] %vm648_vm4, %v615_v42 }
 0x16e   : > { %v629_v44 = vpop.permute.xlu1 %628  ;;  %v1453_v41 = vld [vmem:[#allocation3 + $0x68] sm:$0xff] }
 0x16f   : > { %663 = vst.msk [vmem:[#allocation3 + $0x70] sm:$0xff] %vm648_vm4, %v629_v44  ;;  %1978 = vmatmul.mubr.msk.bf16.gmra.mrb[8].mxu1 %vm1483_vm11, %v1453_v41 }
 0x170   : > { %v742_v45 = vpop.permute.xlu0 %741 }
 0x171   : > { %784 = vst.msk [vmem:[#allocation3 + $0x30] sm:$0xff] %vm777_vm5, %v742_v45 }
 0x172   : > { %v631_v46 = vpop.permute.xlu1 %630 }
 0x173   : > { %664 = vst.msk [vmem:[#allocation3 + $0x78] sm:$0xff] %vm648_vm4, %v631_v46 }
 0x174   : > { %v744_v47 = vpop.permute.xlu0 %743 }
 0x175   : > { %785 = vst.msk [vmem:[#allocation3 + $0x38] sm:$0xff] %vm777_vm5, %v744_v47 }
 0x176   : > { %v758_v43 = vpop.permute.xlu1 %757 }
 0x177   : > { %792 = vst.msk [vmem:[#allocation3 + $0x70] sm:$0xff] %vm777_vm5, %v758_v43 }
 0x178   : > { %v871_v20 = vpop.permute.xlu0 %870 }
 0x179   : > { %913 = vst.msk [vmem:[#allocation3 + $0x30] sm:$0xff] %vm906_vm6, %v871_v20 }
 0x17a   : > { %v760_v48 = vpop.permute.xlu1 %759 }
 0x17b   : > { %793 = vst.msk [vmem:[#allocation3 + $0x78] sm:$0xff] %vm777_vm5, %v760_v48 }
 0x17c   : > { %v873_v49 = vpop.permute.xlu0 %872 }
 0x17d   : > { %914 = vst.msk [vmem:[#allocation3 + $0x38] sm:$0xff] %vm906_vm6, %v873_v49 }
 0x17e   : > { %v887_v50 = vpop.permute.xlu1 %886 }
 0x17f   : > { %921 = vst.msk [vmem:[#allocation3 + $0x70] sm:$0xff] %vm906_vm6, %v887_v50 }
 0x180   : > { %v1000_v51 = vpop.permute.xlu0 %999 }
 0x181   : > { %1042 = vst.msk [vmem:[#allocation3 + $0x30] sm:$0xff] %vm1035_vm7, %v1000_v51 }
 0x182   : > { %v889_v53 = vpop.permute.xlu1 %888 }
 0x183   : > { %922 = vst.msk [vmem:[#allocation3 + $0x78] sm:$0xff] %vm906_vm6, %v889_v53 }
 0x184   : > { %v1002_v54 = vpop.permute.xlu0 %1001 }
 0x185   : > { %1043 = vst.msk [vmem:[#allocation3 + $0x38] sm:$0xff] %vm1035_vm7, %v1002_v54 }
 0x186   : > { %v1016_v55 = vpop.permute.xlu1 %1015 }
 0x187   : > { %1050 = vst.msk [vmem:[#allocation3 + $0x70] sm:$0xff] %vm1035_vm7, %v1016_v55 }
 0x188   : > { %v1130_v56 = vpop.permute.xlu0 %1129 }
 0x189   : > { %1172 = vst.msk [vmem:[#allocation3 + $0x30] sm:$0xff] %vm1165_vm8, %v1130_v56 }
 0x18a   : > { %v1018_v58 = vpop.permute.xlu1 %1017 }
 0x18b   : > { %1051 = vst.msk [vmem:[#allocation3 + $0x78] sm:$0xff] %vm1035_vm7, %v1018_v58 }
 0x18c   : > { %v1132_v59 = vpop.permute.xlu0 %1131 }
 0x18d   : > { %1173 = vst.msk [vmem:[#allocation3 + $0x38] sm:$0xff] %vm1165_vm8, %v1132_v59 }
 0x18e   : > { %v1146_v60 = vpop.permute.xlu1 %1145 }
 0x18f   : > { %1180 = vst.msk [vmem:[#allocation3 + $0x70] sm:$0xff] %vm1165_vm8, %v1146_v60 }
 0x190   : > { %v1259_v61 = vpop.permute.xlu0 %1258 }
 0x191   : > { %1301 = vst.msk [vmem:[#allocation3 + $0x30] sm:$0xff] %vm1294_vm9, %v1259_v61 }
 0x192   : > { %v1148_v62 = vpop.permute.xlu1 %1147 }
 0x193   : > { %1181 = vst.msk [vmem:[#allocation3 + $0x78] sm:$0xff] %vm1165_vm8, %v1148_v62 }
 0x194   : > { %v1261_v63 = vpop.permute.xlu0 %1260 }
 0x195   : > { %1302 = vst.msk [vmem:[#allocation3 + $0x38] sm:$0xff] %vm1294_vm9, %v1261_v63 }
 0x196   : > { %v1275_v0 = vpop.permute.xlu1 %1274 }
 0x197   : > { %1309 = vst.msk [vmem:[#allocation3 + $0x70] sm:$0xff] %vm1294_vm9, %v1275_v0 }
 0x198   : > { %v1388_v1 = vpop.permute.xlu0 %1387 }
 0x199   : > { %1430 = vst.msk [vmem:[#allocation3 + $0x30] sm:$0xff] %vm1423_vm10, %v1388_v1 }
 0x19a   : > { %v1277_v2 = vpop.permute.xlu1 %1276 }
 0x19b   : > { %1310 = vst.msk [vmem:[#allocation3 + $0x78] sm:$0xff] %vm1294_vm9, %v1277_v2 }
 0x19c   : > { %v1390_v3 = vpop.permute.xlu0 %1389 }
 0x19d   : > { %1431 = vst.msk [vmem:[#allocation3 + $0x38] sm:$0xff] %vm1423_vm10, %v1390_v3 }
 0x19e   : > { %v1404_v4 = vpop.permute.xlu1 %1403 }
 0x19f   : > { %1438 = vst.msk [vmem:[#allocation3 + $0x70] sm:$0xff] %vm1423_vm10, %v1404_v4 }
 0x1a0   : > { %v1446_v5 = vld [vmem:[#allocation3 + $0x30] sm:$0xff] }
 0x1a1   : > { %1965 = vmatprep.mubr.msk.bf16.mxu0 %vm1483_vm11, %v1446_v5 }
 0x1a2   : > { %v1406_v6 = vpop.permute.xlu1 %1405 }
 0x1a3   : > { %1439 = vst.msk [vmem:[#allocation3 + $0x78] sm:$0xff] %vm1423_vm10, %v1406_v6 }
 0x1a4   : > { %v1447_v7 = vld [vmem:[#allocation3 + $0x38] sm:$0xff] }
 0x1a5   : > { %1966 = vmatmul.mubr.msk.bf16.gmra.mrb[12].mxu0 %vm1483_vm11, %v1447_v7 }
 0x1a6   : > { %v1454_v8 = vld [vmem:[#allocation3 + $0x70] sm:$0xff] }
 0x1a7   : > { %1981 = vmatprep.mubr.msk.bf16.mxu1 %vm1483_vm11, %v1454_v8 }
 0x1aa   : > { %v1455_v9 = vld [vmem:[#allocation3 + $0x78] sm:$0xff] }
 0x1ab   : > { %1982 = vmatmul.mubr.msk.bf16.gmra.mrb[12].mxu1 %vm1483_vm11, %v1455_v9 }
 0x1bc   : > { %v1955_v12 = vpop.f32.mrb[0].mxu0 }
 0x1bd   : > { %v1579_v13 = vadd.f32 %v1955_v12, %v2734_v11  ;;  %v1570_v15 = vpop.f32.mrb[1].mxu0 }
 0x1be   : > { %v1571_v16 = vadd.f32 %v2734_v11, %v1570_v15  ;;  %v1956_v17 = vpop.f32.mrb[2].mxu0 }
 0x1bf   : > { %v1699_v18 = vmax.f32 %v1579_v13, 0.0  ;;  %v1582_v10 = vadd.f32 %v1956_v17, %v2734_v11  ;;  %v1573_v52 = vpop.f32.mrb[3].mxu0 }
 0x1c0   : > { %v1697_v19 = vmax.f32 %v1571_v16, 0.0  ;;  %v1574_v21 = vadd.f32 %v2734_v11, %v1573_v52 }
 0x1c1   : > { %1731 = vst.msk [vmem:[%s2741_s11 + $0x10] sm:$0xff] %vm172_vm0, %v1699_v18  ;;  %v1700_v22 = vmax.f32 %v1582_v10, 0.0 }
 0x1c2   : > { %1729 = vst.msk [vmem:[%s2741_s11] sm:$0xff] %vm172_vm0, %v1697_v19  ;;  %v1698_v23 = vmax.f32 %v1574_v21, 0.0  ;;  %v1971_v24 = vpop.f32.mrb[0].mxu1 }
 0x1c3   : > { %1732 = vst.msk [vmem:[%s2741_s11 + $0x18] sm:$0xff] %vm172_vm0, %v1700_v22  ;;  %v1643_v14 = vadd.f32 %v1971_v24, %v2734_v11  ;;  %v1634_v57 = vpop.f32.mrb[1].mxu1 }
 0x1c4   : > { %1730 = vst.msk [vmem:[%s2741_s11 + $0x8] sm:$0xff] %vm172_vm0, %v1698_v23  ;;  %v1635_v25 = vadd.f32 %v2734_v11, %v1634_v57  ;;  %v1972_v26 = vpop.f32.mrb[2].mxu1 }
 0x1c5   : > { %v1715_v27 = vmax.f32 %v1643_v14, 0.0  ;;  %v1646_v28 = vadd.f32 %v1972_v26, %v2734_v11  ;;  %v1637_v29 = vpop.f32.mrb[3].mxu1 }
 0x1c6   : > { %v1713_v30 = vmax.f32 %v1635_v25, 0.0  ;;  %v1638_v31 = vadd.f32 %v2734_v11, %v1637_v29 }
 0x1c7   : > { %1747 = vst.msk [vmem:[%s2741_s11 + $0x90] sm:$0xff] %vm172_vm0, %v1715_v27  ;;  %v1716_v32 = vmax.f32 %v1646_v28, 0.0 }
 0x1c8   : > { %1745 = vst.msk [vmem:[%s2741_s11 + $0x80] sm:$0xff] %vm172_vm0, %v1713_v30  ;;  %v1714_v33 = vmax.f32 %v1638_v31, 0.0 }
 0x1c9   : > { %1748 = vst.msk [vmem:[%s2741_s11 + $0x98] sm:$0xff] %vm172_vm0, %v1716_v32 }
 0x1ca   : > { %1746 = vst.msk [vmem:[%s2741_s11 + $0x88] sm:$0xff] %vm172_vm0, %v1714_v33 }
 0x1fc   : > { %v1959_v34 = vpop.f32.mrb[4].mxu0 }
 0x1fd   : > { %v1595_v35 = vadd.f32 %v1959_v34, %v2734_v11  ;;  %v1586_v36 = vpop.f32.mrb[5].mxu0 }
 0x1fe   : > { %v1587_v37 = vadd.f32 %v2734_v11, %v1586_v36  ;;  %v1960_v38 = vpop.f32.mrb[6].mxu0 }
 0x1ff   : > { %v1703_v39 = vmax.f32 %v1595_v35, 0.0  ;;  %v1598_v40 = vadd.f32 %v1960_v38, %v2734_v11  ;;  %v1589_v42 = vpop.f32.mrb[7].mxu0 }
 0x200   : > { %v1701_v44 = vmax.f32 %v1587_v37, 0.0  ;;  %v1590_v41 = vadd.f32 %v2734_v11, %v1589_v42 }
 0x201   : > { %1735 = vst.msk [vmem:[%s2741_s11 + $0x30] sm:$0xff] %vm172_vm0, %v1703_v39  ;;  %v1704_v45 = vmax.f32 %v1598_v40, 0.0 }
 0x202   : > { %1733 = vst.msk [vmem:[%s2741_s11 + $0x20] sm:$0xff] %vm172_vm0, %v1701_v44  ;;  %v1702_v46 = vmax.f32 %v1590_v41, 0.0  ;;  %v1975_v47 = vpop.f32.mrb[4].mxu1 }
 0x203   : > { %1736 = vst.msk [vmem:[%s2741_s11 + $0x38] sm:$0xff] %vm172_vm0, %v1704_v45  ;;  %v1659_v43 = vadd.f32 %v1975_v47, %v2734_v11  ;;  %v1650_v20 = vpop.f32.mrb[5].mxu1 }
 0x204   : > { %1734 = vst.msk [vmem:[%s2741_s11 + $0x28] sm:$0xff] %vm172_vm0, %v1702_v46  ;;  %v1651_v48 = vadd.f32 %v2734_v11, %v1650_v20  ;;  %v1976_v49 = vpop.f32.mrb[6].mxu1 }
 0x205   : > { %v1719_v50 = vmax.f32 %v1659_v43, 0.0  ;;  %v1662_v51 = vadd.f32 %v1976_v49, %v2734_v11  ;;  %v1653_v53 = vpop.f32.mrb[7].mxu1 }
 0x206   : > { %v1717_v54 = vmax.f32 %v1651_v48, 0.0  ;;  %v1654_v55 = vadd.f32 %v2734_v11, %v1653_v53 }
 0x207   : > { %1751 = vst.msk [vmem:[%s2741_s11 + $0xb0] sm:$0xff] %vm172_vm0, %v1719_v50  ;;  %v1720_v56 = vmax.f32 %v1662_v51, 0.0 }
 0x208   : > { %1749 = vst.msk [vmem:[%s2741_s11 + $0xa0] sm:$0xff] %vm172_vm0, %v1717_v54  ;;  %v1718_v58 = vmax.f32 %v1654_v55, 0.0 }
 0x209   : > { %1752 = vst.msk [vmem:[%s2741_s11 + $0xb8] sm:$0xff] %vm172_vm0, %v1720_v56 }
 0x20a   : > { %1750 = vst.msk [vmem:[%s2741_s11 + $0xa8] sm:$0xff] %vm172_vm0, %v1718_v58 }
 0x23c   : > { %v1963_v59 = vpop.f32.mrb[8].mxu0 }
 0x23d   : > { %v1611_v60 = vadd.f32 %v1963_v59, %v2734_v11  ;;  %v1602_v61 = vpop.f32.mrb[9].mxu0 }
 0x23e   : > { %v1603_v62 = vadd.f32 %v2734_v11, %v1602_v61  ;;  %v1964_v63 = vpop.f32.mrb[10].mxu0 }
 0x23f   : > { %v1707_v0 = vmax.f32 %v1611_v60, 0.0  ;;  %v1614_v1 = vadd.f32 %v1964_v63, %v2734_v11  ;;  %v1605_v2 = vpop.f32.mrb[11].mxu0 }
 0x240   : > { %v1705_v3 = vmax.f32 %v1603_v62, 0.0  ;;  %v1606_v4 = vadd.f32 %v2734_v11, %v1605_v2 }
 0x241   : > { %1739 = vst.msk [vmem:[%s2741_s11 + $0x50] sm:$0xff] %vm172_vm0, %v1707_v0  ;;  %v1708_v5 = vmax.f32 %v1614_v1, 0.0 }
 0x242   : > { %1737 = vst.msk [vmem:[%s2741_s11 + $0x40] sm:$0xff] %vm172_vm0, %v1705_v3  ;;  %v1706_v6 = vmax.f32 %v1606_v4, 0.0  ;;  %v1979_v7 = vpop.f32.mrb[8].mxu1 }
 0x243   : > { %1740 = vst.msk [vmem:[%s2741_s11 + $0x58] sm:$0xff] %vm172_vm0, %v1708_v5  ;;  %v1675_v8 = vadd.f32 %v1979_v7, %v2734_v11  ;;  %v1666_v9 = vpop.f32.mrb[9].mxu1 }
 0x244   : > { %1738 = vst.msk [vmem:[%s2741_s11 + $0x48] sm:$0xff] %vm172_vm0, %v1706_v6  ;;  %v1667_v12 = vadd.f32 %v2734_v11, %v1666_v9  ;;  %v1980_v13 = vpop.f32.mrb[10].mxu1 }
 0x245   : > { %v1723_v15 = vmax.f32 %v1675_v8, 0.0  ;;  %v1678_v16 = vadd.f32 %v1980_v13, %v2734_v11  ;;  %v1669_v17 = vpop.f32.mrb[11].mxu1 }
 0x246   : > { %v1721_v18 = vmax.f32 %v1667_v12, 0.0  ;;  %v1670_v10 = vadd.f32 %v2734_v11, %v1669_v17 }
 0x247   : > { %1755 = vst.msk [vmem:[%s2741_s11 + $0xd0] sm:$0xff] %vm172_vm0, %v1723_v15  ;;  %v1724_v52 = vmax.f32 %v1678_v16, 0.0 }
 0x248   : > { %1753 = vst.msk [vmem:[%s2741_s11 + $0xc0] sm:$0xff] %vm172_vm0, %v1721_v18  ;;  %v1722_v19 = vmax.f32 %v1670_v10, 0.0 }
 0x249   : > { %1756 = vst.msk [vmem:[%s2741_s11 + $0xd8] sm:$0xff] %vm172_vm0, %v1724_v52 }
 0x24a   : > { %1754 = vst.msk [vmem:[%s2741_s11 + $0xc8] sm:$0xff] %vm172_vm0, %v1722_v19 }
 0x278   : > { %v1967_v21 = vpop.f32.mrb[12].mxu0 }
 0x279   : > { %v1627_v22 = vadd.f32 %v1967_v21, %v2734_v11  ;;  %v1618_v23 = vpop.f32.mrb[13].mxu0 }
 0x27a   : > { %v1619_v24 = vadd.f32 %v2734_v11, %v1618_v23  ;;  %v1968_v14 = vpop.f32.mrb[14].mxu0 }
 0x27b   : > { %v1711_v57 = vmax.f32 %v1627_v22, 0.0  ;;  %v1630_v25 = vadd.f32 %v1968_v14, %v2734_v11  ;;  %v1621_v26 = vpop.f32.mrb[15].mxu0 }
 0x27c   : > { %v1709_v27 = vmax.f32 %v1619_v24, 0.0  ;;  %v1622_v28 = vadd.f32 %v2734_v11, %v1621_v26 }
 0x27d   : > { %1743 = vst.msk [vmem:[%s2741_s11 + $0x70] sm:$0xff] %vm172_vm0, %v1711_v57  ;;  %v1712_v29 = vmax.f32 %v1630_v25, 0.0 }
 0x27e   : > { %1741 = vst.msk [vmem:[%s2741_s11 + $0x60] sm:$0xff] %vm172_vm0, %v1709_v27  ;;  %v1710_v30 = vmax.f32 %v1622_v28, 0.0  ;;  %v1983_v31 = vpop.f32.mrb[12].mxu1 }
 0x27f   : > { %1744 = vst.msk [vmem:[%s2741_s11 + $0x78] sm:$0xff] %vm172_vm0, %v1712_v29  ;;  %v1691_v32 = vadd.f32 %v1983_v31, %v2734_v11  ;;  %v1682_v33 = vpop.f32.mrb[13].mxu1 }
 0x280   : > { %1742 = vst.msk [vmem:[%s2741_s11 + $0x68] sm:$0xff] %vm172_vm0, %v1710_v30  ;;  %v1683_v34 = vadd.f32 %v2734_v11, %v1682_v33  ;;  %v1984_v35 = vpop.f32.mrb[14].mxu1 }
 0x281   : > { %v1727_v36 = vmax.f32 %v1691_v32, 0.0  ;;  %v1694_v37 = vadd.f32 %v1984_v35, %v2734_v11  ;;  %v1685_v38 = vpop.f32.mrb[15].mxu1 }
 0x282   : > { %v1725_v39 = vmax.f32 %v1683_v34, 0.0  ;;  %v1686_v40 = vadd.f32 %v2734_v11, %v1685_v38 }
 0x283   : > { %1759 = vst.msk [vmem:[%s2741_s11 + $0xf0] sm:$0xff] %vm172_vm0, %v1727_v36  ;;  %v1728_v42 = vmax.f32 %v1694_v37, 0.0 }
 0x284   : > { %1757 = vst.msk [vmem:[%s2741_s11 + $0xe0] sm:$0xff] %vm172_vm0, %v1725_v39  ;;  %v1726_v44 = vmax.f32 %v1686_v40, 0.0 }
 0x285   : > { %1760 = vst.msk [vmem:[%s2741_s11 + $0xf8] sm:$0xff] %vm172_vm0, %v1728_v42 }
 0x286   : > { %1758 = vst.msk [vmem:[%s2741_s11 + $0xe8] sm:$0xff] %vm172_vm0, %v1726_v44 }
 0x287 PF: > { %s13_s12 = sadd.s32 1, %s2019_s12  }
 0x288   : > { %p10_p4 = scmp.ge.s32.totalorder %s13_s12, 4  }
 0x28a   :  { %12 = sbr.rel (!%p10_p4) target bundleno = 1 (0x1), region = 64 }

// kernel: detect_module_forward.4
= control target key start
LH: loop header
LB: loop body
LE: loop exit
PB: predicated region body
PF: predicated region fallthrough
CT: control target
= control target key end

     0   :  { %s2422_s15 = smov 0   ;;  %s3307_s0 = inlined_call_operand.vmem [shape: bf16[2,16,16,4], index: 0, kind: input, shape index: {}]   ;;  %s3308_s1 = inlined_call_operand.vmem [shape: bf16[36,8], index: 1, kind: input, shape index: {}]   ;;  %s3309_s2 = inlined_call_operand.vmem [shape: f32[1,8], index: 2, kind: input, shape index: {}]   ;;  %s3310_s3 = inlined_call_operand.vmem [shape: f32[2,16,16,4], index: 3, kind: output, shape index: {0}]   ;;  %s3311_s4 = inlined_call_operand.vmem [shape: bf16[2,16,16,4], index: 4, kind: output, shape index: {1}]  }
   0x1 LB: > { %s2114_s16 = sadd.s32 4294967295, %s2385_s15   ;;  %p2118_p0 = scmp.ge.s32.totalorder %s2385_s15, 1  ;;  %s2385_s15 = sphi %s2422_s15, %s15_s15  }
   0x2   : > { %p165_p1 = scmp.lt.s32.totalorder %s2385_s15, 3 }
   0x4   : > { %p166_p2 = pnand %p2118_p0, %p165_p1 }
   0x5   : > { %vm212_vm0 = vcmask (!%p166_p2), 31744   ;;  %vm216_vm1 = vcmask (!%p166_p2), 24576   ;;  %v2387_v0 = vmov (!%p166_p2), 0.0   ;;  %p196_p3 = scmp.lt.s32.totalorder (!%p166_p2), %s2114_s16, 1  ;;  %s2388_s21 = smov (!%p166_p2), 4   ;;  %vm1572_vm2 = vcmask (!%p166_p2), 1041408  }
   0x6   : > { %169 = sbr.rel (%p166_p2) target bundleno = 769 (0x301), region = 32  ;;  %214 = vst.msk [vmem:[#allocation2 + $0x8] sm:$0xff] (!%p166_p2), %vm212_vm0, %v2387_v0  ;;  %215 = vst.msk [vmem:[#allocation2 + $0x10] sm:$0xff] (!%p166_p2), %vm212_vm0, %v2387_v0  ;;  %s2389_s22 = smov (!%p166_p2), 8   ;;  %vm559_vm3 = vcmask (!%p166_p2), 64544   ;;  %vm688_vm4 = vcmask (!%p166_p2), 97344  }
   0x7   : > { %213 = vst.msk [vmem:[#allocation2] sm:$0xff] (!%p166_p2), %vm212_vm0, %v2387_v0  ;;  %218 = vst.msk [vmem:[#allocation2 + $0x20] sm:$0xff] (!%p166_p2), %vm212_vm0, %v2387_v0  ;;  %s2390_s23 = smov (!%p166_p2), 12   ;;  %s2391_s24 = smov (!%p166_p2), 16   ;;  %vm817_vm5 = vcmask (!%p166_p2), 130144   ;;  %vm946_vm6 = vcmask (!%p166_p2), 162944  }
   0x8   : > { %219 = vst.msk [vmem:[#allocation2 + $0x28] sm:$0xff] (!%p166_p2), %vm212_vm0, %v2387_v0  ;;  %220 = vst.msk [vmem:[#allocation2 + $0x30] sm:$0xff] (!%p166_p2), %vm212_vm0, %v2387_v0  ;;  %s2392_s25 = smov (!%p166_p2), 20   ;;  %s2393_s26 = smov (!%p166_p2), 24   ;;  %vm1075_vm7 = vcmask (!%p166_p2), 195744   ;;  %vm1205_vm8 = vcmask (!%p166_p2), 228544  }
   0x9   : > { %222 = vst.msk [vmem:[#allocation2 + $0x40] sm:$0xff] (!%p166_p2), %vm212_vm0, %v2387_v0  ;;  %223 = vst.msk [vmem:[#allocation2 + $0x48] sm:$0xff] (!%p166_p2), %vm212_vm0, %v2387_v0  ;;  %s2394_s29 = smov (!%p166_p2), 28   ;;  %s2395_s8 = smov (!%p166_p2), 32   ;;  %vm1334_vm9 = vcmask (!%p166_p2), 261344   ;;  %vm1463_vm10 = vcmask (!%p166_p2), 294144  }
   0xa   : > { %224 = vst.msk [vmem:[#allocation2 + $0x50] sm:$0xff] (!%p166_p2), %vm212_vm0, %v2387_v0  ;;  %226 = vst.msk [vmem:[#allocation2 + $0x60] sm:$0xff] (!%p166_p2), %vm212_vm0, %v2387_v0  ;;  %vm1523_vm11 = vcmask (!%p166_p2), 293888   ;;  %s2396_s18 = smov (!%p166_p2), 124   ;;  %vm1993_vm12 = vcmask (!%p166_p2), 27648  }
   0xb   : > { %227 = vst.msk [vmem:[#allocation2 + $0x68] sm:$0xff] (!%p166_p2), %vm212_vm0, %v2387_v0  ;;  %228 = vst.msk [vmem:[#allocation2 + $0x70] sm:$0xff] (!%p166_p2), %vm212_vm0, %v2387_v0 }
   0xc   : > { %230 = vst.msk [vmem:[#allocation2 + $0x80] sm:$0xff] (!%p166_p2), %vm212_vm0, %v2387_v0  ;;  %231 = vst.msk [vmem:[#allocation2 + $0x88] sm:$0xff] (!%p166_p2), %vm212_vm0, %v2387_v0 }
   0xd   : > { %232 = vst.msk [vmem:[#allocation2 + $0x90] sm:$0xff] %vm212_vm0, %v2387_v0  ;;  %234 = vst.msk [vmem:[#allocation2 + $0xa0] sm:$0xff] %vm212_vm0, %v2387_v0  ;;  %s3313_s16 = smov (!%p196_p3, %s2114_s16), 1  ;;  %v447_v4 = vld [vmem:[#allocation2 + $0x8] sm:$0xff]  ;;  %v448_v5 = vld [vmem:[#allocation2 + $0x10] sm:$0xff] }
   0xe   : > { %235 = vst.msk [vmem:[#allocation2 + $0xa8] sm:$0xff] %vm212_vm0, %v2387_v0  ;;  %236 = vst.msk [vmem:[#allocation2 + $0xb0] sm:$0xff] %vm212_vm0, %v2387_v0  ;;  %s2179_s17 = sshll.u32 %s3313_s16, 7  ;;  %v576_v6 = vld [vmem:[#allocation2 + $0x9] sm:$0xff]  ;;  %v479_v11 = vpack.c.bf16 %v448_v5, %v447_v4  ;;  %s2180_s11 = sshll.u32 %s3313_s16, 8 }
   0xf   : > { %238 = vst.msk [vmem:[#allocation2 + $0xc0] sm:$0xff] %vm212_vm0, %v2387_v0  ;;  %239 = vst.msk [vmem:[#allocation2 + $0xc8] sm:$0xff] %vm212_vm0, %v2387_v0  ;;  %s2586_s20 = scalar_lea.vmem %s3307_s0, %s2179_s17  ;;  %v383_v30 = vld [vmem:[#allocation2 + $0x7] sm:$0xff]  ;;  %v384_v35 = vld [vmem:[#allocation2 + $0xf] sm:$0xff]  ;;  %s3104_s14 = scalar_lea.vmem %s3310_s3, %s2180_s11 }
  0x10   : > { %240 = vst.msk [vmem:[#allocation2 + $0xd0] sm:$0xff] %vm212_vm0, %v2387_v0  ;;  %242 = vst.msk [vmem:[#allocation2 + $0xe0] sm:$0xff] %vm212_vm0, %v2387_v0  ;;  %v2284_v1 = vld [vmem:[%s2586_s20 + $0x38] sm:$0xff]   ;;  %v2215_v2 = vld [vmem:[%s2586_s20] sm:$0xff]   ;;  %511 = vrot.lane.b32.xlu0 %v479_v11, %s2388_s21  ;;  %v415_v40 = vpack.c.bf16 %v384_v35, %v383_v30 }
  0x11   : > { %243 = vst.msk [vmem:[#allocation2 + $0xe8] sm:$0xff] %vm212_vm0, %v2387_v0  ;;  %244 = vst.msk [vmem:[#allocation2 + $0xf0] sm:$0xff] %vm212_vm0, %v2387_v0  ;;  %v2285_v3 = vld [vmem:[%s2586_s20 + $0x40] sm:$0xff]   ;;  %v2244_v7 = vunpack.c.l.bf16 %v2284_v1  ;;  %v2245_v8 = vunpack.c.h.bf16 %v2284_v1  ;;  %v2216_v9 = vunpack.c.l.bf16 %v2215_v2  ;;  %v2217_v10 = vunpack.c.h.bf16 %v2215_v2  ;;  %v2278_v15 = vld [vmem:[%s2586_s20 + $0x8] sm:$0xff]  }
  0x12   : > { %246 = vst.msk [vmem:[#allocation2 + $0x100] sm:$0xff] %vm212_vm0, %v2387_v0  ;;  %247 = vst.msk [vmem:[#allocation2 + $0x108] sm:$0xff] %vm212_vm0, %v2387_v0  ;;  %v2248_v13 = vunpack.c.l.bf16 %v2285_v3  ;;  %v2249_v14 = vunpack.c.h.bf16 %v2285_v3  ;;  %v2286_v16 = vld [vmem:[%s2586_s20 + $0x48] sm:$0xff]   ;;  %v2220_v18 = vunpack.c.l.bf16 %v2278_v15  ;;  %v2221_v19 = vunpack.c.h.bf16 %v2278_v15  ;;  %v2279_v21 = vld [vmem:[%s2586_s20 + $0x10] sm:$0xff]  }
  0x13   : > { %248 = vst.msk [vmem:[#allocation2 + $0x110] sm:$0xff] %vm212_vm0, %v2387_v0  ;;  %250 = vst.msk [vmem:[#allocation2 + $0x120] sm:$0xff] %vm212_vm0, %v2387_v0  ;;  %v2252_v20 = vunpack.c.l.bf16 %v2286_v16  ;;  %v2287_v22 = vld [vmem:[%s2586_s20 + $0x50] sm:$0xff]   ;;  %v2280_v23 = vld [vmem:[%s2586_s20 + $0x18] sm:$0xff]   ;;  %v2253_v24 = vunpack.c.h.bf16 %v2286_v16  ;;  %v2224_v25 = vunpack.c.l.bf16 %v2279_v21  ;;  %v2225_v26 = vunpack.c.h.bf16 %v2279_v21 }
  0x14   : > { %251 = vst.msk [vmem:[#allocation2 + $0x128] sm:$0xff] %vm212_vm0, %v2387_v0  ;;  %252 = vst.msk [vmem:[#allocation2 + $0x130] sm:$0xff] %vm212_vm0, %v2387_v0  ;;  %v2256_v27 = vunpack.c.l.bf16 %v2287_v22  ;;  %v2288_v28 = vld [vmem:[%s2586_s20 + $0x58] sm:$0xff]   ;;  %v2281_v29 = vld [vmem:[%s2586_s20 + $0x20] sm:$0xff]   ;;  %v2257_v31 = vunpack.c.h.bf16 %v2287_v22  ;;  %v2228_v32 = vunpack.c.l.bf16 %v2280_v23  ;;  %v2229_v33 = vunpack.c.h.bf16 %v2280_v23 }
  0x15   : > { %254 = vst.msk [vmem:[#allocation2 + $0x140] sm:$0xff] %vm212_vm0, %v2387_v0  ;;  %255 = vst.msk [vmem:[#allocation2 + $0x148] sm:$0xff] %vm212_vm0, %v2387_v0  ;;  %v2260_v34 = vunpack.c.l.bf16 %v2288_v28  ;;  %v2289_v36 = vld [vmem:[%s2586_s20 + $0x60] sm:$0xff]   ;;  %v2261_v37 = vunpack.c.h.bf16 %v2288_v28  ;;  %v2232_v38 = vunpack.c.l.bf16 %v2281_v29  ;;  %v2233_v39 = vunpack.c.h.bf16 %v2281_v29  ;;  %v2282_v21 = vld [vmem:[%s2586_s20 + $0x28] sm:$0xff]  }
  0x16   : > { %256 = vst.msk [vmem:[#allocation2 + $0x150] sm:$0xff] %vm212_vm0, %v2387_v0  ;;  %258 = vst.msk [vmem:[#allocation2 + $0x160] sm:$0xff] %vm212_vm0, %v2387_v0  ;;  %v2264_v41 = vunpack.c.l.bf16 %v2289_v36  ;;  %v2265_v42 = vunpack.c.h.bf16 %v2289_v36  ;;  %v2290_v22 = vld [vmem:[%s2586_s20 + $0x68] sm:$0xff]   ;;  %v2236_v23 = vunpack.c.l.bf16 %v2282_v21 }
  0x17   : > { %259 = vst.msk [vmem:[#allocation2 + $0x168] sm:$0xff] %vm212_vm0, %v2387_v0  ;;  %260 = vst.msk [vmem:[#allocation2 + $0x170] sm:$0xff] %vm212_vm0, %v2387_v0 }
  0x18   : > { %262 = vst.msk [vmem:[#allocation2 + $0x180] sm:$0xff] %vm212_vm0, %v2387_v0  ;;  %263 = vst.msk [vmem:[#allocation2 + $0x188] sm:$0xff] %vm212_vm0, %v2387_v0 }
  0x19   : > { %264 = vst.msk [vmem:[#allocation2 + $0x190] sm:$0xff] %vm212_vm0, %v2387_v0  ;;  %266 = vst.msk [vmem:[#allocation2 + $0x1a0] sm:$0xff] %vm212_vm0, %v2387_v0 }
  0x1a   : > { %267 = vst.msk [vmem:[#allocation2 + $0x1a8] sm:$0xff] %vm212_vm0, %v2387_v0  ;;  %268 = vst.msk [vmem:[#allocation2 + $0x1b0] sm:$0xff] %vm212_vm0, %v2387_v0 }
  0x1b   : > { %270 = vst.msk [vmem:[#allocation2 + $0x1c0] sm:$0xff] %vm212_vm0, %v2387_v0  ;;  %271 = vst.msk [vmem:[#allocation2 + $0x1c8] sm:$0xff] %vm212_vm0, %v2387_v0 }
  0x1c   : > { %272 = vst.msk [vmem:[#allocation2 + $0x1d0] sm:$0xff] %vm212_vm0, %v2387_v0  ;;  %274 = vst.msk [vmem:[#allocation2 + $0x1e0] sm:$0xff] %vm212_vm0, %v2387_v0 }
  0x1d   : > { %275 = vst.msk [vmem:[#allocation2 + $0x1e8] sm:$0xff] %vm212_vm0, %v2387_v0  ;;  %276 = vst.msk [vmem:[#allocation2 + $0x1f0] sm:$0xff] %vm212_vm0, %v2387_v0 }
  0x1e   : > { %278 = vst.msk [vmem:[#allocation2 + $0x200] sm:$0xff] %vm212_vm0, %v2387_v0  ;;  %279 = vst.msk [vmem:[#allocation2 + $0x208] sm:$0xff] %vm212_vm0, %v2387_v0 }
  0x1f   : > { %280 = vst.msk [vmem:[#allocation2 + $0x210] sm:$0xff] %vm212_vm0, %v2387_v0  ;;  %282 = vst.msk [vmem:[#allocation2 + $0x220] sm:$0xff] %vm212_vm0, %v2387_v0 }
  0x20   : > { %283 = vst.msk [vmem:[#allocation2 + $0x228] sm:$0xff] %vm212_vm0, %v2387_v0  ;;  %284 = vst.msk [vmem:[#allocation2 + $0x230] sm:$0xff] %vm212_vm0, %v2387_v0 }
  0x21   : > { %217 = vst.msk [vmem:[#allocation2 + $0x18] sm:$0x1] %vm216_vm1, %v2387_v0  ;;  %221 = vst.msk [vmem:[#allocation2 + $0x38] sm:$0x1] %vm216_vm1, %v2387_v0 }
  0x22   : > { %225 = vst.msk [vmem:[#allocation2 + $0x58] sm:$0x1] %vm216_vm1, %v2387_v0  ;;  %229 = vst.msk [vmem:[#allocation2 + $0x78] sm:$0x1] %vm216_vm1, %v2387_v0 }
  0x23   : > { %233 = vst.msk [vmem:[#allocation2 + $0x98] sm:$0x1] %vm216_vm1, %v2387_v0  ;;  %237 = vst.msk [vmem:[#allocation2 + $0xb8] sm:$0x1] %vm216_vm1, %v2387_v0 }
  0x24   : > { %241 = vst.msk [vmem:[#allocation2 + $0xd8] sm:$0x1] %vm216_vm1, %v2387_v0  ;;  %245 = vst.msk [vmem:[#allocation2 + $0xf8] sm:$0x1] %vm216_vm1, %v2387_v0 }
  0x25   : > { %249 = vst.msk [vmem:[#allocation2 + $0x118] sm:$0x1] %vm216_vm1, %v2387_v0  ;;  %253 = vst.msk [vmem:[#allocation2 + $0x138] sm:$0x1] %vm216_vm1, %v2387_v0 }
  0x26   : > { %257 = vst.msk [vmem:[#allocation2 + $0x158] sm:$0x1] %vm216_vm1, %v2387_v0  ;;  %261 = vst.msk [vmem:[#allocation2 + $0x178] sm:$0x1] %vm216_vm1, %v2387_v0 }
  0x27   : > { %265 = vst.msk [vmem:[#allocation2 + $0x198] sm:$0x1] %vm216_vm1, %v2387_v0  ;;  %269 = vst.msk [vmem:[#allocation2 + $0x1b8] sm:$0x1] %vm216_vm1, %v2387_v0 }
  0x28   : > { %273 = vst.msk [vmem:[#allocation2 + $0x1d8] sm:$0x1] %vm216_vm1, %v2387_v0  ;;  %277 = vst.msk [vmem:[#allocation2 + $0x1f8] sm:$0x1] %vm216_vm1, %v2387_v0  ;;  %v577_v12 = vld [vmem:[#allocation2 + $0x11] sm:$0xff] }
  0x29   : > { %281 = vst.msk [vmem:[#allocation2 + $0x218] sm:$0x1] %vm216_vm1, %v2387_v0  ;;  %285 = vst.msk [vmem:[#allocation2 + $0x238] sm:$0x1] %vm216_vm1, %v2387_v0  ;;  %v608_v17 = vpack.c.bf16 %v577_v12, %v576_v6 }
  0x2a   : > { %365 = vst.msk [vmem:[#allocation2 + $0x108] sm:$0xff] %vm212_vm0, %v2244_v7  ;;  %366 = vst.msk [vmem:[#allocation2 + $0x110] sm:$0xff] %vm212_vm0, %v2245_v8 }
  0x2b   : > { %351 = vst.msk [vmem:[#allocation2 + $0x28] sm:$0xff] %vm212_vm0, %v2216_v9  ;;  %352 = vst.msk [vmem:[#allocation2 + $0x30] sm:$0xff] %vm212_vm0, %v2217_v10  ;;  %640 = vrot.lane.b32.xlu0 %v608_v17, %s2389_s22 }
  0x2c   : > { %367 = vst.msk [vmem:[#allocation2 + $0x128] sm:$0xff] %vm212_vm0, %v2248_v13  ;;  %368 = vst.msk [vmem:[#allocation2 + $0x130] sm:$0xff] %vm212_vm0, %v2249_v14 }
  0x2d   : > { %353 = vst.msk [vmem:[#allocation2 + $0x48] sm:$0xff] %vm212_vm0, %v2220_v18  ;;  %354 = vst.msk [vmem:[#allocation2 + $0x50] sm:$0xff] %vm212_vm0, %v2221_v19 }
  0x2e   : > { %369 = vst.msk [vmem:[#allocation2 + $0x148] sm:$0xff] %vm212_vm0, %v2252_v20  ;;  %370 = vst.msk [vmem:[#allocation2 + $0x150] sm:$0xff] %vm212_vm0, %v2253_v24  ;;  %v2237_v24 = vunpack.c.h.bf16 %v2282_v21 }
  0x2f   : > { %355 = vst.msk [vmem:[#allocation2 + $0x68] sm:$0xff] %vm212_vm0, %v2224_v25  ;;  %356 = vst.msk [vmem:[#allocation2 + $0x70] sm:$0xff] %vm212_vm0, %v2225_v26  ;;  %v2268_v25 = vunpack.c.l.bf16 %v2290_v22  ;;  %v2269_v26 = vunpack.c.h.bf16 %v2290_v22 }
  0x30   : > { %371 = vst.msk [vmem:[#allocation2 + $0x168] sm:$0xff] %vm212_vm0, %v2256_v27  ;;  %372 = vst.msk [vmem:[#allocation2 + $0x170] sm:$0xff] %vm212_vm0, %v2257_v31 }
  0x31   : > { %357 = vst.msk [vmem:[#allocation2 + $0x88] sm:$0xff] %vm212_vm0, %v2228_v32  ;;  %358 = vst.msk [vmem:[#allocation2 + $0x90] sm:$0xff] %vm212_vm0, %v2229_v33  ;;  %v463_v43 = vld [vmem:[#allocation2 + $0x108] sm:$0xff]  ;;  %v464_v44 = vld [vmem:[#allocation2 + $0x110] sm:$0xff] }
  0x32   : > { %373 = vst.msk [vmem:[#allocation2 + $0x188] sm:$0xff] %vm212_vm0, %v2260_v34  ;;  %374 = vst.msk [vmem:[#allocation2 + $0x190] sm:$0xff] %vm212_vm0, %v2261_v37  ;;  %v449_v45 = vld [vmem:[#allocation2 + $0x28] sm:$0xff]  ;;  %v487_v46 = vpack.c.bf16 %v464_v44, %v463_v43  ;;  %v450_v47 = vld [vmem:[#allocation2 + $0x30] sm:$0xff] }
  0x33   : > { %359 = vst.msk [vmem:[#allocation2 + $0xa8] sm:$0xff] %vm212_vm0, %v2232_v38  ;;  %360 = vst.msk [vmem:[#allocation2 + $0xb0] sm:$0xff] %vm212_vm0, %v2233_v39  ;;  %v578_v48 = vld [vmem:[#allocation2 + $0x29] sm:$0xff]  ;;  %v579_v49 = vld [vmem:[#allocation2 + $0x31] sm:$0xff]  ;;  %v480_v50 = vpack.c.bf16 %v450_v47, %v449_v45 }
  0x34   : > { %431 = vst.msk [vmem:[#allocation3] sm:$0xff] %vm212_vm0, %v415_v40  ;;  %375 = vst.msk [vmem:[#allocation2 + $0x1a8] sm:$0xff] %vm212_vm0, %v2264_v41  ;;  %v465_v51 = vld [vmem:[#allocation2 + $0x128] sm:$0xff]  ;;  %v466_v52 = vld [vmem:[#allocation2 + $0x130] sm:$0xff]  ;;  %527 = vrot.lane.b32.xlu0 %v487_v46, %s2388_s21  ;;  %v2625_v54 = vpack.c.bf16 %v579_v49, %v578_v48 }
  0x35   : > { %376 = vst.msk [vmem:[#allocation2 + $0x1b0] sm:$0xff] %vm212_vm0, %v2265_v42  ;;  %v705_v53 = vld [vmem:[#allocation2 + $0x27] sm:$0xff]  ;;  %v706_v55 = vld [vmem:[#allocation2 + $0x2f] sm:$0xff]  ;;  %513 = vrot.lane.b32.xlu1 %v480_v50, %s2388_s21  ;;  %v2628_v56 = vpack.c.bf16 %v466_v52, %v465_v51  ;;  %361 = vst.msk [vmem:[#allocation2 + $0xc8] sm:$0xff] %vm212_vm0, %v2236_v23 }
  0x36   : > { %v737_v57 = vpack.c.bf16 %v706_v55, %v705_v53  ;;  %v592_v58 = vld [vmem:[#allocation2 + $0x109] sm:$0xff]  ;;  %v593_v61 = vld [vmem:[#allocation2 + $0x111] sm:$0xff]  ;;  %362 = vst.msk [vmem:[#allocation2 + $0xd0] sm:$0xff] %vm212_vm0, %v2237_v24  ;;  %377 = vst.msk [vmem:[#allocation2 + $0x1c8] sm:$0xff] %vm212_vm0, %v2268_v25 }
  0x37   : > { %v707_v59 = vld [vmem:[#allocation2 + $0x47] sm:$0xff]  ;;  %v708_v60 = vld [vmem:[#allocation2 + $0x4f] sm:$0xff]  ;;  %v616_v4 = vpack.c.bf16 %v593_v61, %v592_v58  ;;  %378 = vst.msk [vmem:[#allocation2 + $0x1d0] sm:$0xff] %vm212_vm0, %v2269_v26 }
  0x38   : > { %v2630_v62 = vpack.c.bf16 %v708_v60, %v707_v59  ;;  %v721_v63 = vld [vmem:[#allocation2 + $0x127] sm:$0xff]  ;;  %v722_v0 = vld [vmem:[#allocation2 + $0x12f] sm:$0xff]  ;;  %432 = vst.msk [vmem:[#allocation3 + $0x8] sm:$0xff] %vm212_vm0, %v737_v57  ;;  %642 = vrot.lane.b32.xlu0 %v2625_v54, %s2389_s22 }
  0x39   : > { %v745_v1 = vpack.c.bf16 %v722_v0, %v721_v63  ;;  %v723_v2 = vld [vmem:[#allocation2 + $0x147] sm:$0xff]  ;;  %v724_v3 = vld [vmem:[#allocation2 + $0x14f] sm:$0xff]  ;;  %529 = vrot.lane.b32.xlu1 %v2628_v56, %s2388_s21 }
  0x3a   : > { %433 = vst.msk [vmem:[#allocation3 + $0x10] sm:$0xff] %vm212_vm0, %v2630_v62  ;;  %v2639_v5 = vpack.c.bf16 %v724_v3, %v723_v2  ;;  %v1095_v6 = vld [vmem:[#allocation2 + $0x67] sm:$0xff]  ;;  %v595_v8 = vld [vmem:[#allocation2 + $0x131] sm:$0xff]  ;;  %v2378_v61 = vld [vmem:[%s3308_s1 + $0x10] ss:$0 sps:$4 sm:$0x33]  }
  0x3b   : > { %440 = vst.msk [vmem:[#allocation3 + $0x48] sm:$0xff] %vm212_vm0, %v745_v1  ;;  %v594_v7 = vld [vmem:[#allocation2 + $0x129] sm:$0xff]  ;;  %v966_v28 = vld [vmem:[#allocation2 + $0x51] sm:$0xff]  ;;  %v2376_v53 = vld [vmem:[%s3308_s1] sm:$0xff]  }
  0x3c   : > { %v1096_v9 = vld [vmem:[#allocation2 + $0x6f] sm:$0xff]  ;;  %v1111_v11 = vld [vmem:[#allocation2 + $0x167] sm:$0xff]  ;;  %441 = vst.msk [vmem:[#allocation3 + $0x50] sm:$0xff] %vm212_vm0, %v2639_v5  ;;  %769 = vrot.lane.b32.xlu0 %v737_v57, %s2390_s23  ;;  %v617_v13 = vpack.c.bf16 %v595_v8, %v594_v7  ;;  %2312 = vmatprep.subr.bf16.mxu0 %v2376_v53 }
  0x3d   : > { %v2642_v10 = vpack.c.bf16 %v1096_v9, %v1095_v6  ;;  %v1112_v12 = vld [vmem:[#allocation2 + $0x16f] sm:$0xff]  ;;  %656 = vrot.lane.b32.xlu1 %v616_v4, %s2389_s22  ;;  %v399_v18 = vld [vmem:[#allocation2 + $0x107] sm:$0xff]  ;;  %2313 = vmatpush3.bf16.msra.mxu0 %v2376_v53  ;;  %v2292_v9 = vld [vmem:[%s2586_s20 + $0x78] sm:$0xff]  }
  0x3e   : > { %v2648_v14 = vpack.c.bf16 %v1112_v12, %v1111_v11  ;;  %v836_v15 = vld [vmem:[#allocation2 + $0x48] sm:$0xff]  ;;  %v837_v16 = vld [vmem:[#allocation2 + $0x50] sm:$0xff]  ;;  %2350 = vmatprep.subr.bf16.mxu1 %v2376_v53  ;;  %v2276_v11 = vunpack.c.l.bf16 %v2292_v9  ;;  %v2277_v12 = vunpack.c.h.bf16 %v2292_v9 }
  0x3f   : > { %434 = vst.msk [vmem:[#allocation3 + $0x18] sm:$0xff] %vm212_vm0, %v2642_v10  ;;  %v2658_v17 = vpack.c.bf16 %v837_v16, %v836_v15  ;;  %v400_v19 = vld [vmem:[#allocation2 + $0x10f] sm:$0xff]  ;;  %v715_v37 = vld [vmem:[#allocation2 + $0xc7] sm:$0xff]  ;;  %2353 = vmatpush3.bf16.msra.mxu1 %v2376_v53 }
  0x40   : > { %442 = vst.msk [vmem:[#allocation3 + $0x58] sm:$0xff] %vm212_vm0, %v2648_v14  ;;  %771 = vrot.lane.b32.xlu0 %v2630_v62, %s2390_s23  ;;  %v2661_v20 = vpack.c.bf16 %v400_v19, %v399_v18  ;;  %v965_v27 = vld [vmem:[#allocation2 + $0x49] sm:$0xff]  ;;  %v982_v39 = vld [vmem:[#allocation2 + $0x151] sm:$0xff]  ;;  %381 = vst.msk [vmem:[#allocation2 + $0x208] sm:$0xff] %vm212_vm0, %v2276_v11 }
  0x41   : > { %658 = vrot.lane.b32.xlu1 %v617_v13, %s2389_s22  ;;  %v852_v29 = vld [vmem:[#allocation2 + $0x148] sm:$0xff]  ;;  %v853_v30 = vld [vmem:[#allocation2 + $0x150] sm:$0xff]  ;;  %v2677_v31 = vpack.c.bf16 %v966_v28, %v965_v27  ;;  %382 = vst.msk [vmem:[#allocation2 + $0x210] sm:$0xff] %vm212_vm0, %v2277_v12 }
  0x42   : > { %439 = vst.msk [vmem:[#allocation3 + $0x40] sm:$0xff] %vm212_vm0, %v2661_v20  ;;  %v2283_v32 = vld [vmem:[%s2586_s20 + $0x30] sm:$0xff]   ;;  %v2682_v33 = vpack.c.bf16 %v853_v30, %v852_v29  ;;  %v731_v41 = vld [vmem:[#allocation2 + $0x1c7] sm:$0xff] }
  0x43   : > { %v2240_v34 = vunpack.c.l.bf16 %v2283_v32  ;;  %v2241_v35 = vunpack.c.h.bf16 %v2283_v32  ;;  %v981_v36 = vld [vmem:[#allocation2 + $0x149] sm:$0xff]  ;;  %v1370_v4 = vld [vmem:[#allocation2 + $0x171] sm:$0xff] }
  0x44   : > { %898 = vrot.lane.b32.xlu0 %v480_v50, %s2391_s24  ;;  %v716_v38 = vld [vmem:[#allocation2 + $0xcf] sm:$0xff]  ;;  %v2700_v45 = vpack.c.bf16 %v982_v39, %v981_v36  ;;  %v711_v6 = vld [vmem:[#allocation2 + $0x87] sm:$0xff] }
  0x45   : > { %785 = vrot.lane.b32.xlu1 %v745_v1, %s2390_s23  ;;  %363 = vst.msk [vmem:[#allocation2 + $0xe8] sm:$0xff] %vm212_vm0, %v2240_v34  ;;  %364 = vst.msk [vmem:[#allocation2 + $0xf0] sm:$0xff] %vm212_vm0, %v2241_v35  ;;  %v2690_v40 = vpack.c.bf16 %v716_v38, %v715_v37  ;;  %v732_v42 = vld [vmem:[#allocation2 + $0x1cf] sm:$0xff]  ;;  %v727_v16 = vld [vmem:[#allocation2 + $0x187] sm:$0xff] }
  0x46   : > { %v2692_v43 = vpack.c.bf16 %v732_v42, %v731_v41  ;;  %v2291_v44 = vld [vmem:[%s2586_s20 + $0x70] sm:$0xff]   ;;  %v1224_v51 = vld [vmem:[#allocation2 + $0x68] sm:$0xff] }
  0x47   : > { %437 = vst.msk [vmem:[#allocation3 + $0x30] sm:$0xff] %vm212_vm0, %v2690_v40  ;;  %v2272_v46 = vunpack.c.l.bf16 %v2291_v44  ;;  %v2273_v47 = vunpack.c.h.bf16 %v2291_v44  ;;  %v1225_v52 = vld [vmem:[#allocation2 + $0x70] sm:$0xff]  ;;  %v2377_v55 = vld [vmem:[%s3308_s1 + $0x8] sm:$0xff]  }
  0x48   : > { %900 = vrot.lane.b32.xlu0 %v2658_v17, %s2391_s24  ;;  %445 = vst.msk [vmem:[#allocation3 + $0x70] sm:$0xff] %vm212_vm0, %v2692_v43  ;;  %2314 = vmatprep.subr.bf16.mxu0 %v2377_v55  ;;  %v1240_v59 = vld [vmem:[#allocation2 + $0x168] sm:$0xff]  ;;  %v1241_v60 = vld [vmem:[#allocation2 + $0x170] sm:$0xff] }
  0x49   : > { %787 = vrot.lane.b32.xlu1 %v2639_v5, %s2390_s23  ;;  %379 = vst.msk [vmem:[#allocation2 + $0x1e8] sm:$0xff] %vm212_vm0, %v2272_v46  ;;  %380 = vst.msk [vmem:[#allocation2 + $0x1f0] sm:$0xff] %vm212_vm0, %v2273_v47  ;;  %2315 = vmatpush3.bf16.msra.mxu0 %v2377_v55  ;;  %v1263_v63 = vpack.c.bf16 %v1241_v60, %v1240_v59  ;;  %v1353_v0 = vld [vmem:[#allocation2 + $0x69] sm:$0xff]  ;;  %v1354_v1 = vld [vmem:[#allocation2 + $0x71] sm:$0xff] }
  0x4a   : > { %2351 = vmatprep.subr.bf16.mxu1 %v2377_v55  ;;  %2356 = vmatprep.subr.msk.bf16.mxu0 %vm1572_vm2, %v2378_v61  ;;  %v1384_v2 = vpack.c.bf16 %v1354_v1, %v1353_v0  ;;  %v1369_v3 = vld [vmem:[#allocation2 + $0x169] sm:$0xff]  ;;  %v970_v21 = vld [vmem:[#allocation2 + $0x91] sm:$0xff] }
  0x4b   : > { %2354 = vmatpush3.bf16.msra.mxu1 %v2377_v55  ;;  %v712_v7 = vld [vmem:[#allocation2 + $0x8f] sm:$0xff]  ;;  %v1115_v35 = vld [vmem:[#allocation2 + $0x1a7] sm:$0xff] }
  0x4c   : > { %1027 = vrot.lane.b32.xlu0 %v2625_v54, %s2392_s25  ;;  %v1103_v48 = vld [vmem:[#allocation2 + $0xe7] sm:$0xff]  ;;  %v1104_v49 = vld [vmem:[#allocation2 + $0xef] sm:$0xff]  ;;  %v1255_v54 = vpack.c.bf16 %v1225_v52, %v1224_v51  ;;  %2357 = vmatprep.subr.msk.bf16.mxu1 %vm1572_vm2, %v2378_v61  ;;  %v740_v8 = vpack.c.bf16 %v712_v7, %v711_v6 }
  0x4d   : > { %914 = vrot.lane.b32.xlu1 %v2628_v56, %s2391_s24  ;;  %v2704_v50 = vpack.c.bf16 %v1104_v49, %v1103_v48  ;;  %v841_v15 = vld [vmem:[#allocation2 + $0x90] sm:$0xff]  ;;  %v856_v22 = vld [vmem:[#allocation2 + $0x188] sm:$0xff] }
  0x4e   : > { %v969_v19 = vld [vmem:[#allocation2 + $0x89] sm:$0xff]  ;;  %v986_v28 = vld [vmem:[#allocation2 + $0x191] sm:$0xff] }
  0x4f   : > { %438 = vst.msk [vmem:[#allocation3 + $0x38] sm:$0xff] %vm212_vm0, %v2704_v50  ;;  %v857_v23 = vld [vmem:[#allocation2 + $0x190] sm:$0xff]  ;;  %v2770_v24 = vpack.c.bf16 %v970_v21, %v969_v19  ;;  %v407_v42 = vld [vmem:[#allocation2 + $0x187] sm:$0xff] }
  0x50   : > { %1029 = vrot.lane.b32.xlu0 %v2677_v31, %s2392_s25  ;;  %v1119_v56 = vld [vmem:[#allocation2 + $0x1e7] sm:$0xff]  ;;  %v1120_v57 = vld [vmem:[#allocation2 + $0x1ef] sm:$0xff]  ;;  %v2773_v25 = vpack.c.bf16 %v857_v23, %v856_v22 }
  0x51   : > { %916 = vrot.lane.b32.xlu1 %v2682_v33, %s2391_s24  ;;  %v2725_v58 = vpack.c.bf16 %v1120_v57, %v1119_v56  ;;  %v1100_v26 = vld [vmem:[#allocation2 + $0xaf] sm:$0xff]  ;;  %v393_v46 = vld [vmem:[#allocation2 + $0xa7] sm:$0xff] }
  0x52   : > { %v985_v27 = vld [vmem:[#allocation2 + $0x189] sm:$0xff]  ;;  %v1358_v55 = vld [vmem:[#allocation2 + $0xb1] sm:$0xff] }
  0x53   : > { %446 = vst.msk [vmem:[#allocation3 + $0x78] sm:$0xff] %vm212_vm0, %v2725_v58  ;;  %v2783_v30 = vpack.c.bf16 %v986_v28, %v985_v27  ;;  %v1229_v32 = vld [vmem:[#allocation2 + $0xb0] sm:$0xff]  ;;  %v1244_v49 = vld [vmem:[#allocation2 + $0x1a8] sm:$0xff] }
  0x54   : > { %1157 = vrot.lane.b32.xlu0 %v2630_v62, %s2393_s26  ;;  %v1574_v62 = vsel %vm1572_vm2, %v2378_v61, 0  ;;  %v392_v34 = vld [vmem:[#allocation2 + $0x8f] sm:$0xff]  ;;  %v409_v60 = vld [vmem:[#allocation2 + $0x1a7] sm:$0xff] }
  0x55   : > { %1043 = vrot.lane.b32.xlu1 %v617_v13, %s2392_s25  ;;  %2317 = vmatpush3.bf16.msra.mxu0 %v1574_v62  ;;  %v840_v13 = vld [vmem:[#allocation2 + $0x88] sm:$0xff]  ;;  %v1245_v51 = vld [vmem:[#allocation2 + $0x1b0] sm:$0xff] }
  0x56   : > { %2355 = vmatpush3.bf16.msra.mxu1 %v1574_v62  ;;  %v1116_v36 = vld [vmem:[#allocation2 + $0x1af] sm:$0xff]  ;;  %v2809_v53 = vpack.c.bf16 %v1245_v51, %v1244_v49 }
  0x57   : > { %v2795_v41 = vpack.c.bf16 %v1116_v36, %v1115_v35  ;;  %v408_v44 = vld [vmem:[#allocation2 + $0x18f] sm:$0xff] }
  0x58   : > { %1159 = vrot.lane.b32.xlu0 %v2642_v10, %s2393_s26  ;;  %v394_v47 = vld [vmem:[#allocation2 + $0xaf] sm:$0xff]  ;;  %v427_v48 = vpack.c.bf16 %v408_v44, %v407_v42 }
  0x59   : > { %1045 = vrot.lane.b32.xlu1 %v2700_v45, %s2392_s25  ;;  %v420_v52 = vpack.c.bf16 %v394_v47, %v393_v46  ;;  %v410_v61 = vld [vmem:[#allocation2 + $0x1af] sm:$0xff] }
  0x5a   : > { %443 = vst.msk [vmem:[#allocation3 + $0x60] sm:$0xff] %vm212_vm0, %v427_v48  ;;  %v428_v62 = vpack.c.bf16 %v410_v61, %v409_v60  ;;  %v973_v23 = vld [vmem:[#allocation2 + $0xc9] sm:$0xff] }
  0x5b   : > { %436 = vst.msk [vmem:[#allocation3 + $0x28] sm:$0xff] %vm212_vm0, %v420_v52  ;;  %v1248_v49 = vld [vmem:[#allocation2 + $0x1e8] sm:$0xff]  ;;  %v1249_v51 = vld [vmem:[#allocation2 + $0x1f0] sm:$0xff] }
  0x5c   : > { %1286 = vrot.lane.b32.xlu0 %v2658_v17, %s2394_s29  ;;  %444 = vst.msk [vmem:[#allocation3 + $0x68] sm:$0xff] %vm212_vm0, %v428_v62  ;;  %v2923_v52 = vpack.c.bf16 %v1249_v51, %v1248_v49 }
  0x5d   : > { %1173 = vrot.lane.b32.xlu1 %v2639_v5, %s2393_s26  ;;  %v1392_v5 = vpack.c.bf16 %v1370_v4, %v1369_v3  ;;  %v1374_v3 = vld [vmem:[#allocation2 + $0x1b1] sm:$0xff] }
  0x60   : > { %1288 = vrot.lane.b32.xlu0 %v1255_v54, %s2394_s29 }
  0x61   : > { %1175 = vrot.lane.b32.xlu1 %v2648_v14, %s2393_s26 }
  0x64   : > { %1415 = vrot.lane.b32.xlu0 %v2677_v31, %s2395_s8 }
  0x65   : > { %1302 = vrot.lane.b32.xlu1 %v2682_v33, %s2394_s29 }
  0x68   : > { %515 = vrot.lane.b32.xlu0 %v2658_v17, %s2388_s21  ;;  %v728_v17 = vld [vmem:[#allocation2 + $0x18f] sm:$0xff] }
  0x69   : > { %1304 = vrot.lane.b32.xlu1 %v1263_v63, %s2394_s29  ;;  %v748_v18 = vpack.c.bf16 %v728_v17, %v727_v16  ;;  %v844_v16 = vld [vmem:[#allocation2 + $0xc8] sm:$0xff]  ;;  %v845_v17 = vld [vmem:[#allocation2 + $0xd0] sm:$0xff] }
  0x6a   : > { %v2862_v19 = vpack.c.bf16 %v845_v17, %v844_v16  ;;  %v849_v16 = vld [vmem:[#allocation2 + $0x110] sm:$0xff] }
  0x6c   : > { %1417 = vrot.lane.b32.xlu0 %v1384_v2, %s2395_s8 }
  0x6d   : > { %1431 = vrot.lane.b32.xlu1 %v2700_v45, %s2395_s8 }
  0x70   : > { %517 = vrot.lane.b32.xlu0 %v1255_v54, %s2388_s21 }
  0x71   : > { %531 = vrot.lane.b32.xlu1 %v2682_v33, %s2388_s21  ;;  %v391_v33 = vld [vmem:[#allocation2 + $0x87] sm:$0xff] }
  0x72   : > { %v419_v37 = vpack.c.bf16 %v392_v34, %v391_v33  ;;  %v989_v33 = vld [vmem:[#allocation2 + $0x1c9] sm:$0xff]  ;;  %v990_v34 = vld [vmem:[#allocation2 + $0x1d1] sm:$0xff] }
  0x73   : > { %v2894_v36 = vpack.c.bf16 %v990_v34, %v989_v33  ;;  %v1108_v33 = vld [vmem:[#allocation2 + $0x12f] sm:$0xff] }
  0x74   : > { %644 = vrot.lane.b32.xlu0 %v2677_v31, %s2389_s22  ;;  %v1228_v31 = vld [vmem:[#allocation2 + $0xa8] sm:$0xff]  ;;  %435 = vst.msk [vmem:[#allocation3 + $0x20] sm:$0xff] %vm212_vm0, %v419_v37 }
  0x75   : > { %1433 = vrot.lane.b32.xlu1 %v1392_v5, %s2395_s8  ;;  %v2791_v38 = vpack.c.bf16 %v1229_v32, %v1228_v31 }
  0x78   : > { %646 = vrot.lane.b32.xlu0 %v1384_v2, %s2389_s22 }
  0x79   : > { %533 = vrot.lane.b32.xlu1 %v1263_v63, %s2388_s21 }
  0x7c   : > { %773 = vrot.lane.b32.xlu0 %v2642_v10, %s2390_s23  ;;  %v2762_v10 = vpack.c.bf16 %v841_v15, %v840_v13 }
  0x7d   : > { %660 = vrot.lane.b32.xlu1 %v2700_v45, %s2389_s22 }
  0x80   : > { %775 = vrot.lane.b32.xlu0 %v740_v8, %s2390_s23 }
  0x81   : > { %662 = vrot.lane.b32.xlu1 %v1392_v5, %s2389_s22 }
  0x82   : > { %v512_v39 = vpop.permute.xlu0 %511 }
  0x83   : > { %560 = vst.msk [vmem:[#allocation3] sm:$0xff] %vm559_vm3, %v512_v39  ;;  %v1232_v39 = vld [vmem:[#allocation2 + $0xe8] sm:$0xff] }
  0x84   : > { %902 = vrot.lane.b32.xlu0 %v1255_v54, %s2391_s24  ;;  %v1357_v54 = vld [vmem:[#allocation2 + $0xa9] sm:$0xff] }
  0x85   : > { %789 = vrot.lane.b32.xlu1 %v2648_v14, %s2390_s23  ;;  %v1099_v14 = vld [vmem:[#allocation2 + $0xa7] sm:$0xff]  ;;  %v2815_v59 = vpack.c.bf16 %v1358_v55, %v1357_v54  ;;  %v1362_v54 = vld [vmem:[#allocation2 + $0xf1] sm:$0xff] }
  0x86   : > { %v2780_v29 = vpack.c.bf16 %v1100_v26, %v1099_v14  ;;  %v860_v14 = vld [vmem:[#allocation2 + $0x1c8] sm:$0xff]  ;;  %v861_v26 = vld [vmem:[#allocation2 + $0x1d0] sm:$0xff] }
  0x88   : > { %904 = vrot.lane.b32.xlu0 %v2762_v10, %s2391_s24 }
  0x89   : > { %791 = vrot.lane.b32.xlu1 %v748_v18, %s2390_s23 }
  0x8c   : > { %1031 = vrot.lane.b32.xlu0 %v1384_v2, %s2392_s25  ;;  %v1373_v2 = vld [vmem:[#allocation2 + $0x1a9] sm:$0xff] }
  0x8d   : > { %918 = vrot.lane.b32.xlu1 %v1263_v63, %s2391_s24 }
  0x90   : > { %1033 = vrot.lane.b32.xlu0 %v2770_v24, %s2392_s25 }
  0x91   : > { %920 = vrot.lane.b32.xlu1 %v2773_v25, %s2391_s24 }
  0x94   : > { %1161 = vrot.lane.b32.xlu0 %v740_v8, %s2393_s26 }
  0x95   : > { %1047 = vrot.lane.b32.xlu1 %v1392_v5, %s2392_s25  ;;  %v2832_v5 = vpack.c.bf16 %v1374_v3, %v1373_v2 }
  0x98   : > { %1163 = vrot.lane.b32.xlu0 %v2780_v29, %s2393_s26 }
  0x99   : > { %1049 = vrot.lane.b32.xlu1 %v2783_v30, %s2392_s25 }
  0x9c   : > { %1290 = vrot.lane.b32.xlu0 %v2762_v10, %s2394_s29 }
  0x9d   : > { %1177 = vrot.lane.b32.xlu1 %v748_v18, %s2393_s26  ;;  %v641_v45 = vpop.permute.xlu0 %640 }
  0x9e   : > { %689 = vst.msk [vmem:[#allocation3] sm:$0xff] %vm688_vm4, %v641_v45 }
  0xa0   : > { %1292 = vrot.lane.b32.xlu0 %v2791_v38, %s2394_s29 }
  0xa1   : > { %1179 = vrot.lane.b32.xlu1 %v2795_v41, %s2393_s26 }
  0xa4   : > { %1419 = vrot.lane.b32.xlu0 %v2770_v24, %s2395_s8 }
  0xa5   : > { %1306 = vrot.lane.b32.xlu1 %v2773_v25, %s2394_s29 }
  0xa6   : > { %v528_v56 = vpop.permute.xlu0 %527 }
  0xa7   : > { %568 = vst.msk [vmem:[#allocation3 + $0x40] sm:$0xff] %vm559_vm3, %v528_v56  ;;  %v514_v57 = vpop.permute.xlu1 %513 }
  0xa8   : > { %561 = vst.msk [vmem:[#allocation3 + $0x8] sm:$0xff] %vm559_vm3, %v514_v57  ;;  %519 = vrot.lane.b32.xlu0 %v2762_v10, %s2388_s21 }
  0xa9   : > { %1308 = vrot.lane.b32.xlu1 %v2809_v53, %s2394_s29 }
  0xaa   : > { %v643_v63 = vpop.permute.xlu0 %642 }
  0xab   : > { %690 = vst.msk [vmem:[#allocation3 + $0x8] sm:$0xff] %vm688_vm4, %v643_v63  ;;  %v530_v0 = vpop.permute.xlu1 %529 }
  0xac   : > { %569 = vst.msk [vmem:[#allocation3 + $0x48] sm:$0xff] %vm559_vm3, %v530_v0  ;;  %1421 = vrot.lane.b32.xlu0 %v2815_v59, %s2395_s8  ;;  %v1377_v0 = vld [vmem:[#allocation2 + $0x1e9] sm:$0xff] }
  0xad   : > { %1435 = vrot.lane.b32.xlu1 %v2783_v30, %s2395_s8 }
  0xae   : > { %v770_v1 = vpop.permute.xlu0 %769 }
  0xaf   : > { %818 = vst.msk [vmem:[#allocation3] sm:$0xff] %vm817_vm5, %v770_v1  ;;  %v657_v4 = vpop.permute.xlu1 %656  ;;  %v1378_v1 = vld [vmem:[#allocation2 + $0x1f1] sm:$0xff] }
  0xb0   : > { %697 = vst.msk [vmem:[#allocation3 + $0x40] sm:$0xff] %vm688_vm4, %v657_v4  ;;  %521 = vrot.lane.b32.xlu0 %v2791_v38, %s2388_s21  ;;  %v2948_v4 = vpack.c.bf16 %v1378_v1, %v1377_v0 }
  0xb1   : > { %535 = vrot.lane.b32.xlu1 %v2773_v25, %s2388_s21 }
  0xb2   : > { %v772_v6 = vpop.permute.xlu0 %771 }
  0xb3   : > { %819 = vst.msk [vmem:[#allocation3 + $0x8] sm:$0xff] %vm817_vm5, %v772_v6  ;;  %v659_v7 = vpop.permute.xlu1 %658 }
  0xb4   : > { %698 = vst.msk [vmem:[#allocation3 + $0x48] sm:$0xff] %vm688_vm4, %v659_v7  ;;  %648 = vrot.lane.b32.xlu0 %v2770_v24, %s2389_s22  ;;  %v974_v24 = vld [vmem:[#allocation2 + $0xd1] sm:$0xff] }
  0xb5   : > { %1437 = vrot.lane.b32.xlu1 %v2832_v5, %s2395_s8  ;;  %v2876_v28 = vpack.c.bf16 %v974_v24, %v973_v23  ;;  %v977_v24 = vld [vmem:[#allocation2 + $0x109] sm:$0xff] }
  0xb6   : > { %v899_v8 = vpop.permute.xlu0 %898 }
  0xb7   : > { %947 = vst.msk [vmem:[#allocation3] sm:$0xff] %vm946_vm6, %v899_v8  ;;  %v786_v9 = vpop.permute.xlu1 %785 }
  0xb8   : > { %826 = vst.msk [vmem:[#allocation3 + $0x40] sm:$0xff] %vm817_vm5, %v786_v9  ;;  %650 = vrot.lane.b32.xlu0 %v2815_v59, %s2389_s22 }
  0xb9   : > { %537 = vrot.lane.b32.xlu1 %v2809_v53, %s2388_s21 }
  0xba   : > { %v901_v11 = vpop.permute.xlu0 %900 }
  0xbb   : > { %948 = vst.msk [vmem:[#allocation3 + $0x8] sm:$0xff] %vm946_vm6, %v901_v11  ;;  %v788_v12 = vpop.permute.xlu1 %787 }
  0xbc   : > { %827 = vst.msk [vmem:[#allocation3 + $0x48] sm:$0xff] %vm817_vm5, %v788_v12  ;;  %777 = vrot.lane.b32.xlu0 %v2780_v29, %s2390_s23  ;;  %v2880_v29 = vpack.c.bf16 %v861_v26, %v860_v14  ;;  %v864_v26 = vld [vmem:[#allocation2 + $0x208] sm:$0xff] }
  0xbd   : > { %664 = vrot.lane.b32.xlu1 %v2783_v30, %s2389_s22 }
  0xbe   : > { %v1028_v13 = vpop.permute.xlu0 %1027 }
  0xbf   : > { %1076 = vst.msk [vmem:[#allocation3] sm:$0xff] %vm1075_vm7, %v1028_v13  ;;  %v915_v15 = vpop.permute.xlu1 %914 }
  0xc0   : > { %955 = vst.msk [vmem:[#allocation3 + $0x40] sm:$0xff] %vm946_vm6, %v915_v15  ;;  %779 = vrot.lane.b32.xlu0 %v2690_v40, %s2390_s23  ;;  %v848_v15 = vld [vmem:[#allocation2 + $0x108] sm:$0xff] }
  0xc1   : > { %666 = vrot.lane.b32.xlu1 %v2832_v5, %s2389_s22 }
  0xc2   : > { %v1030_v10 = vpop.permute.xlu0 %1029 }
  0xc3   : > { %1077 = vst.msk [vmem:[#allocation3 + $0x8] sm:$0xff] %vm1075_vm7, %v1030_v10  ;;  %v917_v18 = vpop.permute.xlu1 %916  ;;  %v735_v10 = vld [vmem:[#allocation2 + $0x207] sm:$0xff] }
  0xc4   : > { %956 = vst.msk [vmem:[#allocation3 + $0x48] sm:$0xff] %vm946_vm6, %v917_v18  ;;  %906 = vrot.lane.b32.xlu0 %v2791_v38, %s2391_s24 }
  0xc5   : > { %793 = vrot.lane.b32.xlu1 %v2795_v41, %s2390_s23 }
  0xc6   : > { %v1158_v21 = vpop.permute.xlu0 %1157 }
  0xc7   : > { %1206 = vst.msk [vmem:[#allocation3] sm:$0xff] %vm1205_vm8, %v1158_v21  ;;  %v1044_v22 = vpop.permute.xlu1 %1043 }
  0xc8   : > { %1084 = vst.msk [vmem:[#allocation3 + $0x40] sm:$0xff] %vm1075_vm7, %v1044_v22  ;;  %908 = vrot.lane.b32.xlu0 %v2862_v19, %s2391_s24 }
  0xc9   : > { %795 = vrot.lane.b32.xlu1 %v2692_v43, %s2390_s23 }
  0xca   : > { %v1160_v25 = vpop.permute.xlu0 %1159 }
  0xcb   : > { %1207 = vst.msk [vmem:[#allocation3 + $0x8] sm:$0xff] %vm1205_vm8, %v1160_v25  ;;  %v1046_v27 = vpop.permute.xlu1 %1045  ;;  %v978_v25 = vld [vmem:[#allocation2 + $0x111] sm:$0xff] }
  0xcc   : > { %1085 = vst.msk [vmem:[#allocation3 + $0x48] sm:$0xff] %vm1075_vm7, %v1046_v27  ;;  %1035 = vrot.lane.b32.xlu0 %v2815_v59, %s2392_s25  ;;  %v865_v27 = vld [vmem:[#allocation2 + $0x210] sm:$0xff] }
  0xcd   : > { %922 = vrot.lane.b32.xlu1 %v2809_v53, %s2391_s24  ;;  %v1361_v53 = vld [vmem:[#allocation2 + $0xe9] sm:$0xff] }
  0xce   : > { %v1287_v30 = vpop.permute.xlu0 %1286  ;;  %v2931_v60 = vpack.c.bf16 %v1362_v54, %v1361_v53  ;;  %v1365_v53 = vld [vmem:[#allocation2 + $0x129] sm:$0xff]  ;;  %v1366_v54 = vld [vmem:[#allocation2 + $0x131] sm:$0xff] }
  0xcf   : > { %1335 = vst.msk [vmem:[#allocation3] sm:$0xff] %vm1334_vm9, %v1287_v30  ;;  %v1174_v31 = vpop.permute.xlu1 %1173 }
  0xd0   : > { %1214 = vst.msk [vmem:[#allocation3 + $0x40] sm:$0xff] %vm1205_vm8, %v1174_v31  ;;  %1037 = vrot.lane.b32.xlu0 %v2876_v28, %s2392_s25 }
  0xd1   : > { %924 = vrot.lane.b32.xlu1 %v2880_v29, %s2391_s24 }
  0xd2   : > { %v1289_v32 = vpop.permute.xlu0 %1288 }
  0xd3   : > { %1336 = vst.msk [vmem:[#allocation3 + $0x8] sm:$0xff] %vm1334_vm9, %v1289_v32  ;;  %v1176_v35 = vpop.permute.xlu1 %1175  ;;  %v1107_v32 = vld [vmem:[#allocation2 + $0x127] sm:$0xff] }
  0xd4   : > { %1215 = vst.msk [vmem:[#allocation3 + $0x48] sm:$0xff] %vm1205_vm8, %v1176_v35  ;;  %1165 = vrot.lane.b32.xlu0 %v2690_v40, %s2393_s26  ;;  %v1233_v40 = vld [vmem:[#allocation2 + $0xf0] sm:$0xff] }
  0xd5   : > { %1051 = vrot.lane.b32.xlu1 %v2832_v5, %s2392_s25  ;;  %v2906_v44 = vpack.c.bf16 %v1233_v40, %v1232_v39  ;;  %v993_v35 = vld [vmem:[#allocation2 + $0x209] sm:$0xff] }
  0xd6   : > { %v1416_v37 = vpop.permute.xlu0 %1415 }
  0xd7   : > { %1464 = vst.msk [vmem:[#allocation3] sm:$0xff] %vm1463_vm10, %v1416_v37  ;;  %v1303_v38 = vpop.permute.xlu1 %1302 }
  0xd8   : > { %1343 = vst.msk [vmem:[#allocation3 + $0x40] sm:$0xff] %vm1334_vm9, %v1303_v38  ;;  %1167 = vrot.lane.b32.xlu0 %v2704_v50, %s2393_s26  ;;  %v1132_v38 = vpack.c.bf16 %v1108_v33, %v1107_v32 }
  0xd9   : > { %1053 = vrot.lane.b32.xlu1 %v2894_v36, %s2392_s25 }
  0xda   : > { %v516_v41 = vpop.permute.xlu0 %515 }
  0xdb   : > { %562 = vst.msk [vmem:[#allocation3 + $0x10] sm:$0xff] %vm559_vm3, %v516_v41  ;;  %v1305_v42 = vpop.permute.xlu1 %1304 }
  0xdc   : > { %1344 = vst.msk [vmem:[#allocation3 + $0x48] sm:$0xff] %vm1334_vm9, %v1305_v42  ;;  %1294 = vrot.lane.b32.xlu0 %v2862_v19, %s2394_s29  ;;  %v1236_v42 = vld [vmem:[#allocation2 + $0x128] sm:$0xff] }
  0xdd   : > { %1181 = vrot.lane.b32.xlu1 %v2692_v43, %s2393_s26 }
  0xde   : > { %v1418_v45 = vpop.permute.xlu0 %1417  ;;  %v1480_v46 = vld [vmem:[#allocation3] sm:$0xff] }
  0xdf   : > { %1465 = vst.msk [vmem:[#allocation3 + $0x8] sm:$0xff] %vm1463_vm10, %v1418_v45  ;;  %v1432_v47 = vpop.permute.xlu1 %1431  ;;  %2318 = vmatprep.mubr.msk.bf16.mxu0 %vm1523_vm11, %v1480_v46  ;;  %v1123_v46 = vld [vmem:[#allocation2 + $0x227] sm:$0xff] }
  0xe0   : > { %1472 = vst.msk [vmem:[#allocation3 + $0x40] sm:$0xff] %vm1463_vm10, %v1432_v47  ;;  %1296 = vrot.lane.b32.xlu0 %v2906_v44, %s2394_s29 }
  0xe1   : > { %1183 = vrot.lane.b32.xlu1 %v2725_v58, %s2393_s26 }
  0xe2   : > { %v518_v48 = vpop.permute.xlu0 %517 }
  0xe3   : > { %563 = vst.msk [vmem:[#allocation3 + $0x18] sm:$0xff] %vm559_vm3, %v518_v48  ;;  %v532_v43 = vpop.permute.xlu1 %531 }
  0xe4   : > { %570 = vst.msk [vmem:[#allocation3 + $0x50] sm:$0xff] %vm559_vm3, %v532_v43  ;;  %1423 = vrot.lane.b32.xlu0 %v2876_v28, %s2395_s8 }
  0xe5   : > { %1310 = vrot.lane.b32.xlu1 %v2880_v29, %s2394_s29 }
  0xe6   : > { %v645_v55 = vpop.permute.xlu0 %644  ;;  %v1481_v56 = vld [vmem:[#allocation3 + $0x8] sm:$0xff] }
  0xe7   : > { %691 = vst.msk [vmem:[#allocation3 + $0x10] sm:$0xff] %vm688_vm4, %v645_v55  ;;  %v1434_v57 = vpop.permute.xlu1 %1433  ;;  %2319 = vmatmul.mubr.msk.bf16.vlgmr.msra.gmra.mrb[0].mxu0 %vm1523_vm11, %v1481_v56  ;;  %v1488_v59 = vld [vmem:[#allocation3 + $0x40] sm:$0xff]  ;;  %v1252_v56 = vld [vmem:[#allocation2 + $0x228] sm:$0xff] }
  0xe8   : > { %1473 = vst.msk [vmem:[#allocation3 + $0x48] sm:$0xff] %vm1463_vm10, %v1434_v57  ;;  %2334 = vmatprep.mubr.msk.bf16.mxu1 %vm1523_vm11, %v1488_v59  ;;  %523 = vrot.lane.b32.xlu0 %v2862_v19, %s2388_s21  ;;  %v873_v19 = vpack.c.bf16 %v849_v16, %v848_v15  ;;  %v1253_v57 = vld [vmem:[#allocation2 + $0x230] sm:$0xff] }
  0xe9   : > { %1312 = vrot.lane.b32.xlu1 %v2923_v52, %s2394_s29 }
  0xea   : > { %v647_v61 = vpop.permute.xlu0 %646 }
  0xeb   : > { %692 = vst.msk [vmem:[#allocation3 + $0x18] sm:$0xff] %vm688_vm4, %v647_v61  ;;  %v534_v62 = vpop.permute.xlu1 %533  ;;  %v1269_v61 = vpack.c.bf16 %v1253_v57, %v1252_v56 }
  0xec   : > { %571 = vst.msk [vmem:[#allocation3 + $0x58] sm:$0xff] %vm559_vm3, %v534_v62  ;;  %1425 = vrot.lane.b32.xlu0 %v2931_v60, %s2395_s8 }
  0xed   : > { %1439 = vrot.lane.b32.xlu1 %v2894_v36, %s2395_s8 }
  0xee   : > { %v774_v63 = vpop.permute.xlu0 %773 }
  0xef   : > { %820 = vst.msk [vmem:[#allocation3 + $0x10] sm:$0xff] %vm817_vm5, %v774_v63  ;;  %v661_v2 = vpop.permute.xlu1 %660  ;;  %v1489_v3 = vld [vmem:[#allocation3 + $0x48] sm:$0xff] }
  0xf0   : > { %699 = vst.msk [vmem:[#allocation3 + $0x50] sm:$0xff] %vm688_vm4, %v661_v2  ;;  %2335 = vmatmul.mubr.msk.bf16.vlgmr.msra.gmra.mrb[0].mxu1 %vm1523_vm11, %v1489_v3  ;;  %525 = vrot.lane.b32.xlu0 %v2906_v44, %s2388_s21  ;;  %v1381_v3 = vld [vmem:[#allocation2 + $0x229] sm:$0xff] }
  0xf1   : > { %539 = vrot.lane.b32.xlu1 %v2880_v29, %s2388_s21  ;;  %v881_v29 = vpack.c.bf16 %v865_v27, %v864_v26 }
  0xf2   : > { %v776_v5 = vpop.permute.xlu0 %775 }
  0xf3   : > { %821 = vst.msk [vmem:[#allocation3 + $0x18] sm:$0xff] %vm817_vm5, %v776_v5  ;;  %v663_v6 = vpop.permute.xlu1 %662 }
  0xf4   : > { %700 = vst.msk [vmem:[#allocation3 + $0x58] sm:$0xff] %vm688_vm4, %v663_v6  ;;  %652 = vrot.lane.b32.xlu0 %v2876_v28, %s2389_s22 }
  0xf5   : > { %1441 = vrot.lane.b32.xlu1 %v2948_v4, %s2395_s8 }
  0xf6   : > { %v903_v7 = vpop.permute.xlu0 %902 }
  0xf7   : > { %949 = vst.msk [vmem:[#allocation3 + $0x10] sm:$0xff] %vm946_vm6, %v903_v7  ;;  %v790_v8 = vpop.permute.xlu1 %789 }
  0xf8   : > { %828 = vst.msk [vmem:[#allocation3 + $0x50] sm:$0xff] %vm817_vm5, %v790_v8  ;;  %654 = vrot.lane.b32.xlu0 %v2931_v60, %s2389_s22 }
  0xf9   : > { %541 = vrot.lane.b32.xlu1 %v2923_v52, %s2388_s21  ;;  %s3174_s21 = scalar_lea.vmem %s3311_s4, %s2179_s17 }
  0xfa   : > { %v905_v9 = vpop.permute.xlu0 %904 }
  0xfb   : > { %950 = vst.msk [vmem:[#allocation3 + $0x18] sm:$0xff] %vm946_vm6, %v905_v9  ;;  %v792_v11 = vpop.permute.xlu1 %791 }
  0xfc   : > { %829 = vst.msk [vmem:[#allocation3 + $0x58] sm:$0xff] %vm817_vm5, %v792_v11  ;;  %781 = vrot.lane.b32.xlu0 %v2704_v50, %s2390_s23  ;;  %v736_v50 = vld [vmem:[#allocation2 + $0x20f] sm:$0xff] }
  0xfd   : > { %668 = vrot.lane.b32.xlu1 %v2894_v36, %s2389_s22  ;;  %v752_v21 = vpack.c.bf16 %v736_v50, %v735_v10  ;;  %v994_v36 = vld [vmem:[#allocation2 + $0x211] sm:$0xff] }
  0xfe   : > { %v1032_v12 = vpop.permute.xlu0 %1031  ;;  %v1010_v39 = vpack.c.bf16 %v994_v36, %v993_v35 }
  0xff   : > { %1078 = vst.msk [vmem:[#allocation3 + $0x10] sm:$0xff] %vm1075_vm7, %v1032_v12  ;;  %v919_v13 = vpop.permute.xlu1 %918 }
 0x100   : > { %957 = vst.msk [vmem:[#allocation3 + $0x50] sm:$0xff] %vm946_vm6, %v919_v13  ;;  %783 = vrot.lane.b32.xlu0 %v2661_v20, %s2390_s23 }
 0x101   : > { %670 = vrot.lane.b32.xlu1 %v2948_v4, %s2389_s22 }
 0x102   : > { %v1034_v17 = vpop.permute.xlu0 %1033 }
 0x103   : > { %1079 = vst.msk [vmem:[#allocation3 + $0x18] sm:$0xff] %vm1075_vm7, %v1034_v17  ;;  %v921_v18 = vpop.permute.xlu1 %920 }
 0x104   : > { %958 = vst.msk [vmem:[#allocation3 + $0x58] sm:$0xff] %vm946_vm6, %v921_v18  ;;  %910 = vrot.lane.b32.xlu0 %v2906_v44, %s2391_s24  ;;  %v1237_v44 = vld [vmem:[#allocation2 + $0x130] sm:$0xff] }
 0x105   : > { %797 = vrot.lane.b32.xlu1 %v2725_v58, %s2390_s23  ;;  %v1002_v58 = vpack.c.bf16 %v978_v25, %v977_v24  ;;  %v1261_v48 = vpack.c.bf16 %v1237_v44, %v1236_v42 }
 0x106   : > { %v1162_v22 = vpop.permute.xlu0 %1161 }
 0x107   : > { %1208 = vst.msk [vmem:[#allocation3 + $0x10] sm:$0xff] %vm1205_vm8, %v1162_v22  ;;  %v1048_v23 = vpop.permute.xlu1 %1047 }
 0x108   : > { %1086 = vst.msk [vmem:[#allocation3 + $0x50] sm:$0xff] %vm1075_vm7, %v1048_v23  ;;  %912 = vrot.lane.b32.xlu0 %v873_v19, %s2391_s24 }
 0x109   : > { %799 = vrot.lane.b32.xlu1 %v752_v21, %s2390_s23 }
 0x10a   : > { %v1164_v14 = vpop.permute.xlu0 %1163 }
 0x10b   : > { %1209 = vst.msk [vmem:[#allocation3 + $0x18] sm:$0xff] %vm1205_vm8, %v1164_v14  ;;  %v1050_v28 = vpop.permute.xlu1 %1049 }
 0x10c   : > { %1087 = vst.msk [vmem:[#allocation3 + $0x58] sm:$0xff] %vm1075_vm7, %v1050_v28  ;;  %1039 = vrot.lane.b32.xlu0 %v2931_v60, %s2392_s25  ;;  %v1390_v60 = vpack.c.bf16 %v1366_v54, %v1365_v53 }
 0x10d   : > { %926 = vrot.lane.b32.xlu1 %v2923_v52, %s2391_s24 }
 0x10e   : > { %v1291_v30 = vpop.permute.xlu0 %1290 }
 0x10f   : > { %1337 = vst.msk [vmem:[#allocation3 + $0x10] sm:$0xff] %vm1334_vm9, %v1291_v30  ;;  %v1178_v31 = vpop.permute.xlu1 %1177 }
 0x110   : > { %1216 = vst.msk [vmem:[#allocation3 + $0x50] sm:$0xff] %vm1205_vm8, %v1178_v31  ;;  %1041 = vrot.lane.b32.xlu0 %v1002_v58, %s2392_s25 }
 0x111   : > { %928 = vrot.lane.b32.xlu1 %v881_v29, %s2391_s24 }
 0x112   : > { %v1293_v34 = vpop.permute.xlu0 %1292 }
 0x113   : > { %1338 = vst.msk [vmem:[#allocation3 + $0x18] sm:$0xff] %vm1334_vm9, %v1293_v34  ;;  %v1180_v37 = vpop.permute.xlu1 %1179 }
 0x114   : > { %1217 = vst.msk [vmem:[#allocation3 + $0x58] sm:$0xff] %vm1205_vm8, %v1180_v37  ;;  %1169 = vrot.lane.b32.xlu0 %v2661_v20, %s2393_s26  ;;  %v1124_v20 = vld [vmem:[#allocation2 + $0x22f] sm:$0xff] }
 0x115   : > { %1055 = vrot.lane.b32.xlu1 %v2948_v4, %s2392_s25  ;;  %v1140_v49 = vpack.c.bf16 %v1124_v20, %v1123_v46  ;;  %v1382_v4 = vld [vmem:[#allocation2 + $0x231] sm:$0xff] }
 0x116   : > { %v1420_v40 = vpop.permute.xlu0 %1419  ;;  %v1398_v6 = vpack.c.bf16 %v1382_v4, %v1381_v3 }
 0x117   : > { %1466 = vst.msk [vmem:[#allocation3 + $0x10] sm:$0xff] %vm1463_vm10, %v1420_v40  ;;  %v1307_v41 = vpop.permute.xlu1 %1306 }
 0x118   : > { %1345 = vst.msk [vmem:[#allocation3 + $0x50] sm:$0xff] %vm1334_vm9, %v1307_v41  ;;  %1171 = vrot.lane.b32.xlu0 %v1132_v38, %s2393_s26 }
 0x119   : > { %1057 = vrot.lane.b32.xlu1 %v1010_v39, %s2392_s25 }
 0x11a   : > { %v520_v45 = vpop.permute.xlu0 %519 }
 0x11b   : > { %564 = vst.msk [vmem:[#allocation3 + $0x20] sm:$0xff] %vm559_vm3, %v520_v45  ;;  %v1309_v47 = vpop.permute.xlu1 %1308 }
 0x11c   : > { %1346 = vst.msk [vmem:[#allocation3 + $0x58] sm:$0xff] %vm1334_vm9, %v1309_v47  ;;  %1298 = vrot.lane.b32.xlu0 %v873_v19, %s2394_s29 }
 0x11d   : > { %1185 = vrot.lane.b32.xlu1 %v752_v21, %s2393_s26 }
 0x11e   : > { %v1422_v51 = vpop.permute.xlu0 %1421  ;;  %v1482_v43 = vld [vmem:[#allocation3 + $0x10] sm:$0xff] }
 0x11f   : > { %1467 = vst.msk [vmem:[#allocation3 + $0x18] sm:$0xff] %vm1463_vm10, %v1422_v51  ;;  %v1436_v52 = vpop.permute.xlu1 %1435  ;;  %2322 = vmatprep.mubr.msk.bf16.mxu0 %vm1523_vm11, %v1482_v43 }
 0x120   : > { %1474 = vst.msk [vmem:[#allocation3 + $0x50] sm:$0xff] %vm1463_vm10, %v1436_v52  ;;  %1300 = vrot.lane.b32.xlu0 %v1261_v48, %s2394_s29 }
 0x121   : > { %1187 = vrot.lane.b32.xlu1 %v1140_v49, %s2393_s26 }
 0x122   : > { %v522_v55 = vpop.permute.xlu0 %521 }
 0x123   : > { %565 = vst.msk [vmem:[#allocation3 + $0x28] sm:$0xff] %vm559_vm3, %v522_v55  ;;  %v536_v59 = vpop.permute.xlu1 %535 }
 0x124   : > { %572 = vst.msk [vmem:[#allocation3 + $0x60] sm:$0xff] %vm559_vm3, %v536_v59  ;;  %1427 = vrot.lane.b32.xlu0 %v1002_v58, %s2395_s8 }
 0x125   : > { %1314 = vrot.lane.b32.xlu1 %v881_v29, %s2394_s29 }
 0x126   : > { %v649_v62 = vpop.permute.xlu0 %648  ;;  %v1483_v63 = vld [vmem:[#allocation3 + $0x18] sm:$0xff] }
 0x127   : > { %693 = vst.msk [vmem:[#allocation3 + $0x20] sm:$0xff] %vm688_vm4, %v649_v62  ;;  %v1438_v0 = vpop.permute.xlu1 %1437  ;;  %2323 = vmatmul.mubr.msk.bf16.gmra.mrb[4].mxu0 %vm1523_vm11, %v1483_v63  ;;  %v1490_v1 = vld [vmem:[#allocation3 + $0x50] sm:$0xff] }
 0x128   : > { %1475 = vst.msk [vmem:[#allocation3 + $0x58] sm:$0xff] %vm1463_vm10, %v1438_v0  ;;  %2338 = vmatprep.mubr.msk.bf16.mxu1 %vm1523_vm11, %v1490_v1  ;;  %1429 = vrot.lane.b32.xlu0 %v1390_v60, %s2395_s8 }
 0x129   : > { %1316 = vrot.lane.b32.xlu1 %v1269_v61, %s2394_s29 }
 0x12a   : > { %v651_v2 = vpop.permute.xlu0 %650 }
 0x12b   : > { %694 = vst.msk [vmem:[#allocation3 + $0x28] sm:$0xff] %vm688_vm4, %v651_v2  ;;  %v538_v5 = vpop.permute.xlu1 %537 }
 0x12c   : > { %573 = vst.msk [vmem:[#allocation3 + $0x68] sm:$0xff] %vm559_vm3, %v538_v5 }
 0x12d   : > { %1443 = vrot.lane.b32.xlu1 %v1010_v39, %s2395_s8 }
 0x12e   : > { %v778_v7 = vpop.permute.xlu0 %777 }
 0x12f   : > { %822 = vst.msk [vmem:[#allocation3 + $0x20] sm:$0xff] %vm817_vm5, %v778_v7  ;;  %v665_v8 = vpop.permute.xlu1 %664  ;;  %v1491_v9 = vld [vmem:[#allocation3 + $0x58] sm:$0xff] }
 0x130   : > { %701 = vst.msk [vmem:[#allocation3 + $0x60] sm:$0xff] %vm688_vm4, %v665_v8  ;;  %2339 = vmatmul.mubr.msk.bf16.gmra.mrb[4].mxu1 %vm1523_vm11, %v1491_v9 }
 0x131   : > { %1445 = vrot.lane.b32.xlu1 %v1398_v6, %s2395_s8 }
 0x132   : > { %v780_v11 = vpop.permute.xlu0 %779 }
 0x133   : > { %823 = vst.msk [vmem:[#allocation3 + $0x28] sm:$0xff] %vm817_vm5, %v780_v11  ;;  %v667_v12 = vpop.permute.xlu1 %666  ;;  %v3097_v11 = vld [vmem:[%s3309_s2] ss:$0 sm:$0xff] }
 0x134   : > { %702 = vst.msk [vmem:[#allocation3 + $0x68] sm:$0xff] %vm688_vm4, %v667_v12 }
 0x136   : > { %v907_v13 = vpop.permute.xlu0 %906 }
 0x137   : > { %951 = vst.msk [vmem:[#allocation3 + $0x20] sm:$0xff] %vm946_vm6, %v907_v13  ;;  %v794_v15 = vpop.permute.xlu1 %793 }
 0x138   : > { %830 = vst.msk [vmem:[#allocation3 + $0x60] sm:$0xff] %vm817_vm5, %v794_v15 }
 0x13a   : > { %v909_v16 = vpop.permute.xlu0 %908 }
 0x13b   : > { %952 = vst.msk [vmem:[#allocation3 + $0x28] sm:$0xff] %vm946_vm6, %v909_v16  ;;  %v796_v17 = vpop.permute.xlu1 %795 }
 0x13c   : > { %831 = vst.msk [vmem:[#allocation3 + $0x68] sm:$0xff] %vm817_vm5, %v796_v17 }
 0x13e   : > { %v1036_v10 = vpop.permute.xlu0 %1035 }
 0x13f   : > { %1080 = vst.msk [vmem:[#allocation3 + $0x20] sm:$0xff] %vm1075_vm7, %v1036_v10  ;;  %v923_v50 = vpop.permute.xlu1 %922 }
 0x140   : > { %959 = vst.msk [vmem:[#allocation3 + $0x60] sm:$0xff] %vm946_vm6, %v923_v50 }
 0x142   : > { %v1038_v18 = vpop.permute.xlu0 %1037 }
 0x143   : > { %1081 = vst.msk [vmem:[#allocation3 + $0x28] sm:$0xff] %vm1075_vm7, %v1038_v18  ;;  %v925_v19 = vpop.permute.xlu1 %924 }
 0x144   : > { %960 = vst.msk [vmem:[#allocation3 + $0x68] sm:$0xff] %vm946_vm6, %v925_v19 }
 0x146   : > { %v1166_v21 = vpop.permute.xlu0 %1165 }
 0x147   : > { %1210 = vst.msk [vmem:[#allocation3 + $0x20] sm:$0xff] %vm1205_vm8, %v1166_v21  ;;  %v1052_v22 = vpop.permute.xlu1 %1051 }
 0x148   : > { %1088 = vst.msk [vmem:[#allocation3 + $0x60] sm:$0xff] %vm1075_vm7, %v1052_v22 }
 0x14a   : > { %v1168_v23 = vpop.permute.xlu0 %1167 }
 0x14b   : > { %1211 = vst.msk [vmem:[#allocation3 + $0x28] sm:$0xff] %vm1205_vm8, %v1168_v23  ;;  %v1054_v24 = vpop.permute.xlu1 %1053 }
 0x14c   : > { %1089 = vst.msk [vmem:[#allocation3 + $0x68] sm:$0xff] %vm1075_vm7, %v1054_v24 }
 0x14e   : > { %v1295_v25 = vpop.permute.xlu0 %1294 }
 0x14f   : > { %1339 = vst.msk [vmem:[#allocation3 + $0x20] sm:$0xff] %vm1334_vm9, %v1295_v25  ;;  %v1182_v14 = vpop.permute.xlu1 %1181 }
 0x150   : > { %1218 = vst.msk [vmem:[#allocation3 + $0x60] sm:$0xff] %vm1205_vm8, %v1182_v14 }
 0x152   : > { %v1297_v26 = vpop.permute.xlu0 %1296 }
 0x153   : > { %1340 = vst.msk [vmem:[#allocation3 + $0x28] sm:$0xff] %vm1334_vm9, %v1297_v26  ;;  %v1184_v27 = vpop.permute.xlu1 %1183 }
 0x154   : > { %1219 = vst.msk [vmem:[#allocation3 + $0x68] sm:$0xff] %vm1205_vm8, %v1184_v27 }
 0x156   : > { %v1424_v28 = vpop.permute.xlu0 %1423 }
 0x157   : > { %1468 = vst.msk [vmem:[#allocation3 + $0x20] sm:$0xff] %vm1463_vm10, %v1424_v28  ;;  %v1311_v58 = vpop.permute.xlu1 %1310 }
 0x158   : > { %1347 = vst.msk [vmem:[#allocation3 + $0x60] sm:$0xff] %vm1334_vm9, %v1311_v58 }
 0x15a   : > { %v524_v29 = vpop.permute.xlu0 %523 }
 0x15b   : > { %566 = vst.msk [vmem:[#allocation3 + $0x30] sm:$0xff] %vm559_vm3, %v524_v29  ;;  %v1313_v30 = vpop.permute.xlu1 %1312 }
 0x15c   : > { %1348 = vst.msk [vmem:[#allocation3 + $0x68] sm:$0xff] %vm1334_vm9, %v1313_v30 }
 0x15e   : > { %v1426_v31 = vpop.permute.xlu0 %1425  ;;  %v1484_v32 = vld [vmem:[#allocation3 + $0x20] sm:$0xff] }
 0x15f   : > { %1469 = vst.msk [vmem:[#allocation3 + $0x28] sm:$0xff] %vm1463_vm10, %v1426_v31  ;;  %v1440_v33 = vpop.permute.xlu1 %1439  ;;  %2326 = vmatprep.mubr.msk.bf16.mxu0 %vm1523_vm11, %v1484_v32 }
 0x160   : > { %1476 = vst.msk [vmem:[#allocation3 + $0x60] sm:$0xff] %vm1463_vm10, %v1440_v33 }
 0x162   : > { %v526_v34 = vpop.permute.xlu0 %525 }
 0x163   : > { %567 = vst.msk [vmem:[#allocation3 + $0x38] sm:$0xff] %vm559_vm3, %v526_v34  ;;  %v540_v35 = vpop.permute.xlu1 %539 }
 0x164   : > { %574 = vst.msk [vmem:[#allocation3 + $0x70] sm:$0xff] %vm559_vm3, %v540_v35 }
 0x166   : > { %v653_v36 = vpop.permute.xlu0 %652  ;;  %v1485_v37 = vld [vmem:[#allocation3 + $0x28] sm:$0xff] }
 0x167   : > { %695 = vst.msk [vmem:[#allocation3 + $0x30] sm:$0xff] %vm688_vm4, %v653_v36  ;;  %v1442_v38 = vpop.permute.xlu1 %1441  ;;  %2327 = vmatmul.mubr.msk.bf16.gmra.mrb[8].mxu0 %vm1523_vm11, %v1485_v37  ;;  %v1492_v39 = vld [vmem:[#allocation3 + $0x60] sm:$0xff] }
 0x168   : > { %1477 = vst.msk [vmem:[#allocation3 + $0x68] sm:$0xff] %vm1463_vm10, %v1442_v38  ;;  %2342 = vmatprep.mubr.msk.bf16.mxu1 %vm1523_vm11, %v1492_v39 }
 0x16a   : > { %v655_v40 = vpop.permute.xlu0 %654 }
 0x16b   : > { %696 = vst.msk [vmem:[#allocation3 + $0x38] sm:$0xff] %vm688_vm4, %v655_v40  ;;  %v542_v41 = vpop.permute.xlu1 %541 }
 0x16c   : > { %575 = vst.msk [vmem:[#allocation3 + $0x78] sm:$0xff] %vm559_vm3, %v542_v41 }
 0x16e   : > { %v782_v42 = vpop.permute.xlu0 %781 }
 0x16f   : > { %824 = vst.msk [vmem:[#allocation3 + $0x30] sm:$0xff] %vm817_vm5, %v782_v42  ;;  %v669_v44 = vpop.permute.xlu1 %668  ;;  %v1493_v45 = vld [vmem:[#allocation3 + $0x68] sm:$0xff] }
 0x170   : > { %703 = vst.msk [vmem:[#allocation3 + $0x70] sm:$0xff] %vm688_vm4, %v669_v44  ;;  %2343 = vmatmul.mubr.msk.bf16.gmra.mrb[8].mxu1 %vm1523_vm11, %v1493_v45 }
 0x172   : > { %v784_v46 = vpop.permute.xlu0 %783 }
 0x173   : > { %825 = vst.msk [vmem:[#allocation3 + $0x38] sm:$0xff] %vm817_vm5, %v784_v46  ;;  %v671_v20 = vpop.permute.xlu1 %670 }
 0x174   : > { %704 = vst.msk [vmem:[#allocation3 + $0x78] sm:$0xff] %vm688_vm4, %v671_v20 }
 0x176   : > { %v911_v47 = vpop.permute.xlu0 %910 }
 0x177   : > { %953 = vst.msk [vmem:[#allocation3 + $0x30] sm:$0xff] %vm946_vm6, %v911_v47  ;;  %v798_v48 = vpop.permute.xlu1 %797 }
 0x178   : > { %832 = vst.msk [vmem:[#allocation3 + $0x70] sm:$0xff] %vm817_vm5, %v798_v48 }
 0x17a   : > { %v913_v49 = vpop.permute.xlu0 %912 }
 0x17b   : > { %954 = vst.msk [vmem:[#allocation3 + $0x38] sm:$0xff] %vm946_vm6, %v913_v49  ;;  %v800_v51 = vpop.permute.xlu1 %799 }
 0x17c   : > { %833 = vst.msk [vmem:[#allocation3 + $0x78] sm:$0xff] %vm817_vm5, %v800_v51 }
 0x17e   : > { %v1040_v43 = vpop.permute.xlu0 %1039 }
 0x17f   : > { %1082 = vst.msk [vmem:[#allocation3 + $0x30] sm:$0xff] %vm1075_vm7, %v1040_v43  ;;  %v927_v52 = vpop.permute.xlu1 %926 }
 0x180   : > { %961 = vst.msk [vmem:[#allocation3 + $0x70] sm:$0xff] %vm946_vm6, %v927_v52 }
 0x182   : > { %v1042_v53 = vpop.permute.xlu0 %1041 }
 0x183   : > { %1083 = vst.msk [vmem:[#allocation3 + $0x38] sm:$0xff] %vm1075_vm7, %v1042_v53  ;;  %v929_v54 = vpop.permute.xlu1 %928 }
 0x184   : > { %962 = vst.msk [vmem:[#allocation3 + $0x78] sm:$0xff] %vm946_vm6, %v929_v54 }
 0x186   : > { %v1170_v55 = vpop.permute.xlu0 %1169 }
 0x187   : > { %1212 = vst.msk [vmem:[#allocation3 + $0x30] sm:$0xff] %vm1205_vm8, %v1170_v55  ;;  %v1056_v56 = vpop.permute.xlu1 %1055 }
 0x188   : > { %1090 = vst.msk [vmem:[#allocation3 + $0x70] sm:$0xff] %vm1075_vm7, %v1056_v56 }
 0x18a   : > { %v1172_v57 = vpop.permute.xlu0 %1171 }
 0x18b   : > { %1213 = vst.msk [vmem:[#allocation3 + $0x38] sm:$0xff] %vm1205_vm8, %v1172_v57  ;;  %v1058_v59 = vpop.permute.xlu1 %1057 }
 0x18c   : > { %1091 = vst.msk [vmem:[#allocation3 + $0x78] sm:$0xff] %vm1075_vm7, %v1058_v59 }
 0x18e   : > { %v1299_v60 = vpop.permute.xlu0 %1298 }
 0x18f   : > { %1341 = vst.msk [vmem:[#allocation3 + $0x30] sm:$0xff] %vm1334_vm9, %v1299_v60  ;;  %v1186_v61 = vpop.permute.xlu1 %1185 }
 0x190   : > { %1220 = vst.msk [vmem:[#allocation3 + $0x70] sm:$0xff] %vm1205_vm8, %v1186_v61 }
 0x192   : > { %v1301_v62 = vpop.permute.xlu0 %1300 }
 0x193   : > { %1342 = vst.msk [vmem:[#allocation3 + $0x38] sm:$0xff] %vm1334_vm9, %v1301_v62  ;;  %v1188_v63 = vpop.permute.xlu1 %1187 }
 0x194   : > { %1221 = vst.msk [vmem:[#allocation3 + $0x78] sm:$0xff] %vm1205_vm8, %v1188_v63 }
 0x196   : > { %v1428_v0 = vpop.permute.xlu0 %1427 }
 0x197   : > { %1470 = vst.msk [vmem:[#allocation3 + $0x30] sm:$0xff] %vm1463_vm10, %v1428_v0  ;;  %v1315_v1 = vpop.permute.xlu1 %1314 }
 0x198   : > { %1349 = vst.msk [vmem:[#allocation3 + $0x70] sm:$0xff] %vm1334_vm9, %v1315_v1 }
 0x19a   : > { %v1430_v2 = vpop.permute.xlu0 %1429 }
 0x19b   : > { %1471 = vst.msk [vmem:[#allocation3 + $0x38] sm:$0xff] %vm1463_vm10, %v1430_v2  ;;  %v1317_v3 = vpop.permute.xlu1 %1316 }
 0x19c   : > { %1350 = vst.msk [vmem:[#allocation3 + $0x78] sm:$0xff] %vm1334_vm9, %v1317_v3 }
 0x19e   : > { %v1486_v4 = vld [vmem:[#allocation3 + $0x30] sm:$0xff] }
 0x19f   : > { %v1444_v5 = vpop.permute.xlu1 %1443  ;;  %2330 = vmatprep.mubr.msk.bf16.mxu0 %vm1523_vm11, %v1486_v4 }
 0x1a0   : > { %1478 = vst.msk [vmem:[#allocation3 + $0x70] sm:$0xff] %vm1463_vm10, %v1444_v5 }
 0x1a2   : > { %v1487_v6 = vld [vmem:[#allocation3 + $0x38] sm:$0xff] }
 0x1a3   : > { %v1446_v7 = vpop.permute.xlu1 %1445  ;;  %2331 = vmatmul.mubr.msk.bf16.gmra.mrb[12].mxu0 %vm1523_vm11, %v1487_v6 }
 0x1a4   : > { %1479 = vst.msk [vmem:[#allocation3 + $0x78] sm:$0xff] %vm1463_vm10, %v1446_v7 }
 0x1a7   : > { %v1494_v8 = vld [vmem:[#allocation3 + $0x70] sm:$0xff] }
 0x1a8   : > { %2346 = vmatprep.mubr.msk.bf16.mxu1 %vm1523_vm11, %v1494_v8 }
 0x1ab   : > { %v1495_v9 = vld [vmem:[#allocation3 + $0x78] sm:$0xff] }
 0x1ac   : > { %2347 = vmatmul.mubr.msk.bf16.gmra.mrb[12].mxu1 %vm1523_vm11, %v1495_v9 }
 0x1ba   : > { %v2320_v12 = vpop.f32.mrb[0].mxu0 }
 0x1bb   : > { %v1619_v13 = vadd.f32 %v2320_v12, %v3097_v11  ;;  %v1610_v15 = vpop.f32.mrb[1].mxu0 }
 0x1bc   : > { %v1611_v16 = vadd.f32 %v3097_v11, %v1610_v15  ;;  %v2321_v17 = vpop.f32.mrb[2].mxu0 }
 0x1bd   : > { %v1739_v10 = vmax.f32 %v1619_v13, 0.0  ;;  %v1622_v50 = vadd.f32 %v2321_v17, %v3097_v11  ;;  %v1613_v18 = vpop.f32.mrb[3].mxu0 }
 0x1be   : > { %v1737_v19 = vmax.f32 %v1611_v16, 0.0  ;;  %v1614_v21 = vadd.f32 %v3097_v11, %v1613_v18 }
 0x1bf   : > { %1771 = vst.msk [vmem:[%s3104_s14 + $0x10] sm:$0xff] %vm212_vm0, %v1739_v10  ;;  %v2184_v22 = vpack.c.bf16 %v1739_v10, %v1739_v10  ;;  %v1740_v23 = vmax.f32 %v1622_v50, 0.0 }
 0x1c0   : > { %1769 = vst.msk [vmem:[%s3104_s14] sm:$0xff] %vm212_vm0, %v1737_v19  ;;  %v1738_v24 = vmax.f32 %v1614_v21, 0.0  ;;  %v2182_v14 = vpack.c.bf16 %v1737_v19, %v1737_v19 }
 0x1c1   : > { %1772 = vst.msk [vmem:[%s3104_s14 + $0x18] sm:$0xff] %vm212_vm0, %v1740_v23  ;;  %v2185_v25 = vpack.c.bf16 %v1740_v23, %v1740_v23  ;;  %1901 = vrot.lane.b32.xlu0 %v2184_v22, %s2396_s18 }
 0x1c2   : > { %1770 = vst.msk [vmem:[%s3104_s14 + $0x8] sm:$0xff] %vm212_vm0, %v1738_v24  ;;  %v2183_v58 = vpack.c.bf16 %v1738_v24, %v1738_v24 }
 0x1c3   : > { %v2336_v26 = vpop.f32.mrb[0].mxu1  ;;  %1903 = vrot.lane.b32.xlu1 %v2185_v25, %s2396_s18 }
 0x1c4   : > { %v1683_v27 = vadd.f32 %v2336_v26, %v3097_v11  ;;  %v1674_v28 = vpop.f32.mrb[1].mxu1 }
 0x1c5   : > { %v1675_v29 = vadd.f32 %v3097_v11, %v1674_v28  ;;  %v2337_v30 = vpop.f32.mrb[2].mxu1  ;;  %1897 = vrot.lane.b32.xlu0 %v2182_v14, %s2396_s18 }
 0x1c6   : > { %v1755_v31 = vmax.f32 %v1683_v27, 0.0  ;;  %v1686_v32 = vadd.f32 %v2337_v30, %v3097_v11  ;;  %v1677_v33 = vpop.f32.mrb[3].mxu1 }
 0x1c7   : > { %v1753_v34 = vmax.f32 %v1675_v29, 0.0  ;;  %v1678_v35 = vadd.f32 %v3097_v11, %v1677_v33  ;;  %1899 = vrot.lane.b32.xlu1 %v2183_v58, %s2396_s18 }
 0x1c8   : > { %1787 = vst.msk [vmem:[%s3104_s14 + $0x90] sm:$0xff] %vm212_vm0, %v1755_v31  ;;  %v2200_v36 = vpack.c.bf16 %v1755_v31, %v1755_v31  ;;  %v1756_v37 = vmax.f32 %v1686_v32, 0.0 }
 0x1c9   : > { %1785 = vst.msk [vmem:[%s3104_s14 + $0x80] sm:$0xff] %vm212_vm0, %v1753_v34  ;;  %v1754_v38 = vmax.f32 %v1678_v35, 0.0  ;;  %v2198_v40 = vpack.c.bf16 %v1753_v34, %v1753_v34 }
 0x1ca   : > { %1788 = vst.msk [vmem:[%s3104_s14 + $0x98] sm:$0xff] %vm212_vm0, %v1756_v37  ;;  %v2201_v39 = vpack.c.bf16 %v1756_v37, %v1756_v37  ;;  %1933 = vrot.lane.b32.xlu0 %v2200_v36, %s2396_s18 }
 0x1cb   : > { %1786 = vst.msk [vmem:[%s3104_s14 + $0x88] sm:$0xff] %vm212_vm0, %v1754_v38  ;;  %v2199_v41 = vpack.c.bf16 %v1754_v38, %v1754_v38 }
 0x1cc   : > { %1935 = vrot.lane.b32.xlu1 %v2201_v39, %s2396_s18 }
 0x1ce   : > { %1929 = vrot.lane.b32.xlu0 %v2198_v40, %s2396_s18 }
 0x1d0   : > { %1931 = vrot.lane.b32.xlu1 %v2199_v41, %s2396_s18 }
 0x1fa   : > { %v2324_v42 = vpop.f32.mrb[4].mxu0 }
 0x1fb   : > { %v1635_v44 = vadd.f32 %v2324_v42, %v3097_v11  ;;  %v1626_v45 = vpop.f32.mrb[5].mxu0 }
 0x1fc   : > { %v1627_v46 = vadd.f32 %v3097_v11, %v1626_v45  ;;  %v2325_v20 = vpop.f32.mrb[6].mxu0 }
 0x1fd   : > { %v1743_v47 = vmax.f32 %v1635_v44, 0.0  ;;  %v1638_v48 = vadd.f32 %v2325_v20, %v3097_v11  ;;  %v1629_v49 = vpop.f32.mrb[7].mxu0 }
 0x1fe   : > { %v1741_v51 = vmax.f32 %v1627_v46, 0.0  ;;  %v1630_v43 = vadd.f32 %v3097_v11, %v1629_v49 }
 0x1ff   : > { %1775 = vst.msk [vmem:[%s3104_s14 + $0x30] sm:$0xff] %vm212_vm0, %v1743_v47  ;;  %v2188_v52 = vpack.c.bf16 %v1743_v47, %v1743_v47  ;;  %v1744_v53 = vmax.f32 %v1638_v48, 0.0 }
 0x200   : > { %1773 = vst.msk [vmem:[%s3104_s14 + $0x20] sm:$0xff] %vm212_vm0, %v1741_v51  ;;  %v1742_v54 = vmax.f32 %v1630_v43, 0.0  ;;  %v2186_v56 = vpack.c.bf16 %v1741_v51, %v1741_v51 }
 0x201   : > { %1776 = vst.msk [vmem:[%s3104_s14 + $0x38] sm:$0xff] %vm212_vm0, %v1744_v53  ;;  %v2189_v55 = vpack.c.bf16 %v1744_v53, %v1744_v53  ;;  %1909 = vrot.lane.b32.xlu0 %v2188_v52, %s2396_s18 }
 0x202   : > { %1774 = vst.msk [vmem:[%s3104_s14 + $0x28] sm:$0xff] %vm212_vm0, %v1742_v54  ;;  %v2187_v61 = vpack.c.bf16 %v1742_v54, %v1742_v54 }
 0x203   : > { %v2340_v57 = vpop.f32.mrb[4].mxu1  ;;  %1911 = vrot.lane.b32.xlu1 %v2189_v55, %s2396_s18 }
 0x204   : > { %v1699_v59 = vadd.f32 %v2340_v57, %v3097_v11  ;;  %v1690_v60 = vpop.f32.mrb[5].mxu1 }
 0x205   : > { %v1691_v62 = vadd.f32 %v3097_v11, %v1690_v60  ;;  %v2341_v63 = vpop.f32.mrb[6].mxu1  ;;  %1905 = vrot.lane.b32.xlu0 %v2186_v56, %s2396_s18 }
 0x206   : > { %v1759_v0 = vmax.f32 %v1699_v59, 0.0  ;;  %v1702_v1 = vadd.f32 %v2341_v63, %v3097_v11  ;;  %v1693_v2 = vpop.f32.mrb[7].mxu1 }
 0x207   : > { %v1757_v3 = vmax.f32 %v1691_v62, 0.0  ;;  %v1694_v4 = vadd.f32 %v3097_v11, %v1693_v2  ;;  %1907 = vrot.lane.b32.xlu1 %v2187_v61, %s2396_s18 }
 0x208   : > { %1791 = vst.msk [vmem:[%s3104_s14 + $0xb0] sm:$0xff] %vm212_vm0, %v1759_v0  ;;  %v2204_v5 = vpack.c.bf16 %v1759_v0, %v1759_v0  ;;  %v1760_v6 = vmax.f32 %v1702_v1, 0.0 }
 0x209   : > { %1789 = vst.msk [vmem:[%s3104_s14 + $0xa0] sm:$0xff] %vm212_vm0, %v1757_v3  ;;  %v1758_v7 = vmax.f32 %v1694_v4, 0.0  ;;  %v2202_v9 = vpack.c.bf16 %v1757_v3, %v1757_v3 }
 0x20a   : > { %1792 = vst.msk [vmem:[%s3104_s14 + $0xb8] sm:$0xff] %vm212_vm0, %v1760_v6  ;;  %v2205_v8 = vpack.c.bf16 %v1760_v6, %v1760_v6  ;;  %1941 = vrot.lane.b32.xlu0 %v2204_v5, %s2396_s18 }
 0x20b   : > { %1790 = vst.msk [vmem:[%s3104_s14 + $0xa8] sm:$0xff] %vm212_vm0, %v1758_v7  ;;  %v2203_v12 = vpack.c.bf16 %v1758_v7, %v1758_v7 }
 0x20c   : > { %1943 = vrot.lane.b32.xlu1 %v2205_v8, %s2396_s18 }
 0x20e   : > { %1937 = vrot.lane.b32.xlu0 %v2202_v9, %s2396_s18 }
 0x210   : > { %1939 = vrot.lane.b32.xlu1 %v2203_v12, %s2396_s18 }
 0x233   : > { %v1902_v13 = vpop.permute.xlu0 %1901 }
 0x234   : > { %1996 = vst.msk [vmem:[%s3174_s21 + $0x8] sm:$0xf] %vm1993_vm12, %v1902_v13 }
 0x235   : > { %v1904_v15 = vpop.permute.xlu1 %1903 }
 0x236   : > { %1997 = vst.msk [vmem:[%s3174_s21 + $0xc] sm:$0xf] %vm1993_vm12, %v1904_v15 }
 0x237   : > { %v1898_v16 = vpop.permute.xlu0 %1897 }
 0x238   : > { %1994 = vst.msk [vmem:[%s3174_s21] sm:$0xf] %vm1993_vm12, %v1898_v16 }
 0x239   : > { %v1900_v17 = vpop.permute.xlu1 %1899 }
 0x23a   : > { %1995 = vst.msk [vmem:[%s3174_s21 + $0x4] sm:$0xf] %vm1993_vm12, %v1900_v17  ;;  %v2328_v10 = vpop.f32.mrb[8].mxu0 }
 0x23b   : > { %v1651_v50 = vadd.f32 %v2328_v10, %v3097_v11  ;;  %v1642_v18 = vpop.f32.mrb[9].mxu0 }
 0x23c   : > { %v1643_v19 = vadd.f32 %v3097_v11, %v1642_v18  ;;  %v1934_v21 = vpop.permute.xlu0 %1933  ;;  %v2329_v22 = vpop.f32.mrb[10].mxu0 }
 0x23d   : > { %v1747_v23 = vmax.f32 %v1651_v50, 0.0  ;;  %2012 = vst.msk [vmem:[%s3174_s21 + $0x48] sm:$0xf] %vm1993_vm12, %v1934_v21  ;;  %v1654_v24 = vadd.f32 %v2329_v22, %v3097_v11  ;;  %v1645_v25 = vpop.f32.mrb[11].mxu0 }
 0x23e   : > { %v1745_v14 = vmax.f32 %v1643_v19, 0.0  ;;  %v1646_v26 = vadd.f32 %v3097_v11, %v1645_v25  ;;  %v1936_v27 = vpop.permute.xlu1 %1935 }
 0x23f   : > { %1779 = vst.msk [vmem:[%s3104_s14 + $0x50] sm:$0xff] %vm212_vm0, %v1747_v23  ;;  %v2192_v28 = vpack.c.bf16 %v1747_v23, %v1747_v23  ;;  %v1748_v58 = vmax.f32 %v1654_v24, 0.0 }
 0x240   : > { %2013 = vst.msk [vmem:[%s3174_s21 + $0x4c] sm:$0xf] %vm1993_vm12, %v1936_v27  ;;  %v1746_v29 = vmax.f32 %v1646_v26, 0.0  ;;  %v1930_v30 = vpop.permute.xlu0 %1929  ;;  %v2190_v33 = vpack.c.bf16 %v1745_v14, %v1745_v14 }
 0x241   : > { %1777 = vst.msk [vmem:[%s3104_s14 + $0x40] sm:$0xff] %vm212_vm0, %v1745_v14  ;;  %1780 = vst.msk [vmem:[%s3104_s14 + $0x58] sm:$0xff] %vm212_vm0, %v1748_v58  ;;  %v2193_v31 = vpack.c.bf16 %v1748_v58, %v1748_v58  ;;  %1917 = vrot.lane.b32.xlu0 %v2192_v28, %s2396_s18 }
 0x242   : > { %2010 = vst.msk [vmem:[%s3174_s21 + $0x40] sm:$0xf] %vm1993_vm12, %v1930_v30  ;;  %v1932_v32 = vpop.permute.xlu1 %1931  ;;  %v2191_v37 = vpack.c.bf16 %v1746_v29, %v1746_v29 }
 0x243   : > { %1778 = vst.msk [vmem:[%s3104_s14 + $0x48] sm:$0xff] %vm212_vm0, %v1746_v29  ;;  %v2344_v34 = vpop.f32.mrb[8].mxu1  ;;  %1919 = vrot.lane.b32.xlu1 %v2193_v31, %s2396_s18 }
 0x244   : > { %2011 = vst.msk [vmem:[%s3174_s21 + $0x44] sm:$0xf] %vm1993_vm12, %v1932_v32  ;;  %v1715_v35 = vadd.f32 %v2344_v34, %v3097_v11  ;;  %v1706_v36 = vpop.f32.mrb[9].mxu1 }
 0x245   : > { %v1707_v38 = vadd.f32 %v3097_v11, %v1706_v36  ;;  %v2345_v39 = vpop.f32.mrb[10].mxu1  ;;  %1913 = vrot.lane.b32.xlu0 %v2190_v33, %s2396_s18 }
 0x246   : > { %v1763_v40 = vmax.f32 %v1715_v35, 0.0  ;;  %v1718_v41 = vadd.f32 %v2345_v39, %v3097_v11  ;;  %v1709_v42 = vpop.f32.mrb[11].mxu1 }
 0x247   : > { %v1761_v44 = vmax.f32 %v1707_v38, 0.0  ;;  %v1710_v45 = vadd.f32 %v3097_v11, %v1709_v42  ;;  %1915 = vrot.lane.b32.xlu1 %v2191_v37, %s2396_s18 }
 0x248   : > { %1795 = vst.msk [vmem:[%s3104_s14 + $0xd0] sm:$0xff] %vm212_vm0, %v1763_v40  ;;  %v2208_v46 = vpack.c.bf16 %v1763_v40, %v1763_v40  ;;  %v1764_v20 = vmax.f32 %v1718_v41, 0.0 }
 0x249   : > { %1793 = vst.msk [vmem:[%s3104_s14 + $0xc0] sm:$0xff] %vm212_vm0, %v1761_v44  ;;  %v1762_v47 = vmax.f32 %v1710_v45, 0.0  ;;  %v2206_v49 = vpack.c.bf16 %v1761_v44, %v1761_v44 }
 0x24a   : > { %1796 = vst.msk [vmem:[%s3104_s14 + $0xd8] sm:$0xff] %vm212_vm0, %v1764_v20  ;;  %v2209_v48 = vpack.c.bf16 %v1764_v20, %v1764_v20  ;;  %1949 = vrot.lane.b32.xlu0 %v2208_v46, %s2396_s18 }
 0x24b   : > { %1794 = vst.msk [vmem:[%s3104_s14 + $0xc8] sm:$0xff] %vm212_vm0, %v1762_v47  ;;  %v2207_v51 = vpack.c.bf16 %v1762_v47, %v1762_v47 }
 0x24c   : > { %1951 = vrot.lane.b32.xlu1 %v2209_v48, %s2396_s18 }
 0x24e   : > { %1945 = vrot.lane.b32.xlu0 %v2206_v49, %s2396_s18 }
 0x250   : > { %1947 = vrot.lane.b32.xlu1 %v2207_v51, %s2396_s18 }
 0x273   : > { %v1910_v43 = vpop.permute.xlu0 %1909 }
 0x274   : > { %2000 = vst.msk [vmem:[%s3174_s21 + $0x18] sm:$0xf] %vm1993_vm12, %v1910_v43 }
 0x275   : > { %v1912_v52 = vpop.permute.xlu1 %1911 }
 0x276   : > { %2001 = vst.msk [vmem:[%s3174_s21 + $0x1c] sm:$0xf] %vm1993_vm12, %v1912_v52  ;;  %v2332_v53 = vpop.f32.mrb[12].mxu0 }
 0x277   : > { %v1667_v54 = vadd.f32 %v2332_v53, %v3097_v11  ;;  %v1658_v55 = vpop.f32.mrb[13].mxu0  ;;  %v1906_v56 = vpop.permute.xlu0 %1905 }
 0x278   : > { %v1659_v57 = vadd.f32 %v3097_v11, %v1658_v55  ;;  %1998 = vst.msk [vmem:[%s3174_s21 + $0x10] sm:$0xf] %vm1993_vm12, %v1906_v56  ;;  %v2333_v59 = vpop.f32.mrb[14].mxu0 }
 0x279   : > { %v1751_v60 = vmax.f32 %v1667_v54, 0.0  ;;  %v1670_v61 = vadd.f32 %v2333_v59, %v3097_v11  ;;  %v1661_v62 = vpop.f32.mrb[15].mxu0  ;;  %v1908_v63 = vpop.permute.xlu1 %1907 }
 0x27a   : > { %v1749_v0 = vmax.f32 %v1659_v57, 0.0  ;;  %v1662_v1 = vadd.f32 %v3097_v11, %v1661_v62  ;;  %1999 = vst.msk [vmem:[%s3174_s21 + $0x14] sm:$0xf] %vm1993_vm12, %v1908_v63 }
 0x27b   : > { %1783 = vst.msk [vmem:[%s3104_s14 + $0x70] sm:$0xff] %vm212_vm0, %v1751_v60  ;;  %v2196_v2 = vpack.c.bf16 %v1751_v60, %v1751_v60  ;;  %v1752_v3 = vmax.f32 %v1670_v61, 0.0 }
 0x27c   : > { %1781 = vst.msk [vmem:[%s3104_s14 + $0x60] sm:$0xff] %vm212_vm0, %v1749_v0  ;;  %v1750_v4 = vmax.f32 %v1662_v1, 0.0  ;;  %v1942_v5 = vpop.permute.xlu0 %1941  ;;  %v2194_v8 = vpack.c.bf16 %v1749_v0, %v1749_v0 }
 0x27d   : > { %1784 = vst.msk [vmem:[%s3104_s14 + $0x78] sm:$0xff] %vm212_vm0, %v1752_v3  ;;  %v2197_v6 = vpack.c.bf16 %v1752_v3, %v1752_v3  ;;  %1925 = vrot.lane.b32.xlu0 %v2196_v2, %s2396_s18 }
 0x27e   : > { %2016 = vst.msk [vmem:[%s3174_s21 + $0x58] sm:$0xf] %vm1993_vm12, %v1942_v5  ;;  %v1944_v7 = vpop.permute.xlu1 %1943  ;;  %v2195_v16 = vpack.c.bf16 %v1750_v4, %v1750_v4 }
 0x27f   : > { %1782 = vst.msk [vmem:[%s3104_s14 + $0x68] sm:$0xff] %vm212_vm0, %v1750_v4  ;;  %v2348_v9 = vpop.f32.mrb[12].mxu1  ;;  %1927 = vrot.lane.b32.xlu1 %v2197_v6, %s2396_s18 }
 0x280   : > { %2017 = vst.msk [vmem:[%s3174_s21 + $0x5c] sm:$0xf] %vm1993_vm12, %v1944_v7  ;;  %v1731_v12 = vadd.f32 %v2348_v9, %v3097_v11  ;;  %v1722_v13 = vpop.f32.mrb[13].mxu1  ;;  %v1938_v15 = vpop.permute.xlu0 %1937 }
 0x281   : > { %v1723_v17 = vadd.f32 %v3097_v11, %v1722_v13  ;;  %2014 = vst.msk [vmem:[%s3174_s21 + $0x50] sm:$0xf] %vm1993_vm12, %v1938_v15  ;;  %v2349_v10 = vpop.f32.mrb[14].mxu1  ;;  %1921 = vrot.lane.b32.xlu0 %v2194_v8, %s2396_s18 }
 0x282   : > { %v1767_v50 = vmax.f32 %v1731_v12, 0.0  ;;  %v1734_v18 = vadd.f32 %v2349_v10, %v3097_v11  ;;  %v1725_v19 = vpop.f32.mrb[15].mxu1  ;;  %v1940_v21 = vpop.permute.xlu1 %1939 }
 0x283   : > { %v1765_v22 = vmax.f32 %v1723_v17, 0.0  ;;  %v1726_v23 = vadd.f32 %v3097_v11, %v1725_v19  ;;  %2015 = vst.msk [vmem:[%s3174_s21 + $0x54] sm:$0xf] %vm1993_vm12, %v1940_v21  ;;  %1923 = vrot.lane.b32.xlu1 %v2195_v16, %s2396_s18 }
 0x284   : > { %1799 = vst.msk [vmem:[%s3104_s14 + $0xf0] sm:$0xff] %vm212_vm0, %v1767_v50  ;;  %v1768_v24 = vmax.f32 %v1734_v18, 0.0  ;;  %v2212_v26 = vpack.c.bf16 %v1767_v50, %v1767_v50 }
 0x285   : > { %1797 = vst.msk [vmem:[%s3104_s14 + $0xe0] sm:$0xff] %vm212_vm0, %v1765_v22  ;;  %v2210_v25 = vpack.c.bf16 %v1765_v22, %v1765_v22  ;;  %v1766_v14 = vmax.f32 %v1726_v23, 0.0 }
 0x286   : > { %1800 = vst.msk [vmem:[%s3104_s14 + $0xf8] sm:$0xff] %vm212_vm0, %v1768_v24  ;;  %v2213_v27 = vpack.c.bf16 %v1768_v24, %v1768_v24 }
 0x287   : > { %1798 = vst.msk [vmem:[%s3104_s14 + $0xe8] sm:$0xff] %vm212_vm0, %v1766_v14  ;;  %v2211_v11 = vpack.c.bf16 %v1766_v14, %v1766_v14  ;;  %1953 = vrot.lane.b32.xlu0 %v2210_v25, %s2396_s18 }
 0x289   : > { %1955 = vrot.lane.b32.xlu1 %v2211_v11, %s2396_s18 }
 0x28b   : > { %1957 = vrot.lane.b32.xlu0 %v2212_v26, %s2396_s18 }
 0x28d   : > { %1959 = vrot.lane.b32.xlu1 %v2213_v27, %s2396_s18 }
 0x2b3   : > { %v1918_v28 = vpop.permute.xlu0 %1917 }
 0x2b4   : > { %2004 = vst.msk [vmem:[%s3174_s21 + $0x28] sm:$0xf] %vm1993_vm12, %v1918_v28 }
 0x2b5   : > { %v1920_v58 = vpop.permute.xlu1 %1919 }
 0x2b6   : > { %2005 = vst.msk [vmem:[%s3174_s21 + $0x2c] sm:$0xf] %vm1993_vm12, %v1920_v58 }
 0x2b7   : > { %v1914_v29 = vpop.permute.xlu0 %1913 }
 0x2b8   : > { %2002 = vst.msk [vmem:[%s3174_s21 + $0x20] sm:$0xf] %vm1993_vm12, %v1914_v29 }
 0x2b9   : > { %v1916_v30 = vpop.permute.xlu1 %1915 }
 0x2ba   : > { %2003 = vst.msk [vmem:[%s3174_s21 + $0x24] sm:$0xf] %vm1993_vm12, %v1916_v30 }
 0x2bc   : > { %v1950_v31 = vpop.permute.xlu0 %1949 }
 0x2bd   : > { %2020 = vst.msk [vmem:[%s3174_s21 + $0x68] sm:$0xf] %vm1993_vm12, %v1950_v31 }
 0x2be   : > { %v1952_v32 = vpop.permute.xlu1 %1951 }
 0x2bf   : > { %2021 = vst.msk [vmem:[%s3174_s21 + $0x6c] sm:$0xf] %vm1993_vm12, %v1952_v32 }
 0x2c0   : > { %v1946_v33 = vpop.permute.xlu0 %1945 }
 0x2c1   : > { %2018 = vst.msk [vmem:[%s3174_s21 + $0x60] sm:$0xf] %vm1993_vm12, %v1946_v33 }
 0x2c2   : > { %v1948_v34 = vpop.permute.xlu1 %1947 }
 0x2c3   : > { %2019 = vst.msk [vmem:[%s3174_s21 + $0x64] sm:$0xf] %vm1993_vm12, %v1948_v34 }
 0x2ef   : > { %v1926_v35 = vpop.permute.xlu0 %1925 }
 0x2f0   : > { %2008 = vst.msk [vmem:[%s3174_s21 + $0x38] sm:$0xf] %vm1993_vm12, %v1926_v35 }
 0x2f1   : > { %v1928_v36 = vpop.permute.xlu1 %1927 }
 0x2f2   : > { %2009 = vst.msk [vmem:[%s3174_s21 + $0x3c] sm:$0xf] %vm1993_vm12, %v1928_v36 }
 0x2f3   : > { %v1922_v37 = vpop.permute.xlu0 %1921 }
 0x2f4   : > { %2006 = vst.msk [vmem:[%s3174_s21 + $0x30] sm:$0xf] %vm1993_vm12, %v1922_v37 }
 0x2f5   : > { %v1924_v38 = vpop.permute.xlu1 %1923 }
 0x2f6   : > { %2007 = vst.msk [vmem:[%s3174_s21 + $0x34] sm:$0xf] %vm1993_vm12, %v1924_v38 }
 0x2f9   : > { %v1954_v39 = vpop.permute.xlu0 %1953 }
 0x2fa   : > { %2022 = vst.msk [vmem:[%s3174_s21 + $0x70] sm:$0xf] %vm1993_vm12, %v1954_v39 }
 0x2fb   : > { %v1956_v40 = vpop.permute.xlu1 %1955 }
 0x2fc   : > { %2023 = vst.msk [vmem:[%s3174_s21 + $0x74] sm:$0xf] %vm1993_vm12, %v1956_v40 }
 0x2fd   : > { %v1958_v41 = vpop.permute.xlu0 %1957 }
 0x2fe   : > { %2024 = vst.msk [vmem:[%s3174_s21 + $0x78] sm:$0xf] %vm1993_vm12, %v1958_v41 }
 0x2ff   : > { %v1960_v42 = vpop.permute.xlu1 %1959 }
 0x300   : > { %2025 = vst.msk [vmem:[%s3174_s21 + $0x7c] sm:$0xf] %vm1993_vm12, %v1960_v42 }
 0x301 PF: > { %s15_s15 = sadd.s32 1, %s2385_s15  }
 0x302   : > { %p12_p4 = scmp.ge.s32.totalorder %s15_s15, 4  }
 0x304   :  { %14 = sbr.rel (!%p12_p4) target bundleno = 1 (0x1), region = 76 }

// kernel: detect_module_forward.3
= control target key start
LH: loop header
LB: loop body
LE: loop exit
PB: predicated region body
PF: predicated region fallthrough
CT: control target
= control target key end

     0   :  { %s2386_s15 = smov 0   ;;  %s3291_s0 = inlined_call_operand.vmem [shape: bf16[2,16,16,16], index: 0, kind: input, shape index: {}]   ;;  %s3292_s1 = inlined_call_operand.vmem [shape: bf16[144,12], index: 1, kind: input, shape index: {}]   ;;  %s3293_s2 = inlined_call_operand.vmem [shape: f32[1,12], index: 2, kind: input, shape index: {}]   ;;  %s3294_s3 = inlined_call_operand.vmem [shape: f32[2,16,16,8], index: 3, kind: output, shape index: {0}]   ;;  %s3295_s4 = inlined_call_operand.vmem [shape: bf16[2,16,16,4], index: 4, kind: output, shape index: {1}]  }
   0x1 LB: > { %s2113_s16 = sadd.s32 4294967295, %s2349_s15   ;;  %p2117_p0 = scmp.ge.s32.totalorder %s2349_s15, 1  ;;  %s2349_s15 = sphi %s2386_s15, %s15_s15  }
   0x2   : > { %p165_p1 = scmp.lt.s32.totalorder %s2349_s15, 3 }
   0x4   : > { %p166_p2 = pnand %p2117_p0, %p165_p1 }
   0x5   : > { %vm212_vm0 = vcmask (!%p166_p2), 130048   ;;  %vm216_vm1 = vcmask (!%p166_p2), 122880   ;;  %v2351_v0 = vmov (!%p166_p2), 0.0   ;;  %p196_p3 = scmp.lt.s32.totalorder (!%p166_p2), %s2113_s16, 1  ;;  %v2352_v1 = vmov (!%p166_p2), 0   ;;  %v2334_v2 = vld [vmem:[%s3292_s1] sm:$0xff] (!%p166_p2)  }
   0x6   : > { %169 = sbr.rel (%p166_p2) target bundleno = 731 (0x2db), region = 32  ;;  %214 = vst.msk [vmem:[#allocation2 + $0x8] sm:$0xff] (!%p166_p2), %vm212_vm0, %v2351_v0  ;;  %215 = vst.msk [vmem:[#allocation2 + $0x10] sm:$0xff] (!%p166_p2), %vm212_vm0, %v2351_v0  ;;  %1574 = vmatprep.subr.bf16.mxu0 (!%p166_p2), %v2352_v1  ;;  %2298 = vmatprep.subr.bf16.mxu1 (!%p166_p2), %v2352_v1  ;;  %v2335_v3 = vld [vmem:[%s3292_s1 + $0x8] sm:$0xff] (!%p166_p2)   ;;  %v2565_v4 = vld [vmem:[%s3292_s1 + $0x10] sm:$0xff] (!%p166_p2)   ;;  %s2353_s27 = smov (!%p166_p2), 16  }
   0x7   : > { %213 = vst.msk [vmem:[#allocation2] sm:$0xff] (!%p166_p2), %vm212_vm0, %v2351_v0  ;;  %218 = vst.msk [vmem:[#allocation2 + $0x20] sm:$0xff] (!%p166_p2), %vm212_vm0, %v2351_v0  ;;  %1575 = vmatpush1.bf16.msra.mxu0 (!%p166_p2), %v2334_v2  ;;  %2307 = vmatpush1.bf16.msra.mxu1 (!%p166_p2), %v2334_v2  ;;  %s2354_s28 = smov (!%p166_p2), 32   ;;  %v2337_v41 = vld [vmem:[%s3292_s1 + $0x18] sm:$0xff] (!%p166_p2)   ;;  %v2338_v54 = vld [vmem:[%s3292_s1 + $0x20] sm:$0xff] (!%p166_p2)   ;;  %s2355_s7 = smov (!%p166_p2), 48  }
   0x8   : > { %219 = vst.msk [vmem:[#allocation2 + $0x28] sm:$0xff] (!%p166_p2), %vm212_vm0, %v2351_v0  ;;  %220 = vst.msk [vmem:[#allocation2 + $0x30] sm:$0xff] (!%p166_p2), %vm212_vm0, %v2351_v0  ;;  %1576 = vmatprep.subr.bf16.mxu0 (!%p166_p2), %v2352_v1  ;;  %2299 = vmatprep.subr.bf16.mxu1 (!%p166_p2), %v2352_v1  ;;  %s2356_s8 = smov (!%p166_p2), 64   ;;  %s2357_s9 = smov (!%p166_p2), 80   ;;  %vm559_vm2 = vcmask (!%p166_p2), 261248   ;;  %vm688_vm3 = vcmask (!%p166_p2), 392448  }
   0x9   : > { %222 = vst.msk [vmem:[#allocation2 + $0x40] sm:$0xff] (!%p166_p2), %vm212_vm0, %v2351_v0  ;;  %223 = vst.msk [vmem:[#allocation2 + $0x48] sm:$0xff] (!%p166_p2), %vm212_vm0, %v2351_v0  ;;  %s2358_s10 = smov (!%p166_p2), 96   ;;  %s2359_s13 = smov (!%p166_p2), 112   ;;  %vm817_vm4 = vcmask (!%p166_p2), 523648   ;;  %vm946_vm5 = vcmask (!%p166_p2), 654848  }
   0xa   : > { %224 = vst.msk [vmem:[#allocation2 + $0x50] sm:$0xff] (!%p166_p2), %vm212_vm0, %v2351_v0  ;;  %226 = vst.msk [vmem:[#allocation2 + $0x60] sm:$0xff] (!%p166_p2), %vm212_vm0, %v2351_v0  ;;  %vm1075_vm6 = vcmask (!%p166_p2), 786048   ;;  %vm1205_vm7 = vcmask (!%p166_p2), 917248   ;;  %vm1334_vm8 = vcmask (!%p166_p2), 1048448   ;;  %vm1767_vm9 = vcmask (!%p166_p2), 64512  }
   0xb   : > { %227 = vst.msk [vmem:[#allocation2 + $0x68] sm:$0xff] (!%p166_p2), %vm212_vm0, %v2351_v0  ;;  %228 = vst.msk [vmem:[#allocation2 + $0x70] sm:$0xff] (!%p166_p2), %vm212_vm0, %v2351_v0  ;;  %1577 = vmatpush1.bf16.msra.mxu0 (!%p166_p2), %v2335_v3  ;;  %2308 = vmatpush1.bf16.msra.mxu1 (!%p166_p2), %v2335_v3  ;;  %s2360_s29 = smov (!%p166_p2), 120   ;;  %vm1992_vm10 = vcmask (!%p166_p2), 27648  }
   0xc   : > { %230 = vst.msk [vmem:[#allocation2 + $0x80] sm:$0xff] (!%p166_p2), %vm212_vm0, %v2351_v0  ;;  %231 = vst.msk [vmem:[#allocation2 + $0x88] sm:$0xff] (!%p166_p2), %vm212_vm0, %v2351_v0  ;;  %1578 = vmatprep.subr.bf16.mxu0 (!%p166_p2), %v2352_v1  ;;  %2300 = vmatprep.subr.bf16.mxu1 (!%p166_p2), %v2352_v1 }
   0xd   : > { %232 = vst.msk [vmem:[#allocation2 + $0x90] sm:$0xff] %vm212_vm0, %v2351_v0  ;;  %234 = vst.msk [vmem:[#allocation2 + $0xa0] sm:$0xff] %vm212_vm0, %v2351_v0  ;;  %s3297_s16 = smov (!%p196_p3, %s2113_s16), 1  ;;  %v447_v8 = vld [vmem:[#allocation2 + $0x8] sm:$0xff]  ;;  %v448_v9 = vld [vmem:[#allocation2 + $0x10] sm:$0xff] }
   0xe   : > { %235 = vst.msk [vmem:[#allocation2 + $0xa8] sm:$0xff] %vm212_vm0, %v2351_v0  ;;  %236 = vst.msk [vmem:[#allocation2 + $0xb0] sm:$0xff] %vm212_vm0, %v2351_v0  ;;  %s2184_s21 = sshll.u32 %s3297_s16, 7  ;;  %v576_v10 = vld [vmem:[#allocation2 + $0x9] sm:$0xff]  ;;  %v479_v15 = vpack.c.bf16 %v448_v9, %v447_v8  ;;  %s2185_s25 = sshll.u32 %s3297_s16, 8 }
   0xf   : > { %238 = vst.msk [vmem:[#allocation2 + $0xc0] sm:$0xff] %vm212_vm0, %v2351_v0  ;;  %239 = vst.msk [vmem:[#allocation2 + $0xc8] sm:$0xff] %vm212_vm0, %v2351_v0  ;;  %s2560_s24 = scalar_lea.vmem %s3291_s0, %s2184_s21  ;;  %v383_v39 = vld [vmem:[#allocation2 + $0x7] sm:$0xff]  ;;  %v384_v40 = vld [vmem:[#allocation2 + $0xf] sm:$0xff]  ;;  %1579 = vmatpush1.bf16.msra.mxu0 %v2565_v4  ;;  %2309 = vmatpush1.bf16.msra.mxu1 %v2565_v4  ;;  %s3166_s6 = scalar_lea.vmem %s3295_s4, %s2184_s21 }
  0x10   : > { %240 = vst.msk [vmem:[#allocation2 + $0xd0] sm:$0xff] %vm212_vm0, %v2351_v0  ;;  %242 = vst.msk [vmem:[#allocation2 + $0xe0] sm:$0xff] %vm212_vm0, %v2351_v0  ;;  %v2289_v5 = vld [vmem:[%s2560_s24 + $0x38] sm:$0xff]   ;;  %v2220_v6 = vld [vmem:[%s2560_s24] sm:$0xff]   ;;  %511 = vrot.lane.b32.xlu0 %v479_v15, %s2353_s27  ;;  %1580 = vmatprep.subr.bf16.mxu0 %v2352_v1  ;;  %v415_v48 = vpack.c.bf16 %v384_v40, %v383_v39 }
  0x11   : > { %243 = vst.msk [vmem:[#allocation2 + $0xe8] sm:$0xff] %vm212_vm0, %v2351_v0  ;;  %244 = vst.msk [vmem:[#allocation2 + $0xf0] sm:$0xff] %vm212_vm0, %v2351_v0  ;;  %v2290_v7 = vld [vmem:[%s2560_s24 + $0x40] sm:$0xff]   ;;  %v2249_v11 = vunpack.c.l.bf16 %v2289_v5  ;;  %v2250_v12 = vunpack.c.h.bf16 %v2289_v5  ;;  %v2221_v13 = vunpack.c.l.bf16 %v2220_v6  ;;  %v2222_v14 = vunpack.c.h.bf16 %v2220_v6  ;;  %v2283_v19 = vld [vmem:[%s2560_s24 + $0x8] sm:$0xff]   ;;  %2301 = vmatprep.subr.bf16.mxu1 %v2352_v1 }
  0x12   : > { %246 = vst.msk [vmem:[#allocation2 + $0x100] sm:$0xff] %vm212_vm0, %v2351_v0  ;;  %247 = vst.msk [vmem:[#allocation2 + $0x108] sm:$0xff] %vm212_vm0, %v2351_v0  ;;  %v2253_v17 = vunpack.c.l.bf16 %v2290_v7  ;;  %v2254_v18 = vunpack.c.h.bf16 %v2290_v7  ;;  %v2291_v20 = vld [vmem:[%s2560_s24 + $0x48] sm:$0xff]   ;;  %v2225_v22 = vunpack.c.l.bf16 %v2283_v19  ;;  %v2226_v23 = vunpack.c.h.bf16 %v2283_v19  ;;  %v2284_v25 = vld [vmem:[%s2560_s24 + $0x10] sm:$0xff]  }
  0x13   : > { %248 = vst.msk [vmem:[#allocation2 + $0x110] sm:$0xff] %vm212_vm0, %v2351_v0  ;;  %250 = vst.msk [vmem:[#allocation2 + $0x120] sm:$0xff] %vm212_vm0, %v2351_v0  ;;  %v2257_v24 = vunpack.c.l.bf16 %v2291_v20  ;;  %v2292_v26 = vld [vmem:[%s2560_s24 + $0x50] sm:$0xff]   ;;  %v2285_v27 = vld [vmem:[%s2560_s24 + $0x18] sm:$0xff]   ;;  %v2258_v28 = vunpack.c.h.bf16 %v2291_v20  ;;  %v2229_v29 = vunpack.c.l.bf16 %v2284_v25  ;;  %v2230_v30 = vunpack.c.h.bf16 %v2284_v25  ;;  %1581 = vmatpush1.bf16.msra.mxu0 %v2337_v41  ;;  %2310 = vmatpush1.bf16.msra.mxu1 %v2337_v41 }
  0x14   : > { %251 = vst.msk [vmem:[#allocation2 + $0x128] sm:$0xff] %vm212_vm0, %v2351_v0  ;;  %252 = vst.msk [vmem:[#allocation2 + $0x130] sm:$0xff] %vm212_vm0, %v2351_v0  ;;  %v2261_v31 = vunpack.c.l.bf16 %v2292_v26  ;;  %v2293_v32 = vld [vmem:[%s2560_s24 + $0x58] sm:$0xff]   ;;  %v2286_v33 = vld [vmem:[%s2560_s24 + $0x20] sm:$0xff]   ;;  %v2262_v35 = vunpack.c.h.bf16 %v2292_v26  ;;  %v2233_v36 = vunpack.c.l.bf16 %v2285_v27  ;;  %v2234_v37 = vunpack.c.h.bf16 %v2285_v27  ;;  %1582 = vmatprep.subr.bf16.mxu0 %v2352_v1  ;;  %2302 = vmatprep.subr.bf16.mxu1 %v2352_v1 }
  0x15   : > { %254 = vst.msk [vmem:[#allocation2 + $0x140] sm:$0xff] %vm212_vm0, %v2351_v0  ;;  %255 = vst.msk [vmem:[#allocation2 + $0x148] sm:$0xff] %vm212_vm0, %v2351_v0  ;;  %v2294_v34 = vld [vmem:[%s2560_s24 + $0x60] sm:$0xff]   ;;  %v2265_v38 = vunpack.c.l.bf16 %v2293_v32  ;;  %v2266_v42 = vunpack.c.h.bf16 %v2293_v32  ;;  %v2237_v43 = vunpack.c.l.bf16 %v2286_v33  ;;  %v2238_v44 = vunpack.c.h.bf16 %v2286_v33  ;;  %v2287_v46 = vld [vmem:[%s2560_s24 + $0x28] sm:$0xff]  }
  0x16   : > { %256 = vst.msk [vmem:[#allocation2 + $0x150] sm:$0xff] %vm212_vm0, %v2351_v0  ;;  %258 = vst.msk [vmem:[#allocation2 + $0x160] sm:$0xff] %vm212_vm0, %v2351_v0  ;;  %v2269_v45 = vunpack.c.l.bf16 %v2294_v34  ;;  %v2270_v47 = vunpack.c.h.bf16 %v2294_v34  ;;  %v2241_v49 = vunpack.c.l.bf16 %v2287_v46  ;;  %v2295_v50 = vld [vmem:[%s2560_s24 + $0x68] sm:$0xff]   ;;  %v2242_v51 = vunpack.c.h.bf16 %v2287_v46 }
  0x17   : > { %259 = vst.msk [vmem:[#allocation2 + $0x168] sm:$0xff] %vm212_vm0, %v2351_v0  ;;  %260 = vst.msk [vmem:[#allocation2 + $0x170] sm:$0xff] %vm212_vm0, %v2351_v0  ;;  %v2273_v52 = vunpack.c.l.bf16 %v2295_v50  ;;  %v2274_v53 = vunpack.c.h.bf16 %v2295_v50  ;;  %1583 = vmatpush1.bf16.msra.mxu0 %v2338_v54  ;;  %2311 = vmatpush1.bf16.msra.mxu1 %v2338_v54 }
  0x18   : > { %262 = vst.msk [vmem:[#allocation2 + $0x180] sm:$0xff] %vm212_vm0, %v2351_v0  ;;  %263 = vst.msk [vmem:[#allocation2 + $0x188] sm:$0xff] %vm212_vm0, %v2351_v0  ;;  %1584 = vmatprep.subr.bf16.mxu0 %v2352_v1  ;;  %2303 = vmatprep.subr.bf16.mxu1 %v2352_v1 }
  0x19   : > { %264 = vst.msk [vmem:[#allocation2 + $0x190] sm:$0xff] %vm212_vm0, %v2351_v0  ;;  %266 = vst.msk [vmem:[#allocation2 + $0x1a0] sm:$0xff] %vm212_vm0, %v2351_v0 }
  0x1a   : > { %267 = vst.msk [vmem:[#allocation2 + $0x1a8] sm:$0xff] %vm212_vm0, %v2351_v0  ;;  %268 = vst.msk [vmem:[#allocation2 + $0x1b0] sm:$0xff] %vm212_vm0, %v2351_v0 }
  0x1b   : > { %270 = vst.msk [vmem:[#allocation2 + $0x1c0] sm:$0xff] %vm212_vm0, %v2351_v0  ;;  %271 = vst.msk [vmem:[#allocation2 + $0x1c8] sm:$0xff] %vm212_vm0, %v2351_v0 }
  0x1c   : > { %272 = vst.msk [vmem:[#allocation2 + $0x1d0] sm:$0xff] %vm212_vm0, %v2351_v0  ;;  %274 = vst.msk [vmem:[#allocation2 + $0x1e0] sm:$0xff] %vm212_vm0, %v2351_v0 }
  0x1d   : > { %275 = vst.msk [vmem:[#allocation2 + $0x1e8] sm:$0xff] %vm212_vm0, %v2351_v0  ;;  %276 = vst.msk [vmem:[#allocation2 + $0x1f0] sm:$0xff] %vm212_vm0, %v2351_v0 }
  0x1e   : > { %278 = vst.msk [vmem:[#allocation2 + $0x200] sm:$0xff] %vm212_vm0, %v2351_v0  ;;  %279 = vst.msk [vmem:[#allocation2 + $0x208] sm:$0xff] %vm212_vm0, %v2351_v0 }
  0x1f   : > { %280 = vst.msk [vmem:[#allocation2 + $0x210] sm:$0xff] %vm212_vm0, %v2351_v0  ;;  %282 = vst.msk [vmem:[#allocation2 + $0x220] sm:$0xff] %vm212_vm0, %v2351_v0 }
  0x20   : > { %283 = vst.msk [vmem:[#allocation2 + $0x228] sm:$0xff] %vm212_vm0, %v2351_v0  ;;  %284 = vst.msk [vmem:[#allocation2 + $0x230] sm:$0xff] %vm212_vm0, %v2351_v0 }
  0x21   : > { %217 = vst.msk [vmem:[#allocation2 + $0x18] sm:$0x1] %vm216_vm1, %v2351_v0  ;;  %221 = vst.msk [vmem:[#allocation2 + $0x38] sm:$0x1] %vm216_vm1, %v2351_v0 }
  0x22   : > { %225 = vst.msk [vmem:[#allocation2 + $0x58] sm:$0x1] %vm216_vm1, %v2351_v0  ;;  %229 = vst.msk [vmem:[#allocation2 + $0x78] sm:$0x1] %vm216_vm1, %v2351_v0 }
  0x23   : > { %233 = vst.msk [vmem:[#allocation2 + $0x98] sm:$0x1] %vm216_vm1, %v2351_v0  ;;  %237 = vst.msk [vmem:[#allocation2 + $0xb8] sm:$0x1] %vm216_vm1, %v2351_v0 }
  0x24   : > { %241 = vst.msk [vmem:[#allocation2 + $0xd8] sm:$0x1] %vm216_vm1, %v2351_v0  ;;  %245 = vst.msk [vmem:[#allocation2 + $0xf8] sm:$0x1] %vm216_vm1, %v2351_v0 }
  0x25   : > { %249 = vst.msk [vmem:[#allocation2 + $0x118] sm:$0x1] %vm216_vm1, %v2351_v0  ;;  %253 = vst.msk [vmem:[#allocation2 + $0x138] sm:$0x1] %vm216_vm1, %v2351_v0 }
  0x26   : > { %257 = vst.msk [vmem:[#allocation2 + $0x158] sm:$0x1] %vm216_vm1, %v2351_v0  ;;  %261 = vst.msk [vmem:[#allocation2 + $0x178] sm:$0x1] %vm216_vm1, %v2351_v0 }
  0x27   : > { %265 = vst.msk [vmem:[#allocation2 + $0x198] sm:$0x1] %vm216_vm1, %v2351_v0  ;;  %269 = vst.msk [vmem:[#allocation2 + $0x1b8] sm:$0x1] %vm216_vm1, %v2351_v0 }
  0x28   : > { %273 = vst.msk [vmem:[#allocation2 + $0x1d8] sm:$0x1] %vm216_vm1, %v2351_v0  ;;  %277 = vst.msk [vmem:[#allocation2 + $0x1f8] sm:$0x1] %vm216_vm1, %v2351_v0  ;;  %v577_v16 = vld [vmem:[#allocation2 + $0x11] sm:$0xff] }
  0x29   : > { %281 = vst.msk [vmem:[#allocation2 + $0x218] sm:$0x1] %vm216_vm1, %v2351_v0  ;;  %285 = vst.msk [vmem:[#allocation2 + $0x238] sm:$0x1] %vm216_vm1, %v2351_v0  ;;  %v608_v21 = vpack.c.bf16 %v577_v16, %v576_v10 }
  0x2a   : > { %365 = vst.msk [vmem:[#allocation2 + $0x108] sm:$0xff] %vm212_vm0, %v2249_v11  ;;  %366 = vst.msk [vmem:[#allocation2 + $0x110] sm:$0xff] %vm212_vm0, %v2250_v12 }
  0x2b   : > { %351 = vst.msk [vmem:[#allocation2 + $0x28] sm:$0xff] %vm212_vm0, %v2221_v13  ;;  %352 = vst.msk [vmem:[#allocation2 + $0x30] sm:$0xff] %vm212_vm0, %v2222_v14  ;;  %640 = vrot.lane.b32.xlu1 %v608_v21, %s2354_s28 }
  0x2c   : > { %367 = vst.msk [vmem:[#allocation2 + $0x128] sm:$0xff] %vm212_vm0, %v2253_v17  ;;  %368 = vst.msk [vmem:[#allocation2 + $0x130] sm:$0xff] %vm212_vm0, %v2254_v18 }
  0x2d   : > { %353 = vst.msk [vmem:[#allocation2 + $0x48] sm:$0xff] %vm212_vm0, %v2225_v22  ;;  %354 = vst.msk [vmem:[#allocation2 + $0x50] sm:$0xff] %vm212_vm0, %v2226_v23 }
  0x2e   : > { %369 = vst.msk [vmem:[#allocation2 + $0x148] sm:$0xff] %vm212_vm0, %v2257_v24  ;;  %370 = vst.msk [vmem:[#allocation2 + $0x150] sm:$0xff] %vm212_vm0, %v2258_v28 }
  0x2f   : > { %355 = vst.msk [vmem:[#allocation2 + $0x68] sm:$0xff] %vm212_vm0, %v2229_v29  ;;  %356 = vst.msk [vmem:[#allocation2 + $0x70] sm:$0xff] %vm212_vm0, %v2230_v30 }
  0x30   : > { %371 = vst.msk [vmem:[#allocation2 + $0x168] sm:$0xff] %vm212_vm0, %v2261_v31  ;;  %372 = vst.msk [vmem:[#allocation2 + $0x170] sm:$0xff] %vm212_vm0, %v2262_v35 }
  0x31   : > { %357 = vst.msk [vmem:[#allocation2 + $0x88] sm:$0xff] %vm212_vm0, %v2233_v36  ;;  %358 = vst.msk [vmem:[#allocation2 + $0x90] sm:$0xff] %vm212_vm0, %v2234_v37  ;;  %v463_v55 = vld [vmem:[#allocation2 + $0x108] sm:$0xff]  ;;  %v464_v56 = vld [vmem:[#allocation2 + $0x110] sm:$0xff] }
  0x32   : > { %373 = vst.msk [vmem:[#allocation2 + $0x188] sm:$0xff] %vm212_vm0, %v2265_v38  ;;  %374 = vst.msk [vmem:[#allocation2 + $0x190] sm:$0xff] %vm212_vm0, %v2266_v42  ;;  %v592_v57 = vld [vmem:[#allocation2 + $0x109] sm:$0xff]  ;;  %v487_v58 = vpack.c.bf16 %v464_v56, %v463_v55  ;;  %v593_v59 = vld [vmem:[#allocation2 + $0x111] sm:$0xff] }
  0x33   : > { %359 = vst.msk [vmem:[#allocation2 + $0xa8] sm:$0xff] %vm212_vm0, %v2237_v43  ;;  %360 = vst.msk [vmem:[#allocation2 + $0xb0] sm:$0xff] %vm212_vm0, %v2238_v44  ;;  %v705_v60 = vld [vmem:[#allocation2 + $0x27] sm:$0xff]  ;;  %v706_v61 = vld [vmem:[#allocation2 + $0x2f] sm:$0xff]  ;;  %v616_v62 = vpack.c.bf16 %v593_v59, %v592_v57 }
  0x34   : > { %375 = vst.msk [vmem:[#allocation2 + $0x1a8] sm:$0xff] %vm212_vm0, %v2269_v45  ;;  %376 = vst.msk [vmem:[#allocation2 + $0x1b0] sm:$0xff] %vm212_vm0, %v2270_v47  ;;  %v737_v63 = vpack.c.bf16 %v706_v61, %v705_v60  ;;  %v721_v0 = vld [vmem:[#allocation2 + $0x127] sm:$0xff]  ;;  %v722_v2 = vld [vmem:[#allocation2 + $0x12f] sm:$0xff]  ;;  %527 = vrot.lane.b32.xlu0 %v487_v58, %s2353_s27 }
  0x35   : > { %431 = vst.msk [vmem:[#allocation3] sm:$0xff] %vm212_vm0, %v415_v48  ;;  %361 = vst.msk [vmem:[#allocation2 + $0xc8] sm:$0xff] %vm212_vm0, %v2241_v49  ;;  %v745_v3 = vpack.c.bf16 %v722_v2, %v721_v0  ;;  %656 = vrot.lane.b32.xlu1 %v616_v62, %s2354_s28  ;;  %v834_v4 = vld [vmem:[#allocation2 + $0x28] sm:$0xff]  ;;  %v835_v5 = vld [vmem:[#allocation2 + $0x30] sm:$0xff] }
  0x36   : > { %362 = vst.msk [vmem:[#allocation2 + $0xd0] sm:$0xff] %vm212_vm0, %v2242_v51  ;;  %377 = vst.msk [vmem:[#allocation2 + $0x1c8] sm:$0xff] %vm212_vm0, %v2273_v52  ;;  %v850_v6 = vld [vmem:[#allocation2 + $0x128] sm:$0xff]  ;;  %v851_v7 = vld [vmem:[#allocation2 + $0x130] sm:$0xff]  ;;  %v2630_v8 = vpack.c.bf16 %v835_v5, %v834_v4 }
  0x37   : > { %378 = vst.msk [vmem:[#allocation2 + $0x1d0] sm:$0xff] %vm212_vm0, %v2274_v53  ;;  %432 = vst.msk [vmem:[#allocation3 + $0x10] sm:$0xff] %vm212_vm0, %v737_v63  ;;  %v963_v9 = vld [vmem:[#allocation2 + $0x29] sm:$0xff]  ;;  %v964_v10 = vld [vmem:[#allocation2 + $0x31] sm:$0xff]  ;;  %v2633_v11 = vpack.c.bf16 %v851_v7, %v850_v6 }
  0x38   : > { %440 = vst.msk [vmem:[#allocation3 + $0x90] sm:$0xff] %vm212_vm0, %v745_v3  ;;  %769 = vrot.lane.b32.xlu0 %v737_v63, %s2355_s7  ;;  %v965_v12 = vld [vmem:[#allocation2 + $0x49] sm:$0xff]  ;;  %v966_v13 = vld [vmem:[#allocation2 + $0x51] sm:$0xff]  ;;  %v2641_v20 = vpack.c.bf16 %v964_v10, %v963_v9 }
  0x39   : > { %785 = vrot.lane.b32.xlu1 %v745_v3, %s2355_s7  ;;  %v981_v14 = vld [vmem:[#allocation2 + $0x149] sm:$0xff]  ;;  %v980_v16 = vld [vmem:[#allocation2 + $0x131] sm:$0xff]  ;;  %v2635_v17 = vpack.c.bf16 %v966_v13, %v965_v12 }
  0x3a   : > { %v979_v15 = vld [vmem:[#allocation2 + $0x129] sm:$0xff]  ;;  %v982_v18 = vld [vmem:[#allocation2 + $0x151] sm:$0xff] }
  0x3b   : > { %v2637_v19 = vpack.c.bf16 %v982_v18, %v981_v14  ;;  %v1093_v21 = vld [vmem:[#allocation2 + $0x47] sm:$0xff]  ;;  %v1094_v22 = vld [vmem:[#allocation2 + $0x4f] sm:$0xff]  ;;  %1399 = vst.msk [vmem:[#allocation3 + $0x8] sm:$0xff] %vm212_vm0, %v2635_v17  ;;  %v2647_v23 = vpack.c.bf16 %v980_v16, %v979_v15  ;;  %v2341_v6 = vld [vmem:[%s3292_s1 + $0x38] sm:$0xff]  }
  0x3c   : > { %898 = vrot.lane.b32.xlu0 %v2630_v8, %s2356_s8  ;;  %v967_v24 = vld [vmem:[#allocation2 + $0x69] sm:$0xff]  ;;  %v968_v25 = vld [vmem:[#allocation2 + $0x71] sm:$0xff]  ;;  %v2657_v32 = vpack.c.bf16 %v1094_v22, %v1093_v21 }
  0x3d   : > { %914 = vrot.lane.b32.xlu1 %v2633_v11, %s2356_s8  ;;  %v983_v26 = vld [vmem:[#allocation2 + $0x169] sm:$0xff]  ;;  %1407 = vst.msk [vmem:[#allocation3 + $0x88] sm:$0xff] %vm212_vm0, %v2637_v19  ;;  %v2651_v29 = vpack.c.bf16 %v968_v25, %v967_v24  ;;  %v984_v30 = vld [vmem:[#allocation2 + $0x171] sm:$0xff] }
  0x3e   : > { %v1109_v27 = vld [vmem:[#allocation2 + $0x147] sm:$0xff]  ;;  %v1110_v28 = vld [vmem:[#allocation2 + $0x14f] sm:$0xff]  ;;  %v2653_v31 = vpack.c.bf16 %v984_v30, %v983_v26 }
  0x3f   : > { %v1222_v33 = vld [vmem:[#allocation2 + $0x48] sm:$0xff]  ;;  %v1223_v34 = vld [vmem:[#allocation2 + $0x50] sm:$0xff]  ;;  %1400 = vst.msk [vmem:[#allocation3 + $0x18] sm:$0xff] %vm212_vm0, %v2651_v29  ;;  %v2663_v35 = vpack.c.bf16 %v1110_v28, %v1109_v27 }
  0x40   : > { %1027 = vrot.lane.b32.xlu0 %v2641_v20, %s2357_s9  ;;  %v969_v36 = vld [vmem:[#allocation2 + $0x89] sm:$0xff]  ;;  %v970_v37 = vld [vmem:[#allocation2 + $0x91] sm:$0xff]  ;;  %1408 = vst.msk [vmem:[#allocation3 + $0x98] sm:$0xff] %vm212_vm0, %v2653_v31  ;;  %v2673_v44 = vpack.c.bf16 %v1223_v34, %v1222_v33 }
  0x41   : > { %1043 = vrot.lane.b32.xlu1 %v2647_v23, %s2357_s9  ;;  %v985_v38 = vld [vmem:[#allocation2 + $0x189] sm:$0xff]  ;;  %v2667_v41 = vpack.c.bf16 %v970_v37, %v969_v36  ;;  %v986_v42 = vld [vmem:[#allocation2 + $0x191] sm:$0xff] }
  0x42   : > { %v1238_v39 = vld [vmem:[#allocation2 + $0x148] sm:$0xff]  ;;  %v1239_v40 = vld [vmem:[#allocation2 + $0x150] sm:$0xff]  ;;  %v2669_v43 = vpack.c.bf16 %v986_v42, %v985_v38 }
  0x43   : > { %1401 = vst.msk [vmem:[#allocation3 + $0x28] sm:$0xff] %vm212_vm0, %v2667_v41  ;;  %v2679_v45 = vpack.c.bf16 %v1239_v40, %v1238_v39  ;;  %v399_v46 = vld [vmem:[#allocation2 + $0x107] sm:$0xff]  ;;  %v400_v47 = vld [vmem:[#allocation2 + $0x10f] sm:$0xff] }
  0x44   : > { %1157 = vrot.lane.b32.xlu0 %v2657_v32, %s2358_s10  ;;  %v971_v48 = vld [vmem:[#allocation2 + $0xa9] sm:$0xff]  ;;  %1409 = vst.msk [vmem:[#allocation3 + $0xa8] sm:$0xff] %vm212_vm0, %v2669_v43  ;;  %v2683_v49 = vpack.c.bf16 %v400_v47, %v399_v46  ;;  %v972_v50 = vld [vmem:[#allocation2 + $0xb1] sm:$0xff] }
  0x45   : > { %1173 = vrot.lane.b32.xlu1 %v2663_v35, %s2358_s10  ;;  %v987_v51 = vld [vmem:[#allocation2 + $0x1a9] sm:$0xff]  ;;  %v988_v52 = vld [vmem:[#allocation2 + $0x1b1] sm:$0xff]  ;;  %v2685_v53 = vpack.c.bf16 %v972_v50, %v971_v48 }
  0x46   : > { %v2687_v54 = vpack.c.bf16 %v988_v52, %v987_v51  ;;  %v2339_v55 = vld [vmem:[%s3292_s1 + $0x28] sm:$0xff]   ;;  %439 = vst.msk [vmem:[#allocation3 + $0x80] sm:$0xff] %vm212_vm0, %v2683_v49  ;;  %v2340_v62 = vld [vmem:[%s3292_s1 + $0x30] sm:$0xff]   ;;  %v2297_v46 = vld [vmem:[%s2560_s24 + $0x78] sm:$0xff]  }
  0x47   : > { %v1101_v56 = vld [vmem:[#allocation2 + $0xc7] sm:$0xff]  ;;  %v1102_v57 = vld [vmem:[#allocation2 + $0xcf] sm:$0xff]  ;;  %1585 = vmatpush1.bf16.msra.mxu0 %v2339_v55  ;;  %1402 = vst.msk [vmem:[#allocation3 + $0x38] sm:$0xff] %vm212_vm0, %v2685_v53  ;;  %2312 = vmatpush1.bf16.msra.mxu1 %v2339_v55  ;;  %v2281_v48 = vunpack.c.l.bf16 %v2297_v46  ;;  %v2282_v50 = vunpack.c.h.bf16 %v2297_v46 }
  0x48   : > { %1286 = vrot.lane.b32.xlu0 %v2673_v44, %s2359_s13  ;;  %v2696_v58 = vpack.c.bf16 %v1102_v57, %v1101_v56  ;;  %v1117_v59 = vld [vmem:[#allocation2 + $0x1c7] sm:$0xff]  ;;  %v1118_v60 = vld [vmem:[#allocation2 + $0x1cf] sm:$0xff]  ;;  %1410 = vst.msk [vmem:[#allocation3 + $0xb8] sm:$0xff] %vm212_vm0, %v2687_v54  ;;  %1586 = vmatprep.subr.bf16.mxu0 %v2352_v1 }
  0x49   : > { %1302 = vrot.lane.b32.xlu1 %v2679_v45, %s2359_s13  ;;  %v2700_v61 = vpack.c.bf16 %v1118_v60, %v1117_v59  ;;  %2304 = vmatprep.subr.bf16.mxu1 %v2352_v1  ;;  %v1416_v63 = vld [vmem:[#allocation3 + $0x8] sm:$0xff]  ;;  %v974_v3 = vld [vmem:[#allocation2 + $0xd1] sm:$0xff]  ;;  %381 = vst.msk [vmem:[#allocation2 + $0x208] sm:$0xff] %vm212_vm0, %v2281_v48  ;;  %382 = vst.msk [vmem:[#allocation2 + $0x210] sm:$0xff] %vm212_vm0, %v2282_v50 }
  0x4a   : > { %437 = vst.msk [vmem:[#allocation3 + $0x60] sm:$0xff] %vm212_vm0, %v2696_v58  ;;  %v1432_v0 = vld [vmem:[#allocation3 + $0x88] sm:$0xff]  ;;  %2134 = vmatprep.mubr.msk.bf16.mxu0 %vm212_vm0, %v1416_v63  ;;  %v990_v5 = vld [vmem:[#allocation2 + $0x1d1] sm:$0xff] }
  0x4b   : > { %v973_v2 = vld [vmem:[#allocation2 + $0xc9] sm:$0xff]  ;;  %445 = vst.msk [vmem:[#allocation3 + $0xe0] sm:$0xff] %vm212_vm0, %v2700_v61  ;;  %1587 = vmatpush1.bf16.msra.mxu0 %v2340_v62  ;;  %2313 = vmatpush1.bf16.msra.mxu1 %v2340_v62 }
  0x4c   : > { %513 = vrot.lane.b32.xlu0 %v2630_v8, %s2353_s27  ;;  %v989_v4 = vld [vmem:[#allocation2 + $0x1c9] sm:$0xff]  ;;  %v2723_v7 = vpack.c.bf16 %v974_v3, %v973_v2  ;;  %1588 = vmatprep.subr.bf16.mxu0 %v2352_v1 }
  0x4d   : > { %529 = vrot.lane.b32.xlu1 %v2633_v11, %s2353_s27  ;;  %v2725_v9 = vpack.c.bf16 %v990_v5, %v989_v4  ;;  %v2288_v10 = vld [vmem:[%s2560_s24 + $0x30] sm:$0xff]   ;;  %2305 = vmatprep.subr.bf16.mxu1 %v2352_v1  ;;  %v2342_v11 = vld [vmem:[%s3292_s1 + $0x40] sm:$0xff]   ;;  %v1224_v37 = vld [vmem:[#allocation2 + $0x68] sm:$0xff] }
  0x4e   : > { %v2296_v12 = vld [vmem:[%s2560_s24 + $0x70] sm:$0xff]   ;;  %v2245_v8 = vunpack.c.l.bf16 %v2288_v10  ;;  %v2246_v13 = vunpack.c.h.bf16 %v2288_v10  ;;  %2142 = vmatprep.mubr.msk.bf16.mxu1 %vm212_vm0, %v1432_v0  ;;  %1403 = vst.msk [vmem:[#allocation3 + $0x48] sm:$0xff] %vm212_vm0, %v2723_v7  ;;  %v387_v25 = vld [vmem:[#allocation2 + $0x47] sm:$0xff] }
  0x4f   : > { %v2277_v14 = vunpack.c.l.bf16 %v2296_v12  ;;  %v2278_v15 = vunpack.c.h.bf16 %v2296_v12  ;;  %1411 = vst.msk [vmem:[#allocation3 + $0xc8] sm:$0xff] %vm212_vm0, %v2725_v9  ;;  %1589 = vmatpush1.bf16.msra.mxu0 %v2341_v6  ;;  %2314 = vmatpush1.bf16.msra.mxu1 %v2341_v6  ;;  %v1111_v26 = vld [vmem:[#allocation2 + $0x167] sm:$0xff]  ;;  %v1112_v27 = vld [vmem:[#allocation2 + $0x16f] sm:$0xff] }
  0x50   : > { %642 = vrot.lane.b32.xlu0 %v2641_v20, %s2354_s28  ;;  %363 = vst.msk [vmem:[#allocation2 + $0xe8] sm:$0xff] %vm212_vm0, %v2245_v8  ;;  %364 = vst.msk [vmem:[#allocation2 + $0xf0] sm:$0xff] %vm212_vm0, %v2246_v13  ;;  %1590 = vmatprep.subr.bf16.mxu0 %v2352_v1  ;;  %v388_v28 = vld [vmem:[#allocation2 + $0x4f] sm:$0xff]  ;;  %v1134_v36 = vpack.c.bf16 %v1112_v27, %v1111_v26  ;;  %v1113_v0 = vld [vmem:[#allocation2 + $0x187] sm:$0xff] }
  0x51   : > { %379 = vst.msk [vmem:[#allocation2 + $0x1e8] sm:$0xff] %vm212_vm0, %v2277_v14  ;;  %380 = vst.msk [vmem:[#allocation2 + $0x1f0] sm:$0xff] %vm212_vm0, %v2278_v15  ;;  %658 = vrot.lane.b32.xlu1 %v2647_v23, %s2354_s28  ;;  %2306 = vmatprep.subr.bf16.mxu1 %v2352_v1  ;;  %v1095_v1 = vld [vmem:[#allocation2 + $0x67] sm:$0xff]  ;;  %v1096_v23 = vld [vmem:[#allocation2 + $0x6f] sm:$0xff]  ;;  %v417_v30 = vpack.c.bf16 %v388_v28, %v387_v25 }
  0x52   : > { %v404_v33 = vld [vmem:[#allocation2 + $0x14f] sm:$0xff]  ;;  %v1126_v34 = vpack.c.bf16 %v1096_v23, %v1095_v1  ;;  %v391_v1 = vld [vmem:[#allocation2 + $0x87] sm:$0xff] }
  0x53   : > { %1591 = vmatpush1.bf16.msra.mxu0 %v2342_v11  ;;  %2315 = vmatpush1.bf16.msra.mxu1 %v2342_v11  ;;  %v1225_v38 = vld [vmem:[#allocation2 + $0x70] sm:$0xff]  ;;  %433 = vst.msk [vmem:[#allocation3 + $0x20] sm:$0xff] %vm212_vm0, %v417_v30  ;;  %v1240_v39 = vld [vmem:[#allocation2 + $0x168] sm:$0xff] }
  0x54   : > { %771 = vrot.lane.b32.xlu0 %v2657_v32, %s2355_s7  ;;  %v403_v32 = vld [vmem:[#allocation2 + $0x147] sm:$0xff]  ;;  %v1241_v40 = vld [vmem:[#allocation2 + $0x170] sm:$0xff]  ;;  %v1255_v42 = vpack.c.bf16 %v1225_v38, %v1224_v37 }
  0x55   : > { %787 = vrot.lane.b32.xlu1 %v2663_v35, %s2355_s7  ;;  %v425_v35 = vpack.c.bf16 %v404_v33, %v403_v32  ;;  %v1263_v47 = vpack.c.bf16 %v1241_v40, %v1240_v39  ;;  %v390_v60 = vld [vmem:[#allocation2 + $0x6f] sm:$0xff]  ;;  %v1099_v26 = vld [vmem:[#allocation2 + $0xa7] sm:$0xff] }
  0x56   : > { %v1098_v63 = vld [vmem:[#allocation2 + $0x8f] sm:$0xff]  ;;  %v1115_v28 = vld [vmem:[#allocation2 + $0x1a7] sm:$0xff] }
  0x57   : > { %v1103_v16 = vld [vmem:[#allocation2 + $0xe7] sm:$0xff]  ;;  %v1104_v18 = vld [vmem:[#allocation2 + $0xef] sm:$0xff]  ;;  %441 = vst.msk [vmem:[#allocation3 + $0xa0] sm:$0xff] %vm212_vm0, %v425_v35 }
  0x58   : > { %v1119_v20 = vld [vmem:[#allocation2 + $0x1e7] sm:$0xff]  ;;  %900 = vrot.lane.b32.xlu0 %v2673_v44, %s2356_s8  ;;  %v2755_v21 = vpack.c.bf16 %v1104_v18, %v1103_v16  ;;  %v1120_v22 = vld [vmem:[#allocation2 + $0x1ef] sm:$0xff] }
  0x59   : > { %916 = vrot.lane.b32.xlu1 %v2679_v45, %s2356_s8  ;;  %v2759_v24 = vpack.c.bf16 %v1120_v22, %v1119_v20  ;;  %v975_v51 = vld [vmem:[#allocation2 + $0xe9] sm:$0xff]  ;;  %v976_v52 = vld [vmem:[#allocation2 + $0xf1] sm:$0xff] }
  0x5a   : > { %438 = vst.msk [vmem:[#allocation3 + $0x70] sm:$0xff] %vm212_vm0, %v2755_v21  ;;  %v2778_v55 = vpack.c.bf16 %v976_v52, %v975_v51  ;;  %v991_v56 = vld [vmem:[#allocation2 + $0x1e9] sm:$0xff]  ;;  %v992_v57 = vld [vmem:[#allocation2 + $0x1f1] sm:$0xff] }
  0x5b   : > { %446 = vst.msk [vmem:[#allocation3 + $0xf0] sm:$0xff] %vm212_vm0, %v2759_v24  ;;  %v2780_v59 = vpack.c.bf16 %v992_v57, %v991_v56  ;;  %v1114_v2 = vld [vmem:[#allocation2 + $0x18f] sm:$0xff]  ;;  %v393_v52 = vld [vmem:[#allocation2 + $0xa7] sm:$0xff] }
  0x5c   : > { %1029 = vrot.lane.b32.xlu0 %v2635_v17, %s2357_s9  ;;  %1404 = vst.msk [vmem:[#allocation3 + $0x58] sm:$0xff] %vm212_vm0, %v2778_v55  ;;  %v406_v3 = vld [vmem:[#allocation2 + $0x16f] sm:$0xff]  ;;  %v1135_v5 = vpack.c.bf16 %v1114_v2, %v1113_v0 }
  0x5d   : > { %1045 = vrot.lane.b32.xlu1 %v2637_v19, %s2357_s9  ;;  %1412 = vst.msk [vmem:[#allocation3 + $0xd8] sm:$0xff] %vm212_vm0, %v2780_v59  ;;  %v1226_v6 = vld [vmem:[#allocation2 + $0x88] sm:$0xff]  ;;  %v1227_v10 = vld [vmem:[#allocation2 + $0x90] sm:$0xff] }
  0x5e   : > { %v1242_v12 = vld [vmem:[#allocation2 + $0x188] sm:$0xff]  ;;  %v1243_v8 = vld [vmem:[#allocation2 + $0x190] sm:$0xff]  ;;  %v1256_v13 = vpack.c.bf16 %v1227_v10, %v1226_v6 }
  0x5f   : > { %v1264_v14 = vpack.c.bf16 %v1243_v8, %v1242_v12  ;;  %v977_v15 = vld [vmem:[#allocation2 + $0x109] sm:$0xff]  ;;  %v978_v11 = vld [vmem:[#allocation2 + $0x111] sm:$0xff] }
  0x60   : > { %1159 = vrot.lane.b32.xlu0 %v1126_v34, %s2358_s10  ;;  %v2808_v16 = vpack.c.bf16 %v978_v11, %v977_v15  ;;  %v993_v18 = vld [vmem:[#allocation2 + $0x209] sm:$0xff]  ;;  %v994_v20 = vld [vmem:[#allocation2 + $0x211] sm:$0xff] }
  0x61   : > { %1175 = vrot.lane.b32.xlu1 %v1134_v36, %s2358_s10  ;;  %v2810_v22 = vpack.c.bf16 %v994_v20, %v993_v18  ;;  %v392_v23 = vld [vmem:[#allocation2 + $0x8f] sm:$0xff]  ;;  %v1418_v11 = vld [vmem:[#allocation3 + $0x18] sm:$0xff] }
  0x62   : > { %1405 = vst.msk [vmem:[#allocation3 + $0x68] sm:$0xff] %vm212_vm0, %v2808_v16  ;;  %v419_v25 = vpack.c.bf16 %v392_v23, %v391_v1  ;;  %v1100_v27 = vld [vmem:[#allocation2 + $0xaf] sm:$0xff]  ;;  %v1434_v1 = vld [vmem:[#allocation3 + $0x98] sm:$0xff] }
  0x63   : > { %1413 = vst.msk [vmem:[#allocation3 + $0xe8] sm:$0xff] %vm212_vm0, %v2810_v22  ;;  %v1116_v30 = vld [vmem:[#allocation2 + $0x1af] sm:$0xff] }
  0x64   : > { %1288 = vrot.lane.b32.xlu0 %v1255_v42, %s2359_s13  ;;  %435 = vst.msk [vmem:[#allocation3 + $0x40] sm:$0xff] %vm212_vm0, %v419_v25  ;;  %v408_v32 = vld [vmem:[#allocation2 + $0x18f] sm:$0xff] }
  0x65   : > { %1304 = vrot.lane.b32.xlu1 %v1263_v47, %s2359_s13  ;;  %v1228_v35 = vld [vmem:[#allocation2 + $0xa8] sm:$0xff]  ;;  %v1245_v38 = vld [vmem:[#allocation2 + $0x1b0] sm:$0xff] }
  0x66   : > { %v1244_v37 = vld [vmem:[#allocation2 + $0x1a8] sm:$0xff]  ;;  %v1233_v25 = vld [vmem:[#allocation2 + $0xf0] sm:$0xff] }
  0x67   : > { %v2836_v40 = vpack.c.bf16 %v1245_v38, %v1244_v37  ;;  %v1246_v2 = vld [vmem:[#allocation2 + $0x1c8] sm:$0xff] }
  0x68   : > { %515 = vrot.lane.b32.xlu0 %v2673_v44, %s2353_s27  ;;  %v389_v44 = vld [vmem:[#allocation2 + $0x67] sm:$0xff] }
  0x69   : > { %531 = vrot.lane.b32.xlu1 %v2679_v45, %s2353_s27  ;;  %v418_v62 = vpack.c.bf16 %v390_v60, %v389_v44  ;;  %v1097_v45 = vld [vmem:[#allocation2 + $0x87] sm:$0xff]  ;;  %v410_v60 = vld [vmem:[#allocation2 + $0x1af] sm:$0xff] }
  0x6a   : > { %v409_v44 = vld [vmem:[#allocation2 + $0x1a7] sm:$0xff] }
  0x6b   : > { %434 = vst.msk [vmem:[#allocation3 + $0x30] sm:$0xff] %vm212_vm0, %v418_v62  ;;  %v428_v62 = vpack.c.bf16 %v410_v60, %v409_v44  ;;  %v1232_v23 = vld [vmem:[#allocation2 + $0xe8] sm:$0xff] }
  0x6c   : > { %644 = vrot.lane.b32.xlu0 %v2635_v17, %s2354_s28  ;;  %v405_v17 = vld [vmem:[#allocation2 + $0x167] sm:$0xff] }
  0x6d   : > { %660 = vrot.lane.b32.xlu1 %v2637_v19, %s2354_s28  ;;  %v1127_v19 = vpack.c.bf16 %v1098_v63, %v1097_v45  ;;  %v426_v4 = vpack.c.bf16 %v406_v3, %v405_v17  ;;  %v1230_v45 = vld [vmem:[#allocation2 + $0xc8] sm:$0xff]  ;;  %v1231_v63 = vld [vmem:[#allocation2 + $0xd0] sm:$0xff]  ;;  %444 = vst.msk [vmem:[#allocation3 + $0xd0] sm:$0xff] %vm212_vm0, %v428_v62 }
  0x6e   : > { %v1247_v17 = vld [vmem:[#allocation2 + $0x1d0] sm:$0xff] }
  0x6f   : > { %442 = vst.msk [vmem:[#allocation3 + $0xb0] sm:$0xff] %vm212_vm0, %v426_v4  ;;  %v2876_v4 = vpack.c.bf16 %v1247_v17, %v1246_v2 }
  0x70   : > { %773 = vrot.lane.b32.xlu0 %v1126_v34, %s2355_s7  ;;  %v1136_v34 = vpack.c.bf16 %v1116_v30, %v1115_v28  ;;  %v1249_v28 = vld [vmem:[#allocation2 + $0x1f0] sm:$0xff] }
  0x71   : > { %789 = vrot.lane.b32.xlu1 %v1134_v36, %s2355_s7  ;;  %v1229_v36 = vld [vmem:[#allocation2 + $0xb0] sm:$0xff] }
  0x72   : > { %v2833_v39 = vpack.c.bf16 %v1229_v36, %v1228_v35 }
  0x74   : > { %902 = vrot.lane.b32.xlu0 %v1255_v42, %s2356_s8 }
  0x75   : > { %918 = vrot.lane.b32.xlu1 %v1263_v47, %s2356_s8 }
  0x78   : > { %1031 = vrot.lane.b32.xlu0 %v2651_v29, %s2357_s9 }
  0x79   : > { %1047 = vrot.lane.b32.xlu1 %v2653_v31, %s2357_s9 }
  0x7c   : > { %1161 = vrot.lane.b32.xlu0 %v1127_v19, %s2358_s10 }
  0x7d   : > { %1177 = vrot.lane.b32.xlu1 %v1135_v5, %s2358_s10 }
  0x80   : > { %1290 = vrot.lane.b32.xlu0 %v1256_v13, %s2359_s13 }
  0x81   : > { %1306 = vrot.lane.b32.xlu1 %v1264_v14, %s2359_s13 }
  0x84   : > { %517 = vrot.lane.b32.xlu0 %v1255_v42, %s2353_s27  ;;  %v512_v42 = vpop.permute.xlu0 %511 }
  0x85   : > { %533 = vrot.lane.b32.xlu1 %v1263_v47, %s2353_s27  ;;  %560 = vst.msk [vmem:[#allocation3] sm:$0xff] %vm559_vm2, %v512_v42 }
  0x88   : > { %646 = vrot.lane.b32.xlu0 %v2651_v29, %s2354_s28  ;;  %v407_v29 = vld [vmem:[#allocation2 + $0x187] sm:$0xff] }
  0x89   : > { %662 = vrot.lane.b32.xlu1 %v2653_v31, %s2354_s28  ;;  %v1128_v31 = vpack.c.bf16 %v1100_v27, %v1099_v26  ;;  %v427_v33 = vpack.c.bf16 %v408_v32, %v407_v29  ;;  %v1248_v27 = vld [vmem:[#allocation2 + $0x1e8] sm:$0xff]  ;;  %v2920_v29 = vpack.c.bf16 %v1233_v25, %v1232_v23 }
  0x8a   : > { %v2924_v32 = vpack.c.bf16 %v1249_v28, %v1248_v27  ;;  %v1236_v25 = vld [vmem:[#allocation2 + $0x128] sm:$0xff] }
  0x8b   : > { %443 = vst.msk [vmem:[#allocation3 + $0xc0] sm:$0xff] %vm212_vm0, %v427_v33  ;;  %v1252_v28 = vld [vmem:[#allocation2 + $0x228] sm:$0xff] }
  0x8c   : > { %775 = vrot.lane.b32.xlu0 %v1127_v19, %s2355_s7  ;;  %v2872_v19 = vpack.c.bf16 %v1231_v63, %v1230_v45 }
  0x8d   : > { %791 = vrot.lane.b32.xlu1 %v1135_v5, %s2355_s7 }
  0x90   : > { %904 = vrot.lane.b32.xlu0 %v1256_v13, %s2356_s8 }
  0x91   : > { %920 = vrot.lane.b32.xlu1 %v1264_v14, %s2356_s8 }
  0x94   : > { %1033 = vrot.lane.b32.xlu0 %v2667_v41, %s2357_s9 }
  0x95   : > { %1049 = vrot.lane.b32.xlu1 %v2669_v43, %s2357_s9 }
  0x98   : > { %1163 = vrot.lane.b32.xlu0 %v1128_v31, %s2358_s10 }
  0x99   : > { %1179 = vrot.lane.b32.xlu1 %v1136_v34, %s2358_s10 }
  0x9c   : > { %1292 = vrot.lane.b32.xlu0 %v2833_v39, %s2359_s13 }
  0x9d   : > { %1308 = vrot.lane.b32.xlu1 %v2836_v40, %s2359_s13  ;;  %v641_v46 = vpop.permute.xlu1 %640 }
  0x9e   : > { %689 = vst.msk [vmem:[#allocation3] sm:$0xff] %vm688_vm3, %v641_v46 }
  0xa0   : > { %519 = vrot.lane.b32.xlu0 %v1256_v13, %s2353_s27 }
  0xa1   : > { %535 = vrot.lane.b32.xlu1 %v1264_v14, %s2353_s27 }
  0xa4   : > { %648 = vrot.lane.b32.xlu0 %v2667_v41, %s2354_s28  ;;  %v394_v41 = vld [vmem:[#allocation2 + $0xaf] sm:$0xff] }
  0xa5   : > { %664 = vrot.lane.b32.xlu1 %v2669_v43, %s2354_s28  ;;  %v420_v43 = vpack.c.bf16 %v394_v41, %v393_v52  ;;  %v1234_v52 = vld [vmem:[#allocation2 + $0x108] sm:$0xff]  ;;  %v1235_v41 = vld [vmem:[#allocation2 + $0x110] sm:$0xff] }
  0xa6   : > { %v528_v47 = vpop.permute.xlu0 %527  ;;  %v1260_v60 = vpack.c.bf16 %v1235_v41, %v1234_v52 }
  0xa7   : > { %568 = vst.msk [vmem:[#allocation3 + $0x80] sm:$0xff] %vm559_vm2, %v528_v47  ;;  %v657_v48 = vpop.permute.xlu1 %656  ;;  %v1436_v47 = vld [vmem:[#allocation3 + $0xa8] sm:$0xff] }
  0xa8   : > { %697 = vst.msk [vmem:[#allocation3 + $0x80] sm:$0xff] %vm688_vm3, %v657_v48  ;;  %777 = vrot.lane.b32.xlu0 %v1128_v31, %s2355_s7  ;;  %v1121_v48 = vld [vmem:[#allocation2 + $0x207] sm:$0xff] }
  0xa9   : > { %793 = vrot.lane.b32.xlu1 %v1136_v34, %s2355_s7  ;;  %436 = vst.msk [vmem:[#allocation3 + $0x50] sm:$0xff] %vm212_vm0, %v420_v43 }
  0xaa   : > { %v770_v50 = vpop.permute.xlu0 %769 }
  0xab   : > { %818 = vst.msk [vmem:[#allocation3] sm:$0xff] %vm817_vm4, %v770_v50  ;;  %v786_v51 = vpop.permute.xlu1 %785  ;;  %v1122_v50 = vld [vmem:[#allocation2 + $0x20f] sm:$0xff] }
  0xac   : > { %826 = vst.msk [vmem:[#allocation3 + $0x80] sm:$0xff] %vm817_vm4, %v786_v51  ;;  %906 = vrot.lane.b32.xlu0 %v2833_v39, %s2356_s8  ;;  %v1139_v51 = vpack.c.bf16 %v1122_v50, %v1121_v48 }
  0xad   : > { %922 = vrot.lane.b32.xlu1 %v2836_v40, %s2356_s8 }
  0xae   : > { %v899_v56 = vpop.permute.xlu0 %898 }
  0xaf   : > { %947 = vst.msk [vmem:[#allocation3] sm:$0xff] %vm946_vm5, %v899_v56  ;;  %v915_v57 = vpop.permute.xlu1 %914  ;;  %v1250_v56 = vld [vmem:[#allocation2 + $0x208] sm:$0xff] }
  0xb0   : > { %955 = vst.msk [vmem:[#allocation3 + $0x80] sm:$0xff] %vm946_vm5, %v915_v57  ;;  %1035 = vrot.lane.b32.xlu0 %v2685_v53, %s2357_s9  ;;  %v1251_v57 = vld [vmem:[#allocation2 + $0x210] sm:$0xff] }
  0xb1   : > { %1051 = vrot.lane.b32.xlu1 %v2687_v54, %s2357_s9  ;;  %v1268_v62 = vpack.c.bf16 %v1251_v57, %v1250_v56  ;;  %v1426_v57 = vld [vmem:[#allocation3 + $0x58] sm:$0xff] }
  0xb2   : > { %v1028_v0 = vpop.permute.xlu0 %1027 }
  0xb3   : > { %1076 = vst.msk [vmem:[#allocation3] sm:$0xff] %vm1075_vm6, %v1028_v0  ;;  %v1044_v3 = vpop.permute.xlu1 %1043 }
  0xb4   : > { %1084 = vst.msk [vmem:[#allocation3 + $0x80] sm:$0xff] %vm1075_vm6, %v1044_v3  ;;  %1165 = vrot.lane.b32.xlu0 %v2696_v58, %s2358_s10 }
  0xb5   : > { %1181 = vrot.lane.b32.xlu1 %v2700_v61, %s2358_s10 }
  0xb6   : > { %v1158_v5 = vpop.permute.xlu0 %1157 }
  0xb7   : > { %1206 = vst.msk [vmem:[#allocation3] sm:$0xff] %vm1205_vm7, %v1158_v5  ;;  %v1174_v6 = vpop.permute.xlu1 %1173  ;;  %v1422_v5 = vld [vmem:[#allocation3 + $0x38] sm:$0xff] }
  0xb8   : > { %1214 = vst.msk [vmem:[#allocation3 + $0x80] sm:$0xff] %vm1205_vm7, %v1174_v6  ;;  %1294 = vrot.lane.b32.xlu0 %v2872_v19, %s2359_s13  ;;  %v1438_v6 = vld [vmem:[#allocation3 + $0xb8] sm:$0xff] }
  0xb9   : > { %1310 = vrot.lane.b32.xlu1 %v2876_v4, %s2359_s13 }
  0xba   : > { %v1287_v10 = vpop.permute.xlu0 %1286 }
  0xbb   : > { %1335 = vst.msk [vmem:[#allocation3] sm:$0xff] %vm1334_vm8, %v1287_v10  ;;  %v1303_v12 = vpop.permute.xlu1 %1302 }
  0xbc   : > { %1343 = vst.msk [vmem:[#allocation3 + $0x80] sm:$0xff] %vm1334_vm8, %v1303_v12  ;;  %521 = vrot.lane.b32.xlu0 %v2833_v39, %s2353_s27 }
  0xbd   : > { %537 = vrot.lane.b32.xlu1 %v2836_v40, %s2353_s27  ;;  %v1420_v40 = vld [vmem:[#allocation3 + $0x28] sm:$0xff] }
  0xbe   : > { %v514_v8 = vpop.permute.xlu0 %513 }
  0xbf   : > { %561 = vst.msk [vmem:[#allocation3 + $0x10] sm:$0xff] %vm559_vm2, %v514_v8  ;;  %v530_v13 = vpop.permute.xlu1 %529  ;;  %v1365_v8 = vld [vmem:[#allocation2 + $0x129] sm:$0xff] }
  0xc0   : > { %569 = vst.msk [vmem:[#allocation3 + $0x90] sm:$0xff] %vm559_vm2, %v530_v13  ;;  %650 = vrot.lane.b32.xlu0 %v2685_v53, %s2354_s28  ;;  %v1366_v13 = vld [vmem:[#allocation2 + $0x131] sm:$0xff] }
  0xc1   : > { %666 = vrot.lane.b32.xlu1 %v2687_v54, %s2354_s28 }
  0xc2   : > { %v643_v14 = vpop.permute.xlu0 %642  ;;  %v1415_v15 = vld [vmem:[#allocation3] sm:$0xff] }
  0xc3   : > { %690 = vst.msk [vmem:[#allocation3 + $0x10] sm:$0xff] %vm688_vm3, %v643_v14  ;;  %v659_v18 = vpop.permute.xlu1 %658  ;;  %1607 = vmatmul.mubr.bf16.vlgmr.msra.gmra.mrb[0].mxu0 %v1415_v15  ;;  %v1431_v20 = vld [vmem:[#allocation3 + $0x80] sm:$0xff]  ;;  %v1381_v14 = vld [vmem:[#allocation2 + $0x229] sm:$0xff] }
  0xc4   : > { %698 = vst.msk [vmem:[#allocation3 + $0x90] sm:$0xff] %vm688_vm3, %v659_v18  ;;  %1671 = vmatmul.mubr.bf16.vlgmr.msra.gmra.mrb[0].mxu1 %v1431_v20  ;;  %779 = vrot.lane.b32.xlu0 %v2696_v58, %s2355_s7  ;;  %v1108_v20 = vld [vmem:[#allocation2 + $0x12f] sm:$0xff] }
  0xc5   : > { %795 = vrot.lane.b32.xlu1 %v2700_v61, %s2355_s7  ;;  %2135 = vmatprep.mubr.msk.bf16.mxu0 %vm212_vm0, %v1418_v11 }
  0xc6   : > { %v772_v53 = vpop.permute.xlu0 %771  ;;  %2143 = vmatprep.mubr.msk.bf16.mxu1 %vm212_vm0, %v1434_v1 }
  0xc7   : > { %819 = vst.msk [vmem:[#allocation3 + $0x10] sm:$0xff] %vm817_vm4, %v772_v53  ;;  %v788_v54 = vpop.permute.xlu1 %787  ;;  %v1123_v53 = vld [vmem:[#allocation2 + $0x227] sm:$0xff] }
  0xc8   : > { %827 = vst.msk [vmem:[#allocation3 + $0x90] sm:$0xff] %vm817_vm4, %v788_v54  ;;  %908 = vrot.lane.b32.xlu0 %v2872_v19, %s2356_s8  ;;  %v1124_v54 = vld [vmem:[#allocation2 + $0x22f] sm:$0xff] }
  0xc9   : > { %924 = vrot.lane.b32.xlu1 %v2876_v4, %s2356_s8  ;;  %v1140_v23 = vpack.c.bf16 %v1124_v54, %v1123_v53 }
  0xca   : > { %v901_v58 = vpop.permute.xlu0 %900 }
  0xcb   : > { %948 = vst.msk [vmem:[#allocation3 + $0x10] sm:$0xff] %vm946_vm5, %v901_v58  ;;  %v917_v61 = vpop.permute.xlu1 %916 }
  0xcc   : > { %956 = vst.msk [vmem:[#allocation3 + $0x90] sm:$0xff] %vm946_vm5, %v917_v61  ;;  %1037 = vrot.lane.b32.xlu0 %v2723_v7, %s2357_s9 }
  0xcd   : > { %1053 = vrot.lane.b32.xlu1 %v2725_v9, %s2357_s9 }
  0xce   : > { %v1030_v26 = vpop.permute.xlu0 %1029 }
  0xcf   : > { %1077 = vst.msk [vmem:[#allocation3 + $0x10] sm:$0xff] %vm1075_vm6, %v1030_v26  ;;  %v1046_v30 = vpop.permute.xlu1 %1045  ;;  %v1237_v26 = vld [vmem:[#allocation2 + $0x130] sm:$0xff] }
  0xd0   : > { %1085 = vst.msk [vmem:[#allocation3 + $0x90] sm:$0xff] %vm1075_vm6, %v1046_v30  ;;  %1167 = vrot.lane.b32.xlu0 %v2755_v21, %s2358_s10  ;;  %v1253_v30 = vld [vmem:[#allocation2 + $0x230] sm:$0xff] }
  0xd1   : > { %1183 = vrot.lane.b32.xlu1 %v2759_v24, %s2358_s10 }
  0xd2   : > { %v1160_v31 = vpop.permute.xlu0 %1159 }
  0xd3   : > { %1207 = vst.msk [vmem:[#allocation3 + $0x10] sm:$0xff] %vm1205_vm7, %v1160_v31  ;;  %v1176_v33 = vpop.permute.xlu1 %1175 }
  0xd4   : > { %1215 = vst.msk [vmem:[#allocation3 + $0x90] sm:$0xff] %vm1205_vm7, %v1176_v33  ;;  %1296 = vrot.lane.b32.xlu0 %v2920_v29, %s2359_s13 }
  0xd5   : > { %1312 = vrot.lane.b32.xlu1 %v2924_v32, %s2359_s13 }
  0xd6   : > { %v1289_v34 = vpop.permute.xlu0 %1288 }
  0xd7   : > { %1336 = vst.msk [vmem:[#allocation3 + $0x10] sm:$0xff] %vm1334_vm8, %v1289_v34  ;;  %v1305_v35 = vpop.permute.xlu1 %1304 }
  0xd8   : > { %1344 = vst.msk [vmem:[#allocation3 + $0x90] sm:$0xff] %vm1334_vm8, %v1305_v35  ;;  %523 = vrot.lane.b32.xlu0 %v2872_v19, %s2353_s27 }
  0xd9   : > { %539 = vrot.lane.b32.xlu1 %v2876_v4, %s2353_s27 }
  0xda   : > { %v516_v36 = vpop.permute.xlu0 %515 }
  0xdb   : > { %562 = vst.msk [vmem:[#allocation3 + $0x20] sm:$0xff] %vm559_vm2, %v516_v36  ;;  %v532_v37 = vpop.permute.xlu1 %531 }
  0xdc   : > { %570 = vst.msk [vmem:[#allocation3 + $0xa0] sm:$0xff] %vm559_vm2, %v532_v37  ;;  %652 = vrot.lane.b32.xlu0 %v2723_v7, %s2354_s28  ;;  %v1424_v37 = vld [vmem:[#allocation3 + $0x48] sm:$0xff] }
  0xdd   : > { %668 = vrot.lane.b32.xlu1 %v2725_v9, %s2354_s28 }
  0xde   : > { %v645_v38 = vpop.permute.xlu0 %644  ;;  %v1417_v39 = vld [vmem:[#allocation3 + $0x10] sm:$0xff] }
  0xdf   : > { %691 = vst.msk [vmem:[#allocation3 + $0x20] sm:$0xff] %vm688_vm3, %v645_v38  ;;  %v661_v42 = vpop.permute.xlu1 %660  ;;  %1615 = vmatmul.mubr.bf16.gmra.mrb[4].mxu0 %v1417_v39  ;;  %v1433_v46 = vld [vmem:[#allocation3 + $0x90] sm:$0xff] }
  0xe0   : > { %699 = vst.msk [vmem:[#allocation3 + $0xa0] sm:$0xff] %vm688_vm3, %v661_v42  ;;  %1679 = vmatmul.mubr.bf16.gmra.mrb[4].mxu1 %v1433_v46  ;;  %781 = vrot.lane.b32.xlu0 %v2755_v21, %s2355_s7 }
  0xe1   : > { %797 = vrot.lane.b32.xlu1 %v2759_v24, %s2355_s7  ;;  %2136 = vmatprep.mubr.msk.bf16.mxu0 %vm212_vm0, %v1420_v40  ;;  %v1440_v40 = vld [vmem:[#allocation3 + $0xc8] sm:$0xff] }
  0xe2   : > { %v774_v7 = vpop.permute.xlu0 %773  ;;  %2144 = vmatprep.mubr.msk.bf16.mxu1 %vm212_vm0, %v1436_v47 }
  0xe3   : > { %820 = vst.msk [vmem:[#allocation3 + $0x20] sm:$0xff] %vm817_vm4, %v774_v7  ;;  %v790_v9 = vpop.permute.xlu1 %789 }
  0xe4   : > { %828 = vst.msk [vmem:[#allocation3 + $0xa0] sm:$0xff] %vm817_vm4, %v790_v9  ;;  %910 = vrot.lane.b32.xlu0 %v2920_v29, %s2356_s8 }
  0xe5   : > { %926 = vrot.lane.b32.xlu1 %v2924_v32, %s2356_s8 }
  0xe6   : > { %v903_v21 = vpop.permute.xlu0 %902 }
  0xe7   : > { %949 = vst.msk [vmem:[#allocation3 + $0x20] sm:$0xff] %vm946_vm5, %v903_v21  ;;  %v919_v24 = vpop.permute.xlu1 %918 }
  0xe8   : > { %957 = vst.msk [vmem:[#allocation3 + $0xa0] sm:$0xff] %vm946_vm5, %v919_v24  ;;  %1039 = vrot.lane.b32.xlu0 %v2778_v55, %s2357_s9 }
  0xe9   : > { %1055 = vrot.lane.b32.xlu1 %v2780_v59, %s2357_s9 }
  0xea   : > { %v1032_v43 = vpop.permute.xlu0 %1031 }
  0xeb   : > { %1078 = vst.msk [vmem:[#allocation3 + $0x20] sm:$0xff] %vm1075_vm6, %v1032_v43  ;;  %v1048_v44 = vpop.permute.xlu1 %1047 }
  0xec   : > { %1086 = vst.msk [vmem:[#allocation3 + $0xa0] sm:$0xff] %vm1075_vm6, %v1048_v44  ;;  %1169 = vrot.lane.b32.xlu0 %v2683_v49, %s2358_s10 }
  0xed   : > { %1185 = vrot.lane.b32.xlu1 %v1139_v51, %s2358_s10 }
  0xee   : > { %v1162_v45 = vpop.permute.xlu0 %1161 }
  0xef   : > { %1208 = vst.msk [vmem:[#allocation3 + $0x20] sm:$0xff] %vm1205_vm7, %v1162_v45  ;;  %v1178_v63 = vpop.permute.xlu1 %1177 }
  0xf0   : > { %1216 = vst.msk [vmem:[#allocation3 + $0xa0] sm:$0xff] %vm1205_vm7, %v1178_v63  ;;  %1298 = vrot.lane.b32.xlu0 %v1260_v60, %s2359_s13 }
  0xf1   : > { %1314 = vrot.lane.b32.xlu1 %v1268_v62, %s2359_s13 }
  0xf2   : > { %v1291_v0 = vpop.permute.xlu0 %1290 }
  0xf3   : > { %1337 = vst.msk [vmem:[#allocation3 + $0x20] sm:$0xff] %vm1334_vm8, %v1291_v0  ;;  %v1307_v2 = vpop.permute.xlu1 %1306 }
  0xf4   : > { %1345 = vst.msk [vmem:[#allocation3 + $0xa0] sm:$0xff] %vm1334_vm8, %v1307_v2  ;;  %525 = vrot.lane.b32.xlu0 %v2920_v29, %s2353_s27 }
  0xf5   : > { %541 = vrot.lane.b32.xlu1 %v2924_v32, %s2353_s27  ;;  %v1261_v32 = vpack.c.bf16 %v1237_v26, %v1236_v25 }
  0xf6   : > { %v518_v17 = vpop.permute.xlu0 %517 }
  0xf7   : > { %563 = vst.msk [vmem:[#allocation3 + $0x30] sm:$0xff] %vm559_vm2, %v518_v17  ;;  %v534_v3 = vpop.permute.xlu1 %533 }
  0xf8   : > { %571 = vst.msk [vmem:[#allocation3 + $0xb0] sm:$0xff] %vm559_vm2, %v534_v3  ;;  %654 = vrot.lane.b32.xlu0 %v2778_v55, %s2354_s28  ;;  %v1390_v55 = vpack.c.bf16 %v1366_v13, %v1365_v8 }
  0xf9   : > { %670 = vrot.lane.b32.xlu1 %v2780_v59, %s2354_s28  ;;  %v1382_v59 = vld [vmem:[#allocation2 + $0x231] sm:$0xff]  ;;  %s3088_s28 = scalar_lea.vmem %s3294_s3, %s2185_s25 }
  0xfa   : > { %v647_v19 = vpop.permute.xlu0 %646  ;;  %v1419_v4 = vld [vmem:[#allocation3 + $0x20] sm:$0xff]  ;;  %v1398_v15 = vpack.c.bf16 %v1382_v59, %v1381_v14  ;;  %1406 = vst.msk [vmem:[#allocation3 + $0x78] sm:$0xff] %vm212_vm0, %v1390_v55  ;;  %v1428_v55 = vld [vmem:[#allocation3 + $0x68] sm:$0xff] }
  0xfb   : > { %692 = vst.msk [vmem:[#allocation3 + $0x30] sm:$0xff] %vm688_vm3, %v647_v19  ;;  %v663_v10 = vpop.permute.xlu1 %662  ;;  %1623 = vmatmul.mubr.bf16.gmra.mrb[8].mxu0 %v1419_v4  ;;  %v1435_v12 = vld [vmem:[#allocation3 + $0xa0] sm:$0xff] }
  0xfc   : > { %700 = vst.msk [vmem:[#allocation3 + $0xb0] sm:$0xff] %vm688_vm3, %v663_v10  ;;  %1687 = vmatmul.mubr.bf16.gmra.mrb[8].mxu1 %v1435_v12  ;;  %783 = vrot.lane.b32.xlu0 %v2683_v49, %s2355_s7  ;;  %v1107_v49 = vld [vmem:[#allocation2 + $0x127] sm:$0xff] }
  0xfd   : > { %799 = vrot.lane.b32.xlu1 %v1139_v51, %s2355_s7  ;;  %2137 = vmatprep.mubr.msk.bf16.mxu0 %vm212_vm0, %v1422_v5  ;;  %1414 = vst.msk [vmem:[#allocation3 + $0xf8] sm:$0xff] %vm212_vm0, %v1398_v15  ;;  %v1132_v61 = vpack.c.bf16 %v1108_v20, %v1107_v49  ;;  %v1444_v15 = vld [vmem:[#allocation3 + $0xe8] sm:$0xff] }
  0xfe   : > { %v776_v11 = vpop.permute.xlu0 %775  ;;  %2145 = vmatprep.mubr.msk.bf16.mxu1 %vm212_vm0, %v1438_v6 }
  0xff   : > { %821 = vst.msk [vmem:[#allocation3 + $0x30] sm:$0xff] %vm817_vm4, %v776_v11  ;;  %v792_v18 = vpop.permute.xlu1 %791 }
 0x100   : > { %829 = vst.msk [vmem:[#allocation3 + $0xb0] sm:$0xff] %vm817_vm4, %v792_v18  ;;  %912 = vrot.lane.b32.xlu0 %v1260_v60, %s2356_s8 }
 0x101   : > { %928 = vrot.lane.b32.xlu1 %v1268_v62, %s2356_s8  ;;  %v1442_v62 = vld [vmem:[#allocation3 + $0xd8] sm:$0xff] }
 0x102   : > { %v905_v1 = vpop.permute.xlu0 %904 }
 0x103   : > { %950 = vst.msk [vmem:[#allocation3 + $0x30] sm:$0xff] %vm946_vm5, %v905_v1  ;;  %v921_v58 = vpop.permute.xlu1 %920 }
 0x104   : > { %958 = vst.msk [vmem:[#allocation3 + $0xb0] sm:$0xff] %vm946_vm5, %v921_v58  ;;  %1041 = vrot.lane.b32.xlu0 %v2808_v16, %s2357_s9  ;;  %v1269_v16 = vpack.c.bf16 %v1253_v30, %v1252_v28  ;;  %v1430_v30 = vld [vmem:[#allocation3 + $0x78] sm:$0xff] }
 0x105   : > { %1057 = vrot.lane.b32.xlu1 %v2810_v22, %s2357_s9 }
 0x106   : > { %v1034_v27 = vpop.permute.xlu0 %1033 }
 0x107   : > { %1079 = vst.msk [vmem:[#allocation3 + $0x30] sm:$0xff] %vm1075_vm6, %v1034_v27  ;;  %v1050_v29 = vpop.permute.xlu1 %1049 }
 0x108   : > { %1087 = vst.msk [vmem:[#allocation3 + $0xb0] sm:$0xff] %vm1075_vm6, %v1050_v29  ;;  %1171 = vrot.lane.b32.xlu0 %v1132_v61, %s2358_s10 }
 0x109   : > { %1187 = vrot.lane.b32.xlu1 %v1140_v23, %s2358_s10 }
 0x10a   : > { %v1164_v31 = vpop.permute.xlu0 %1163 }
 0x10b   : > { %1209 = vst.msk [vmem:[#allocation3 + $0x30] sm:$0xff] %vm1205_vm7, %v1164_v31  ;;  %v1180_v22 = vpop.permute.xlu1 %1179 }
 0x10c   : > { %1217 = vst.msk [vmem:[#allocation3 + $0xb0] sm:$0xff] %vm1205_vm7, %v1180_v22  ;;  %1300 = vrot.lane.b32.xlu0 %v1261_v32, %s2359_s13 }
 0x10d   : > { %1316 = vrot.lane.b32.xlu1 %v1269_v16, %s2359_s13  ;;  %v1446_v16 = vld [vmem:[#allocation3 + $0xf8] sm:$0xff] }
 0x10e   : > { %v1293_v33 = vpop.permute.xlu0 %1292 }
 0x10f   : > { %1338 = vst.msk [vmem:[#allocation3 + $0x30] sm:$0xff] %vm1334_vm8, %v1293_v33  ;;  %v1309_v34 = vpop.permute.xlu1 %1308 }
 0x110   : > { %1346 = vst.msk [vmem:[#allocation3 + $0xb0] sm:$0xff] %vm1334_vm8, %v1309_v34 }
 0x112   : > { %v520_v35 = vpop.permute.xlu0 %519 }
 0x113   : > { %564 = vst.msk [vmem:[#allocation3 + $0x40] sm:$0xff] %vm559_vm2, %v520_v35  ;;  %v536_v36 = vpop.permute.xlu1 %535 }
 0x114   : > { %572 = vst.msk [vmem:[#allocation3 + $0xc0] sm:$0xff] %vm559_vm2, %v536_v36 }
 0x116   : > { %v649_v38 = vpop.permute.xlu0 %648  ;;  %v1421_v39 = vld [vmem:[#allocation3 + $0x30] sm:$0xff] }
 0x117   : > { %693 = vst.msk [vmem:[#allocation3 + $0x40] sm:$0xff] %vm688_vm3, %v649_v38  ;;  %v665_v42 = vpop.permute.xlu1 %664  ;;  %1631 = vmatmul.mubr.bf16.gmra.mrb[12].mxu0 %v1421_v39  ;;  %v1437_v46 = vld [vmem:[#allocation3 + $0xb0] sm:$0xff] }
 0x118   : > { %701 = vst.msk [vmem:[#allocation3 + $0xc0] sm:$0xff] %vm688_vm3, %v665_v42  ;;  %1695 = vmatmul.mubr.bf16.gmra.mrb[12].mxu1 %v1437_v46  ;;  %2138 = vmatprep.mubr.msk.bf16.mxu0 %vm212_vm0, %v1424_v37 }
 0x119   : > { %2146 = vmatprep.mubr.msk.bf16.mxu1 %vm212_vm0, %v1440_v40 }
 0x11a   : > { %v778_v47 = vpop.permute.xlu0 %777 }
 0x11b   : > { %822 = vst.msk [vmem:[#allocation3 + $0x40] sm:$0xff] %vm817_vm4, %v778_v47  ;;  %v794_v7 = vpop.permute.xlu1 %793 }
 0x11c   : > { %830 = vst.msk [vmem:[#allocation3 + $0xc0] sm:$0xff] %vm817_vm4, %v794_v7 }
 0x11e   : > { %v907_v9 = vpop.permute.xlu0 %906 }
 0x11f   : > { %951 = vst.msk [vmem:[#allocation3 + $0x40] sm:$0xff] %vm946_vm5, %v907_v9  ;;  %v923_v21 = vpop.permute.xlu1 %922  ;;  %v3081_v9 = vld [vmem:[%s3293_s2] ss:$0 sm:$0xff] }
 0x120   : > { %959 = vst.msk [vmem:[#allocation3 + $0xc0] sm:$0xff] %vm946_vm5, %v923_v21 }
 0x122   : > { %v1036_v48 = vpop.permute.xlu0 %1035 }
 0x123   : > { %1080 = vst.msk [vmem:[#allocation3 + $0x40] sm:$0xff] %vm1075_vm6, %v1036_v48  ;;  %v1052_v50 = vpop.permute.xlu1 %1051 }
 0x124   : > { %1088 = vst.msk [vmem:[#allocation3 + $0xc0] sm:$0xff] %vm1075_vm6, %v1052_v50 }
 0x126   : > { %v1166_v24 = vpop.permute.xlu0 %1165 }
 0x127   : > { %1210 = vst.msk [vmem:[#allocation3 + $0x40] sm:$0xff] %vm1205_vm7, %v1166_v24  ;;  %v1182_v51 = vpop.permute.xlu1 %1181 }
 0x128   : > { %1218 = vst.msk [vmem:[#allocation3 + $0xc0] sm:$0xff] %vm1205_vm7, %v1182_v51 }
 0x12a   : > { %v1295_v52 = vpop.permute.xlu0 %1294 }
 0x12b   : > { %1339 = vst.msk [vmem:[#allocation3 + $0x40] sm:$0xff] %vm1334_vm8, %v1295_v52  ;;  %v1311_v41 = vpop.permute.xlu1 %1310 }
 0x12c   : > { %1347 = vst.msk [vmem:[#allocation3 + $0xc0] sm:$0xff] %vm1334_vm8, %v1311_v41 }
 0x12e   : > { %v522_v43 = vpop.permute.xlu0 %521 }
 0x12f   : > { %565 = vst.msk [vmem:[#allocation3 + $0x50] sm:$0xff] %vm559_vm2, %v522_v43  ;;  %v538_v56 = vpop.permute.xlu1 %537 }
 0x130   : > { %573 = vst.msk [vmem:[#allocation3 + $0xd0] sm:$0xff] %vm559_vm2, %v538_v56 }
 0x132   : > { %v651_v44 = vpop.permute.xlu0 %650  ;;  %v1423_v60 = vld [vmem:[#allocation3 + $0x40] sm:$0xff] }
 0x133   : > { %694 = vst.msk [vmem:[#allocation3 + $0x50] sm:$0xff] %vm688_vm3, %v651_v44  ;;  %v667_v45 = vpop.permute.xlu1 %666  ;;  %1639 = vmatmul.mubr.bf16.gmra.mrb[16].mxu0 %v1423_v60  ;;  %v1439_v63 = vld [vmem:[#allocation3 + $0xc0] sm:$0xff] }
 0x134   : > { %702 = vst.msk [vmem:[#allocation3 + $0xd0] sm:$0xff] %vm688_vm3, %v667_v45  ;;  %1703 = vmatmul.mubr.bf16.gmra.mrb[16].mxu1 %v1439_v63  ;;  %2139 = vmatprep.mubr.msk.bf16.mxu0 %vm212_vm0, %v1426_v57 }
 0x135   : > { %2147 = vmatprep.mubr.msk.bf16.mxu1 %vm212_vm0, %v1442_v62 }
 0x136   : > { %v780_v0 = vpop.permute.xlu0 %779 }
 0x137   : > { %823 = vst.msk [vmem:[#allocation3 + $0x50] sm:$0xff] %vm817_vm4, %v780_v0  ;;  %v796_v2 = vpop.permute.xlu1 %795 }
 0x138   : > { %831 = vst.msk [vmem:[#allocation3 + $0xd0] sm:$0xff] %vm817_vm4, %v796_v2 }
 0x13a   : > { %v909_v17 = vpop.permute.xlu0 %908 }
 0x13b   : > { %952 = vst.msk [vmem:[#allocation3 + $0x50] sm:$0xff] %vm946_vm5, %v909_v17  ;;  %v925_v3 = vpop.permute.xlu1 %924 }
 0x13c   : > { %960 = vst.msk [vmem:[#allocation3 + $0xd0] sm:$0xff] %vm946_vm5, %v925_v3 }
 0x13e   : > { %v1038_v19 = vpop.permute.xlu0 %1037 }
 0x13f   : > { %1081 = vst.msk [vmem:[#allocation3 + $0x50] sm:$0xff] %vm1075_vm6, %v1038_v19  ;;  %v1054_v4 = vpop.permute.xlu1 %1053 }
 0x140   : > { %1089 = vst.msk [vmem:[#allocation3 + $0xd0] sm:$0xff] %vm1075_vm6, %v1054_v4 }
 0x142   : > { %v1168_v5 = vpop.permute.xlu0 %1167 }
 0x143   : > { %1211 = vst.msk [vmem:[#allocation3 + $0x50] sm:$0xff] %vm1205_vm7, %v1168_v5  ;;  %v1184_v6 = vpop.permute.xlu1 %1183 }
 0x144   : > { %1219 = vst.msk [vmem:[#allocation3 + $0xd0] sm:$0xff] %vm1205_vm7, %v1184_v6 }
 0x146   : > { %v1297_v10 = vpop.permute.xlu0 %1296 }
 0x147   : > { %1340 = vst.msk [vmem:[#allocation3 + $0x50] sm:$0xff] %vm1334_vm8, %v1297_v10  ;;  %v1313_v12 = vpop.permute.xlu1 %1312 }
 0x148   : > { %1348 = vst.msk [vmem:[#allocation3 + $0xd0] sm:$0xff] %vm1334_vm8, %v1313_v12 }
 0x14a   : > { %v524_v8 = vpop.permute.xlu0 %523 }
 0x14b   : > { %566 = vst.msk [vmem:[#allocation3 + $0x60] sm:$0xff] %vm559_vm2, %v524_v8  ;;  %v540_v13 = vpop.permute.xlu1 %539 }
 0x14c   : > { %574 = vst.msk [vmem:[#allocation3 + $0xe0] sm:$0xff] %vm559_vm2, %v540_v13 }
 0x14e   : > { %v653_v14 = vpop.permute.xlu0 %652  ;;  %v1425_v59 = vld [vmem:[#allocation3 + $0x50] sm:$0xff] }
 0x14f   : > { %695 = vst.msk [vmem:[#allocation3 + $0x60] sm:$0xff] %vm688_vm3, %v653_v14  ;;  %v669_v11 = vpop.permute.xlu1 %668  ;;  %1647 = vmatmul.mubr.bf16.gmra.mrb[20].mxu0 %v1425_v59  ;;  %v1441_v18 = vld [vmem:[#allocation3 + $0xd0] sm:$0xff] }
 0x150   : > { %703 = vst.msk [vmem:[#allocation3 + $0xe0] sm:$0xff] %vm688_vm3, %v669_v11  ;;  %1711 = vmatmul.mubr.bf16.gmra.mrb[20].mxu1 %v1441_v18  ;;  %2140 = vmatprep.mubr.msk.bf16.mxu0 %vm212_vm0, %v1428_v55 }
 0x151   : > { %2148 = vmatprep.mubr.msk.bf16.mxu1 %vm212_vm0, %v1444_v15 }
 0x152   : > { %v782_v49 = vpop.permute.xlu0 %781 }
 0x153   : > { %824 = vst.msk [vmem:[#allocation3 + $0x60] sm:$0xff] %vm817_vm4, %v782_v49  ;;  %v798_v20 = vpop.permute.xlu1 %797 }
 0x154   : > { %832 = vst.msk [vmem:[#allocation3 + $0xe0] sm:$0xff] %vm817_vm4, %v798_v20 }
 0x156   : > { %v911_v1 = vpop.permute.xlu0 %910 }
 0x157   : > { %953 = vst.msk [vmem:[#allocation3 + $0x60] sm:$0xff] %vm946_vm5, %v911_v1  ;;  %v927_v53 = vpop.permute.xlu1 %926 }
 0x158   : > { %961 = vst.msk [vmem:[#allocation3 + $0xe0] sm:$0xff] %vm946_vm5, %v927_v53 }
 0x15a   : > { %v1040_v54 = vpop.permute.xlu0 %1039 }
 0x15b   : > { %1082 = vst.msk [vmem:[#allocation3 + $0x60] sm:$0xff] %vm1075_vm6, %v1040_v54  ;;  %v1056_v58 = vpop.permute.xlu1 %1055 }
 0x15c   : > { %1090 = vst.msk [vmem:[#allocation3 + $0xe0] sm:$0xff] %vm1075_vm6, %v1056_v58 }
 0x15e   : > { %v1170_v61 = vpop.permute.xlu0 %1169 }
 0x15f   : > { %1212 = vst.msk [vmem:[#allocation3 + $0x60] sm:$0xff] %vm1205_vm7, %v1170_v61  ;;  %v1186_v23 = vpop.permute.xlu1 %1185 }
 0x160   : > { %1220 = vst.msk [vmem:[#allocation3 + $0xe0] sm:$0xff] %vm1205_vm7, %v1186_v23 }
 0x162   : > { %v1299_v25 = vpop.permute.xlu0 %1298 }
 0x163   : > { %1341 = vst.msk [vmem:[#allocation3 + $0x60] sm:$0xff] %vm1334_vm8, %v1299_v25  ;;  %v1315_v26 = vpop.permute.xlu1 %1314 }
 0x164   : > { %1349 = vst.msk [vmem:[#allocation3 + $0xe0] sm:$0xff] %vm1334_vm8, %v1315_v26 }
 0x166   : > { %v526_v27 = vpop.permute.xlu0 %525 }
 0x167   : > { %567 = vst.msk [vmem:[#allocation3 + $0x70] sm:$0xff] %vm559_vm2, %v526_v27  ;;  %v542_v28 = vpop.permute.xlu1 %541 }
 0x168   : > { %575 = vst.msk [vmem:[#allocation3 + $0xf0] sm:$0xff] %vm559_vm2, %v542_v28 }
 0x16a   : > { %v655_v29 = vpop.permute.xlu0 %654  ;;  %v1427_v32 = vld [vmem:[#allocation3 + $0x60] sm:$0xff] }
 0x16b   : > { %696 = vst.msk [vmem:[#allocation3 + $0x70] sm:$0xff] %vm688_vm3, %v655_v29  ;;  %v671_v31 = vpop.permute.xlu1 %670  ;;  %1655 = vmatmul.mubr.bf16.gmra.mrb[24].mxu0 %v1427_v32  ;;  %v1443_v22 = vld [vmem:[#allocation3 + $0xe0] sm:$0xff] }
 0x16c   : > { %704 = vst.msk [vmem:[#allocation3 + $0xf0] sm:$0xff] %vm688_vm3, %v671_v31  ;;  %1719 = vmatmul.mubr.bf16.gmra.mrb[24].mxu1 %v1443_v22  ;;  %2141 = vmatprep.mubr.msk.bf16.mxu0 %vm212_vm0, %v1430_v30 }
 0x16d   : > { %2149 = vmatprep.mubr.msk.bf16.mxu1 %vm212_vm0, %v1446_v16 }
 0x16e   : > { %v784_v33 = vpop.permute.xlu0 %783 }
 0x16f   : > { %825 = vst.msk [vmem:[#allocation3 + $0x70] sm:$0xff] %vm817_vm4, %v784_v33  ;;  %v800_v34 = vpop.permute.xlu1 %799 }
 0x170   : > { %833 = vst.msk [vmem:[#allocation3 + $0xf0] sm:$0xff] %vm817_vm4, %v800_v34 }
 0x172   : > { %v913_v35 = vpop.permute.xlu0 %912 }
 0x173   : > { %954 = vst.msk [vmem:[#allocation3 + $0x70] sm:$0xff] %vm946_vm5, %v913_v35  ;;  %v929_v36 = vpop.permute.xlu1 %928 }
 0x174   : > { %962 = vst.msk [vmem:[#allocation3 + $0xf0] sm:$0xff] %vm946_vm5, %v929_v36 }
 0x176   : > { %v1042_v37 = vpop.permute.xlu0 %1041 }
 0x177   : > { %1083 = vst.msk [vmem:[#allocation3 + $0x70] sm:$0xff] %vm1075_vm6, %v1042_v37  ;;  %v1058_v38 = vpop.permute.xlu1 %1057 }
 0x178   : > { %1091 = vst.msk [vmem:[#allocation3 + $0xf0] sm:$0xff] %vm1075_vm6, %v1058_v38 }
 0x17a   : > { %v1172_v39 = vpop.permute.xlu0 %1171 }
 0x17b   : > { %1213 = vst.msk [vmem:[#allocation3 + $0x70] sm:$0xff] %vm1205_vm7, %v1172_v39  ;;  %v1188_v40 = vpop.permute.xlu1 %1187 }
 0x17c   : > { %1221 = vst.msk [vmem:[#allocation3 + $0xf0] sm:$0xff] %vm1205_vm7, %v1188_v40 }
 0x17e   : > { %v1301_v42 = vpop.permute.xlu0 %1300 }
 0x17f   : > { %1342 = vst.msk [vmem:[#allocation3 + $0x70] sm:$0xff] %vm1334_vm8, %v1301_v42  ;;  %v1317_v46 = vpop.permute.xlu1 %1316 }
 0x180   : > { %1350 = vst.msk [vmem:[#allocation3 + $0xf0] sm:$0xff] %vm1334_vm8, %v1317_v46 }
 0x186   : > { %v1429_v47 = vld [vmem:[#allocation3 + $0x70] sm:$0xff] }
 0x187   : > { %1663 = vmatmul.mubr.bf16.gmra.mrb[28].mxu0 %v1429_v47  ;;  %v1445_v7 = vld [vmem:[#allocation3 + $0xf0] sm:$0xff] }
 0x188   : > { %1727 = vmatmul.mubr.bf16.gmra.mrb[28].mxu1 %v1445_v7 }
 0x196   : > { %v1608_v21 = vpop.f32.mrb[0].mxu0 }
 0x197   : > { %v1609_v48 = vadd.f32 %v3081_v9, %v1608_v21  ;;  %v1610_v50 = vpop.f32.mrb[1].mxu0  ;;  %v1672_v24 = vpop.f32.mrb[0].mxu1 }
 0x198   : > { %v1673_v51 = vadd.f32 %v3081_v9, %v1672_v24  ;;  %v1611_v52 = vpop.f32.mrb[2].mxu0  ;;  %v1674_v41 = vpop.f32.mrb[1].mxu1 }
 0x199   : > { %v1735_v43 = vmax.f32 %v1609_v48, 0.0  ;;  %v1612_v56 = vadd.f32 %v3081_v9, %v1611_v52  ;;  %v1613_v57 = vpop.f32.mrb[3].mxu0  ;;  %v1675_v44 = vpop.f32.mrb[2].mxu1 }
 0x19a   : > { %v1751_v60 = vmax.f32 %v1673_v51, 0.0  ;;  %v1676_v62 = vadd.f32 %v3081_v9, %v1675_v44  ;;  %v1677_v45 = vpop.f32.mrb[3].mxu1 }
 0x19b   : > { %1768 = vst.msk [vmem:[%s3088_s28] sm:$0xff] %vm1767_vm9, %v1735_v43  ;;  %v2187_v63 = vpack.c.bf16 %v1735_v43, %v1735_v43  ;;  %v1736_v0 = vmax.f32 %v1612_v56, 0.0 }
 0x19c   : > { %1784 = vst.msk [vmem:[%s3088_s28 + $0x80] sm:$0xff] %vm1767_vm9, %v1751_v60  ;;  %v1752_v2 = vmax.f32 %v1676_v62, 0.0  ;;  %v2203_v17 = vpack.c.bf16 %v1751_v60, %v1751_v60 }
 0x19d   : > { %1769 = vst.msk [vmem:[%s3088_s28 + $0x8] sm:$0xff] %vm1767_vm9, %v1736_v0  ;;  %v2188_v3 = vpack.c.bf16 %v1736_v0, %v1736_v0  ;;  %1896 = vrot.lane.b32.xlu0 %v2187_v63, %s2360_s29 }
 0x19e   : > { %1785 = vst.msk [vmem:[%s3088_s28 + $0x88] sm:$0xff] %vm1767_vm9, %v1752_v2  ;;  %v2204_v19 = vpack.c.bf16 %v1752_v2, %v1752_v2 }
 0x19f   : > { %1898 = vrot.lane.b32.xlu1 %v2188_v3, %s2360_s29 }
 0x1a1   : > { %1928 = vrot.lane.b32.xlu0 %v2203_v17, %s2360_s29 }
 0x1a3   : > { %1930 = vrot.lane.b32.xlu1 %v2204_v19, %s2360_s29 }
 0x1b2   : > { %v1616_v4 = vpop.f32.mrb[4].mxu0 }
 0x1b3   : > { %v1617_v5 = vadd.f32 %v3081_v9, %v1616_v4  ;;  %v1618_v6 = vpop.f32.mrb[5].mxu0  ;;  %v1680_v10 = vpop.f32.mrb[4].mxu1 }
 0x1b4   : > { %v1681_v12 = vadd.f32 %v3081_v9, %v1680_v10  ;;  %v1619_v8 = vpop.f32.mrb[6].mxu0  ;;  %v1682_v13 = vpop.f32.mrb[5].mxu1 }
 0x1b5   : > { %v1737_v55 = vmax.f32 %v1617_v5, 0.0  ;;  %v1620_v14 = vadd.f32 %v3081_v9, %v1619_v8  ;;  %v1621_v59 = vpop.f32.mrb[7].mxu0  ;;  %v1683_v15 = vpop.f32.mrb[6].mxu1 }
 0x1b6   : > { %v1753_v11 = vmax.f32 %v1681_v12, 0.0  ;;  %v1684_v18 = vadd.f32 %v3081_v9, %v1683_v15  ;;  %v1685_v49 = vpop.f32.mrb[7].mxu1 }
 0x1b7   : > { %1770 = vst.msk [vmem:[%s3088_s28 + $0x10] sm:$0xff] %vm1767_vm9, %v1737_v55  ;;  %v2189_v20 = vpack.c.bf16 %v1737_v55, %v1737_v55  ;;  %v1738_v1 = vmax.f32 %v1620_v14, 0.0 }
 0x1b8   : > { %1786 = vst.msk [vmem:[%s3088_s28 + $0x90] sm:$0xff] %vm1767_vm9, %v1753_v11  ;;  %v1754_v53 = vmax.f32 %v1684_v18, 0.0  ;;  %v2205_v54 = vpack.c.bf16 %v1753_v11, %v1753_v11 }
 0x1b9   : > { %1771 = vst.msk [vmem:[%s3088_s28 + $0x18] sm:$0xff] %vm1767_vm9, %v1738_v1  ;;  %v2190_v58 = vpack.c.bf16 %v1738_v1, %v1738_v1  ;;  %1900 = vrot.lane.b32.xlu0 %v2189_v20, %s2360_s29 }
 0x1ba   : > { %1787 = vst.msk [vmem:[%s3088_s28 + $0x98] sm:$0xff] %vm1767_vm9, %v1754_v53  ;;  %v2206_v61 = vpack.c.bf16 %v1754_v53, %v1754_v53 }
 0x1bb   : > { %1902 = vrot.lane.b32.xlu1 %v2190_v58, %s2360_s29 }
 0x1bd   : > { %1932 = vrot.lane.b32.xlu0 %v2205_v54, %s2360_s29 }
 0x1bf   : > { %1934 = vrot.lane.b32.xlu1 %v2206_v61, %s2360_s29 }
 0x1ce   : > { %v1624_v23 = vpop.f32.mrb[8].mxu0 }
 0x1cf   : > { %v1625_v25 = vadd.f32 %v3081_v9, %v1624_v23  ;;  %v1626_v26 = vpop.f32.mrb[9].mxu0  ;;  %v1688_v27 = vpop.f32.mrb[8].mxu1 }
 0x1d0   : > { %v1689_v28 = vadd.f32 %v3081_v9, %v1688_v27  ;;  %v1627_v30 = vpop.f32.mrb[10].mxu0  ;;  %v1690_v29 = vpop.f32.mrb[9].mxu1 }
 0x1d1   : > { %v1739_v32 = vmax.f32 %v1625_v25, 0.0  ;;  %v1628_v16 = vadd.f32 %v3081_v9, %v1627_v30  ;;  %v1629_v31 = vpop.f32.mrb[11].mxu0  ;;  %v1691_v22 = vpop.f32.mrb[10].mxu1 }
 0x1d2   : > { %v1755_v33 = vmax.f32 %v1689_v28, 0.0  ;;  %v1692_v34 = vadd.f32 %v3081_v9, %v1691_v22  ;;  %v1693_v35 = vpop.f32.mrb[11].mxu1 }
 0x1d3   : > { %1772 = vst.msk [vmem:[%s3088_s28 + $0x20] sm:$0xff] %vm1767_vm9, %v1739_v32  ;;  %v2191_v36 = vpack.c.bf16 %v1739_v32, %v1739_v32  ;;  %v1740_v37 = vmax.f32 %v1628_v16, 0.0 }
 0x1d4   : > { %1788 = vst.msk [vmem:[%s3088_s28 + $0xa0] sm:$0xff] %vm1767_vm9, %v1755_v33  ;;  %v1756_v38 = vmax.f32 %v1692_v34, 0.0  ;;  %v2207_v39 = vpack.c.bf16 %v1755_v33, %v1755_v33 }
 0x1d5   : > { %1773 = vst.msk [vmem:[%s3088_s28 + $0x28] sm:$0xff] %vm1767_vm9, %v1740_v37  ;;  %v2192_v40 = vpack.c.bf16 %v1740_v37, %v1740_v37  ;;  %1904 = vrot.lane.b32.xlu0 %v2191_v36, %s2360_s29 }
 0x1d6   : > { %1789 = vst.msk [vmem:[%s3088_s28 + $0xa8] sm:$0xff] %vm1767_vm9, %v1756_v38  ;;  %v2208_v42 = vpack.c.bf16 %v1756_v38, %v1756_v38 }
 0x1d7   : > { %1906 = vrot.lane.b32.xlu1 %v2192_v40, %s2360_s29 }
 0x1d9   : > { %1936 = vrot.lane.b32.xlu0 %v2207_v39, %s2360_s29 }
 0x1db   : > { %1938 = vrot.lane.b32.xlu1 %v2208_v42, %s2360_s29 }
 0x1ea   : > { %v1632_v46 = vpop.f32.mrb[12].mxu0 }
 0x1eb   : > { %v1633_v47 = vadd.f32 %v3081_v9, %v1632_v46  ;;  %v1634_v7 = vpop.f32.mrb[13].mxu0  ;;  %v1696_v21 = vpop.f32.mrb[12].mxu1 }
 0x1ec   : > { %v1697_v48 = vadd.f32 %v3081_v9, %v1696_v21  ;;  %v1635_v50 = vpop.f32.mrb[14].mxu0  ;;  %v1698_v24 = vpop.f32.mrb[13].mxu1 }
 0x1ed   : > { %v1741_v51 = vmax.f32 %v1633_v47, 0.0  ;;  %v1636_v52 = vadd.f32 %v3081_v9, %v1635_v50  ;;  %v1637_v41 = vpop.f32.mrb[15].mxu0  ;;  %v1699_v43 = vpop.f32.mrb[14].mxu1 }
 0x1ee   : > { %v1757_v56 = vmax.f32 %v1697_v48, 0.0  ;;  %v1700_v57 = vadd.f32 %v3081_v9, %v1699_v43  ;;  %v1701_v44 = vpop.f32.mrb[15].mxu1 }
 0x1ef   : > { %1774 = vst.msk [vmem:[%s3088_s28 + $0x30] sm:$0xff] %vm1767_vm9, %v1741_v51  ;;  %v2193_v60 = vpack.c.bf16 %v1741_v51, %v1741_v51  ;;  %v1742_v62 = vmax.f32 %v1636_v52, 0.0 }
 0x1f0   : > { %1790 = vst.msk [vmem:[%s3088_s28 + $0xb0] sm:$0xff] %vm1767_vm9, %v1757_v56  ;;  %v1758_v45 = vmax.f32 %v1700_v57, 0.0  ;;  %v2209_v63 = vpack.c.bf16 %v1757_v56, %v1757_v56 }
 0x1f1   : > { %1775 = vst.msk [vmem:[%s3088_s28 + $0x38] sm:$0xff] %vm1767_vm9, %v1742_v62  ;;  %v2194_v0 = vpack.c.bf16 %v1742_v62, %v1742_v62  ;;  %1908 = vrot.lane.b32.xlu0 %v2193_v60, %s2360_s29 }
 0x1f2   : > { %1791 = vst.msk [vmem:[%s3088_s28 + $0xb8] sm:$0xff] %vm1767_vm9, %v1758_v45  ;;  %v2210_v2 = vpack.c.bf16 %v1758_v45, %v1758_v45 }
 0x1f3   : > { %1910 = vrot.lane.b32.xlu1 %v2194_v0, %s2360_s29 }
 0x1f5   : > { %1940 = vrot.lane.b32.xlu0 %v2209_v63, %s2360_s29 }
 0x1f7   : > { %1942 = vrot.lane.b32.xlu1 %v2210_v2, %s2360_s29 }
 0x206   : > { %v1640_v17 = vpop.f32.mrb[16].mxu0 }
 0x207   : > { %v1641_v3 = vadd.f32 %v3081_v9, %v1640_v17  ;;  %v1642_v19 = vpop.f32.mrb[17].mxu0  ;;  %v1704_v4 = vpop.f32.mrb[16].mxu1 }
 0x208   : > { %v1705_v5 = vadd.f32 %v3081_v9, %v1704_v4  ;;  %v1643_v6 = vpop.f32.mrb[18].mxu0  ;;  %v1706_v10 = vpop.f32.mrb[17].mxu1 }
 0x209   : > { %v1743_v12 = vmax.f32 %v1641_v3, 0.0  ;;  %v1644_v8 = vadd.f32 %v3081_v9, %v1643_v6  ;;  %v1645_v13 = vpop.f32.mrb[19].mxu0  ;;  %v1707_v55 = vpop.f32.mrb[18].mxu1 }
 0x20a   : > { %v1759_v14 = vmax.f32 %v1705_v5, 0.0  ;;  %v1708_v59 = vadd.f32 %v3081_v9, %v1707_v55  ;;  %v1709_v15 = vpop.f32.mrb[19].mxu1 }
 0x20b   : > { %1776 = vst.msk [vmem:[%s3088_s28 + $0x40] sm:$0xff] %vm1767_vm9, %v1743_v12  ;;  %v2195_v11 = vpack.c.bf16 %v1743_v12, %v1743_v12  ;;  %v1744_v18 = vmax.f32 %v1644_v8, 0.0 }
 0x20c   : > { %1792 = vst.msk [vmem:[%s3088_s28 + $0xc0] sm:$0xff] %vm1767_vm9, %v1759_v14  ;;  %v1760_v49 = vmax.f32 %v1708_v59, 0.0  ;;  %v2211_v20 = vpack.c.bf16 %v1759_v14, %v1759_v14 }
 0x20d   : > { %1777 = vst.msk [vmem:[%s3088_s28 + $0x48] sm:$0xff] %vm1767_vm9, %v1744_v18  ;;  %v2196_v1 = vpack.c.bf16 %v1744_v18, %v1744_v18  ;;  %1912 = vrot.lane.b32.xlu0 %v2195_v11, %s2360_s29 }
 0x20e   : > { %1793 = vst.msk [vmem:[%s3088_s28 + $0xc8] sm:$0xff] %vm1767_vm9, %v1760_v49  ;;  %v2212_v54 = vpack.c.bf16 %v1760_v49, %v1760_v49 }
 0x20f   : > { %v1897_v53 = vpop.permute.xlu0 %1896  ;;  %1914 = vrot.lane.b32.xlu1 %v2196_v1, %s2360_s29 }
 0x210   : > { %1993 = vst.msk [vmem:[%s3166_s6] sm:$0xf] %vm1992_vm10, %v1897_v53 }
 0x211   : > { %v1899_v58 = vpop.permute.xlu1 %1898  ;;  %1944 = vrot.lane.b32.xlu0 %v2211_v20, %s2360_s29 }
 0x212   : > { %1994 = vst.msk [vmem:[%s3166_s6 + $0x4] sm:$0xf] %vm1992_vm10, %v1899_v58 }
 0x213   : > { %v1929_v61 = vpop.permute.xlu0 %1928  ;;  %1946 = vrot.lane.b32.xlu1 %v2212_v54, %s2360_s29 }
 0x214   : > { %2009 = vst.msk [vmem:[%s3166_s6 + $0x40] sm:$0xf] %vm1992_vm10, %v1929_v61 }
 0x215   : > { %v1931_v23 = vpop.permute.xlu1 %1930 }
 0x216   : > { %2010 = vst.msk [vmem:[%s3166_s6 + $0x44] sm:$0xf] %vm1992_vm10, %v1931_v23 }
 0x222   : > { %v1648_v25 = vpop.f32.mrb[20].mxu0 }
 0x223   : > { %v1649_v26 = vadd.f32 %v3081_v9, %v1648_v25  ;;  %v1650_v27 = vpop.f32.mrb[21].mxu0  ;;  %v1712_v28 = vpop.f32.mrb[20].mxu1 }
 0x224   : > { %v1713_v30 = vadd.f32 %v3081_v9, %v1712_v28  ;;  %v1651_v29 = vpop.f32.mrb[22].mxu0  ;;  %v1714_v32 = vpop.f32.mrb[21].mxu1 }
 0x225   : > { %v1745_v16 = vmax.f32 %v1649_v26, 0.0  ;;  %v1652_v31 = vadd.f32 %v3081_v9, %v1651_v29  ;;  %v1653_v22 = vpop.f32.mrb[23].mxu0  ;;  %v1715_v33 = vpop.f32.mrb[22].mxu1 }
 0x226   : > { %v1761_v34 = vmax.f32 %v1713_v30, 0.0  ;;  %v1716_v35 = vadd.f32 %v3081_v9, %v1715_v33  ;;  %v1717_v36 = vpop.f32.mrb[23].mxu1 }
 0x227   : > { %1778 = vst.msk [vmem:[%s3088_s28 + $0x50] sm:$0xff] %vm1767_vm9, %v1745_v16  ;;  %v2197_v37 = vpack.c.bf16 %v1745_v16, %v1745_v16  ;;  %v1746_v38 = vmax.f32 %v1652_v31, 0.0 }
 0x228   : > { %1794 = vst.msk [vmem:[%s3088_s28 + $0xd0] sm:$0xff] %vm1767_vm9, %v1761_v34  ;;  %v1762_v39 = vmax.f32 %v1716_v35, 0.0  ;;  %v2213_v40 = vpack.c.bf16 %v1761_v34, %v1761_v34 }
 0x229   : > { %1779 = vst.msk [vmem:[%s3088_s28 + $0x58] sm:$0xff] %vm1767_vm9, %v1746_v38  ;;  %v2198_v42 = vpack.c.bf16 %v1746_v38, %v1746_v38  ;;  %1916 = vrot.lane.b32.xlu0 %v2197_v37, %s2360_s29 }
 0x22a   : > { %1795 = vst.msk [vmem:[%s3088_s28 + $0xd8] sm:$0xff] %vm1767_vm9, %v1762_v39  ;;  %v2214_v47 = vpack.c.bf16 %v1762_v39, %v1762_v39 }
 0x22b   : > { %1918 = vrot.lane.b32.xlu1 %v2198_v42, %s2360_s29  ;;  %v1901_v46 = vpop.permute.xlu0 %1900 }
 0x22c   : > { %1995 = vst.msk [vmem:[%s3166_s6 + $0x8] sm:$0xf] %vm1992_vm10, %v1901_v46 }
 0x22d   : > { %v1903_v7 = vpop.permute.xlu1 %1902  ;;  %1948 = vrot.lane.b32.xlu0 %v2213_v40, %s2360_s29 }
 0x22e   : > { %1996 = vst.msk [vmem:[%s3166_s6 + $0xc] sm:$0xf] %vm1992_vm10, %v1903_v7 }
 0x22f   : > { %1950 = vrot.lane.b32.xlu1 %v2214_v47, %s2360_s29  ;;  %v1933_v21 = vpop.permute.xlu0 %1932 }
 0x230   : > { %2011 = vst.msk [vmem:[%s3166_s6 + $0x48] sm:$0xf] %vm1992_vm10, %v1933_v21 }
 0x231   : > { %v1935_v48 = vpop.permute.xlu1 %1934 }
 0x232   : > { %2012 = vst.msk [vmem:[%s3166_s6 + $0x4c] sm:$0xf] %vm1992_vm10, %v1935_v48 }
 0x23e   : > { %v1656_v50 = vpop.f32.mrb[24].mxu0 }
 0x23f   : > { %v1657_v24 = vadd.f32 %v3081_v9, %v1656_v50  ;;  %v1658_v51 = vpop.f32.mrb[25].mxu0  ;;  %v1720_v52 = vpop.f32.mrb[24].mxu1 }
 0x240   : > { %v1721_v41 = vadd.f32 %v3081_v9, %v1720_v52  ;;  %v1659_v43 = vpop.f32.mrb[26].mxu0  ;;  %v1722_v56 = vpop.f32.mrb[25].mxu1 }
 0x241   : > { %v1747_v57 = vmax.f32 %v1657_v24, 0.0  ;;  %v1660_v44 = vadd.f32 %v3081_v9, %v1659_v43  ;;  %v1661_v60 = vpop.f32.mrb[27].mxu0  ;;  %v1723_v62 = vpop.f32.mrb[26].mxu1 }
 0x242   : > { %v1763_v45 = vmax.f32 %v1721_v41, 0.0  ;;  %v1724_v63 = vadd.f32 %v3081_v9, %v1723_v62  ;;  %v1725_v0 = vpop.f32.mrb[27].mxu1 }
 0x243   : > { %1780 = vst.msk [vmem:[%s3088_s28 + $0x60] sm:$0xff] %vm1767_vm9, %v1747_v57  ;;  %v2199_v2 = vpack.c.bf16 %v1747_v57, %v1747_v57  ;;  %v1748_v17 = vmax.f32 %v1660_v44, 0.0 }
 0x244   : > { %1796 = vst.msk [vmem:[%s3088_s28 + $0xe0] sm:$0xff] %vm1767_vm9, %v1763_v45  ;;  %v1764_v3 = vmax.f32 %v1724_v63, 0.0  ;;  %v2215_v19 = vpack.c.bf16 %v1763_v45, %v1763_v45 }
 0x245   : > { %1781 = vst.msk [vmem:[%s3088_s28 + $0x68] sm:$0xff] %vm1767_vm9, %v1748_v17  ;;  %v2200_v4 = vpack.c.bf16 %v1748_v17, %v1748_v17  ;;  %1920 = vrot.lane.b32.xlu0 %v2199_v2, %s2360_s29 }
 0x246   : > { %1797 = vst.msk [vmem:[%s3088_s28 + $0xe8] sm:$0xff] %vm1767_vm9, %v1764_v3  ;;  %v2216_v6 = vpack.c.bf16 %v1764_v3, %v1764_v3 }
 0x247   : > { %1922 = vrot.lane.b32.xlu1 %v2200_v4, %s2360_s29  ;;  %v1905_v5 = vpop.permute.xlu0 %1904 }
 0x248   : > { %1997 = vst.msk [vmem:[%s3166_s6 + $0x10] sm:$0xf] %vm1992_vm10, %v1905_v5 }
 0x249   : > { %v1907_v10 = vpop.permute.xlu1 %1906  ;;  %1952 = vrot.lane.b32.xlu0 %v2215_v19, %s2360_s29 }
 0x24a   : > { %1998 = vst.msk [vmem:[%s3166_s6 + $0x14] sm:$0xf] %vm1992_vm10, %v1907_v10 }
 0x24b   : > { %1954 = vrot.lane.b32.xlu1 %v2216_v6, %s2360_s29  ;;  %v1937_v12 = vpop.permute.xlu0 %1936 }
 0x24c   : > { %2013 = vst.msk [vmem:[%s3166_s6 + $0x50] sm:$0xf] %vm1992_vm10, %v1937_v12 }
 0x24d   : > { %v1939_v8 = vpop.permute.xlu1 %1938 }
 0x24e   : > { %2014 = vst.msk [vmem:[%s3166_s6 + $0x54] sm:$0xf] %vm1992_vm10, %v1939_v8 }
 0x25a   : > { %v1664_v13 = vpop.f32.mrb[28].mxu0 }
 0x25b   : > { %v1665_v55 = vadd.f32 %v3081_v9, %v1664_v13  ;;  %v1666_v14 = vpop.f32.mrb[29].mxu0  ;;  %v1728_v59 = vpop.f32.mrb[28].mxu1 }
 0x25c   : > { %v1729_v15 = vadd.f32 %v3081_v9, %v1728_v59  ;;  %v1667_v11 = vpop.f32.mrb[30].mxu0  ;;  %v1730_v18 = vpop.f32.mrb[29].mxu1 }
 0x25d   : > { %v1749_v49 = vmax.f32 %v1665_v55, 0.0  ;;  %v1668_v20 = vadd.f32 %v3081_v9, %v1667_v11  ;;  %v1669_v1 = vpop.f32.mrb[31].mxu0  ;;  %v1731_v53 = vpop.f32.mrb[30].mxu1 }
 0x25e   : > { %v1765_v54 = vmax.f32 %v1729_v15, 0.0  ;;  %v1732_v58 = vadd.f32 %v3081_v9, %v1731_v53  ;;  %v1733_v61 = vpop.f32.mrb[31].mxu1 }
 0x25f   : > { %1782 = vst.msk [vmem:[%s3088_s28 + $0x70] sm:$0xff] %vm1767_vm9, %v1749_v49  ;;  %v2201_v23 = vpack.c.bf16 %v1749_v49, %v1749_v49  ;;  %v1750_v25 = vmax.f32 %v1668_v20, 0.0 }
 0x260   : > { %1798 = vst.msk [vmem:[%s3088_s28 + $0xf0] sm:$0xff] %vm1767_vm9, %v1765_v54  ;;  %v1766_v26 = vmax.f32 %v1732_v58, 0.0  ;;  %v2217_v27 = vpack.c.bf16 %v1765_v54, %v1765_v54 }
 0x261   : > { %1783 = vst.msk [vmem:[%s3088_s28 + $0x78] sm:$0xff] %vm1767_vm9, %v1750_v25  ;;  %v2202_v28 = vpack.c.bf16 %v1750_v25, %v1750_v25  ;;  %1924 = vrot.lane.b32.xlu0 %v2201_v23, %s2360_s29 }
 0x262   : > { %1799 = vst.msk [vmem:[%s3088_s28 + $0xf8] sm:$0xff] %vm1767_vm9, %v1766_v26  ;;  %v2218_v30 = vpack.c.bf16 %v1766_v26, %v1766_v26 }
 0x263   : > { %1926 = vrot.lane.b32.xlu1 %v2202_v28, %s2360_s29  ;;  %v1909_v9 = vpop.permute.xlu0 %1908 }
 0x264   : > { %1999 = vst.msk [vmem:[%s3166_s6 + $0x18] sm:$0xf] %vm1992_vm10, %v1909_v9 }
 0x265   : > { %v1911_v29 = vpop.permute.xlu1 %1910  ;;  %1956 = vrot.lane.b32.xlu0 %v2217_v27, %s2360_s29 }
 0x266   : > { %2000 = vst.msk [vmem:[%s3166_s6 + $0x1c] sm:$0xf] %vm1992_vm10, %v1911_v29 }
 0x267   : > { %1958 = vrot.lane.b32.xlu1 %v2218_v30, %s2360_s29  ;;  %v1941_v32 = vpop.permute.xlu0 %1940 }
 0x268   : > { %2015 = vst.msk [vmem:[%s3166_s6 + $0x58] sm:$0xf] %vm1992_vm10, %v1941_v32 }
 0x269   : > { %v1943_v16 = vpop.permute.xlu1 %1942 }
 0x26a   : > { %2016 = vst.msk [vmem:[%s3166_s6 + $0x5c] sm:$0xf] %vm1992_vm10, %v1943_v16 }
 0x27f   : > { %v1913_v31 = vpop.permute.xlu0 %1912 }
 0x280   : > { %2001 = vst.msk [vmem:[%s3166_s6 + $0x20] sm:$0xf] %vm1992_vm10, %v1913_v31 }
 0x281   : > { %v1915_v22 = vpop.permute.xlu1 %1914 }
 0x282   : > { %2002 = vst.msk [vmem:[%s3166_s6 + $0x24] sm:$0xf] %vm1992_vm10, %v1915_v22 }
 0x283   : > { %v1945_v33 = vpop.permute.xlu0 %1944 }
 0x284   : > { %2017 = vst.msk [vmem:[%s3166_s6 + $0x60] sm:$0xf] %vm1992_vm10, %v1945_v33 }
 0x285   : > { %v1947_v34 = vpop.permute.xlu1 %1946 }
 0x286   : > { %2018 = vst.msk [vmem:[%s3166_s6 + $0x64] sm:$0xf] %vm1992_vm10, %v1947_v34 }
 0x29b   : > { %v1917_v35 = vpop.permute.xlu0 %1916 }
 0x29c   : > { %2003 = vst.msk [vmem:[%s3166_s6 + $0x28] sm:$0xf] %vm1992_vm10, %v1917_v35 }
 0x29d   : > { %v1919_v36 = vpop.permute.xlu1 %1918 }
 0x29e   : > { %2004 = vst.msk [vmem:[%s3166_s6 + $0x2c] sm:$0xf] %vm1992_vm10, %v1919_v36 }
 0x29f   : > { %v1949_v37 = vpop.permute.xlu0 %1948 }
 0x2a0   : > { %2019 = vst.msk [vmem:[%s3166_s6 + $0x68] sm:$0xf] %vm1992_vm10, %v1949_v37 }
 0x2a1   : > { %v1951_v38 = vpop.permute.xlu1 %1950 }
 0x2a2   : > { %2020 = vst.msk [vmem:[%s3166_s6 + $0x6c] sm:$0xf] %vm1992_vm10, %v1951_v38 }
 0x2b7   : > { %v1921_v39 = vpop.permute.xlu0 %1920 }
 0x2b8   : > { %2005 = vst.msk [vmem:[%s3166_s6 + $0x30] sm:$0xf] %vm1992_vm10, %v1921_v39 }
 0x2b9   : > { %v1923_v40 = vpop.permute.xlu1 %1922 }
 0x2ba   : > { %2006 = vst.msk [vmem:[%s3166_s6 + $0x34] sm:$0xf] %vm1992_vm10, %v1923_v40 }
 0x2bb   : > { %v1953_v42 = vpop.permute.xlu0 %1952 }
 0x2bc   : > { %2021 = vst.msk [vmem:[%s3166_s6 + $0x70] sm:$0xf] %vm1992_vm10, %v1953_v42 }
 0x2bd   : > { %v1955_v46 = vpop.permute.xlu1 %1954 }
 0x2be   : > { %2022 = vst.msk [vmem:[%s3166_s6 + $0x74] sm:$0xf] %vm1992_vm10, %v1955_v46 }
 0x2d3   : > { %v1925_v47 = vpop.permute.xlu0 %1924 }
 0x2d4   : > { %2007 = vst.msk [vmem:[%s3166_s6 + $0x38] sm:$0xf] %vm1992_vm10, %v1925_v47 }
 0x2d5   : > { %v1927_v7 = vpop.permute.xlu1 %1926 }
 0x2d6   : > { %2008 = vst.msk [vmem:[%s3166_s6 + $0x3c] sm:$0xf] %vm1992_vm10, %v1927_v7 }
 0x2d7   : > { %v1957_v21 = vpop.permute.xlu0 %1956 }
 0x2d8   : > { %2023 = vst.msk [vmem:[%s3166_s6 + $0x78] sm:$0xf] %vm1992_vm10, %v1957_v21 }
 0x2d9   : > { %v1959_v48 = vpop.permute.xlu1 %1958 }
 0x2da   : > { %2024 = vst.msk [vmem:[%s3166_s6 + $0x7c] sm:$0xf] %vm1992_vm10, %v1959_v48 }
 0x2db PF: > { %s15_s15 = sadd.s32 1, %s2349_s15  }
 0x2dc   : > { %p12_p4 = scmp.ge.s32.totalorder %s15_s15, 4  }
 0x2de   :  { %14 = sbr.rel (!%p12_p4) target bundleno = 1 (0x1), region = 76 }

</bundles_post_ra>
